<compile_context>
chip_gen: v7x
topology: tpu7x:2x2x1
jax: 0.10.0
libtpu: 0.0.40
codegen_flags: <defaults>
</compile_context>

<pallas_src>
import jax
import jax.numpy as jnp
from jax.experimental import pallas as pl
from jax.experimental.pallas import tpu as pltpu


def _round_up(v: int, m: int) -> int:
    return (v + m - 1) // m * m


# --------------------------------------------------------------------------- #
# Kernel
# --------------------------------------------------------------------------- #
def _pool_kernel(ts_ref, tc_ref, ptr_ref, batch_ref, x_ref, max_ref, sum_ref):
    g = pl.program_id(0)            # graph-block index   ("parallel")
    k = pl.program_id(2)            # node-tile step      ("arbitrary", reduction)
    gb = max_ref.shape[0]           # graphs per block (static)
    tn = x_ref.shape[0]             # nodes  per tile  (static)

    @pl.when(k == 0)
    def _init():
        max_ref[...] = jnp.full(max_ref.shape, -jnp.inf, max_ref.dtype)
        sum_ref[...] = jnp.zeros(sum_ref.shape, sum_ref.dtype)

    # Only the first tc_ref[g] node tiles belong to this graph block; skipped
    # steps repeat the previous block index (DMA dedups) and do no compute.
    @pl.when(k < tc_ref[g])
    def _step():
        x = x_ref[...]                                    # [tn, tf]
        batch_row = batch_ref[...]                        # [1, tn] int32
        gid0 = g * gb
        row_start = (ts_ref[g] + k) * tn                  # global row of this tile
        row_end = row_start + tn

        # ---- segment-sum on the (otherwise idle) MXU: one_hot^T @ x ----------
        gids_col = gid0 + jax.lax.broadcasted_iota(jnp.int32, (gb, 1), 0)
        one_hot_t = (gids_col == batch_row).astype(x.dtype)           # [gb, tn]
        prec = (jax.lax.Precision.HIGHEST
                if x_ref.dtype == jnp.float32 else None)
        sum_ref[...] += jnp.dot(one_hot_t, x,
                                preferred_element_type=jnp.float32,
                                precision=prec)

        # ---- per-graph running max (VPU select + sublane reduce) -------------
        # batch is sorted, so graph `gid` owns rows [ptr[gid], ptr[gid+1]);
        # pl.when skips graphs with no nodes in this tile (most of the block).
        row_iota = jax.lax.broadcasted_iota(jnp.int32, (tn, 1), 0)    # [tn, 1]
        for gg in range(gb):
            lo = ptr_ref[gid0 + gg]
            hi = ptr_ref[gid0 + gg + 1]

            @pl.when(jnp.maximum(lo, row_start) < jnp.minimum(hi, row_end))
            def _update(lo=lo, hi=hi, gg=gg):
                mask = jnp.logical_and(row_iota >= lo - row_start,
                                       row_iota < hi - row_start)     # [tn, 1]
                tile_max = jnp.max(jnp.where(mask, x, -jnp.inf),
                                   axis=0, keepdims=True)             # [1, tf]
                max_ref[gg:gg + 1, :] = jnp.maximum(max_ref[gg:gg + 1, :],
                                                    tile_max)


# --------------------------------------------------------------------------- #
# Index maps (scalar-prefetch refs arrive as trailing positional args)
# --------------------------------------------------------------------------- #
def _node_block(g, k, ts_ref, tc_ref):
    last = ts_ref[g] + jnp.maximum(tc_ref[g], 1) - 1
    return jnp.minimum(ts_ref[g] + k, last)


def _batch_map(g, f, k, ts_ref, tc_ref, ptr_ref):
    return (0, _node_block(g, k, ts_ref, tc_ref))


def _x_map(g, f, k, ts_ref, tc_ref, ptr_ref):
    return (_node_block(g, k, ts_ref, tc_ref), f)


def _out_map(g, f, k, ts_ref, tc_ref, ptr_ref):
    return (g, f)


# --------------------------------------------------------------------------- #
# Wrapper
# --------------------------------------------------------------------------- #
def global_max_mean_pool(x: jax.Array, batch: jax.Array, num_graphs: int,
                         *, node_tile: int = 2048, graph_block: int = 64,
                         feature_block: int | None = None) -> jax.Array:
    """x: [N, F], batch: [N] sorted int graph ids -> [num_graphs, 2F]."""
    n, f = x.shape
    assert graph_block % 8 == 0, "graph_block must be a multiple of 8"
    assert node_tile % 128 == 0, "node_tile must be a multiple of 128"

    # ---- graph blocking -------------------------------------------------------
    gb = min(graph_block, _round_up(max(num_graphs, 1), 8))
    b_pad = _round_up(max(num_graphs, 1), gb)
    n_gblocks = b_pad // gb

    # ---- feature blocking ("parallel"; bounds VMEM, feeds v7x's 2nd core) -----
    if feature_block is None:
        tf = f
        if f % 256 == 0 and (f > 1024 or n_gblocks == 1):
            tf = f // 2
            while tf > 1024 and tf % 256 == 0:
                tf //= 2
    else:
        tf = feature_block
    assert tf == f or (f % tf == 0 and tf % 128 == 0), "bad feature_block"
    f_blocks = f // tf

    # ---- node tiling (double-buffered x block capped at ~8 MiB) ---------------
    itemsize = jnp.dtype(x.dtype).itemsize
    tn_cap = max(128, (8 * 1024 * 1024 // (2 * itemsize * tf)) // 128 * 128)
    tn = min(node_tile, tn_cap)
    n_min = _round_up(max(n, 1), 8)
    if n_min <= tn:
        tn = n_min                               # single node tile
    n_pad = _round_up(max(n, 1), tn)
    n_k = n_pad // tn

    # ---- pad inputs ------------------------------------------------------------
    pad = n_pad - n
    x_p = jnp.pad(x, ((0, pad), (0, 0))) if pad else x
    b_i = batch.astype(jnp.int32)
    b_p = jnp.pad(b_i, (0, pad), constant_values=b_pad) if pad else b_i
    batch_row = b_p.reshape(1, n_pad)            # lane-dense id stream

    # ---- tiny O(B) scalar metadata (scalar-prefetched into SMEM) ---------------
    # batch is sorted (torch_geometric), so graph i owns rows [ptr[i], ptr[i+1]).
    ptr = jnp.searchsorted(
        b_i, jnp.arange(b_pad + 1, dtype=jnp.int32)).astype(jnp.int32)
    blk_lo = ptr[0:b_pad:gb]                     # node start per graph block
    blk_hi = ptr[gb:b_pad + 1:gb]                # node end   per graph block
    nonempty = blk_hi > blk_lo
    t_begin = blk_lo // tn
    t_end = (blk_hi + tn - 1) // tn
    tile_start = jnp.where(nonempty, t_begin, 0).astype(jnp.int32)
    tile_count = jnp.where(nonempty, t_end - t_begin, 0).astype(jnp.int32)

    grid = (n_gblocks, f_blocks, n_k)

    max_out, sum_out = pl.pallas_call(
        _pool_kernel,
        out_shape=(
            jax.ShapeDtypeStruct((b_pad, f), jnp.float32),
            jax.ShapeDtypeStruct((b_pad, f), jnp.float32),
        ),
        grid_spec=pltpu.PrefetchScalarGridSpec(
            num_scalar_prefetch=3,
            grid=grid,
            in_specs=[
                pl.BlockSpec((1, tn), _batch_map),    # graph ids (lane-dense row)
                pl.BlockSpec((tn, tf), _x_map),       # node features
            ],
            out_specs=[
                pl.BlockSpec((gb, tf), _out_map),     # per-graph max (resident over k)
                pl.BlockSpec((gb, tf), _out_map),     # per-graph sum (resident over k)
            ],
        ),
        compiler_params=pltpu.CompilerParams(
            dimension_semantics=("parallel", "parallel", "arbitrary"),
            vmem_limit_bytes=32 * 1024 * 1024,
        ),
    )(tile_start, tile_count, ptr, batch_row, x_p)

    # ---- finalize on the tiny [B, F] result -------------------------------------
    counts = (ptr[1:num_graphs + 1] - ptr[:num_graphs]).astype(jnp.float32)
    max_g = jnp.where((counts > 0)[:, None], max_out[:num_graphs], 0.0)
    mean_g = sum_out[:num_graphs] / jnp.maximum(counts, 1.0)[:, None]
    return jnp.concatenate([max_g, mean_g], axis=1).astype(x.dtype)


# --------------------------------------------------------------------------- #
# Pure-JAX reference
# --------------------------------------------------------------------------- #
def _reference(x, batch, num_graphs):
    seg_max = jax.ops.segment_max(x, batch, num_segments=num_graphs)
    seg_sum = jax.ops.segment_sum(x, batch, num_segments=num_graphs)
    counts = jax.ops.segment_sum(jnp.ones((x.shape[0],), jnp.float32), batch,
                                 num_segments=num_graphs)
    seg_max = jnp.where((counts > 0)[:, None], seg_max, 0.0)
    seg_mean = seg_sum / jnp.maximum(counts, 1.0)[:, None]
    return jnp.concatenate([seg_max, seg_mean], axis=1)


if __name__ == "__main__":
    key = jax.random.PRNGKey(0)
    N, F, B = 300, 256, 10

    x = jax.random.normal(key, (N, F), dtype=jnp.float32)
    # torch_geometric-style sorted batch vector with varying graph sizes.
    sizes = jnp.array([12, 45, 30, 8, 27, 51, 33, 19, 40, 35], dtype=jnp.int32)
    batch = jnp.repeat(jnp.arange(B, dtype=jnp.int32), sizes)          # [300]

    ref = _reference(x, batch, B)

    configs = (
        dict(),                              # single node tile, auto feature split
        dict(node_tile=128),                 # multi-tile node streaming over k
        dict(node_tile=128, graph_block=8),  # 2 graph blocks -> data-dependent
                                             # per-block node-tile ranges
    )
    for cfg in configs:
        out = jax.block_until_ready(global_max_mean_pool(x, batch, B, **cfg))
        assert out.shape == (B, 2 * F), out.shape
        err = float(jnp.max(jnp.abs(out - ref)))
        assert jnp.allclose(out, ref, atol=1e-5, rtol=1e-5), \
            f"mismatch vs reference for {cfg} (max abs err {err})"

    print("KERNEL_OK")
</pallas_src>

<mosaic_0001>
module attributes {stable_mosaic.version = 11 : i64} {
  func.func @_pool_kernel(%arg0: i32, %arg1: i32, %arg2: i32, %arg3: memref<1xi32, #tpu.memory_space<smem>>, %arg4: memref<1xi32, #tpu.memory_space<smem>>, %arg5: memref<17xi32, #tpu.memory_space<smem>>, %arg6: memref<1x304xi32, #tpu.memory_space<vmem>>, %arg7: memref<304x128xf32, #tpu.memory_space<vmem>>, %arg8: memref<16x128xf32, #tpu.memory_space<vmem>>, %arg9: memref<16x128xf32, #tpu.memory_space<vmem>>) attributes {dimension_semantics = [#tpu.dimension_semantics<parallel>, #tpu.dimension_semantics<parallel>, #tpu.dimension_semantics<arbitrary>], iteration_bounds = array<i64: 1, 2, 1>, scalar_prefetch = 3 : i64, scratch_operands = 0 : i64, tpu.core_type = #tpu.core_type<tc>, window_params = [{transform_indices = @transform_0, window_bounds = array<i64: 1, 304>}, {transform_indices = @transform_1, window_bounds = array<i64: 304, 128>}, {transform_indices = @transform_2, window_bounds = array<i64: 16, 128>}, {transform_indices = @transform_3, window_bounds = array<i64: 16, 128>}]} {
    %c0_i32 = arith.constant 0 : i32
    %0 = arith.cmpi eq, %arg2, %c0_i32 : i32
    %1 = arith.extui %0 : i1 to i32
    %c0_i32_0 = arith.constant 0 : i32
    %2 = arith.cmpi ne, %1, %c0_i32_0 : i32
    scf.if %2 {
      %cst = arith.constant 0xFF800000 : f32
      %8 = vector.broadcast %cst : f32 to vector<16x128xf32>
      %c0 = arith.constant 0 : index
      %c0_2 = arith.constant 0 : index
      %9 = vector.load %arg8[%c0, %c0_2] : memref<16x128xf32, #tpu.memory_space<vmem>>, vector<16x128xf32>
      tpu.vector_store %arg8[%c0, %c0_2], %8 {strides = array<i32>} : memref<16x128xf32, #tpu.memory_space<vmem>>, vector<16x128xf32>,
      %cst_3 = arith.constant 0.000000e+00 : f32
      %10 = vector.broadcast %cst_3 : f32 to vector<16x128xf32>
      %c0_4 = arith.constant 0 : index
      %c0_5 = arith.constant 0 : index
      %11 = vector.load %arg9[%c0_4, %c0_5] : memref<16x128xf32, #tpu.memory_space<vmem>>, vector<16x128xf32>
      tpu.vector_store %arg9[%c0_4, %c0_5], %10 {strides = array<i32>} : memref<16x128xf32, #tpu.memory_space<vmem>>, vector<16x128xf32>,
    } else {
    }
    %3 = arith.index_cast %arg0 : i32 to index
    %4 = memref.load %arg4[%3] : memref<1xi32, #tpu.memory_space<smem>>
    %5 = arith.cmpi slt, %arg2, %4 : i32
    %6 = arith.extui %5 : i1 to i32
    %c0_i32_1 = arith.constant 0 : i32
    %7 = arith.cmpi ne, %6, %c0_i32_1 : i32
    scf.if %7 {
      %c0 = arith.constant 0 : index
      %c0_2 = arith.constant 0 : index
      %8 = vector.load %arg7[%c0, %c0_2] : memref<304x128xf32, #tpu.memory_space<vmem>>, vector<304x128xf32>
      %c0_3 = arith.constant 0 : index
      %c0_4 = arith.constant 0 : index
      %9 = vector.load %arg6[%c0_3, %c0_4] : memref<1x304xi32, #tpu.memory_space<vmem>>, vector<1x304xi32>
      %c16_i32 = arith.constant 16 : i32
      %10 = arith.muli %arg0, %c16_i32 : i32
      %11 = arith.index_cast %arg0 : i32 to index
      %12 = memref.load %arg3[%11] : memref<1xi32, #tpu.memory_space<smem>>
      %13 = arith.addi %12, %arg2 : i32
      %c304_i32 = arith.constant 304 : i32
      %14 = arith.muli %13, %c304_i32 : i32
      %c304_i32_5 = arith.constant 304 : i32
      %15 = arith.addi %14, %c304_i32_5 : i32
      %16 = tpu.iota {dimensions = array<i32: 0>} : vector<16x1xi32>
      %17 = vector.broadcast %10 : i32 to vector<16x1xi32>
      %18 = arith.addi %17, %16 : vector<16x1xi32>
      %19 = vector.broadcast %18 : vector<16x1xi32> to vector<16x304xi32>
      %20 = vector.broadcast %9 : vector<1x304xi32> to vector<16x304xi32>
      %21 = arith.cmpi eq, %19, %20 : vector<16x304xi32>
      %22 = arith.extui %21 : vector<16x304xi1> to vector<16x304xi32>
      %23 = arith.sitofp %22 : vector<16x304xi32> to vector<16x304xf32>
      %c0_6 = arith.constant 0 : index
      %c0_7 = arith.constant 0 : index
      %24 = vector.load %arg9[%c0_6, %c0_7] : memref<16x128xf32, #tpu.memory_space<vmem>>, vector<16x128xf32>
      %cst = arith.constant dense<0.000000e+00> : vector<16x128xf32>
      %25 = tpu.matmul %23, %8, %cst {dimension_numbers = #tpu.dot_dimension_numbers<[1], [0], [0], [1], [0, 0, 1, 1], [], []>, precision = #tpu.contract_precision<fp32>} : vector<16x304xf32>, vector<304x128xf32>, vector<16x128xf32> -> vector<16x128xf32>
      %26 = arith.addf %24, %25 : vector<16x128xf32>
      %c0_8 = arith.constant 0 : index
      %c0_9 = arith.constant 0 : index
      %27 = vector.load %arg9[%c0_8, %c0_9] : memref<16x128xf32, #tpu.memory_space<vmem>>, vector<16x128xf32>
      tpu.vector_store %arg9[%c0_8, %c0_9], %26 {strides = array<i32>} : memref<16x128xf32, #tpu.memory_space<vmem>>, vector<16x128xf32>,
      %28 = tpu.iota {dimensions = array<i32: 0>} : vector<304x1xi32>
      %c0_i32_10 = arith.constant 0 : i32
      %29 = arith.addi %10, %c0_i32_10 : i32
      %30 = arith.index_cast %29 : i32 to index
      %31 = memref.load %arg5[%30] : memref<17xi32, #tpu.memory_space<smem>>
      %c0_i32_11 = arith.constant 0 : i32
      %32 = arith.addi %10, %c0_i32_11 : i32
      %c1_i32 = arith.constant 1 : i32
      %33 = arith.addi %32, %c1_i32 : i32
      %34 = arith.index_cast %33 : i32 to index
      %35 = memref.load %arg5[%34] : memref<17xi32, #tpu.memory_space<smem>>
      %36 = arith.maxsi %31, %14 : i32
      %37 = arith.minsi %35, %15 : i32
      %38 = arith.cmpi slt, %36, %37 : i32
      %39 = arith.extui %38 : i1 to i32
      %c0_i32_12 = arith.constant 0 : i32
      %40 = arith.cmpi ne, %39, %c0_i32_12 : i32
      scf.if %40 {
        %221 = arith.subi %31, %14 : i32
        %222 = vector.broadcast %221 : i32 to vector<304x1xi32>
        %223 = arith.cmpi sge, %28, %222 : vector<304x1xi32>
        %224 = arith.subi %35, %14 : i32
        %225 = vector.broadcast %224 : i32 to vector<304x1xi32>
        %226 = arith.cmpi slt, %28, %225 : vector<304x1xi32>
        %227 = arith.andi %223, %226 : vector<304x1xi1>
        %cst_59 = arith.constant 0xFF800000 : f32
        %228 = vector.shape_cast %227 : vector<304x1xi1> to vector<304x1xi1>
        %229 = vector.broadcast %228 : vector<304x1xi1> to vector<304x128xi1>
        %230 = vector.broadcast %cst_59 : f32 to vector<304x128xf32>
        %231 = arith.select %229, %8, %230 : vector<304x128xi1>, vector<304x128xf32>
        %cst_60 = arith.constant dense<0xFF800000> : vector<128xf32>
        %232 = vector.multi_reduction <maximumf>, %231, %cst_60 [0] : vector<304x128xf32> to vector<128xf32>
        %233 = vector.shape_cast %232 : vector<128xf32> to vector<1x128xf32>
        %c0_61 = arith.constant 0 : index
        %c0_62 = arith.constant 0 : index
        %234 = vector.load %arg8[%c0_61, %c0_62] : memref<16x128xf32, #tpu.memory_space<vmem>>, vector<1x128xf32>
        %235 = arith.maximumf %234, %233 : vector<1x128xf32>
        %c0_63 = arith.constant 0 : index
        %c0_64 = arith.constant 0 : index
        %236 = vector.load %arg8[%c0_63, %c0_64] : memref<16x128xf32, #tpu.memory_space<vmem>>, vector<1x128xf32>
        tpu.vector_store %arg8[%c0_63, %c0_64], %235 {strides = array<i32>} : memref<16x128xf32, #tpu.memory_space<vmem>>, vector<1x128xf32>,
      } else {
      }
      %c1_i32_13 = arith.constant 1 : i32
      %41 = arith.addi %10, %c1_i32_13 : i32
      %42 = arith.index_cast %41 : i32 to index
      %43 = memref.load %arg5[%42] : memref<17xi32, #tpu.memory_space<smem>>
      %c1_i32_14 = arith.constant 1 : i32
      %44 = arith.addi %10, %c1_i32_14 : i32
      %c1_i32_15 = arith.constant 1 : i32
      %45 = arith.addi %44, %c1_i32_15 : i32
      %46 = arith.index_cast %45 : i32 to index
      %47 = memref.load %arg5[%46] : memref<17xi32, #tpu.memory_space<smem>>
      %48 = arith.maxsi %43, %14 : i32
      %49 = arith.minsi %47, %15 : i32
      %50 = arith.cmpi slt, %48, %49 : i32
      %51 = arith.extui %50 : i1 to i32
      %c0_i32_16 = arith.constant 0 : i32
      %52 = arith.cmpi ne, %51, %c0_i32_16 : i32
      scf.if %52 {
        %221 = arith.subi %43, %14 : i32
        %222 = vector.broadcast %221 : i32 to vector<304x1xi32>
        %223 = arith.cmpi sge, %28, %222 : vector<304x1xi32>
        %224 = arith.subi %47, %14 : i32
        %225 = vector.broadcast %224 : i32 to vector<304x1xi32>
        %226 = arith.cmpi slt, %28, %225 : vector<304x1xi32>
        %227 = arith.andi %223, %226 : vector<304x1xi1>
        %cst_59 = arith.constant 0xFF800000 : f32
        %228 = vector.shape_cast %227 : vector<304x1xi1> to vector<304x1xi1>
        %229 = vector.broadcast %228 : vector<304x1xi1> to vector<304x128xi1>
        %230 = vector.broadcast %cst_59 : f32 to vector<304x128xf32>
        %231 = arith.select %229, %8, %230 : vector<304x128xi1>, vector<304x128xf32>
        %cst_60 = arith.constant dense<0xFF800000> : vector<128xf32>
        %232 = vector.multi_reduction <maximumf>, %231, %cst_60 [0] : vector<304x128xf32> to vector<128xf32>
        %233 = vector.shape_cast %232 : vector<128xf32> to vector<1x128xf32>
        %c1 = arith.constant 1 : index
        %c0_61 = arith.constant 0 : index
        %234 = vector.load %arg8[%c1, %c0_61] : memref<16x128xf32, #tpu.memory_space<vmem>>, vector<1x128xf32>
        %235 = arith.maximumf %234, %233 : vector<1x128xf32>
        %c1_62 = arith.constant 1 : index
        %c0_63 = arith.constant 0 : index
        %236 = vector.load %arg8[%c1_62, %c0_63] : memref<16x128xf32, #tpu.memory_space<vmem>>, vector<1x128xf32>
        tpu.vector_store %arg8[%c1_62, %c0_63], %235 {strides = array<i32>} : memref<16x128xf32, #tpu.memory_space<vmem>>, vector<1x128xf32>,
      } else {
      }
      %c2_i32 = arith.constant 2 : i32
      %53 = arith.addi %10, %c2_i32 : i32
      %54 = arith.index_cast %53 : i32 to index
      %55 = memref.load %arg5[%54] : memref<17xi32, #tpu.memory_space<smem>>
      %c2_i32_17 = arith.constant 2 : i32
      %56 = arith.addi %10, %c2_i32_17 : i32
      %c1_i32_18 = arith.constant 1 : i32
      %57 = arith.addi %56, %c1_i32_18 : i32
      %58 = arith.index_cast %57 : i32 to index
      %59 = memref.load %arg5[%58] : memref<17xi32, #tpu.memory_space<smem>>
      %60 = arith.maxsi %55, %14 : i32
      %61 = arith.minsi %59, %15 : i32
      %62 = arith.cmpi slt, %60, %61 : i32
      %63 = arith.extui %62 : i1 to i32
      %c0_i32_19 = arith.constant 0 : i32
      %64 = arith.cmpi ne, %63, %c0_i32_19 : i32
      scf.if %64 {
        %221 = arith.subi %55, %14 : i32
        %222 = vector.broadcast %221 : i32 to vector<304x1xi32>
        %223 = arith.cmpi sge, %28, %222 : vector<304x1xi32>
        %224 = arith.subi %59, %14 : i32
        %225 = vector.broadcast %224 : i32 to vector<304x1xi32>
        %226 = arith.cmpi slt, %28, %225 : vector<304x1xi32>
        %227 = arith.andi %223, %226 : vector<304x1xi1>
        %cst_59 = arith.constant 0xFF800000 : f32
        %228 = vector.shape_cast %227 : vector<304x1xi1> to vector<304x1xi1>
        %229 = vector.broadcast %228 : vector<304x1xi1> to vector<304x128xi1>
        %230 = vector.broadcast %cst_59 : f32 to vector<304x128xf32>
        %231 = arith.select %229, %8, %230 : vector<304x128xi1>, vector<304x128xf32>
        %cst_60 = arith.constant dense<0xFF800000> : vector<128xf32>
        %232 = vector.multi_reduction <maximumf>, %231, %cst_60 [0] : vector<304x128xf32> to vector<128xf32>
        %233 = vector.shape_cast %232 : vector<128xf32> to vector<1x128xf32>
        %c2 = arith.constant 2 : index
        %c0_61 = arith.constant 0 : index
        %234 = vector.load %arg8[%c2, %c0_61] : memref<16x128xf32, #tpu.memory_space<vmem>>, vector<1x128xf32>
        %235 = arith.maximumf %234, %233 : vector<1x128xf32>
        %c2_62 = arith.constant 2 : index
        %c0_63 = arith.constant 0 : index
        %236 = vector.load %arg8[%c2_62, %c0_63] : memref<16x128xf32, #tpu.memory_space<vmem>>, vector<1x128xf32>
        tpu.vector_store %arg8[%c2_62, %c0_63], %235 {strides = array<i32>} : memref<16x128xf32, #tpu.memory_space<vmem>>, vector<1x128xf32>,
      } else {
      }
      %c3_i32 = arith.constant 3 : i32
      %65 = arith.addi %10, %c3_i32 : i32
      %66 = arith.index_cast %65 : i32 to index
      %67 = memref.load %arg5[%66] : memref<17xi32, #tpu.memory_space<smem>>
      %c3_i32_20 = arith.constant 3 : i32
      %68 = arith.addi %10, %c3_i32_20 : i32
      %c1_i32_21 = arith.constant 1 : i32
      %69 = arith.addi %68, %c1_i32_21 : i32
      %70 = arith.index_cast %69 : i32 to index
      %71 = memref.load %arg5[%70] : memref<17xi32, #tpu.memory_space<smem>>
      %72 = arith.maxsi %67, %14 : i32
      %73 = arith.minsi %71, %15 : i32
      %74 = arith.cmpi slt, %72, %73 : i32
      %75 = arith.extui %74 : i1 to i32
      %c0_i32_22 = arith.constant 0 : i32
      %76 = arith.cmpi ne, %75, %c0_i32_22 : i32
      scf.if %76 {
        %221 = arith.subi %67, %14 : i32
        %222 = vector.broadcast %221 : i32 to vector<304x1xi32>
        %223 = arith.cmpi sge, %28, %222 : vector<304x1xi32>
        %224 = arith.subi %71, %14 : i32
        %225 = vector.broadcast %224 : i32 to vector<304x1xi32>
        %226 = arith.cmpi slt, %28, %225 : vector<304x1xi32>
        %227 = arith.andi %223, %226 : vector<304x1xi1>
        %cst_59 = arith.constant 0xFF800000 : f32
        %228 = vector.shape_cast %227 : vector<304x1xi1> to vector<304x1xi1>
        %229 = vector.broadcast %228 : vector<304x1xi1> to vector<304x128xi1>
        %230 = vector.broadcast %cst_59 : f32 to vector<304x128xf32>
        %231 = arith.select %229, %8, %230 : vector<304x128xi1>, vector<304x128xf32>
        %cst_60 = arith.constant dense<0xFF800000> : vector<128xf32>
        %232 = vector.multi_reduction <maximumf>, %231, %cst_60 [0] : vector<304x128xf32> to vector<128xf32>
        %233 = vector.shape_cast %232 : vector<128xf32> to vector<1x128xf32>
        %c3 = arith.constant 3 : index
        %c0_61 = arith.constant 0 : index
        %234 = vector.load %arg8[%c3, %c0_61] : memref<16x128xf32, #tpu.memory_space<vmem>>, vector<1x128xf32>
        %235 = arith.maximumf %234, %233 : vector<1x128xf32>
        %c3_62 = arith.constant 3 : index
        %c0_63 = arith.constant 0 : index
        %236 = vector.load %arg8[%c3_62, %c0_63] : memref<16x128xf32, #tpu.memory_space<vmem>>, vector<1x128xf32>
        tpu.vector_store %arg8[%c3_62, %c0_63], %235 {strides = array<i32>} : memref<16x128xf32, #tpu.memory_space<vmem>>, vector<1x128xf32>,
      } else {
      }
      %c4_i32 = arith.constant 4 : i32
      %77 = arith.addi %10, %c4_i32 : i32
      %78 = arith.index_cast %77 : i32 to index
      %79 = memref.load %arg5[%78] : memref<17xi32, #tpu.memory_space<smem>>
      %c4_i32_23 = arith.constant 4 : i32
      %80 = arith.addi %10, %c4_i32_23 : i32
      %c1_i32_24 = arith.constant 1 : i32
      %81 = arith.addi %80, %c1_i32_24 : i32
      %82 = arith.index_cast %81 : i32 to index
      %83 = memref.load %arg5[%82] : memref<17xi32, #tpu.memory_space<smem>>
      %84 = arith.maxsi %79, %14 : i32
      %85 = arith.minsi %83, %15 : i32
      %86 = arith.cmpi slt, %84, %85 : i32
      %87 = arith.extui %86 : i1 to i32
      %c0_i32_25 = arith.constant 0 : i32
      %88 = arith.cmpi ne, %87, %c0_i32_25 : i32
      scf.if %88 {
        %221 = arith.subi %79, %14 : i32
        %222 = vector.broadcast %221 : i32 to vector<304x1xi32>
        %223 = arith.cmpi sge, %28, %222 : vector<304x1xi32>
        %224 = arith.subi %83, %14 : i32
        %225 = vector.broadcast %224 : i32 to vector<304x1xi32>
        %226 = arith.cmpi slt, %28, %225 : vector<304x1xi32>
        %227 = arith.andi %223, %226 : vector<304x1xi1>
        %cst_59 = arith.constant 0xFF800000 : f32
        %228 = vector.shape_cast %227 : vector<304x1xi1> to vector<304x1xi1>
        %229 = vector.broadcast %228 : vector<304x1xi1> to vector<304x128xi1>
        %230 = vector.broadcast %cst_59 : f32 to vector<304x128xf32>
        %231 = arith.select %229, %8, %230 : vector<304x128xi1>, vector<304x128xf32>
        %cst_60 = arith.constant dense<0xFF800000> : vector<128xf32>
        %232 = vector.multi_reduction <maximumf>, %231, %cst_60 [0] : vector<304x128xf32> to vector<128xf32>
        %233 = vector.shape_cast %232 : vector<128xf32> to vector<1x128xf32>
        %c4 = arith.constant 4 : index
        %c0_61 = arith.constant 0 : index
        %234 = vector.load %arg8[%c4, %c0_61] : memref<16x128xf32, #tpu.memory_space<vmem>>, vector<1x128xf32>
        %235 = arith.maximumf %234, %233 : vector<1x128xf32>
        %c4_62 = arith.constant 4 : index
        %c0_63 = arith.constant 0 : index
        %236 = vector.load %arg8[%c4_62, %c0_63] : memref<16x128xf32, #tpu.memory_space<vmem>>, vector<1x128xf32>
        tpu.vector_store %arg8[%c4_62, %c0_63], %235 {strides = array<i32>} : memref<16x128xf32, #tpu.memory_space<vmem>>, vector<1x128xf32>,
      } else {
      }
      %c5_i32 = arith.constant 5 : i32
      %89 = arith.addi %10, %c5_i32 : i32
      %90 = arith.index_cast %89 : i32 to index
      %91 = memref.load %arg5[%90] : memref<17xi32, #tpu.memory_space<smem>>
      %c5_i32_26 = arith.constant 5 : i32
      %92 = arith.addi %10, %c5_i32_26 : i32
      %c1_i32_27 = arith.constant 1 : i32
      %93 = arith.addi %92, %c1_i32_27 : i32
      %94 = arith.index_cast %93 : i32 to index
      %95 = memref.load %arg5[%94] : memref<17xi32, #tpu.memory_space<smem>>
      %96 = arith.maxsi %91, %14 : i32
      %97 = arith.minsi %95, %15 : i32
      %98 = arith.cmpi slt, %96, %97 : i32
      %99 = arith.extui %98 : i1 to i32
      %c0_i32_28 = arith.constant 0 : i32
      %100 = arith.cmpi ne, %99, %c0_i32_28 : i32
      scf.if %100 {
        %221 = arith.subi %91, %14 : i32
        %222 = vector.broadcast %221 : i32 to vector<304x1xi32>
        %223 = arith.cmpi sge, %28, %222 : vector<304x1xi32>
        %224 = arith.subi %95, %14 : i32
        %225 = vector.broadcast %224 : i32 to vector<304x1xi32>
        %226 = arith.cmpi slt, %28, %225 : vector<304x1xi32>
        %227 = arith.andi %223, %226 : vector<304x1xi1>
        %cst_59 = arith.constant 0xFF800000 : f32
        %228 = vector.shape_cast %227 : vector<304x1xi1> to vector<304x1xi1>
        %229 = vector.broadcast %228 : vector<304x1xi1> to vector<304x128xi1>
        %230 = vector.broadcast %cst_59 : f32 to vector<304x128xf32>
        %231 = arith.select %229, %8, %230 : vector<304x128xi1>, vector<304x128xf32>
        %cst_60 = arith.constant dense<0xFF800000> : vector<128xf32>
        %232 = vector.multi_reduction <maximumf>, %231, %cst_60 [0] : vector<304x128xf32> to vector<128xf32>
        %233 = vector.shape_cast %232 : vector<128xf32> to vector<1x128xf32>
        %c5 = arith.constant 5 : index
        %c0_61 = arith.constant 0 : index
        %234 = vector.load %arg8[%c5, %c0_61] : memref<16x128xf32, #tpu.memory_space<vmem>>, vector<1x128xf32>
        %235 = arith.maximumf %234, %233 : vector<1x128xf32>
        %c5_62 = arith.constant 5 : index
        %c0_63 = arith.constant 0 : index
        %236 = vector.load %arg8[%c5_62, %c0_63] : memref<16x128xf32, #tpu.memory_space<vmem>>, vector<1x128xf32>
        tpu.vector_store %arg8[%c5_62, %c0_63], %235 {strides = array<i32>} : memref<16x128xf32, #tpu.memory_space<vmem>>, vector<1x128xf32>,
      } else {
      }
      %c6_i32 = arith.constant 6 : i32
      %101 = arith.addi %10, %c6_i32 : i32
      %102 = arith.index_cast %101 : i32 to index
      %103 = memref.load %arg5[%102] : memref<17xi32, #tpu.memory_space<smem>>
      %c6_i32_29 = arith.constant 6 : i32
      %104 = arith.addi %10, %c6_i32_29 : i32
      %c1_i32_30 = arith.constant 1 : i32
      %105 = arith.addi %104, %c1_i32_30 : i32
      %106 = arith.index_cast %105 : i32 to index
      %107 = memref.load %arg5[%106] : memref<17xi32, #tpu.memory_space<smem>>
      %108 = arith.maxsi %103, %14 : i32
      %109 = arith.minsi %107, %15 : i32
      %110 = arith.cmpi slt, %108, %109 : i32
      %111 = arith.extui %110 : i1 to i32
      %c0_i32_31 = arith.constant 0 : i32
      %112 = arith.cmpi ne, %111, %c0_i32_31 : i32
      scf.if %112 {
        %221 = arith.subi %103, %14 : i32
        %222 = vector.broadcast %221 : i32 to vector<304x1xi32>
        %223 = arith.cmpi sge, %28, %222 : vector<304x1xi32>
        %224 = arith.subi %107, %14 : i32
        %225 = vector.broadcast %224 : i32 to vector<304x1xi32>
        %226 = arith.cmpi slt, %28, %225 : vector<304x1xi32>
        %227 = arith.andi %223, %226 : vector<304x1xi1>
        %cst_59 = arith.constant 0xFF800000 : f32
        %228 = vector.shape_cast %227 : vector<304x1xi1> to vector<304x1xi1>
        %229 = vector.broadcast %228 : vector<304x1xi1> to vector<304x128xi1>
        %230 = vector.broadcast %cst_59 : f32 to vector<304x128xf32>
        %231 = arith.select %229, %8, %230 : vector<304x128xi1>, vector<304x128xf32>
        %cst_60 = arith.constant dense<0xFF800000> : vector<128xf32>
        %232 = vector.multi_reduction <maximumf>, %231, %cst_60 [0] : vector<304x128xf32> to vector<128xf32>
        %233 = vector.shape_cast %232 : vector<128xf32> to vector<1x128xf32>
        %c6 = arith.constant 6 : index
        %c0_61 = arith.constant 0 : index
        %234 = vector.load %arg8[%c6, %c0_61] : memref<16x128xf32, #tpu.memory_space<vmem>>, vector<1x128xf32>
        %235 = arith.maximumf %234, %233 : vector<1x128xf32>
        %c6_62 = arith.constant 6 : index
        %c0_63 = arith.constant 0 : index
        %236 = vector.load %arg8[%c6_62, %c0_63] : memref<16x128xf32, #tpu.memory_space<vmem>>, vector<1x128xf32>
        tpu.vector_store %arg8[%c6_62, %c0_63], %235 {strides = array<i32>} : memref<16x128xf32, #tpu.memory_space<vmem>>, vector<1x128xf32>,
      } else {
      }
      %c7_i32 = arith.constant 7 : i32
      %113 = arith.addi %10, %c7_i32 : i32
      %114 = arith.index_cast %113 : i32 to index
      %115 = memref.load %arg5[%114] : memref<17xi32, #tpu.memory_space<smem>>
      %c7_i32_32 = arith.constant 7 : i32
      %116 = arith.addi %10, %c7_i32_32 : i32
      %c1_i32_33 = arith.constant 1 : i32
      %117 = arith.addi %116, %c1_i32_33 : i32
      %118 = arith.index_cast %117 : i32 to index
      %119 = memref.load %arg5[%118] : memref<17xi32, #tpu.memory_space<smem>>
      %120 = arith.maxsi %115, %14 : i32
      %121 = arith.minsi %119, %15 : i32
      %122 = arith.cmpi slt, %120, %121 : i32
      %123 = arith.extui %122 : i1 to i32
      %c0_i32_34 = arith.constant 0 : i32
      %124 = arith.cmpi ne, %123, %c0_i32_34 : i32
      scf.if %124 {
        %221 = arith.subi %115, %14 : i32
        %222 = vector.broadcast %221 : i32 to vector<304x1xi32>
        %223 = arith.cmpi sge, %28, %222 : vector<304x1xi32>
        %224 = arith.subi %119, %14 : i32
        %225 = vector.broadcast %224 : i32 to vector<304x1xi32>
        %226 = arith.cmpi slt, %28, %225 : vector<304x1xi32>
        %227 = arith.andi %223, %226 : vector<304x1xi1>
        %cst_59 = arith.constant 0xFF800000 : f32
        %228 = vector.shape_cast %227 : vector<304x1xi1> to vector<304x1xi1>
        %229 = vector.broadcast %228 : vector<304x1xi1> to vector<304x128xi1>
        %230 = vector.broadcast %cst_59 : f32 to vector<304x128xf32>
        %231 = arith.select %229, %8, %230 : vector<304x128xi1>, vector<304x128xf32>
        %cst_60 = arith.constant dense<0xFF800000> : vector<128xf32>
        %232 = vector.multi_reduction <maximumf>, %231, %cst_60 [0] : vector<304x128xf32> to vector<128xf32>
        %233 = vector.shape_cast %232 : vector<128xf32> to vector<1x128xf32>
        %c7 = arith.constant 7 : index
        %c0_61 = arith.constant 0 : index
        %234 = vector.load %arg8[%c7, %c0_61] : memref<16x128xf32, #tpu.memory_space<vmem>>, vector<1x128xf32>
        %235 = arith.maximumf %234, %233 : vector<1x128xf32>
        %c7_62 = arith.constant 7 : index
        %c0_63 = arith.constant 0 : index
        %236 = vector.load %arg8[%c7_62, %c0_63] : memref<16x128xf32, #tpu.memory_space<vmem>>, vector<1x128xf32>
        tpu.vector_store %arg8[%c7_62, %c0_63], %235 {strides = array<i32>} : memref<16x128xf32, #tpu.memory_space<vmem>>, vector<1x128xf32>,
      } else {
      }
      %c8_i32 = arith.constant 8 : i32
      %125 = arith.addi %10, %c8_i32 : i32
      %126 = arith.index_cast %125 : i32 to index
      %127 = memref.load %arg5[%126] : memref<17xi32, #tpu.memory_space<smem>>
      %c8_i32_35 = arith.constant 8 : i32
      %128 = arith.addi %10, %c8_i32_35 : i32
      %c1_i32_36 = arith.constant 1 : i32
      %129 = arith.addi %128, %c1_i32_36 : i32
      %130 = arith.index_cast %129 : i32 to index
      %131 = memref.load %arg5[%130] : memref<17xi32, #tpu.memory_space<smem>>
      %132 = arith.maxsi %127, %14 : i32
      %133 = arith.minsi %131, %15 : i32
      %134 = arith.cmpi slt, %132, %133 : i32
      %135 = arith.extui %134 : i1 to i32
      %c0_i32_37 = arith.constant 0 : i32
      %136 = arith.cmpi ne, %135, %c0_i32_37 : i32
      scf.if %136 {
        %221 = arith.subi %127, %14 : i32
        %222 = vector.broadcast %221 : i32 to vector<304x1xi32>
        %223 = arith.cmpi sge, %28, %222 : vector<304x1xi32>
        %224 = arith.subi %131, %14 : i32
        %225 = vector.broadcast %224 : i32 to vector<304x1xi32>
        %226 = arith.cmpi slt, %28, %225 : vector<304x1xi32>
        %227 = arith.andi %223, %226 : vector<304x1xi1>
        %cst_59 = arith.constant 0xFF800000 : f32
        %228 = vector.shape_cast %227 : vector<304x1xi1> to vector<304x1xi1>
        %229 = vector.broadcast %228 : vector<304x1xi1> to vector<304x128xi1>
        %230 = vector.broadcast %cst_59 : f32 to vector<304x128xf32>
        %231 = arith.select %229, %8, %230 : vector<304x128xi1>, vector<304x128xf32>
        %cst_60 = arith.constant dense<0xFF800000> : vector<128xf32>
        %232 = vector.multi_reduction <maximumf>, %231, %cst_60 [0] : vector<304x128xf32> to vector<128xf32>
        %233 = vector.shape_cast %232 : vector<128xf32> to vector<1x128xf32>
        %c8 = arith.constant 8 : index
        %c0_61 = arith.constant 0 : index
        %234 = vector.load %arg8[%c8, %c0_61] : memref<16x128xf32, #tpu.memory_space<vmem>>, vector<1x128xf32>
        %235 = arith.maximumf %234, %233 : vector<1x128xf32>
        %c8_62 = arith.constant 8 : index
        %c0_63 = arith.constant 0 : index
        %236 = vector.load %arg8[%c8_62, %c0_63] : memref<16x128xf32, #tpu.memory_space<vmem>>, vector<1x128xf32>
        tpu.vector_store %arg8[%c8_62, %c0_63], %235 {strides = array<i32>} : memref<16x128xf32, #tpu.memory_space<vmem>>, vector<1x128xf32>,
      } else {
      }
      %c9_i32 = arith.constant 9 : i32
      %137 = arith.addi %10, %c9_i32 : i32
      %138 = arith.index_cast %137 : i32 to index
      %139 = memref.load %arg5[%138] : memref<17xi32, #tpu.memory_space<smem>>
      %c9_i32_38 = arith.constant 9 : i32
      %140 = arith.addi %10, %c9_i32_38 : i32
      %c1_i32_39 = arith.constant 1 : i32
      %141 = arith.addi %140, %c1_i32_39 : i32
      %142 = arith.index_cast %141 : i32 to index
      %143 = memref.load %arg5[%142] : memref<17xi32, #tpu.memory_space<smem>>
      %144 = arith.maxsi %139, %14 : i32
      %145 = arith.minsi %143, %15 : i32
      %146 = arith.cmpi slt, %144, %145 : i32
      %147 = arith.extui %146 : i1 to i32
      %c0_i32_40 = arith.constant 0 : i32
      %148 = arith.cmpi ne, %147, %c0_i32_40 : i32
      scf.if %148 {
        %221 = arith.subi %139, %14 : i32
        %222 = vector.broadcast %221 : i32 to vector<304x1xi32>
        %223 = arith.cmpi sge, %28, %222 : vector<304x1xi32>
        %224 = arith.subi %143, %14 : i32
        %225 = vector.broadcast %224 : i32 to vector<304x1xi32>
        %226 = arith.cmpi slt, %28, %225 : vector<304x1xi32>
        %227 = arith.andi %223, %226 : vector<304x1xi1>
        %cst_59 = arith.constant 0xFF800000 : f32
        %228 = vector.shape_cast %227 : vector<304x1xi1> to vector<304x1xi1>
        %229 = vector.broadcast %228 : vector<304x1xi1> to vector<304x128xi1>
        %230 = vector.broadcast %cst_59 : f32 to vector<304x128xf32>
        %231 = arith.select %229, %8, %230 : vector<304x128xi1>, vector<304x128xf32>
        %cst_60 = arith.constant dense<0xFF800000> : vector<128xf32>
        %232 = vector.multi_reduction <maximumf>, %231, %cst_60 [0] : vector<304x128xf32> to vector<128xf32>
        %233 = vector.shape_cast %232 : vector<128xf32> to vector<1x128xf32>
        %c9 = arith.constant 9 : index
        %c0_61 = arith.constant 0 : index
        %234 = vector.load %arg8[%c9, %c0_61] : memref<16x128xf32, #tpu.memory_space<vmem>>, vector<1x128xf32>
        %235 = arith.maximumf %234, %233 : vector<1x128xf32>
        %c9_62 = arith.constant 9 : index
        %c0_63 = arith.constant 0 : index
        %236 = vector.load %arg8[%c9_62, %c0_63] : memref<16x128xf32, #tpu.memory_space<vmem>>, vector<1x128xf32>
        tpu.vector_store %arg8[%c9_62, %c0_63], %235 {strides = array<i32>} : memref<16x128xf32, #tpu.memory_space<vmem>>, vector<1x128xf32>,
      } else {
      }
      %c10_i32 = arith.constant 10 : i32
      %149 = arith.addi %10, %c10_i32 : i32
      %150 = arith.index_cast %149 : i32 to index
      %151 = memref.load %arg5[%150] : memref<17xi32, #tpu.memory_space<smem>>
      %c10_i32_41 = arith.constant 10 : i32
      %152 = arith.addi %10, %c10_i32_41 : i32
      %c1_i32_42 = arith.constant 1 : i32
      %153 = arith.addi %152, %c1_i32_42 : i32
      %154 = arith.index_cast %153 : i32 to index
      %155 = memref.load %arg5[%154] : memref<17xi32, #tpu.memory_space<smem>>
      %156 = arith.maxsi %151, %14 : i32
      %157 = arith.minsi %155, %15 : i32
      %158 = arith.cmpi slt, %156, %157 : i32
      %159 = arith.extui %158 : i1 to i32
      %c0_i32_43 = arith.constant 0 : i32
      %160 = arith.cmpi ne, %159, %c0_i32_43 : i32
      scf.if %160 {
        %221 = arith.subi %151, %14 : i32
        %222 = vector.broadcast %221 : i32 to vector<304x1xi32>
        %223 = arith.cmpi sge, %28, %222 : vector<304x1xi32>
        %224 = arith.subi %155, %14 : i32
        %225 = vector.broadcast %224 : i32 to vector<304x1xi32>
        %226 = arith.cmpi slt, %28, %225 : vector<304x1xi32>
        %227 = arith.andi %223, %226 : vector<304x1xi1>
        %cst_59 = arith.constant 0xFF800000 : f32
        %228 = vector.shape_cast %227 : vector<304x1xi1> to vector<304x1xi1>
        %229 = vector.broadcast %228 : vector<304x1xi1> to vector<304x128xi1>
        %230 = vector.broadcast %cst_59 : f32 to vector<304x128xf32>
        %231 = arith.select %229, %8, %230 : vector<304x128xi1>, vector<304x128xf32>
        %cst_60 = arith.constant dense<0xFF800000> : vector<128xf32>
        %232 = vector.multi_reduction <maximumf>, %231, %cst_60 [0] : vector<304x128xf32> to vector<128xf32>
        %233 = vector.shape_cast %232 : vector<128xf32> to vector<1x128xf32>
        %c10 = arith.constant 10 : index
        %c0_61 = arith.constant 0 : index
        %234 = vector.load %arg8[%c10, %c0_61] : memref<16x128xf32, #tpu.memory_space<vmem>>, vector<1x128xf32>
        %235 = arith.maximumf %234, %233 : vector<1x128xf32>
        %c10_62 = arith.constant 10 : index
        %c0_63 = arith.constant 0 : index
        %236 = vector.load %arg8[%c10_62, %c0_63] : memref<16x128xf32, #tpu.memory_space<vmem>>, vector<1x128xf32>
        tpu.vector_store %arg8[%c10_62, %c0_63], %235 {strides = array<i32>} : memref<16x128xf32, #tpu.memory_space<vmem>>, vector<1x128xf32>,
      } else {
      }
      %c11_i32 = arith.constant 11 : i32
      %161 = arith.addi %10, %c11_i32 : i32
      %162 = arith.index_cast %161 : i32 to index
      %163 = memref.load %arg5[%162] : memref<17xi32, #tpu.memory_space<smem>>
      %c11_i32_44 = arith.constant 11 : i32
      %164 = arith.addi %10, %c11_i32_44 : i32
      %c1_i32_45 = arith.constant 1 : i32
      %165 = arith.addi %164, %c1_i32_45 : i32
      %166 = arith.index_cast %165 : i32 to index
      %167 = memref.load %arg5[%166] : memref<17xi32, #tpu.memory_space<smem>>
      %168 = arith.maxsi %163, %14 : i32
      %169 = arith.minsi %167, %15 : i32
      %170 = arith.cmpi slt, %168, %169 : i32
      %171 = arith.extui %170 : i1 to i32
      %c0_i32_46 = arith.constant 0 : i32
      %172 = arith.cmpi ne, %171, %c0_i32_46 : i32
      scf.if %172 {
        %221 = arith.subi %163, %14 : i32
        %222 = vector.broadcast %221 : i32 to vector<304x1xi32>
        %223 = arith.cmpi sge, %28, %222 : vector<304x1xi32>
        %224 = arith.subi %167, %14 : i32
        %225 = vector.broadcast %224 : i32 to vector<304x1xi32>
        %226 = arith.cmpi slt, %28, %225 : vector<304x1xi32>
        %227 = arith.andi %223, %226 : vector<304x1xi1>
        %cst_59 = arith.constant 0xFF800000 : f32
        %228 = vector.shape_cast %227 : vector<304x1xi1> to vector<304x1xi1>
        %229 = vector.broadcast %228 : vector<304x1xi1> to vector<304x128xi1>
        %230 = vector.broadcast %cst_59 : f32 to vector<304x128xf32>
        %231 = arith.select %229, %8, %230 : vector<304x128xi1>, vector<304x128xf32>
        %cst_60 = arith.constant dense<0xFF800000> : vector<128xf32>
        %232 = vector.multi_reduction <maximumf>, %231, %cst_60 [0] : vector<304x128xf32> to vector<128xf32>
        %233 = vector.shape_cast %232 : vector<128xf32> to vector<1x128xf32>
        %c11 = arith.constant 11 : index
        %c0_61 = arith.constant 0 : index
        %234 = vector.load %arg8[%c11, %c0_61] : memref<16x128xf32, #tpu.memory_space<vmem>>, vector<1x128xf32>
        %235 = arith.maximumf %234, %233 : vector<1x128xf32>
        %c11_62 = arith.constant 11 : index
        %c0_63 = arith.constant 0 : index
        %236 = vector.load %arg8[%c11_62, %c0_63] : memref<16x128xf32, #tpu.memory_space<vmem>>, vector<1x128xf32>
        tpu.vector_store %arg8[%c11_62, %c0_63], %235 {strides = array<i32>} : memref<16x128xf32, #tpu.memory_space<vmem>>, vector<1x128xf32>,
      } else {
      }
      %c12_i32 = arith.constant 12 : i32
      %173 = arith.addi %10, %c12_i32 : i32
      %174 = arith.index_cast %173 : i32 to index
      %175 = memref.load %arg5[%174] : memref<17xi32, #tpu.memory_space<smem>>
      %c12_i32_47 = arith.constant 12 : i32
      %176 = arith.addi %10, %c12_i32_47 : i32
      %c1_i32_48 = arith.constant 1 : i32
      %177 = arith.addi %176, %c1_i32_48 : i32
      %178 = arith.index_cast %177 : i32 to index
      %179 = memref.load %arg5[%178] : memref<17xi32, #tpu.memory_space<smem>>
      %180 = arith.maxsi %175, %14 : i32
      %181 = arith.minsi %179, %15 : i32
      %182 = arith.cmpi slt, %180, %181 : i32
      %183 = arith.extui %182 : i1 to i32
      %c0_i32_49 = arith.constant 0 : i32
      %184 = arith.cmpi ne, %183, %c0_i32_49 : i32
      scf.if %184 {
        %221 = arith.subi %175, %14 : i32
        %222 = vector.broadcast %221 : i32 to vector<304x1xi32>
        %223 = arith.cmpi sge, %28, %222 : vector<304x1xi32>
        %224 = arith.subi %179, %14 : i32
        %225 = vector.broadcast %224 : i32 to vector<304x1xi32>
        %226 = arith.cmpi slt, %28, %225 : vector<304x1xi32>
        %227 = arith.andi %223, %226 : vector<304x1xi1>
        %cst_59 = arith.constant 0xFF800000 : f32
        %228 = vector.shape_cast %227 : vector<304x1xi1> to vector<304x1xi1>
        %229 = vector.broadcast %228 : vector<304x1xi1> to vector<304x128xi1>
        %230 = vector.broadcast %cst_59 : f32 to vector<304x128xf32>
        %231 = arith.select %229, %8, %230 : vector<304x128xi1>, vector<304x128xf32>
        %cst_60 = arith.constant dense<0xFF800000> : vector<128xf32>
        %232 = vector.multi_reduction <maximumf>, %231, %cst_60 [0] : vector<304x128xf32> to vector<128xf32>
        %233 = vector.shape_cast %232 : vector<128xf32> to vector<1x128xf32>
        %c12 = arith.constant 12 : index
        %c0_61 = arith.constant 0 : index
        %234 = vector.load %arg8[%c12, %c0_61] : memref<16x128xf32, #tpu.memory_space<vmem>>, vector<1x128xf32>
        %235 = arith.maximumf %234, %233 : vector<1x128xf32>
        %c12_62 = arith.constant 12 : index
        %c0_63 = arith.constant 0 : index
        %236 = vector.load %arg8[%c12_62, %c0_63] : memref<16x128xf32, #tpu.memory_space<vmem>>, vector<1x128xf32>
        tpu.vector_store %arg8[%c12_62, %c0_63], %235 {strides = array<i32>} : memref<16x128xf32, #tpu.memory_space<vmem>>, vector<1x128xf32>,
      } else {
      }
      %c13_i32 = arith.constant 13 : i32
      %185 = arith.addi %10, %c13_i32 : i32
      %186 = arith.index_cast %185 : i32 to index
      %187 = memref.load %arg5[%186] : memref<17xi32, #tpu.memory_space<smem>>
      %c13_i32_50 = arith.constant 13 : i32
      %188 = arith.addi %10, %c13_i32_50 : i32
      %c1_i32_51 = arith.constant 1 : i32
      %189 = arith.addi %188, %c1_i32_51 : i32
      %190 = arith.index_cast %189 : i32 to index
      %191 = memref.load %arg5[%190] : memref<17xi32, #tpu.memory_space<smem>>
      %192 = arith.maxsi %187, %14 : i32
      %193 = arith.minsi %191, %15 : i32
      %194 = arith.cmpi slt, %192, %193 : i32
      %195 = arith.extui %194 : i1 to i32
      %c0_i32_52 = arith.constant 0 : i32
      %196 = arith.cmpi ne, %195, %c0_i32_52 : i32
      scf.if %196 {
        %221 = arith.subi %187, %14 : i32
        %222 = vector.broadcast %221 : i32 to vector<304x1xi32>
        %223 = arith.cmpi sge, %28, %222 : vector<304x1xi32>
        %224 = arith.subi %191, %14 : i32
        %225 = vector.broadcast %224 : i32 to vector<304x1xi32>
        %226 = arith.cmpi slt, %28, %225 : vector<304x1xi32>
        %227 = arith.andi %223, %226 : vector<304x1xi1>
        %cst_59 = arith.constant 0xFF800000 : f32
        %228 = vector.shape_cast %227 : vector<304x1xi1> to vector<304x1xi1>
        %229 = vector.broadcast %228 : vector<304x1xi1> to vector<304x128xi1>
        %230 = vector.broadcast %cst_59 : f32 to vector<304x128xf32>
        %231 = arith.select %229, %8, %230 : vector<304x128xi1>, vector<304x128xf32>
        %cst_60 = arith.constant dense<0xFF800000> : vector<128xf32>
        %232 = vector.multi_reduction <maximumf>, %231, %cst_60 [0] : vector<304x128xf32> to vector<128xf32>
        %233 = vector.shape_cast %232 : vector<128xf32> to vector<1x128xf32>
        %c13 = arith.constant 13 : index
        %c0_61 = arith.constant 0 : index
        %234 = vector.load %arg8[%c13, %c0_61] : memref<16x128xf32, #tpu.memory_space<vmem>>, vector<1x128xf32>
        %235 = arith.maximumf %234, %233 : vector<1x128xf32>
        %c13_62 = arith.constant 13 : index
        %c0_63 = arith.constant 0 : index
        %236 = vector.load %arg8[%c13_62, %c0_63] : memref<16x128xf32, #tpu.memory_space<vmem>>, vector<1x128xf32>
        tpu.vector_store %arg8[%c13_62, %c0_63], %235 {strides = array<i32>} : memref<16x128xf32, #tpu.memory_space<vmem>>, vector<1x128xf32>,
      } else {
      }
      %c14_i32 = arith.constant 14 : i32
      %197 = arith.addi %10, %c14_i32 : i32
      %198 = arith.index_cast %197 : i32 to index
      %199 = memref.load %arg5[%198] : memref<17xi32, #tpu.memory_space<smem>>
      %c14_i32_53 = arith.constant 14 : i32
      %200 = arith.addi %10, %c14_i32_53 : i32
      %c1_i32_54 = arith.constant 1 : i32
      %201 = arith.addi %200, %c1_i32_54 : i32
      %202 = arith.index_cast %201 : i32 to index
      %203 = memref.load %arg5[%202] : memref<17xi32, #tpu.memory_space<smem>>
      %204 = arith.maxsi %199, %14 : i32
      %205 = arith.minsi %203, %15 : i32
      %206 = arith.cmpi slt, %204, %205 : i32
      %207 = arith.extui %206 : i1 to i32
      %c0_i32_55 = arith.constant 0 : i32
      %208 = arith.cmpi ne, %207, %c0_i32_55 : i32
      scf.if %208 {
        %221 = arith.subi %199, %14 : i32
        %222 = vector.broadcast %221 : i32 to vector<304x1xi32>
        %223 = arith.cmpi sge, %28, %222 : vector<304x1xi32>
        %224 = arith.subi %203, %14 : i32
        %225 = vector.broadcast %224 : i32 to vector<304x1xi32>
        %226 = arith.cmpi slt, %28, %225 : vector<304x1xi32>
        %227 = arith.andi %223, %226 : vector<304x1xi1>
        %cst_59 = arith.constant 0xFF800000 : f32
        %228 = vector.shape_cast %227 : vector<304x1xi1> to vector<304x1xi1>
        %229 = vector.broadcast %228 : vector<304x1xi1> to vector<304x128xi1>
        %230 = vector.broadcast %cst_59 : f32 to vector<304x128xf32>
        %231 = arith.select %229, %8, %230 : vector<304x128xi1>, vector<304x128xf32>
        %cst_60 = arith.constant dense<0xFF800000> : vector<128xf32>
        %232 = vector.multi_reduction <maximumf>, %231, %cst_60 [0] : vector<304x128xf32> to vector<128xf32>
        %233 = vector.shape_cast %232 : vector<128xf32> to vector<1x128xf32>
        %c14 = arith.constant 14 : index
        %c0_61 = arith.constant 0 : index
        %234 = vector.load %arg8[%c14, %c0_61] : memref<16x128xf32, #tpu.memory_space<vmem>>, vector<1x128xf32>
        %235 = arith.maximumf %234, %233 : vector<1x128xf32>
        %c14_62 = arith.constant 14 : index
        %c0_63 = arith.constant 0 : index
        %236 = vector.load %arg8[%c14_62, %c0_63] : memref<16x128xf32, #tpu.memory_space<vmem>>, vector<1x128xf32>
        tpu.vector_store %arg8[%c14_62, %c0_63], %235 {strides = array<i32>} : memref<16x128xf32, #tpu.memory_space<vmem>>, vector<1x128xf32>,
      } else {
      }
      %c15_i32 = arith.constant 15 : i32
      %209 = arith.addi %10, %c15_i32 : i32
      %210 = arith.index_cast %209 : i32 to index
      %211 = memref.load %arg5[%210] : memref<17xi32, #tpu.memory_space<smem>>
      %c15_i32_56 = arith.constant 15 : i32
      %212 = arith.addi %10, %c15_i32_56 : i32
      %c1_i32_57 = arith.constant 1 : i32
      %213 = arith.addi %212, %c1_i32_57 : i32
      %214 = arith.index_cast %213 : i32 to index
      %215 = memref.load %arg5[%214] : memref<17xi32, #tpu.memory_space<smem>>
      %216 = arith.maxsi %211, %14 : i32
      %217 = arith.minsi %215, %15 : i32
      %218 = arith.cmpi slt, %216, %217 : i32
      %219 = arith.extui %218 : i1 to i32
      %c0_i32_58 = arith.constant 0 : i32
      %220 = arith.cmpi ne, %219, %c0_i32_58 : i32
      scf.if %220 {
        %221 = arith.subi %211, %14 : i32
        %222 = vector.broadcast %221 : i32 to vector<304x1xi32>
        %223 = arith.cmpi sge, %28, %222 : vector<304x1xi32>
        %224 = arith.subi %215, %14 : i32
        %225 = vector.broadcast %224 : i32 to vector<304x1xi32>
        %226 = arith.cmpi slt, %28, %225 : vector<304x1xi32>
        %227 = arith.andi %223, %226 : vector<304x1xi1>
        %cst_59 = arith.constant 0xFF800000 : f32
        %228 = vector.shape_cast %227 : vector<304x1xi1> to vector<304x1xi1>
        %229 = vector.broadcast %228 : vector<304x1xi1> to vector<304x128xi1>
        %230 = vector.broadcast %cst_59 : f32 to vector<304x128xf32>
        %231 = arith.select %229, %8, %230 : vector<304x128xi1>, vector<304x128xf32>
        %cst_60 = arith.constant dense<0xFF800000> : vector<128xf32>
        %232 = vector.multi_reduction <maximumf>, %231, %cst_60 [0] : vector<304x128xf32> to vector<128xf32>
        %233 = vector.shape_cast %232 : vector<128xf32> to vector<1x128xf32>
        %c15 = arith.constant 15 : index
        %c0_61 = arith.constant 0 : index
        %234 = vector.load %arg8[%c15, %c0_61] : memref<16x128xf32, #tpu.memory_space<vmem>>, vector<1x128xf32>
        %235 = arith.maximumf %234, %233 : vector<1x128xf32>
        %c15_62 = arith.constant 15 : index
        %c0_63 = arith.constant 0 : index
        %236 = vector.load %arg8[%c15_62, %c0_63] : memref<16x128xf32, #tpu.memory_space<vmem>>, vector<1x128xf32>
        tpu.vector_store %arg8[%c15_62, %c0_63], %235 {strides = array<i32>} : memref<16x128xf32, #tpu.memory_space<vmem>>, vector<1x128xf32>,
      } else {
      }
    } else {
    }
    return
  }
  func.func @transform_0(%arg0: i32, %arg1: i32, %arg2: i32, %arg3: memref<1xi32, #tpu.memory_space<smem>>, %arg4: memref<1xi32, #tpu.memory_space<smem>>, %arg5: memref<17xi32, #tpu.memory_space<smem>>) -> (i32, i32) {
    %0 = arith.index_cast %arg0 : i32 to index
    %1 = memref.load %arg3[%0] : memref<1xi32, #tpu.memory_space<smem>>
    %2 = arith.index_cast %arg0 : i32 to index
    %3 = memref.load %arg4[%2] : memref<1xi32, #tpu.memory_space<smem>>
    %c1_i32 = arith.constant 1 : i32
    %4 = arith.maxsi %3, %c1_i32 : i32
    %5 = arith.addi %1, %4 : i32
    %c1_i32_0 = arith.constant 1 : i32
    %6 = arith.subi %5, %c1_i32_0 : i32
    %7 = arith.index_cast %arg0 : i32 to index
    %8 = memref.load %arg3[%7] : memref<1xi32, #tpu.memory_space<smem>>
    %9 = arith.addi %8, %arg2 : i32
    %10 = arith.minsi %9, %6 : i32
    %c0_i32 = arith.constant 0 : i32
    %c0_i32_1 = arith.constant 0 : i32
    return %c0_i32, %10 : i32, i32
  }
  func.func @transform_1(%arg0: i32, %arg1: i32, %arg2: i32, %arg3: memref<1xi32, #tpu.memory_space<smem>>, %arg4: memref<1xi32, #tpu.memory_space<smem>>, %arg5: memref<17xi32, #tpu.memory_space<smem>>) -> (i32, i32) {
    %0 = arith.index_cast %arg0 : i32 to index
    %1 = memref.load %arg3[%0] : memref<1xi32, #tpu.memory_space<smem>>
    %2 = arith.index_cast %arg0 : i32 to index
    %3 = memref.load %arg4[%2] : memref<1xi32, #tpu.memory_space<smem>>
    %c1_i32 = arith.constant 1 : i32
    %4 = arith.maxsi %3, %c1_i32 : i32
    %5 = arith.addi %1, %4 : i32
    %c1_i32_0 = arith.constant 1 : i32
    %6 = arith.subi %5, %c1_i32_0 : i32
    %7 = arith.index_cast %arg0 : i32 to index
    %8 = memref.load %arg3[%7] : memref<1xi32, #tpu.memory_space<smem>>
    %9 = arith.addi %8, %arg2 : i32
    %10 = arith.minsi %9, %6 : i32
    %c0_i32 = arith.constant 0 : i32
    return %10, %arg1 : i32, i32
  }
  func.func @transform_2(%arg0: i32, %arg1: i32, %arg2: i32, %arg3: memref<1xi32, #tpu.memory_space<smem>>, %arg4: memref<1xi32, #tpu.memory_space<smem>>, %arg5: memref<17xi32, #tpu.memory_space<smem>>) -> (i32, i32) {
    %c0_i32 = arith.constant 0 : i32
    return %arg0, %arg1 : i32, i32
  }
  func.func @transform_3(%arg0: i32, %arg1: i32, %arg2: i32, %arg3: memref<1xi32, #tpu.memory_space<smem>>, %arg4: memref<1xi32, #tpu.memory_space<smem>>, %arg5: memref<17xi32, #tpu.memory_space<smem>>) -> (i32, i32) {
    %c0_i32 = arith.constant 0 : i32
    return %arg0, %arg1 : i32, i32
  }
}

</mosaic_0001>

<bundles_post_ra>
// kernel: tpu_custom_call.1
= control target key start
LH: loop header
LB: loop body
LE: loop exit
PB: predicated region body
PF: predicated region fallthrough
CT: control target
= control target key end

     0   :  { %s16362_s0 = inlined_call_operand.<no memory space> [shape: s32[1], index: 0, kind: input, shape index: {}]   ;;  %s16363_s1 = inlined_call_operand.<no memory space> [shape: s32[1], index: 1, kind: input, shape index: {}]   ;;  %s16364_s2 = inlined_call_operand.vmem [shape: s32[17], index: 2, kind: input, shape index: {}]   ;;  %s16365_s3 = inlined_call_operand.vmem [shape: s32[1,304], index: 3, kind: input, shape index: {}]   ;;  %s16366_s4 = inlined_call_operand.hbm [shape: f32[304,256], index: 4, kind: input, shape index: {}]   ;;  %s16367_s5 = inlined_call_operand.hbm [shape: f32[16,256], index: 5, kind: output, shape index: {0}]   ;;  %s16368_s6 = inlined_call_operand.hbm [shape: f32[16,256], index: 6, kind: output, shape index: {1}]  }
   0x1   :  { %12 = sst [smem:[#allocation3]] %s16362_s0  ;;  %s14_s25 = sshll.u32 %s16364_s2, 4  ;;  %s15_s25 = int_to_ptr.vmem [resolvable:$true] %s14_s25 }
   0x2   :  { %13 = sst [smem:[#allocation4]] %s16363_s1  ;;  %s7611_s28 = scalar_lea.vmem %s15_s25, 16 }
   0x3   :  { %p7612_p0 = scmp.ne.s32.totalorder %s15_s25, %s7611_s28  ;;  %p7616_p1 = scmp.lt.s32.totalorder %s15_s25, %s15_s25 }
   0x4   :  { %p7617_p2 = scmp.lt.s32.totalorder %s7611_s28, %s7611_s28 }
   0x6   :  { %p7618_p3 = por %p7617_p2, %p7616_p1 }
   0x8   :  { %p7619_p4 = pnand %p7618_p3, %p7612_p0 }
   0xa   :  { %7622 = shalt.err (!%p7619_p4)  }
   0xb   :  { %s7795_s29 = smov [#allocation5]  }
   0xc   :  { %17 = dma.vmem_to_smem %s15_s25, 16, %s7795_s29, [#allocation2] }
   0xd   :  { %7745 = dma.done.wait [#allocation2], 16 }
   0xe   :  { %7746 = vsyncadd [#allocation2], 4294967280 }
   0xf   :  { %19 = sfence }
  0x10   :  { %20 = vsyncpa [#allocation7], 0 }
  0x11   :  { %22 = vsyncpa [#allocation7 + $0x1], 0 }
  0x12   :  { %23 = vsyncpa [#allocation8], 0 }
  0x13   :  { %25 = vsyncpa [#allocation8 + $0x1], 0 }
  0x14   :  { %26 = vsyncpa [#allocation11], 0 }
  0x15   :  { %28 = vsyncpa [#allocation11 + $0x1], 0  ;;  %s7853_s0 = smov 0   ;;  %s7855_s1 = smov 0  }
  0x16   :  { %s7857_s2 = smov 0   ;;  %s7859_s30 = smov 0  }
  0x17   :  { %s7861_s7 = smov 0   ;;  %s7863_s8 = smov 0  }
  0x18   :  { %s7865_s9 = smov 0   ;;  %s7867_s10 = smov 0  }
  0x19   :  { %s7869_s11 = smov 0  }
  0x1a LB: > { %s6770_s12 = sadd.s32 4294967295, %s7793_s11   ;;  %s6771_s13 = sadd.s32 4294967294, %s7793_s11   ;;  %s7793_s11 = sphi %s7869_s11, %s34_s11   ;;  %s7789_s10 = sphi %s7867_s10, %s18949_s10   ;;  %s7785_s9 = sphi %s7865_s9, %s18948_s9   ;;  %s7781_s8 = sphi %s7863_s8, %s18947_s8   ;;  %s7777_s7 = sphi %s7861_s7, %s18946_s7   ;;  %s7773_s30 = sphi %s7859_s30, %s18945_s30   ;;  %s7769_s2 = sphi %s7857_s2, %s18944_s2   ;;  %s7765_s1 = sphi %s7855_s1, %s18943_s1   ;;  %s7761_s0 = sphi %s7853_s0, %s18942_s0  }
  0x1b   : > { %s49_s14 = sadd.s32 1, %s7789_s10  ;;  %s101_s15 = sld [smem:[#allocation3]] }
  0x1c   : > { %p51_p5 = scmp.ge.s32.totalorder %s49_s14, 2  ;;  %s102_s16 = sld [smem:[#allocation4]] }
  0x1d   : > { %s124_s17 = sadd.s32 1, %s7781_s8  ;;  %p131_p6 = scmp.ne.s32.totalorder %s7781_s8, %s7777_s7 }
  0x1e   : > { %s18951_s14 = smov (%p51_p5, %s49_s14), 0  ;;  %p132_p7 = scmp.eq.s32.totalorder %s7793_s11, 0 }
  0x1f   : > { %17004 = sst [smem:[#allocation16_spill]] %s18951_s14  ;;  %p137_p8 = scmp.ne.s32.totalorder %s7777_s7, %s7773_s30 }
  0x20   : > { %s120_s18 = ssub.s32 %s7789_s10, %s18951_s14  ;;  %p138_p9 = scmp.eq.s32.totalorder %s6770_s12, 0 }
  0x21   : > { %p7908_p10 = por %p132_p7, %p131_p6  ;;  %p7912_p11 = scmp.eq.s32.totalorder %s120_s18, 0 }
  0x22   : > { %p103_p12 = scmp.gt.s32.totalorder %s102_s16, 1  ;;  %p7916_p13 = por %p138_p9, %p137_p8 }
  0x23   : > { %s152_s22 = sadd.s32 1, %s7769_s2  ;;  %p162_p0 = scmp.ne.s32.totalorder %s7769_s2, %s7765_s1 }
  0x24   : > { %s18953_s16 = smov (!%p103_p12, %s102_s16), 1  ;;  %p163_p1 = scmp.eq.s32.totalorder %s6770_s12, 1 }
  0x25   : > { %s7926_s23 = scalar_select %p7912_p11, %s7769_s2, %s152_s22  }
  0x26   : > { %s105_s24 = sadd.s32 %s18953_s16, %s101_s15  ;;  %p168_p2 = scmp.ne.s32.totalorder %s7765_s1, %s7761_s0 }
  0x27   : > { %17008 = sst [smem:[#allocation17_spill]] %s7926_s23  ;;  %s6774_s25 = sadd.s32 4294967295, %s105_s24 }
  0x28   : > { %p108_p3 = scmp.lt.s32.totalorder %s101_s15, %s6774_s25  ;;  %p7930_p4 = por %p163_p1, %p162_p0 }
  0x29   : > { %p169_p5 = scmp.eq.s32.totalorder %s6771_s13, 1  ;;  %p7526_p8 = scmp.lt.s32.totalorder %s7793_s11, 2 }
  0x2a   : > { %s17009_s26 = scalar_select %p7930_p4, 1, 0 }
  0x2b   : > { %s18955_s15 = smov (!%p108_p3, %s101_s15), %s6774_s25  ;;  %p7935_p7 = por %p169_p5, %p168_p2 }
  0x2c   : > { %s243_s28 = sand.u32 1, %s7781_s8   ;;  %s6864_s30 = smul.u32 76, %s18955_s15 }
  0x2d   : > { %s17010_s27 = scalar_select %p7935_p7, 1, 0 }
  0x2e   : > { %s7507_s29 = smul.u32 304, %s243_s28  ;;  %p7943_p9 = pnand %p7526_p8, %p7908_p10 }
  0x2f   : > { %s7952_s13 = scalar_select %p7912_p11, %s7781_s8, %s124_s17  }
  0x30   : > { %s262_s16 = sadd.s32 %s7789_s10, %s6864_s30  ;;  %s247_s22 = scalar_lea.vmem [#allocation6], %s7507_s29 }
  0x31   : > { %s6780_s18 = sshll.u32 %s262_s16, 7  ;;  %s265_s24 = sshll.u32 %s247_s22, 4  ;;  %s7960_s24 = int_to_ptr.vmem [resolvable:$true] %s265_s24 }
  0x32   : > { %s7958_s23 = scalar_lea.hbm %s16366_s4, %s6780_s18  ;;  %s7962_s15 = scalar_lea.sflag [#allocation7], %s243_s28 }
  0x33   : > { %s7623_s19 = scalar_lea.hbm %s7958_s23, 4864  ;;  %p7625_p11 = pneg %p7943_p9 }
  0x34   : > { %p7624_p10 = scmp.ne.s32.totalorder %s7958_s23, %s7623_s19  ;;  %s7628_s20 = scalar_lea.hbm %s16366_s4, 9728 }
  0x35   : > { %p7629_p1 = scmp.lt.u32.totalorder %s7958_s23, %s16366_s4  ;;  %p7630_p2 = scmp.lt.u32.totalorder %s7628_s20, %s7623_s19 }
  0x36   : > { %p7626_p12 = pnand %p7625_p11, %p7624_p10  ;;  %p7632_p5 = scmp.lt.u32.totalorder %s7623_s19, %s7958_s23 }
  0x37   : > { %p7631_p3 = por %p7630_p2, %p7629_p1 }
  0x38   : > { %p7627_p0 = pneg %p7626_p12 }
  0x39   : > { %p7633_p8 = por %p7632_p5, %p7631_p3 }
  0x3b   : > { %p7634_p6 = pnand %p7633_p8, %p7627_p0 }
  0x3d   : > { %7637 = shalt.err (!%p7634_p6)
}
  0x3e   : > { %s7638_s28 = scalar_lea.vmem %s7960_s24, 4864  ;;  %s7796_s16 = smov [#allocation6]  }
  0x3f   : > { %p7639_p10 = scmp.ne.s32.totalorder %s7960_s24, %s7638_s28  ;;  %s7643_s18 = sshll.u32 %s7796_s16, 4  ;;  %s7644_s18 = int_to_ptr.vmem [resolvable:$false] %s7643_s18 }
  0x40   : > { %s7645_s22 = scalar_lea.vmem %s7644_s18, 9728  ;;  %p7646_p4 = scmp.lt.s32.totalorder %s7960_s24, %s7644_s18 }
  0x41   : > { %p7641_p12 = pnand %p7639_p10, %p7625_p11  ;;  %p7647_p1 = scmp.lt.s32.totalorder %s7645_s22, %s7638_s28 }
  0x43   : > { %p7642_p7 = pneg %p7641_p12  ;;  %p7648_p2 = por %p7647_p1, %p7646_p4 }
  0x45   : > { %p7649_p3 = pnand %p7648_p2, %p7642_p7 }
  0x47   : > { %7652 = shalt.err (!%p7649_p3)
}
  0x48   : > { %s7797_s25 = smov 256   ;;  %s7798_s19 = smov 128  }
  0x49   : > { %s7799_s17 = smov 8   ;;  %p6781_p6 = scmp.ge.s32.totalorder %s7793_s11, 1 }
  0x4a   : > { %7518 = dma.hbm_to_vmem [thread:$0]  (!%p7943_p9), %s7958_s23, 4864, %s7960_s24, %s7962_s15, %s7797_s25, %s7798_s19, %s7799_s17  }
  0x4b   : > { %p273_p11 = scmp.lt.s32.totalorder %s7793_s11, 3 }
  0x4d   : > { %p274_p0 = pnand %p6781_p6, %p273_p11 }
  0x4e   : > { %s279_s14 = sand.u32 (!%p274_p0), 1, %s7777_s7  }
  0x4f   : > { %277 = sbr.rel (%p274_p0) target bundleno = 1725 (0x6bd), region = 28  ;;  %s280_s29 = scalar_lea.sflag (!%p274_p0), [#allocation7], %s279_s14 }
  0x50   : > { %s7508_s20 = smul.u32 (!%p274_p0), 304, %s279_s14 }
  0x52   : > { %s7993_s30 = scalar_lea.vmem (!%p274_p0), [#allocation6], %s7508_s20 }
  0x56   : > { %7748 = dma.done.wait (%p7916_p13), %s280_s29, 4864  }
  0x57   : > { %7750 = vsyncadd (%p7916_p13), %s280_s29, 4294962432  ;;  %s8000_s28 = sand.u32 1, %s7765_s1   ;;  %s325_s23 = sld [smem:[#allocation4]]  ;;  %v7800_v0 = vmov -inf   ;;  %v7801_v1 = vmov 0.0  }
  0x58   : > { %s324_s12 = sld [smem:[#allocation3]]  ;;  %s6782_s24 = sshll.u32 %s8000_s28, 4 }
  0x59   : > { %s8003_s15 = scalar_lea.vmem [#allocation9], %s6782_s24  ;;  %s8007_s16 = scalar_lea.vmem [#allocation10], %s6782_s24 }
  0x5a   : > { %363 = vst [vmem:[%s8003_s15] sm:$0xff] %v7800_v0  ;;  %364 = vst [vmem:[%s8003_s15 + $0x8] sm:$0xff] %v7800_v0 }
  0x5b   : > { %365 = vst [vmem:[%s8007_s16] sm:$0xff] %v7801_v1  ;;  %366 = vst [vmem:[%s8007_s16 + $0x8] sm:$0xff] %v7801_v1 }
  0x5d   : > { %p326_p13 = scmp.gt.s32.totalorder %s325_s23, 1  ;;  %p6786_p9 = scmp.le.s32.totalorder %s325_s23, 0 }
  0x5f   : > { %s327_s21 = scalar_select %p326_p13, %s325_s23, 1 }
  0x61   : > { %s328_s18 = sadd.s32 %s327_s21, %s324_s12 }
  0x62   : > { %s6784_s22 = sadd.s32 4294967295, %s328_s18 }
  0x63   : > { %p331_p4 = scmp.lt.s32.totalorder %s324_s12, %s6784_s22 }
  0x65   : > { %s18957_s12 = smov (!%p331_p4, %s324_s12), %s6784_s22  ;;  %371 = sbr.rel (%p6786_p9) target bundleno = 1675 (0x68b), region = 40 }
  0x66   : > { %s333_s25 = smul.u32 3, %s18957_s12 }
  0x68   : > { %p334_p7 = scmp.lt.s32.totalorder %s333_s25, 2 }
  0x6a   : > { %s18959_s25 = smov (!%p334_p7, %s333_s25), 2 }
  0x6b   : > { %s336_s14 = scalar_lea.vmem %s16365_s3, %s18959_s25 }
  0x6c   : > { %v8018_v2 = vld [vmem:[%s7993_s30 + $0x80] sm:$0xff]  ;;  %v8021_v3 = vld [vmem:[%s7993_s30 + $0x88] sm:$0xff]  ;;  %v8033_v9 = vld [vmem:[%s7993_s30 + $0x90] sm:$0xff]  ;;  %vm454_vm6 = vcmask 392192   ;;  %s8824_s12 = sld [smem:[#allocation5]]  ;;  %s8826_s24 = sld [smem:[#allocation5 + $0x1]] }
  0x6d   : > { %17012 = vst [vmem:[#allocation18_spill] sm:$0xff] %v8018_v2  ;;  %17013 = vst [vmem:[#allocation19_spill] sm:$0xff] %v8021_v3  ;;  %v8024_v4 = vld [vmem:[%s7993_s30] sm:$0xff]  ;;  %v510_v5 = vand.u32 4294901760, %v8018_v2  ;;  %v513_v6 = vand.u32 4294901760, %v8021_v3  ;;  %v8029_v7 = vld [vmem:[%s7993_s30 + $0x8] sm:$0xff] }
  0x6e   : > { %17014 = vst [vmem:[#allocation20_spill] sm:$0xff] %v8024_v4  ;;  %17015 = vst [vmem:[#allocation21_spill] sm:$0xff] %v8029_v7  ;;  %v462_v8 = vand.u32 4294901760, %v8024_v4  ;;  %v8036_v10 = vld [vmem:[%s7993_s30 + $0x98] sm:$0xff]  ;;  %v465_v12 = vand.u32 4294901760, %v8029_v7  ;;  %v516_v13 = vand.u32 4294901760, %v8033_v9 }
  0x6f   : > { %17016 = vst [vmem:[#allocation22_spill] sm:$0xff] %v8033_v9  ;;  %17017 = vst [vmem:[#allocation23_spill] sm:$0xff] %v8036_v10  ;;  %v519_v14 = vand.u32 4294901760, %v8036_v10  ;;  %v8042_v15 = vld [vmem:[%s7993_s30 + $0x10] sm:$0xff]  ;;  %v8044_v16 = vpack.c.bf16 %v513_v6, %v510_v5  ;;  %v8047_v17 = vsub.f32 %v8018_v2, %v510_v5  ;;  %v8050_v18 = vsub.f32 %v8021_v3, %v513_v6  ;;  %v8056_v20 = vld [vmem:[%s7993_s30 + $0x18] sm:$0xff] }
  0x70   : > { %17018 = vst [vmem:[#allocation24_spill] sm:$0xff] %v8042_v15  ;;  %v8053_v19 = vsub.f32 %v8024_v4, %v462_v8  ;;  %17019 = vst [vmem:[#allocation25_spill] sm:$0xff] %v8056_v20  ;;  %v8059_v21 = vld [vmem:[%s7993_s30 + $0xa0] sm:$0xff]  ;;  %v8061_v22 = vpack.c.bf16 %v465_v12, %v462_v8  ;;  %v8064_v23 = vsub.f32 %v8029_v7, %v465_v12  ;;  %v8072_v26 = vld [vmem:[%s7993_s30 + $0xa8] sm:$0xff]  ;;  %v468_v31 = vand.u32 4294901760, %v8042_v15 }
  0x71   : > { %17020 = vst [vmem:[#allocation26_spill] sm:$0xff] %v8059_v21  ;;  %v8066_v24 = vpack.c.bf16 %v519_v14, %v516_v13  ;;  %v8069_v25 = vsub.f32 %v8033_v9, %v516_v13  ;;  %17021 = vst [vmem:[#allocation27_spill] sm:$0xff] %v8072_v26  ;;  %v8075_v27 = vld [vmem:[%s7993_s30 + $0x20] sm:$0xff]  ;;  %7232 = vmatprep.subr.bf16.mxu1 %v8044_v16  ;;  %v7295_v28 = vpack.c.bf16 %v8050_v18, %v8047_v17  ;;  %v8086_v32 = vld [vmem:[%s7993_s30 + $0x28] sm:$0xff] }
  0x72   : > { %17022 = vst [vmem:[#allocation28_spill] sm:$0xff] %v8075_v27  ;;  %v8082_v30 = vsub.f32 %v8036_v10, %v519_v14  ;;  %17023 = vst [vmem:[#allocation29_spill] sm:$0xff] %v8086_v32  ;;  %7234 = vmatpush3.bf16.msra.mxu1 %v8061_v22  ;;  %v7297_v34 = vpack.c.bf16 %v8064_v23, %v8053_v19  ;;  %v471_v35 = vand.u32 4294901760, %v8056_v20  ;;  %v522_v36 = vand.u32 4294901760, %v8059_v21  ;;  %v8095_v37 = vld [vmem:[%s7993_s30 + $0xb0] sm:$0xff]  ;;  %v8106_v42 = vld [vmem:[%s7993_s30 + $0xb8] sm:$0xff] }
  0x73   : > { %17024 = vst [vmem:[#allocation30_spill] sm:$0xff] %v8095_v37  ;;  %7296 = vmatprep.subr.bf16.mxu0 %v7295_v28  ;;  %7236 = vmatprep.subr.bf16.mxu1 %v8066_v24  ;;  %v8099_v38 = vsub.f32 %v8042_v15, %v468_v31  ;;  %v525_v40 = vand.u32 4294901760, %v8072_v26  ;;  %v474_v41 = vand.u32 4294901760, %v8075_v27  ;;  %17025 = vst [vmem:[#allocation31_spill] sm:$0xff] %v8106_v42  ;;  %v477_v46 = vand.u32 4294901760, %v8086_v32  ;;  %v8118_v47 = vld [vmem:[%s7993_s30 + $0x30] sm:$0xff] }
  0x74   : > { %v7299_v39 = vpack.c.bf16 %v8082_v30, %v8069_v25  ;;  %7298 = vmatpush3.bf16.msra.mxu0 %v7297_v34  ;;  %v8108_v43 = vpack.c.bf16 %v471_v35, %v468_v31  ;;  %v8111_v44 = vsub.f32 %v8056_v20, %v471_v35  ;;  %v8114_v45 = vsub.f32 %v8059_v21, %v522_v36  ;;  %v8121_v48 = vld [vmem:[%s7993_s30 + $0x38] sm:$0xff]  ;;  %v8133_v53 = vld [vmem:[%s7993_s30 + $0xc0] sm:$0xff]  ;;  %v8145_v58 = vld [vmem:[%s7993_s30 + $0xc8] sm:$0xff] }
  0x75   : > { %17026 = vst [vmem:[#allocation32_spill] sm:$0xff] %v8118_v47  ;;  %17027 = vst [vmem:[#allocation33_spill] sm:$0xff] %v8121_v48  ;;  %v8123_v49 = vpack.c.bf16 %v525_v40, %v522_v36  ;;  %v8126_v50 = vsub.f32 %v8072_v26, %v525_v40  ;;  %v8129_v51 = vsub.f32 %v8075_v27, %v474_v41  ;;  %v528_v52 = vand.u32 4294901760, %v8095_v37  ;;  %v8156_v63 = vld [vmem:[%s7993_s30 + $0x40] sm:$0xff]  ;;  %v8159_v0 = vld [vmem:[%s7993_s30 + $0x48] sm:$0xff] }
  0x76   : > { %7300 = vmatprep.subr.bf16.mxu0 %v7299_v39  ;;  %17028 = vst [vmem:[#allocation34_spill] sm:$0xff] %v8133_v53  ;;  %7238 = vmatpush3.bf16.msra.mxu1 %v8108_v43  ;;  %v7301_v54 = vpack.c.bf16 %v8111_v44, %v8099_v38  ;;  %v8138_v55 = vpack.c.bf16 %v477_v46, %v474_v41  ;;  %v531_v57 = vand.u32 4294901760, %v8106_v42  ;;  %17030 = vst [vmem:[#allocation36_spill] sm:$0xff] %v8145_v58  ;;  %v8170_v12 = vld [vmem:[%s7993_s30 + $0xd0] sm:$0xff]  ;;  %v8182_v34 = vld [vmem:[%s7993_s30 + $0xd8] sm:$0xff] }
  0x77   : > { %v8141_v56 = vsub.f32 %v8086_v32, %v477_v46  ;;  %7240 = vmatprep.subr.bf16.mxu1 %v8123_v49  ;;  %v7303_v59 = vpack.c.bf16 %v8126_v50, %v8114_v45  ;;  %v8151_v60 = vsub.f32 %v8095_v37, %v528_v52  ;;  %v480_v61 = vand.u32 4294901760, %v8118_v47  ;;  %17031 = vst [vmem:[#allocation37_spill] sm:$0xff] %v8156_v63  ;;  %v8193_v41 = vld [vmem:[%s7993_s30 + $0x50] sm:$0xff]  ;;  %v8196_v46 = vld [vmem:[%s7993_s30 + $0x58] sm:$0xff]  ;;  %v8220_v11 = vld [vmem:[%s7993_s30 + $0xe8] sm:$0xff] }
  0x78   : > { %17029 = vst [vmem:[#allocation35_spill] sm:$0xff] %v8138_v55  ;;  %v483_v62 = vand.u32 4294901760, %v8121_v48  ;;  %17032 = vst [vmem:[#allocation38_spill] sm:$0xff] %v8159_v0  ;;  %7302 = vmatpush3.bf16.msra.mxu0 %v7301_v54  ;;  %v8163_v5 = vpack.c.bf16 %v531_v57, %v528_v52  ;;  %v8166_v6 = vsub.f32 %v8106_v42, %v531_v57  ;;  %v534_v8 = vand.u32 4294901760, %v8133_v53  ;;  %v8245_v26 = vld [vmem:[%s7993_s30 + $0xf0] sm:$0xff]  ;;  %v8258_v3 = vld [vmem:[%s7993_s30 + $0xf8] sm:$0xff] }
  0x79   : > { %v7305_v1 = vpack.c.bf16 %v8141_v56, %v8129_v51  ;;  %17034 = vst [vmem:[#allocation40_spill] sm:$0xff] %v8170_v12  ;;  %7304 = vmatprep.subr.bf16.mxu0 %v7303_v59  ;;  %v8175_v14 = vsub.f32 %v8118_v47, %v480_v61  ;;  %v537_v31 = vand.u32 4294901760, %v8145_v58  ;;  %17036 = vst [vmem:[#allocation42_spill] sm:$0xff] %v8182_v34  ;;  %v486_v39 = vand.u32 4294901760, %v8156_v63 }
  0x7a   : > { %17033 = vst [vmem:[#allocation39_spill] sm:$0xff] %v8163_v5  ;;  %v8172_v13 = vpack.c.bf16 %v483_v62, %v480_v61  ;;  %v8178_v28 = vsub.f32 %v8121_v48, %v483_v62  ;;  %7242 = vmatpush3.bf16.msra.mxu1 %v8138_v55  ;;  %v7307_v35 = vpack.c.bf16 %v8166_v6, %v8151_v60  ;;  %v489_v40 = vand.u32 4294901760, %v8159_v0  ;;  %v8208_v61 = vld [vmem:[%s7993_s30 + $0xe0] sm:$0xff] }
  0x7b   : > { %v8188_v36 = vsub.f32 %v8133_v53, %v534_v8  ;;  %17037 = vst [vmem:[#allocation43_spill] sm:$0xff] %v8193_v41  ;;  %17038 = vst [vmem:[#allocation44_spill] sm:$0xff] %v8196_v46  ;;  %7244 = vmatprep.subr.bf16.mxu1 %v8163_v5  ;;  %v8201_v54 = vpack.c.bf16 %v537_v31, %v534_v8  ;;  %v8204_v57 = vsub.f32 %v8145_v58, %v537_v31  ;;  %v8230_v53 = vld [vmem:[%s7993_s30 + $0x60] sm:$0xff] }
  0x7c   : > { %17035 = vst [vmem:[#allocation41_spill] sm:$0xff] %v8172_v13  ;;  %v7309_v52 = vpack.c.bf16 %v8178_v28, %v8175_v14  ;;  %v540_v59 = vand.u32 4294901760, %v8170_v12  ;;  %17040 = vst [vmem:[#allocation46_spill] sm:$0xff] %v8208_v61  ;;  %7306 = vmatpush3.bf16.msra.mxu0 %v7305_v1  ;;  %v8210_v62 = vpack.c.bf16 %v489_v40, %v486_v39  ;;  %v543_v8 = vand.u32 4294901760, %v8182_v34 }
  0x7d   : > { %17039 = vst [vmem:[#allocation45_spill] sm:$0xff] %v8201_v54  ;;  %v8213_v33 = vsub.f32 %v8156_v63, %v486_v39  ;;  %v8216_v29 = vsub.f32 %v8159_v0, %v489_v40  ;;  %17042 = vst [vmem:[#allocation48_spill] sm:$0xff] %v8220_v11  ;;  %7308 = vmatprep.subr.bf16.mxu0 %v7307_v35  ;;  %v7311_v31 = vpack.c.bf16 %v8204_v57, %v8188_v36  ;;  %v8233_v40 = vld [vmem:[%s7993_s30 + $0x68] sm:$0xff] }
  0x7e   : > { %17041 = vst [vmem:[#allocation47_spill] sm:$0xff] %v8210_v62  ;;  %v8225_v58 = vsub.f32 %v8170_v12, %v540_v59  ;;  %v492_v1 = vand.u32 4294901760, %v8193_v41  ;;  %v495_v39 = vand.u32 4294901760, %v8196_v46  ;;  %17043 = vst [vmem:[#allocation49_spill] sm:$0xff] %v8230_v53  ;;  %7246 = vmatpush3.bf16.msra.mxu1 %v8172_v13  ;;  %v8238_v42 = vpack.c.bf16 %v543_v8, %v540_v59 }
  0x7f   : > { %17044 = vst [vmem:[#allocation50_spill] sm:$0xff] %v8233_v40  ;;  %v7313_v35 = vpack.c.bf16 %v8216_v29, %v8213_v33  ;;  %v8241_v12 = vsub.f32 %v8182_v34, %v543_v8  ;;  %v546_v37 = vand.u32 4294901760, %v8208_v61  ;;  %17046 = vst [vmem:[#allocation52_spill] sm:$0xff] %v8245_v26  ;;  %7248 = vmatprep.subr.bf16.mxu1 %v8201_v54  ;;  %v549_v59 = vand.u32 4294901760, %v8220_v11 }
  0x80   : > { %17045 = vst [vmem:[#allocation51_spill] sm:$0xff] %v8238_v42  ;;  %v8248_v21 = vpack.c.bf16 %v495_v39, %v492_v1  ;;  %v8251_v10 = vsub.f32 %v8193_v41, %v492_v1  ;;  %v8254_v9 = vsub.f32 %v8196_v46, %v495_v39  ;;  %17048 = vst [vmem:[#allocation54_spill] sm:$0xff] %v8258_v3  ;;  %7310 = vmatpush3.bf16.msra.mxu0 %v7309_v52  ;;  %v8268_v1 = vld [vmem:[%s7993_s30 + $0x70] sm:$0xff]  ;;  %v8271_v41 = vld [vmem:[%s7993_s30 + $0x78] sm:$0xff] }
  0x81   : > { %v7315_v8 = vpack.c.bf16 %v8241_v12, %v8225_v58  ;;  %v8263_v34 = vsub.f32 %v8208_v61, %v546_v37  ;;  %v498_v2 = vand.u32 4294901760, %v8230_v53  ;;  %v501_v0 = vand.u32 4294901760, %v8233_v40  ;;  %17049 = vst [vmem:[#allocation55_spill] sm:$0xff] %v8268_v1  ;;  %17050 = vst [vmem:[#allocation56_spill] sm:$0xff] %v8271_v41  ;;  %7312 = vmatprep.subr.bf16.mxu0 %v7311_v31 }
  0x82   : > { %17047 = vst [vmem:[#allocation53_spill] sm:$0xff] %v8248_v21  ;;  %v7317_v39 = vpack.c.bf16 %v8254_v9, %v8251_v10  ;;  %v8275_v46 = vpack.c.bf16 %v549_v59, %v546_v37  ;;  %v8278_v52 = vsub.f32 %v8220_v11, %v549_v59  ;;  %v552_v61 = vand.u32 4294901760, %v8245_v26  ;;  %7250 = vmatpush3.bf16.msra.mxu1 %v8210_v62 }
  0x83   : > { %v8282_v63 = vpack.c.bf16 %v501_v0, %v498_v2  ;;  %v8285_v48 = vsub.f32 %v8230_v53, %v498_v2  ;;  %v8288_v47 = vsub.f32 %v8233_v40, %v501_v0  ;;  %v555_v31 = vand.u32 4294901760, %v8258_v3  ;;  %7252 = vmatprep.subr.bf16.mxu1 %v8238_v42 }
  0x84   : > { %17051 = vst [vmem:[#allocation57_spill] sm:$0xff] %v8275_v46  ;;  %v7319_v37 = vpack.c.bf16 %v8278_v52, %v8263_v34  ;;  %v8295_v59 = vsub.f32 %v8245_v26, %v552_v61  ;;  %v504_v11 = vand.u32 4294901760, %v8268_v1  ;;  %v507_v32 = vand.u32 4294901760, %v8271_v41  ;;  %7314 = vmatpush3.bf16.msra.mxu0 %v7313_v35 }
  0x85   : > { %17052 = vst [vmem:[#allocation58_spill] sm:$0xff] %v8282_v63  ;;  %v7321_v2 = vpack.c.bf16 %v8288_v47, %v8285_v48  ;;  %v8301_v0 = vpack.c.bf16 %v555_v31, %v552_v61  ;;  %v8304_v40 = vsub.f32 %v8258_v3, %v555_v31  ;;  %v17054_v53 = vlaneseq  ;;  %7316 = vmatprep.subr.bf16.mxu0 %v7315_v8  ;;  %v8322_v61 = vld [vmem:[%s336_s14] sm:$0x7] }
  0x86   : > { %v8309_v20 = vpack.c.bf16 %v507_v32, %v504_v11  ;;  %v8312_v26 = vsub.f32 %v8268_v1, %v504_v11  ;;  %v8315_v15 = vsub.f32 %v8271_v41, %v507_v32  ;;  %7254 = vmatpush3.bf16.msra.mxu1 %v8248_v21  ;;  %v724_v21 = vand.u32 4294901760, %v8082_v30 }
  0x87   : > { %17053 = vst [vmem:[#allocation59_spill] sm:$0xff] %v8301_v0  ;;  %v8307_v27 = vshrl.u32 %v17054_v53, 7  ;;  %v7323_v53 = vpack.c.bf16 %v8304_v40, %v8295_v59  ;;  %7256 = vmatprep.subr.bf16.mxu1 %v8275_v46  ;;  %v731_v13 = vand.u32 4294901760, %v8114_v45 }
  0x88   : > { %17055 = vst [vmem:[#allocation60_spill] sm:$0xff] %v8309_v20  ;;  %v7325_v31 = vpack.c.bf16 %v8315_v15, %v8312_v26  ;;  %7318 = vmatpush3.bf16.msra.mxu0 %v7317_v39 }
  0x89   : > { %v8329_v8 = vadd.s32 8, %v8307_v27  ;;  %v428_v11 = vsub.s32 1, %v8307_v27  ;;  %v432_v32 = vsub.s32 2, %v8307_v27  ;;  %v8337_v3 = vadd.s32 16, %v8307_v27  ;;  %7320 = vmatprep.subr.bf16.mxu0 %v7319_v37 }
  0x8a   : > { %v8340_v35 = vadd.s32 24, %v8307_v27  ;;  %v8343_v41 = vadd.s32 32, %v8307_v27  ;;  %v8352_v4 = vadd.s32 40, %v8307_v27  ;;  %v8355_v46 = vadd.s32 48, %v8307_v27  ;;  %7258 = vmatpush3.bf16.msra.mxu1 %v8282_v63 }
  0x8b   : > { %17056 = vst [vmem:[#allocation61_spill] sm:$0xff] %v8337_v3  ;;  %v8346_v1 = vrot.slane %v8322_v61, %v428_v11  ;;  %v8349_v7 = vrot.slane %v8322_v61, %v432_v32  ;;  %v8358_v3 = vadd.s32 56, %v8307_v27  ;;  %v8364_v39 = vadd.s32 72, %v8307_v27  ;;  %7260 = vmatprep.subr.bf16.mxu1 %v8301_v0 }
  0x8c   : > { %17057 = vst [vmem:[#allocation62_spill] sm:$0xff] %v8340_v35  ;;  %17058 = vst [vmem:[#allocation63_spill] sm:$0xff] %v8343_v41  ;;  %v8361_v35 = vadd.s32 64, %v8307_v27  ;;  %v8367_v11 = vadd.s32 80, %v8307_v27  ;;  %v8375_v37 = vadd.s32 88, %v8307_v27  ;;  %v8378_v32 = vadd.s32 96, %v8307_v27  ;;  %7322 = vmatpush3.bf16.msra.mxu0 %v7321_v2 }
  0x8d   : > { %17059 = vst [vmem:[#allocation64_spill] sm:$0xff] %v8352_v4  ;;  %17060 = vst [vmem:[#allocation65_spill] sm:$0xff] %v8355_v46  ;;  %vm435_vm0 = vcmp.eq.s32.totalorder %v8307_v27, %v8346_v1  ;;  %vm439_vm1 = vcmp.eq.s32.totalorder %v8329_v8, %v8349_v7  ;;  %v8392_v46 = vadd.s32 112, %v8307_v27  ;;  %v8400_v4 = vadd.s32 128, %v8307_v27  ;;  %7324 = vmatprep.subr.bf16.mxu0 %v7323_v53 }
  0x8e   : > { %17061 = vst [vmem:[#allocation66_spill] sm:$0xff] %v8358_v3  ;;  %17062 = vst [vmem:[#allocation67_spill] sm:$0xff] %v8361_v35  ;;  %v8389_v3 = vadd.s32 104, %v8307_v27  ;;  %v8403_v41 = vadd.s32 136, %v8307_v27  ;;  %v8412_v2 = vadd.s32 160, %v8307_v27  ;;  %7262 = vmatpush3.bf16.msra.mxu1 %v8309_v20  ;;  %v8423_v53 = vadd.s32 184, %v8307_v27 }
  0x8f   : > { %17063 = vst [vmem:[#allocation68_spill] sm:$0xff] %v8364_v39  ;;  %17064 = vst [vmem:[#allocation69_spill] sm:$0xff] %v8367_v11  ;;  %v16581_v39 = vmov 0.0   ;;  %vm438_vm3 = vcmp.eq.s32.totalorder %v8329_v8, %v8346_v1  ;;  %vm436_vm5 = vcmp.eq.s32.totalorder %v8307_v27, %v8349_v7 }
  0x90   : > { %17065 = vst [vmem:[#allocation70_spill] sm:$0xff] %v8375_v37  ;;  %17066 = vst [vmem:[#allocation71_spill] sm:$0xff] %v8378_v32  ;;  %v6788_v11 = vsel %vm435_vm0, 1.0, %v16581_v39  ;;  %v8386_v35 = vsel %vm439_vm1, 1.0, %v16581_v39  ;;  %v8397_v32 = vadd.s32 120, %v8307_v27  ;;  %v8406_v39 = vadd.s32 144, %v8307_v27  ;;  %7326 = vmatpush3.bf16.msra.mxu0 %v7325_v31 }
  0x91   : > { %17067 = vst [vmem:[#allocation72_spill] sm:$0xff] %v8389_v3  ;;  %17068 = vst [vmem:[#allocation73_spill] sm:$0xff] %v8392_v46  ;;  %v8394_v37 = vsub.f32 %v6788_v11, %v6788_v11  ;;  %v8409_v3 = vadd.s32 152, %v8307_v27  ;;  %v8415_v11 = vadd.s32 168, %v8307_v27  ;;  %v8460_v31 = vadd.s32 272, %v8307_v27 }
  0x92   : > { %17069 = vst [vmem:[#allocation74_spill] sm:$0xff] %v8397_v32  ;;  %17070 = vst [vmem:[#allocation75_spill] sm:$0xff] %v8400_v4  ;;  %v8420_v32 = vadd.s32 176, %v8307_v27  ;;  %v8439_v4 = vadd.s32 224, %v8307_v27  ;;  %v710_v46 = vand.u32 4294901760, %v8050_v18  ;;  %v459_v7 = vsel %vm454_vm6, %v8386_v35, 0 }
  0x93   : > { %17071 = vst [vmem:[#allocation76_spill] sm:$0xff] %v8403_v41  ;;  %17072 = vst [vmem:[#allocation77_spill] sm:$0xff] %v8406_v39  ;;  %v8426_v39 = vadd.s32 192, %v8307_v27  ;;  %957 = vmatprep.mubr.f32.mxu0 %v8394_v37  ;;  %v8448_v41 = vadd.s32 240, %v8307_v27 }
  0x94   : > { %17073 = vst [vmem:[#allocation78_spill] sm:$0xff] %v8409_v3  ;;  %17074 = vst [vmem:[#allocation79_spill] sm:$0xff] %v8412_v2  ;;  %v8430_v2 = vadd.s32 200, %v8307_v27  ;;  %v8436_v3 = vadd.s32 216, %v8307_v27  ;;  %v711_v42 = vsub.f32 %v8050_v18, %v710_v46  ;;  %v612_v18 = vand.u32 4294901760, %v8111_v44 }
  0x95   : > { %17075 = vst [vmem:[#allocation80_spill] sm:$0xff] %v8415_v11  ;;  %17076 = vst [vmem:[#allocation81_spill] sm:$0xff] %v8420_v32  ;;  %v8433_v11 = vadd.s32 208, %v8307_v27 }
  0x96   : > { %17077 = vst [vmem:[#allocation82_spill] sm:$0xff] %v8423_v53  ;;  %17078 = vst [vmem:[#allocation83_spill] sm:$0xff] %v8426_v39  ;;  %v17083_v53 = vand.u32 4294901760, %v8394_v37  ;;  %v8445_v39 = vadd.s32 232, %v8307_v27 }
  0x97   : > { %17079 = vst [vmem:[#allocation84_spill] sm:$0xff] %v8430_v2  ;;  %17080 = vst [vmem:[#allocation85_spill] sm:$0xff] %v8433_v11  ;;  %v8451_v2 = vadd.s32 248, %v8307_v27  ;;  %v8454_v11 = vadd.s32 256, %v8307_v27 }
  0x98   : > { %17081 = vst [vmem:[#allocation86_spill] sm:$0xff] %v8436_v3  ;;  %17082 = vst [vmem:[#allocation87_spill] sm:$0xff] %v8439_v4  ;;  %v560_v32 = vsub.f32 %v8394_v37, %v17083_v53  ;;  %v8457_v3 = vadd.s32 264, %v8307_v27  ;;  %v8463_v53 = vadd.s32 280, %v8307_v27 }
  0x99   : > { %17084 = vst [vmem:[#allocation88_spill] sm:$0xff] %v8445_v39  ;;  %17085 = vst [vmem:[#allocation89_spill] sm:$0xff] %v8448_v41  ;;  %v8466_v39 = vadd.s32 288, %v8307_v27  ;;  %v8469_v41 = vadd.s32 296, %v8307_v27 }
  0x9a   : > { %17086 = vst [vmem:[#allocation90_spill] sm:$0xff] %v8451_v2  ;;  %17087 = vst [vmem:[#allocation91_spill] sm:$0xff] %v8454_v11  ;;  %v561_v4 = vand.u32 4294901760, %v560_v32  ;;  %v17093_v2 = vand.u32 4294901760, %v8047_v17  ;;  %v17095_v32 = vand.u32 4294901760, %v8064_v23 }
  0x9b   : > { %17088 = vst [vmem:[#allocation92_spill] sm:$0xff] %v8457_v3  ;;  %17089 = vst [vmem:[#allocation93_spill] sm:$0xff] %v8460_v31  ;;  %v424_v3 = vsub.s32 0, %v8307_v27  ;;  %v17094_v31 = vand.u32 4294901760, %v8053_v19 }
  0x9c   : > { %17090 = vst [vmem:[#allocation94_spill] sm:$0xff] %v8463_v53  ;;  %17091 = vst [vmem:[#allocation95_spill] sm:$0xff] %v8466_v39  ;;  %v704_v11 = vsub.f32 %v8047_v17, %v17093_v2  ;;  %v599_v53 = vsub.f32 %v8064_v23, %v17095_v32  ;;  %562 = vmatprep.mubr.f32.mxu1 %v561_v4  ;;  %v17097_v0 = vmov %v17095_v32  ;;  %v717_v2 = vand.u32 4294901760, %v8069_v25 }
  0x9d   : > { %17092 = vst [vmem:[#allocation96_spill] sm:$0xff] %v8469_v41  ;;  %v592_v20 = vsub.f32 %v8053_v19, %v17094_v31  ;;  %v17096_v41 = vmov %v17094_v31  ;;  %v8490_v62 = vrot.slane %v8322_v61, %v424_v3  ;;  %v17098_v32 = vand.u32 4294901760, %v8047_v17 }
  0x9e   : > { %v705_v39 = vand.u32 4294901760, %v704_v11  ;;  %v7361_v63 = vpack.c.bf16 %v17097_v0, %v17096_v41  ;;  %v600_v54 = vand.u32 4294901760, %v599_v53  ;;  %v718_v11 = vsub.f32 %v8069_v25, %v717_v2 }
  0x9f   : > { %v593_v31 = vand.u32 4294901760, %v592_v20  ;;  %v7359_v4 = vpack.c.bf16 %v710_v46, %v17098_v32  ;;  %v725_v19 = vsub.f32 %v8082_v30, %v724_v21  ;;  %v605_v23 = vand.u32 4294901760, %v8099_v38 }
  0xa0   : > { %v712_v41 = vand.u32 4294901760, %v711_v42  ;;  %vm434_vm2 = vcmp.eq.s32.totalorder %v8307_v27, %v8490_v62  ;;  %v17099_v3 = vmov 0.0   ;;  %v719_v17 = vand.u32 4294901760, %v718_v11 }
  0xa1   : > { %v7265_v0 = vpack.c.bf16 %v600_v54, %v593_v31  ;;  %v6787_v20 = vsel %vm434_vm2, 1.0, %v17099_v3  ;;  %7360 = vmatprep.subr.bf16.mxu0 %v7359_v4  ;;  %v726_v46 = vand.u32 4294901760, %v725_v19  ;;  %v606_v25 = vsub.f32 %v8099_v38, %v605_v23 }
  0xa2   : > { %v7263_v30 = vpack.c.bf16 %v712_v41, %v705_v39  ;;  %v8505_v61 = vsub.f32 %v6787_v20, %v6787_v20  ;;  %v613_v42 = vsub.f32 %v8111_v44, %v612_v18  ;;  %v7363_v53 = vpack.c.bf16 %v724_v21, %v717_v2 }
  0xa3   : > { %v7267_v32 = vpack.c.bf16 %v726_v46, %v719_v17  ;;  %v607_v54 = vand.u32 4294901760, %v606_v25  ;;  %v7365_v31 = vpack.c.bf16 %v612_v18, %v605_v23  ;;  %v738_v11 = vand.u32 4294901760, %v8126_v50 }
  0xa4   : > { %7264 = vmatprep.subr.bf16.mxu1 %v7263_v30  ;;  %v17003_v5 = vand.u32 4294901760, %v8505_v61  ;;  %960 = vmatmul.mubr.f32.vlgmr.msra.gmra.mrb[0].mxu0 %v8505_v61  ;;  %v614_v4 = vand.u32 4294901760, %v613_v42  ;;  %v619_v38 = vand.u32 4294901760, %v8129_v51  ;;  %v732_v39 = vsub.f32 %v8114_v45, %v731_v13 }
  0xa5   : > { %7362 = vmatpush3.bf16.msra.mxu0 %v7361_v63  ;;  %v626_v21 = vand.u32 4294901760, %v8141_v56  ;;  %v745_v44 = vand.u32 4294901760, %v8151_v60  ;;  %v752_v2 = vand.u32 4294901760, %v8166_v6  ;;  %v739_v41 = vsub.f32 %v8126_v50, %v738_v11 }
  0xa6   : > { %v566_v19 = vsub.f32 %v8505_v61, %v17003_v5  ;;  %v7269_v23 = vpack.c.bf16 %v614_v4, %v607_v54  ;;  %7364 = vmatprep.subr.bf16.mxu0 %v7363_v53  ;;  %v620_v18 = vsub.f32 %v8129_v51, %v619_v38  ;;  %v733_v20 = vand.u32 4294901760, %v732_v39 }
  0xa7   : > { %v627_v63 = vsub.f32 %v8141_v56, %v626_v21  ;;  %v7367_v45 = vpack.c.bf16 %v738_v11, %v731_v13  ;;  %v7369_v17 = vpack.c.bf16 %v626_v21, %v619_v38  ;;  %v740_v25 = vand.u32 4294901760, %v739_v41 }
  0xa8   : > { %v567_v46 = vand.u32 4294901760, %v566_v19  ;;  %v621_v30 = vand.u32 4294901760, %v620_v18  ;;  %v746_v42 = vsub.f32 %v8151_v60, %v745_v44  ;;  %v753_v5 = vsub.f32 %v8166_v6, %v752_v2 }
  0xa9   : > { %7366 = vmatpush3.bf16.msra.mxu0 %v7365_v31  ;;  %v628_v55 = vand.u32 4294901760, %v627_v63  ;;  %v633_v53 = vand.u32 4294901760, %v8175_v14  ;;  %v640_v50 = vand.u32 4294901760, %v8178_v28  ;;  %v7271_v51 = vpack.c.bf16 %v740_v25, %v733_v20 }
  0xaa   : > { %568 = vmatmul.mubr.f32.vlgmr.msra.gmra.mrb[0].mxu1 %v567_v46  ;;  %7368 = vmatprep.subr.bf16.mxu0 %v7367_v45  ;;  %v747_v54 = vand.u32 4294901760, %v746_v42  ;;  %v7371_v56 = vpack.c.bf16 %v752_v2, %v745_v44  ;;  %v759_v13 = vand.u32 4294901760, %v8188_v36  ;;  %v754_v11 = vand.u32 4294901760, %v753_v5 }
  0xab   : > { %7266 = vmatpush3.bf16.msra.mxu1 %v7265_v0  ;;  %v7273_v4 = vpack.c.bf16 %v628_v55, %v621_v30  ;;  %v634_v60 = vsub.f32 %v8175_v14, %v633_v53  ;;  %v641_v31 = vsub.f32 %v8178_v28, %v640_v50  ;;  %v7373_v6 = vpack.c.bf16 %v640_v50, %v633_v53 }
  0xac   : > { %7268 = vmatprep.subr.bf16.mxu1 %v7267_v32  ;;  %v760_v38 = vsub.f32 %v8188_v36, %v759_v13  ;;  %v766_v39 = vand.u32 4294901760, %v8204_v57  ;;  %v647_v21 = vand.u32 4294901760, %v8213_v33  ;;  %v7275_v19 = vpack.c.bf16 %v754_v11, %v747_v54 }
  0xad   : > { %7370 = vmatpush3.bf16.msra.mxu0 %v7369_v17  ;;  %v635_v44 = vand.u32 4294901760, %v634_v60  ;;  %v642_v2 = vand.u32 4294901760, %v641_v31  ;;  %v654_v0 = vand.u32 4294901760, %v8216_v29  ;;  %v773_v18 = vand.u32 4294901760, %v8225_v58 }
  0xae   : > { %7372 = vmatprep.subr.bf16.mxu0 %v7371_v56  ;;  %v761_v55 = vand.u32 4294901760, %v760_v38  ;;  %v767_v5 = vsub.f32 %v8204_v57, %v766_v39  ;;  %v648_v14 = vsub.f32 %v8213_v33, %v647_v21  ;;  %v7375_v28 = vpack.c.bf16 %v766_v39, %v759_v13 }
  0xaf   : > { %7270 = vmatpush3.bf16.msra.mxu1 %v7269_v23  ;;  %v7277_v32 = vpack.c.bf16 %v642_v2, %v635_v44  ;;  %v655_v36 = vsub.f32 %v8216_v29, %v654_v0  ;;  %v7377_v41 = vpack.c.bf16 %v654_v0, %v647_v21  ;;  %v780_v45 = vand.u32 4294901760, %v8241_v12 }
  0xb0   : > { %7272 = vmatprep.subr.bf16.mxu1 %v7271_v51  ;;  %v768_v20 = vand.u32 4294901760, %v767_v5  ;;  %v649_v63 = vand.u32 4294901760, %v648_v14  ;;  %v661_v17 = vand.u32 4294901760, %v8251_v10  ;;  %v774_v57 = vsub.f32 %v8225_v58, %v773_v18 }
  0xb1   : > { %7374 = vmatpush3.bf16.msra.mxu0 %v7373_v6  ;;  %v656_v46 = vand.u32 4294901760, %v655_v36  ;;  %v668_v33 = vand.u32 4294901760, %v8254_v9  ;;  %v787_v23 = vand.u32 4294901760, %v8263_v34  ;;  %v781_v29 = vsub.f32 %v8241_v12, %v780_v45 }
  0xb2   : > { %v7279_v25 = vpack.c.bf16 %v768_v20, %v761_v55  ;;  %7376 = vmatprep.subr.bf16.mxu0 %v7375_v28  ;;  %v662_v30 = vsub.f32 %v8251_v10, %v661_v17  ;;  %v7379_v42 = vpack.c.bf16 %v780_v45, %v773_v18  ;;  %v775_v50 = vand.u32 4294901760, %v774_v57 }
  0xb3   : > { %7274 = vmatpush3.bf16.msra.mxu1 %v7273_v4  ;;  %v7281_v53 = vpack.c.bf16 %v656_v46, %v649_v63  ;;  %v669_v51 = vsub.f32 %v8254_v9, %v668_v33  ;;  %v7381_v54 = vpack.c.bf16 %v668_v33, %v661_v17  ;;  %v782_v56 = vand.u32 4294901760, %v781_v29  ;;  %v8583_v46 = vld [vmem:[%s7993_s30 + $0x100] sm:$0xff]  ;;  %v8594_v29 = vld [vmem:[%s7993_s30 + $0x118] sm:$0xff] }
  0xb4   : > { %7276 = vmatprep.subr.bf16.mxu1 %v7275_v19  ;;  %v663_v58 = vand.u32 4294901760, %v662_v30  ;;  %v788_v13 = vsub.f32 %v8263_v34, %v787_v23  ;;  %v794_v11 = vand.u32 4294901760, %v8278_v52  ;;  %v675_v12 = vand.u32 4294901760, %v8285_v48 }
  0xb5   : > { %7378 = vmatpush3.bf16.msra.mxu0 %v7377_v41  ;;  %v670_v60 = vand.u32 4294901760, %v669_v51  ;;  %v682_v10 = vand.u32 4294901760, %v8288_v47  ;;  %v7283_v4 = vpack.c.bf16 %v782_v56, %v775_v50  ;;  %v6791_v21 = vsel %vm438_vm3, 1.0, %v17099_v3 }
  0xb6   : > { %7380 = vmatprep.subr.bf16.mxu0 %v7379_v42  ;;  %v789_v9 = vand.u32 4294901760, %v788_v13  ;;  %v795_v31 = vsub.f32 %v8278_v52, %v794_v11  ;;  %v7383_v6 = vpack.c.bf16 %v794_v11, %v787_v23  ;;  %v676_v34 = vsub.f32 %v8285_v48, %v675_v12 }
  0xb7   : > { %7278 = vmatpush3.bf16.msra.mxu1 %v7277_v32  ;;  %v7285_v38 = vpack.c.bf16 %v670_v60, %v663_v58  ;;  %v683_v39 = vsub.f32 %v8288_v47, %v682_v10  ;;  %v8559_v44 = vsub.f32 %v6791_v21, %v6791_v21  ;;  %v7385_v2 = vpack.c.bf16 %v682_v10, %v675_v12  ;;  %v8609_v58 = vld [vmem:[%s7993_s30 + $0x128] sm:$0xff] }
  0xb8   : > { %7280 = vmatprep.subr.bf16.mxu1 %v7279_v25  ;;  %v796_v19 = vand.u32 4294901760, %v795_v31  ;;  %vm437_vm4 = vcmp.eq.s32.totalorder %v8329_v8, %v8490_v62  ;;  %v677_v52 = vand.u32 4294901760, %v676_v34  ;;  %v801_v48 = vand.u32 4294901760, %v8295_v59  ;;  %v8591_v25 = vld [vmem:[%s7993_s30 + $0x110] sm:$0xff] }
  0xb9   : > { %7382 = vmatpush3.bf16.msra.mxu0 %v7381_v54  ;;  %v684_v0 = vand.u32 4294901760, %v683_v39  ;;  %v6790_v47 = vsel %vm437_vm4, 1.0, %v17099_v3  ;;  %v574_v5 = vand.u32 4294901760, %v8559_v44  ;;  %v808_v28 = vand.u32 4294901760, %v8304_v40  ;;  %966 = vmatprep.mubr.f32.mxu0 %v8559_v44 }
  0xba   : > { %v7287_v55 = vpack.c.bf16 %v796_v19, %v789_v9  ;;  %7384 = vmatprep.subr.bf16.mxu0 %v7383_v6  ;;  %v8569_v14 = vsub.f32 %v6790_v47, %v6790_v47  ;;  %v802_v36 = vsub.f32 %v8295_v59, %v801_v48  ;;  %v689_v41 = vand.u32 4294901760, %v8312_v26  ;;  %v8586_v59 = vld [vmem:[%s7993_s30 + $0x108] sm:$0xff] }
  0xbb   : > { %7282 = vmatpush3.bf16.msra.mxu1 %v7281_v53  ;;  %v7289_v32 = vpack.c.bf16 %v684_v0, %v677_v52  ;;  %v696_v18 = vand.u32 4294901760, %v8315_v15  ;;  %v575_v20 = vsub.f32 %v8559_v44, %v574_v5  ;;  %v809_v45 = vsub.f32 %v8304_v40, %v808_v28 }
  0xbc   : > { %7284 = vmatprep.subr.bf16.mxu1 %v7283_v4  ;;  %v580_v63 = vand.u32 4294901760, %v8569_v14  ;;  %969 = vmatmul.mubr.f32.gmra.mrb[2].mxu0 %v8569_v14  ;;  %v7387_v17 = vpack.c.bf16 %v808_v28, %v801_v48  ;;  %v803_v57 = vand.u32 4294901760, %v802_v36  ;;  %v690_v33 = vsub.f32 %v8312_v26, %v689_v41 }
  0xbd   : > { %7386 = vmatpush3.bf16.msra.mxu0 %v7385_v2  ;;  %v697_v23 = vsub.f32 %v8315_v15, %v696_v18  ;;  %v576_v40 = vand.u32 4294901760, %v575_v20  ;;  %v810_v42 = vand.u32 4294901760, %v809_v45  ;;  %v7389_v53 = vpack.c.bf16 %v696_v18, %v689_v41  ;;  %v8604_v15 = vld [vmem:[%s7993_s30 + $0x120] sm:$0xff]  ;;  %s412_s30 = sld [smem:[#allocation3]] }
  0xbe   : > { %v581_v30 = vsub.f32 %v8569_v14, %v580_v63  ;;  %7388 = vmatprep.subr.bf16.mxu0 %v7387_v17  ;;  %v7803_v50 = vmov 1.0   ;;  %v691_v26 = vand.u32 4294901760, %v690_v33  ;;  %v1380_v54 = vand.u32 4294901760, %v8583_v46 }
  0xbf   : > { %6797 = vmatprep.mubr.msk.f32.mxu0 %vm435_vm0, %v7803_v50  ;;  %7286 = vmatpush3.bf16.msra.mxu1 %v7285_v38  ;;  %v698_v51 = vand.u32 4294901760, %v697_v23  ;;  %v1383_v56 = vand.u32 4294901760, %v8586_v59  ;;  %v7291_v11 = vpack.c.bf16 %v810_v42, %v803_v57  ;;  %v1386_v60 = vand.u32 4294901760, %v8591_v25 }
  0xc0   : > { %7288 = vmatprep.subr.bf16.mxu1 %v7287_v55  ;;  %577 = vmatprep.mubr.f32.mxu1 %v576_v40  ;;  %v582_v13 = vand.u32 4294901760, %v581_v30  ;;  %v1389_v12 = vand.u32 4294901760, %v8594_v29  ;;  %v1392_v9 = vand.u32 4294901760, %v8604_v15  ;;  %v1395_v31 = vand.u32 4294901760, %v8609_v58 }
  0xc1   : > { %v7293_v10 = vpack.c.bf16 %v698_v51, %v691_v26  ;;  %7390 = vmatpush3.bf16.msra.mxu0 %v7389_v53  ;;  %v8613_v4 = vpack.c.bf16 %v1383_v56, %v1380_v54  ;;  %v8620_v6 = vsub.f32 %v8583_v46, %v1380_v54  ;;  %v8629_v34 = vsel %vm436_vm5, 1.0, %v17099_v3 }
  0xc2   : > { %583 = vmatmul.mubr.f32.gmra.mrb[2].mxu1 %v582_v13  ;;  %v8626_v38 = vpack.c.bf16 %v1389_v12, %v1386_v60  ;;  %v8632_v39 = vsub.f32 %v8586_v59, %v1383_v56  ;;  %v456_v21 = vsel %vm454_vm6, %v8629_v34, 0  ;;  %v8643_v2 = vsub.f32 %v459_v7, %v459_v7  ;;  %v17101_v7 = vld [vmem:[#allocation35_spill] sm:$0xff] }
  0xc3   : > { %7290 = vmatpush3.bf16.msra.mxu1 %v7289_v32  ;;  %6793 = vmatprep.mubr.msk.f32.mxu1 %vm435_vm0, %v7803_v50  ;;  %v1473_v19 = vand.u32 4294901760, %v8620_v6  ;;  %v8646_v3 = vsub.f32 %v8591_v25, %v1386_v60  ;;  %v8653_v52 = vsub.f32 %v456_v21, %v456_v21  ;;  %v8657_v47 = vsub.f32 %v8594_v29, %v1389_v12  ;;  %s8822_s23 = smul.u32 304, %s412_s30 }
  0xc4   : > { %7292 = vmatprep.subr.bf16.mxu1 %v7291_v11  ;;  %6798 = vmatmul.mubr.msk.f32.vlgmr.msra.gmra.mrb[4].mxu0 %vm434_vm2, %v7803_v50  ;;  %v1480_v0 = vand.u32 4294901760, %v8632_v39  ;;  %v8660_v48 = vsub.f32 %v8604_v15, %v1392_v9  ;;  %v1462_v28 = vand.u32 4294901760, %v8643_v2  ;;  %v8669_v36 = vsub.f32 %v8609_v58, %v1395_v31 }
  0xc5   : > { %7424 = vmatprep.subr.bf16.mxu0 %v8613_v4  ;;  %6799 = vmatprep.mubr.msk.f32.mxu0 %vm438_vm3, %v7803_v50  ;;  %v1474_v55 = vsub.f32 %v8620_v6, %v1473_v19  ;;  %v1487_v32 = vand.u32 4294901760, %v8646_v3  ;;  %v1452_v41 = vand.u32 4294901760, %v8653_v52  ;;  %v1494_v20 = vand.u32 4294901760, %v8657_v47  ;;  %s8829_s21 = sadd.s32 304, %s8822_s23  ;;  %p1976_p5 = scmp.gt.s32.totalorder %s8824_s12, %s8822_s23 }
  0xc6   : > { %7426 = vmatpush3.bf16.msra.mxu0 %v8613_v4  ;;  %v1481_v18 = vsub.f32 %v8632_v39, %v1480_v0  ;;  %v1501_v45 = vand.u32 4294901760, %v8660_v48  ;;  %v8683_v17 = vpack.c.bf16 %v1395_v31, %v1392_v9  ;;  %v1508_v23 = vand.u32 4294901760, %v8669_v36  ;;  %p1978_p8 = scmp.lt.s32.totalorder %s8826_s24, %s8829_s21 }
  0xc7   : > { %7294 = vmatpush3.bf16.msra.mxu1 %v7293_v10  ;;  %7428 = vmatprep.subr.bf16.mxu0 %v8626_v38  ;;  %v1475_v57 = vand.u32 4294901760, %v1474_v55  ;;  %v1488_v33 = vsub.f32 %v8646_v3, %v1487_v32  ;;  %v1453_v40 = vsub.f32 %v8653_v52, %v1452_v41  ;;  %v1463_v42 = vsub.f32 %v8643_v2, %v1462_v28  ;;  %v17102_v55 = vld [vmem:[#allocation39_spill] sm:$0xff]  ;;  %s8837_s18 = scalar_select %p1976_p5, %s8824_s12, %s8822_s23 }
  0xc8   : > { %7328 = vmatprep.subr.bf16.mxu1 %v8044_v16  ;;  %6800 = vmatmul.mubr.msk.f32.gmra.mrb[6].mxu0 %vm437_vm4, %v7803_v50  ;;  %v1482_v30 = vand.u32 4294901760, %v1481_v18  ;;  %v1495_v53 = vsub.f32 %v8657_v47, %v1494_v20  ;;  %v1502_v51 = vsub.f32 %v8660_v48, %v1501_v45  ;;  %v1509_v11 = vsub.f32 %v8669_v36, %v1508_v23  ;;  %v17103_v18 = vld [vmem:[#allocation41_spill] sm:$0xff]  ;;  %s8841_s22 = scalar_select %p1978_p8, %s8826_s24, %s8829_s21 }
  0xc9   : > { %v1489_v26 = vand.u32 4294901760, %v1488_v33  ;;  %v1454_v54 = vand.u32 4294901760, %v1453_v40  ;;  %v1464_v60 = vand.u32 4294901760, %v1463_v42  ;;  %v17100_v31 = vand.u32 4294901760, %v8394_v37  ;;  %v17104_v37 = vld [vmem:[#allocation45_spill] sm:$0xff]  ;;  %v17105_v33 = vld [vmem:[#allocation47_spill] sm:$0xff] }
  0xca   : > { %6794 = vmatmul.mubr.msk.f32.vlgmr.msra.gmra.mrb[4].mxu1 %vm434_vm2, %v7803_v50  ;;  %7430 = vmatpush3.bf16.msra.mxu0 %v8626_v38  ;;  %v7435_v56 = vpack.c.bf16 %v1482_v30, %v1475_v57  ;;  %v1496_v13 = vand.u32 4294901760, %v1495_v53  ;;  %v1503_v10 = vand.u32 4294901760, %v1502_v51  ;;  %v1510_v9 = vand.u32 4294901760, %v1509_v11  ;;  %v17106_v30 = vld [vmem:[#allocation51_spill] sm:$0xff]  ;;  %v17107_v42 = vld [vmem:[#allocation53_spill] sm:$0xff]  ;;  %v17109_v51 = vld [vmem:[#allocation58_spill] sm:$0xff]  ;;  %p6812_p10 = scmp.ge.s32.totalorder %s8837_s18, %s8841_s22 }
  0xcb   : > { %7330 = vmatpush3.bf16.msra.mxu1 %v8061_v22  ;;  %6795 = vmatprep.mubr.msk.f32.mxu1 %vm438_vm3, %v7803_v50  ;;  %v7447_v57 = vpack.c.bf16 %v8632_v39, %v8620_v6  ;;  %v7451_v40 = vpack.c.bf16 %v8657_v47, %v8646_v3  ;;  %v7455_v53 = vpack.c.bf16 %v8669_v36, %v8660_v48  ;;  %s1984_s25 = ssub.s32 (!%p6812_p10), %s8824_s12, %s8822_s23  ;;  %s2024_s19 = ssub.s32 (!%p6812_p10), %s8826_s24, %s8822_s23 }
  0xcc   : > { %7332 = vmatprep.subr.bf16.mxu1 %v8066_v24  ;;  %7432 = vmatprep.subr.bf16.mxu0 %v8683_v17  ;;  %v7439_v12 = vpack.c.bf16 %v1496_v13, %v1489_v26  ;;  %v7443_v21 = vpack.c.bf16 %v1510_v9, %v1503_v10  ;;  %v17108_v26 = vld [vmem:[#allocation57_spill] sm:$0xff]  ;;  %v17112_v13 = vand.u32 4294901760, %v8505_v61 }
  0xcd   : > { %7153 = vmatprep.mubr.f32.mxu0 %v1454_v54  ;;  %v17110_v54 = vld [vmem:[#allocation59_spill] sm:$0xff] }
  0xce   : > { %6796 = vmatmul.mubr.msk.f32.gmra.mrb[6].mxu1 %vm437_vm4, %v7803_v50  ;;  %7434 = vmatpush3.bf16.msra.mxu0 %v8683_v17 }
  0xcf   : > { %7334 = vmatpush3.bf16.msra.mxu1 %v8108_v43  ;;  %7436 = vmatprep.subr.bf16.mxu0 %v7435_v56 }
  0xd0   : > { %7336 = vmatprep.subr.bf16.mxu1 %v8123_v49  ;;  %1073 = vmatprep.mubr.f32.mxu1 %v17100_v31 }
  0xd1   : > { %7154 = vmatmul.mubr.f32.vlgmr.msra.gmra.mrb[8].mxu0 %v1464_v60 }
  0xd2   : > { %7438 = vmatpush3.bf16.msra.mxu0 %v7435_v56  ;;  %7168 = vmatprep.mubr.msk.f32.mxu0 %vm454_vm6, %v8629_v34  ;;  %v17111_v56 = vld [vmem:[#allocation60_spill] sm:$0xff] }
  0xd3   : > { %7338 = vmatpush3.bf16.msra.mxu1 %v17101_v7  ;;  %7440 = vmatprep.subr.bf16.mxu0 %v7439_v12 }
  0xd4   : > { %7340 = vmatprep.subr.bf16.mxu1 %v17102_v55 }
  0xd6   : > { %7442 = vmatpush3.bf16.msra.mxu0 %v7439_v12 }
  0xd7   : > { %7342 = vmatpush3.bf16.msra.mxu1 %v17103_v18  ;;  %7444 = vmatprep.subr.bf16.mxu0 %v7443_v21 }
  0xd8   : > { %7344 = vmatprep.subr.bf16.mxu1 %v17104_v37 }
  0xda   : > { %7446 = vmatpush3.bf16.msra.mxu0 %v7443_v21 }
  0xdb   : > { %7346 = vmatpush3.bf16.msra.mxu1 %v17105_v33  ;;  %7448 = vmatprep.subr.bf16.mxu0 %v7447_v57 }
  0xdc   : > { %7348 = vmatprep.subr.bf16.mxu1 %v17106_v30 }
  0xdd   : > { %7169 = vmatmul.mubr.msk.f32.vlgmr.msra.gmra.mrb[8].mxu0 %vm454_vm6, %v8386_v35 }
  0xde   : > { %7450 = vmatpush3.bf16.msra.mxu0 %v7447_v57  ;;  %7183 = vmatprep.mubr.f32.mxu0 %v8653_v52 }
  0xdf   : > { %7350 = vmatpush3.bf16.msra.mxu1 %v17107_v42  ;;  %7452 = vmatprep.subr.bf16.mxu0 %v7451_v40 }
  0xe0   : > { %7352 = vmatprep.subr.bf16.mxu1 %v17108_v26 }
  0xe2   : > { %7454 = vmatpush3.bf16.msra.mxu0 %v7451_v40 }
  0xe3   : > { %7354 = vmatpush3.bf16.msra.mxu1 %v17109_v51  ;;  %7456 = vmatprep.subr.bf16.mxu0 %v7455_v53 }
  0xe4   : > { %7356 = vmatprep.subr.bf16.mxu1 %v17110_v54 }
  0xe6   : > { %7458 = vmatpush3.bf16.msra.mxu0 %v7455_v53 }
  0xe7   : > { %7358 = vmatpush3.bf16.msra.mxu1 %v17111_v56  ;;  %7460 = vmatprep.subr.bf16.mxu0 %v8613_v4 }
  0xe8   : > { %7392 = vmatprep.subr.bf16.mxu1 %v8044_v16  ;;  %v7471_v16 = vpack.c.bf16 %v1480_v0, %v1473_v19 }
  0xe9   : > { %7184 = vmatmul.mubr.f32.vlgmr.msra.gmra.mrb[8].mxu0 %v8643_v2 }
  0xea   : > { %1077 = vmatmul.mubr.f32.vlgmr.msra.gmra.mrb[8].mxu1 %v17112_v13  ;;  %7462 = vmatpush3.bf16.msra.mxu0 %v8613_v4 }
  0xeb   : > { %7394 = vmatpush3.bf16.msra.mxu1 %v8061_v22  ;;  %1084 = vmatprep.mubr.f32.mxu1 %v574_v5  ;;  %v7475_v22 = vpack.c.bf16 %v1494_v20, %v1487_v32 }
  0xec   : > { %7396 = vmatprep.subr.bf16.mxu1 %v8066_v24  ;;  %7464 = vmatprep.subr.bf16.mxu0 %v8626_v38  ;;  %v7479_v24 = vpack.c.bf16 %v1508_v23, %v1501_v45 }
  0xed   : > { %7198 = vmatprep.mubr.f32.mxu0 %v1452_v41 }
  0xee   : > { %1088 = vmatmul.mubr.f32.gmra.mrb[10].mxu1 %v580_v63  ;;  %7466 = vmatpush3.bf16.msra.mxu0 %v8626_v38 }
  0xef   : > { %7398 = vmatpush3.bf16.msra.mxu1 %v8108_v43  ;;  %7468 = vmatprep.subr.bf16.mxu0 %v8683_v17 }
  0xf0   : > { %7400 = vmatprep.subr.bf16.mxu1 %v8123_v49  ;;  %6801 = vmatprep.mubr.msk.f32.mxu1 %vm435_vm0, %v7803_v50 }
  0xf2   : > { %7470 = vmatpush3.bf16.msra.mxu0 %v8683_v17 }
  0xf3   : > { %7402 = vmatpush3.bf16.msra.mxu1 %v17101_v7  ;;  %7472 = vmatprep.subr.bf16.mxu0 %v7471_v16 }
  0xf4   : > { %7404 = vmatprep.subr.bf16.mxu1 %v17102_v55 }
  0xf5   : > { %7199 = vmatmul.mubr.f32.vlgmr.msra.gmra.mrb[8].mxu0 %v1462_v28 }
  0xf6   : > { %7474 = vmatpush3.bf16.msra.mxu0 %v7471_v16  ;;  %7213 = vmatprep.mubr.msk.f32.mxu0 %vm454_vm6, %v8629_v34 }
  0xf7   : > { %7406 = vmatpush3.bf16.msra.mxu1 %v17103_v18  ;;  %7476 = vmatprep.subr.bf16.mxu0 %v7475_v22 }
  0xf8   : > { %7408 = vmatprep.subr.bf16.mxu1 %v17104_v37 }
  0xfa   : > { %7478 = vmatpush3.bf16.msra.mxu0 %v7475_v22  ;;  %v8853_v22 = vstv (!%p6812_p10), %s1984_s25 }
  0xfb   : > { %7410 = vmatpush3.bf16.msra.mxu1 %v17105_v33  ;;  %7480 = vmatprep.subr.bf16.mxu0 %v7479_v24  ;;  %vm1986_vm7 = vcmp.ge.s32.totalorder (!%p6812_p10), %v8307_v27, %v8853_v22  ;;  %vm1987_vm8 = vcmp.ge.s32.totalorder (!%p6812_p10), %v8329_v8, %v8853_v22 }
  0xfc   : > { %7412 = vmatprep.subr.bf16.mxu1 %v17106_v30 }
  0xfe   : > { %7482 = vmatpush3.bf16.msra.mxu0 %v7479_v24  ;;  %v8855_v24 = vstv (!%p6812_p10), %s2024_s19 }
  0xff   : > { %7414 = vmatpush3.bf16.msra.mxu1 %v17107_v42  ;;  %7484 = vmatprep.subr.bf16.mxu0 %v8613_v4  ;;  %v452_v42 = vld [vmem:[%s8007_s16] sm:$0xff]  ;;  %vm2026_vm10 = vcmp.lt.s32.totalorder (!%p6812_p10), %v8307_v27, %v8855_v24  ;;  %vm2027_vm11 = vcmp.lt.s32.totalorder (!%p6812_p10), %v8329_v8, %v8855_v24 }
 0x100   : > { %7416 = vmatprep.subr.bf16.mxu1 %v17108_v26  ;;  %vm8873_vm15 = vmand (!%p6812_p10), %vm1986_vm7, %vm2026_vm10 }
 0x101   : > { %7214 = vmatmul.mubr.msk.f32.vlgmr.msra.gmra.mrb[8].mxu0 %vm454_vm6, %v8386_v35 }
 0x102   : > { %7486 = vmatpush3.bf16.msra.mxu0 %v8613_v4  ;;  %7228 = vmatprep.mubr.msk.f32.mxu0 %vm454_vm6, %v8629_v34 }
 0x103   : > { %7418 = vmatpush3.bf16.msra.mxu1 %v17109_v51  ;;  %7488 = vmatprep.subr.bf16.mxu0 %v8626_v38 }
 0x104   : > { %7420 = vmatprep.subr.bf16.mxu1 %v17110_v54 }
 0x106   : > { %7490 = vmatpush3.bf16.msra.mxu0 %v8626_v38 }
 0x107   : > { %7422 = vmatpush3.bf16.msra.mxu1 %v17111_v56  ;;  %7492 = vmatprep.subr.bf16.mxu0 %v8683_v17  ;;  %v453_v56 = vld [vmem:[%s8007_s16 + $0x8] sm:$0xff] }
 0x10a   : > { %6802 = vmatmul.mubr.msk.f32.vlgmr.msra.gmra.mrb[12].mxu1 %vm434_vm2, %v7803_v50  ;;  %7494 = vmatpush3.bf16.msra.mxu0 %v8683_v17  ;;  %vm8881_vm2 = vmand (!%p6812_p10), %vm1987_vm8, %vm2027_vm11 }
 0x10b   : > { %6803 = vmatprep.mubr.msk.f32.mxu1 %vm438_vm3, %v7803_v50 }
 0x10d   : > { %7229 = vmatmul.mubr.msk.f32.vlgmr.msra.gmra.mrb[8].mxu0 %vm454_vm6, %v8386_v35 }
 0x10e   : > { %6804 = vmatmul.mubr.msk.f32.gmra.mrb[14].mxu1 %vm437_vm4, %v7803_v50 }
 0x177   : > { %v6973_v43 = vpop.f32.mrb[0].mxu0 }
 0x178   : > { %v6974_v49 = vpop.f32.mrb[1].mxu0 }
 0x179   : > { %v6975_v62 = vadd.f32 %v6974_v49, %v6973_v43  ;;  %v17113_v43 = vld [vmem:[#allocation61_spill] sm:$0xff] (!%p6812_p10)  ;;  %v17114_v49 = vld [vmem:[#allocation62_spill] sm:$0xff] (!%p6812_p10) }
 0x17a   : > { %vm1988_vm9 = vcmp.ge.s32.totalorder (!%p6812_p10), %v17113_v43, %v8853_v22  ;;  %vm1989_vm12 = vcmp.ge.s32.totalorder (!%p6812_p10), %v17114_v49, %v8853_v22  ;;  %vm2028_vm13 = vcmp.lt.s32.totalorder (!%p6812_p10), %v17113_v43, %v8855_v24  ;;  %vm2029_vm14 = vcmp.lt.s32.totalorder (!%p6812_p10), %v17114_v49, %v8855_v24 }
 0x17b   : > { %vm8889_vm5 = vmand (!%p6812_p10), %vm1988_vm9, %vm2028_vm13 }
 0x17c   : > { %vm8899_vm10 = vmand (!%p6812_p10), %vm1989_vm12, %vm2029_vm14 }
 0x17d   : > { %v6897_v1 = vpop.f32.mrb[0].mxu1 }
 0x17e   : > { %v6898_v35 = vpop.f32.mrb[1].mxu1 }
 0x17f   : > { %v6899_v61 = vadd.f32 %v6898_v35, %v6897_v1  ;;  %v17117_v1 = vld [vmem:[#allocation63_spill] sm:$0xff] (!%p6812_p10)  ;;  %v17212_v35 = vld [vmem:[#allocation36_spill] sm:$0xff] (!%p6812_p10) }
 0x180   : > { %vm1990_vm0 = vcmp.ge.s32.totalorder (!%p6812_p10), %v17117_v1, %v8853_v22  ;;  %vm2030_vm1 = vcmp.lt.s32.totalorder (!%p6812_p10), %v17117_v1, %v8855_v24 }
 0x181   : > { %vm8911_vm7 = vmand (!%p6812_p10), %vm1990_vm0, %vm2030_vm1 }
 0x18f   : > { %v6976_v44 = vpop.f32.mrb[2].mxu0 }
 0x190   : > { %v6977_v5 = vpop.f32.mrb[3].mxu0 }
 0x191   : > { %v6978_v14 = vadd.f32 %v6977_v5, %v6976_v44  ;;  %v17123_v5 = vld [vmem:[#allocation65_spill] sm:$0xff] (!%p6812_p10) }
 0x192   : > { %vm2032_vm8 = vcmp.lt.s32.totalorder (!%p6812_p10), %v17123_v5, %v8855_v24 }
 0x195   : > { %v6900_v63 = vpop.f32.mrb[2].mxu1 }
 0x196   : > { %v6901_v50 = vpop.f32.mrb[3].mxu1 }
 0x197   : > { %v6902_v4 = vadd.f32 %v6901_v50, %v6900_v63  ;;  %v7049_v6 = vpop.f32.mrb[4].mxu0  ;;  %v17127_v50 = vld [vmem:[#allocation67_spill] sm:$0xff] (!%p6812_p10) }
 0x198   : > { %v7050_v38 = vpop.f32.mrb[5].mxu0 }
 0x199   : > { %v7051_v34 = vadd.f32 %v7050_v38, %v7049_v6  ;;  %v17129_v6 = vld [vmem:[#allocation69_spill] sm:$0xff] (!%p6812_p10)  ;;  %v17186_v38 = vld [vmem:[#allocation78_spill] sm:$0xff] (!%p6812_p10) }
 0x19a   : > { %vm2036_vm11 = vcmp.lt.s32.totalorder (!%p6812_p10), %v17129_v6, %v8855_v24 }
 0x19b   : > { %v7052_v39 = vpop.f32.mrb[6].mxu0 }
 0x19c   : > { %v7053_v19 = vpop.f32.mrb[7].mxu0 }
 0x19d   : > { %v6935_v2 = vpop.f32.mrb[4].mxu1  ;;  %v7054_v3 = vadd.f32 %v7053_v19, %v7052_v39  ;;  %v17133_v39 = vld [vmem:[#allocation71_spill] sm:$0xff] (!%p6812_p10)  ;;  %v17134_v19 = vld [vmem:[#allocation72_spill] sm:$0xff] (!%p6812_p10) }
 0x19e   : > { %v6936_v52 = vpop.f32.mrb[5].mxu1 }
 0x19f   : > { %v6937_v0 = vadd.f32 %v6936_v52, %v6935_v2  ;;  %v17138_v52 = vld [vmem:[#allocation74_spill] sm:$0xff] (!%p6812_p10)  ;;  %v17190_v2 = vld [vmem:[#allocation56_spill] sm:$0xff] (!%p6812_p10) }
 0x1a0   : > { %vm2041_vm13 = vcmp.lt.s32.totalorder (!%p6812_p10), %v17138_v52, %v8855_v24 }
 0x1a1   : > { %v817_v47 = vadd.f32 %v6937_v0, %v6899_v61  ;;  %v6938_v48 = vpop.f32.mrb[6].mxu1  ;;  %v17120_v61 = vld [vmem:[#allocation64_spill] sm:$0xff] (!%p6812_p10)  ;;  %v17139_v0 = vld [vmem:[#allocation75_spill] sm:$0xff] (!%p6812_p10) }
 0x1a2   : > { %v6939_v28 = vpop.f32.mrb[7].mxu1  ;;  %vm1991_vm3 = vcmp.ge.s32.totalorder (!%p6812_p10), %v17120_v61, %v8853_v22  ;;  %vm2031_vm4 = vcmp.lt.s32.totalorder (!%p6812_p10), %v17120_v61, %v8855_v24  ;;  %v17183_v61 = vld [vmem:[#allocation49_spill] sm:$0xff] (!%p6812_p10) }
 0x1a3   : > { %v6940_v32 = vadd.f32 %v6939_v28, %v6938_v48  ;;  %v962_v36 = vadd.f32 %v6975_v62, %v817_v47  ;;  %vm8929_vm0 = vmand (!%p6812_p10), %vm1991_vm3, %vm2031_vm4  ;;  %vm17140_vm3 = vcmp.ge.s32.totalorder (!%p6812_p10), %v17123_v5, %v8853_v22  ;;  %v17141_v47 = vmov (!%p6812_p10), 0  ;;  %v17143_v48 = vld [vmem:[#allocation76_spill] sm:$0xff] (!%p6812_p10)  ;;  %v17144_v28 = vld [vmem:[#allocation77_spill] sm:$0xff] (!%p6812_p10) }
 0x1a4   : > { %vm8947_vm4 = vmand (!%p6812_p10), %vm17140_vm3, %vm2032_vm8 }
 0x1a5   : > { %v824_v41 = vadd.f32 %v6940_v32, %v6902_v4  ;;  %v17128_v4 = vld [vmem:[#allocation68_spill] sm:$0xff] (!%p6812_p10)  ;;  %v17142_v47 = vsel (!%p6812_p10), %vm8947_vm4, 4294967295, %v17141_v47  ;;  %vm17148_vm4 = vcmp.lt.s32.totalorder (!%p6812_p10), %v17127_v50, %v8855_v24 }
 0x1a6   : > { %vm2035_vm12 = vcmp.lt.s32.totalorder (!%p6812_p10), %v17128_v4, %v8855_v24  ;;  %vm17152_vm1 = vcmp.ge.s32.totalorder (!%p6812_p10), %v17128_v4, %v8853_v22 }
 0x1a7   : > { %v971_v20 = vadd.f32 %v6978_v14, %v824_v41  ;;  %v17124_v14 = vld [vmem:[#allocation66_spill] sm:$0xff] (!%p6812_p10)  ;;  %vm8990_vm14 = vmand (!%p6812_p10), %vm17152_vm1, %vm2035_vm12  ;;  %vm17159_vm12 = vcmp.ge.s32.totalorder (!%p6812_p10), %v17129_v6, %v8853_v22 }
 0x1a8   : > { %vm2033_vm6 = vcmp.lt.s32.totalorder (!%p6812_p10), %v17124_v14, %v8855_v24  ;;  %vm17145_vm8 = vcmp.ge.s32.totalorder (!%p6812_p10), %v17124_v14, %v8853_v22  ;;  %vm9009_vm1 = vmand (!%p6812_p10), %vm17159_vm12, %vm2036_vm11  ;;  %vm17175_vm11 = vcmp.ge.s32.totalorder (!%p6812_p10), %v17133_v39, %v8853_v22  ;;  %v17185_v14 = vld [vmem:[#allocation50_spill] sm:$0xff] (!%p6812_p10) }
 0x1a9   : > { %vm8965_vm3 = vmand (!%p6812_p10), %vm17145_vm8, %vm2033_vm6  ;;  %vm17149_vm6 = vcmp.ge.s32.totalorder (!%p6812_p10), %v17127_v50, %v8853_v22 }
 0x1aa   : > { %vm8983_vm8 = vmand (!%p6812_p10), %vm17149_vm6, %vm17148_vm4  ;;  %vm2043_vm4 = vcmp.lt.s32.totalorder (!%p6812_p10), %v17143_v48, %v8855_v24  ;;  %vm17180_vm6 = vcmp.ge.s32.totalorder (!%p6812_p10), %v17134_v19, %v8853_v22 }
 0x1bd   : > { %v7011_v45 = vpop.f32.mrb[8].mxu1 }
 0x1be   : > { %v7012_v17 = vpop.f32.mrb[9].mxu1 }
 0x1bf   : > { %v7013_v23 = vadd.f32 %v7012_v17, %v7011_v45  ;;  %v17156_v17 = vld [vmem:[#allocation21_spill] sm:$0xff] (!%p6812_p10) }
 0x1c1   : > { %v1079_v11 = vadd.f32 %v7013_v23, %v962_v36  ;;  %v7014_v60 = vpop.f32.mrb[10].mxu1  ;;  %v2179_v23 = vsel (!%p6812_p10), %vm8881_vm2, %v17156_v17, -inf  ;;  %v17193_v36 = vld [vmem:[#allocation18_spill] sm:$0xff] (!%p6812_p10) }
 0x1c2   : > { %v7015_v12 = vpop.f32.mrb[11].mxu1 }
 0x1c3   : > { %v7016_v10 = vadd.f32 %v7015_v12, %v7014_v60  ;;  %v1258_v9 = vadd.f32 %v7051_v34, %v1079_v11  ;;  %v17132_v34 = vld [vmem:[#allocation70_spill] sm:$0xff] (!%p6812_p10)  ;;  %v17157_v11 = vld [vmem:[#allocation24_spill] sm:$0xff] (!%p6812_p10)  ;;  %v17158_v12 = vld [vmem:[#allocation25_spill] sm:$0xff] (!%p6812_p10) }
 0x1c4   : > { %v2180_v60 = vsel (!%p6812_p10), %vm8889_vm5, %v17157_v11, -inf  ;;  %vm17167_vm2 = vcmp.lt.s32.totalorder (!%p6812_p10), %v17132_v34, %v8855_v24  ;;  %vm17168_vm5 = vcmp.ge.s32.totalorder (!%p6812_p10), %v17132_v34, %v8853_v22  ;;  %v17188_v34 = vld [vmem:[#allocation55_spill] sm:$0xff] (!%p6812_p10)  ;;  %v17198_v11 = vld [vmem:[#allocation22_spill] sm:$0xff] (!%p6812_p10) }
 0x1c5   : > { %v1090_v31 = vadd.f32 %v7016_v10, %v971_v20  ;;  %v17155_v20 = vld [vmem:[#allocation20_spill] sm:$0xff] (!%p6812_p10)  ;;  %v2181_v10 = vsel (!%p6812_p10), %vm8899_vm10, %v17158_v12, -inf  ;;  %vm9031_vm10 = vmand (!%p6812_p10), %vm17168_vm5, %vm17167_vm2  ;;  %vm2044_vm2 = vcmp.lt.s32.totalorder (!%p6812_p10), %v17144_v28, %v8855_v24  ;;  %vm17187_vm5 = vcmp.ge.s32.totalorder (!%p6812_p10), %v17138_v52, %v8853_v22  ;;  %v17191_v52 = vld [vmem:[#allocation79_spill] sm:$0xff] (!%p6812_p10) }
 0x1c6   : > { %v2178_v45 = vsel (!%p6812_p10), %vm8873_vm15, %v17155_v20, -inf  ;;  %vm17165_vm15 = vnez (!%p6812_p10), %v17142_v47  ;;  %v17194_v20 = vld [vmem:[#allocation80_spill] sm:$0xff] (!%p6812_p10)  ;;  %v17199_v12 = vld [vmem:[#allocation82_spill] sm:$0xff] (!%p6812_p10) }
 0x1c7   : > { %v1265_v7 = vadd.f32 %v7054_v3, %v1090_v31  ;;  %v17137_v3 = vld [vmem:[#allocation73_spill] sm:$0xff] (!%p6812_p10)  ;;  %v17162_v31 = vld [vmem:[#allocation28_spill] sm:$0xff] (!%p6812_p10) }
 0x1c8   : > { %vm2040_vm9 = vcmp.lt.s32.totalorder (!%p6812_p10), %v17137_v3, %v8855_v24  ;;  %vm17184_vm12 = vcmp.ge.s32.totalorder (!%p6812_p10), %v17137_v3, %v8853_v22 }
 0x1dd   : > { %v7087_v21 = vpop.f32.mrb[12].mxu1 }
 0x1de   : > { %v7088_v55 = vpop.f32.mrb[13].mxu1 }
 0x1df   : > { %v7089_v18 = vadd.f32 %v7088_v55, %v7087_v21  ;;  %v17163_v21 = vld [vmem:[#allocation29_spill] sm:$0xff] (!%p6812_p10) }
 0x1e0   : > { %v7230_v57 = vpop.f32.mrb[8].mxu0  ;;  %v2183_v55 = vsel (!%p6812_p10), %vm8929_vm0, %v17163_v21, -inf  ;;  %v17202_v21 = vld [vmem:[#allocation26_spill] sm:$0xff] (!%p6812_p10) }
 0x1e1   : > { %v7090_v37 = vpop.f32.mrb[14].mxu1  ;;  %v1369_v33 = vadd.f32 %v7089_v18, %v1258_v9  ;;  %v1923_v40 = vpop.f32.mrb[9].mxu0  ;;  %v17164_v18 = vld [vmem:[#allocation32_spill] sm:$0xff] (!%p6812_p10)  ;;  %v2217_v49 = vmax.f32 (!%p6812_p10), %v2179_v23, %v2183_v55  ;;  %v17197_v23 = vld [vmem:[#allocation81_spill] sm:$0xff] (!%p6812_p10) }
 0x1e2   : > { %v7091_v30 = vpop.f32.mrb[15].mxu1 }
 0x1e3   : > { %v7092_v53 = vadd.f32 %v7091_v30, %v7090_v37  ;;  %v7496_v26 = vadd.f32 %v1923_v40, %v1369_v33  ;;  %v17166_v37 = vld [vmem:[#allocation33_spill] sm:$0xff] (!%p6812_p10) }
 0x1e4   : > { %v2185_v33 = vsel (!%p6812_p10), %vm8965_vm3, %v17166_v37, -inf  ;;  %v17171_v30 = vld [vmem:[#allocation37_spill] sm:$0xff] (!%p6812_p10)  ;;  %vm17179_vm3 = vcmp.lt.s32.totalorder (!%p6812_p10), %v17134_v19, %v8855_v24  ;;  %v17204_v37 = vld [vmem:[#allocation27_spill] sm:$0xff] (!%p6812_p10) }
 0x1e5   : > { %v1376_v51 = vadd.f32 %v7092_v53, %v1265_v7  ;;  %v1933_v54 = vadd.f32 %v7496_v26, %v452_v42  ;;  %1983 = sbr.rel (%p6812_p10) target bundleno = 535 (0x217), region = 44  ;;  %v2182_v7 = vsel (!%p6812_p10), %vm8911_vm7, %v17162_v31, -inf  ;;  %v2186_v42 = vsel (!%p6812_p10), %vm8983_vm8, %v17171_v30, -inf  ;;  %v17172_v53 = vld [vmem:[#allocation38_spill] sm:$0xff] (!%p6812_p10)  ;;  %vm9067_vm8 = vmand (!%p6812_p10), %vm17180_vm6, %vm17179_vm3  ;;  %v17205_v30 = vld [vmem:[#allocation85_spill] sm:$0xff] (!%p6812_p10) }
 0x1e6   : > { %v2187_v26 = vsel (!%p6812_p10), %vm8990_vm14, %v17172_v53, -inf  ;;  %vm17174_vm7 = vcmp.lt.s32.totalorder (!%p6812_p10), %v17133_v39, %v8855_v24  ;;  %v2219_v1 = vmax.f32 (!%p6812_p10), %v2181_v10, %v2185_v33  ;;  %vm2042_vm14 = vcmp.lt.s32.totalorder (!%p6812_p10), %v17139_v0, %v8855_v24  ;;  %v17200_v10 = vld [vmem:[#allocation23_spill] sm:$0xff] (!%p6812_p10) }
 0x1e7   : > { %v7495_v13 = vadd.f32 %v7230_v57, %v1376_v51  ;;  %1935 = vst [vmem:[%s8007_s16] sm:$0xff] %v1933_v54  ;;  %v2184_v57 = vsel (!%p6812_p10), %vm17165_vm15, %v17164_v18, -inf  ;;  %v17173_v51 = vld [vmem:[#allocation43_spill] sm:$0xff] (!%p6812_p10)  ;;  %vm9050_vm0 = vmand (!%p6812_p10), %vm17175_vm11, %vm17174_vm7  ;;  %v2191_v63 = vsel (!%p6812_p10), %vm9067_vm8, %v17185_v14, -inf  ;;  %v2221_v50 = vmax.f32 (!%p6812_p10), %v2217_v49, %v2187_v26  ;;  %v17214_v14 = vld [vmem:[#allocation40_spill] sm:$0xff] (!%p6812_p10) }
 0x1e8   : > { %v2188_v54 = vsel (!%p6812_p10), %vm9009_vm1, %v17173_v51, -inf  ;;  %v2218_v62 = vmax.f32 (!%p6812_p10), %v2180_v60, %v2184_v57  ;;  %v2190_v44 = vsel (!%p6812_p10), %vm9050_vm0, %v17183_v61, -inf  ;;  %vm2078_vm1 = vmand (!%p6812_p10), %vm17184_vm12, %vm2040_vm9  ;;  %vm2005_vm15 = vcmp.ge.s32.totalorder (!%p6812_p10), %v17186_v38, %v8853_v22  ;;  %v17203_v57 = vld [vmem:[#allocation84_spill] sm:$0xff] (!%p6812_p10)  ;;  %v17207_v51 = vld [vmem:[#allocation86_spill] sm:$0xff] (!%p6812_p10) }
 0x1e9   : > { %v1934_v16 = vadd.f32 %v7495_v13, %v453_v56  ;;  %v2216_v56 = vmax.f32 (!%p6812_p10), %v2178_v45, %v2182_v7  ;;  %vm2079_vm9 = vmand (!%p6812_p10), %vm17187_vm5, %vm2041_vm13  ;;  %v2192_v39 = vsel (!%p6812_p10), %vm2078_vm1, %v17188_v34, -inf  ;;  %vm17189_vm7 = vcmp.ge.s32.totalorder (!%p6812_p10), %v17139_v0, %v8853_v22  ;;  %v17196_v45 = vld [vmem:[#allocation19_spill] sm:$0xff] (!%p6812_p10) }
 0x1ea   : > { %v2222_v4 = vmax.f32 (!%p6812_p10), %v2218_v62, %v2188_v54  ;;  %vm2080_vm11 = vmand (!%p6812_p10), %vm17189_vm7, %vm2042_vm14  ;;  %v2193_v3 = vsel (!%p6812_p10), %vm2079_vm9, %v17190_v2, -inf  ;;  %v2225_v47 = vmax.f32 (!%p6812_p10), %v2221_v50, %v2191_v63  ;;  %vm2006_vm13 = vcmp.ge.s32.totalorder (!%p6812_p10), %v17191_v52, %v8853_v22  ;;  %v17201_v7 = vld [vmem:[#allocation83_spill] sm:$0xff] (!%p6812_p10) }
 0x1eb   : > { %1936 = vst [vmem:[%s8007_s16 + $0x8] sm:$0xff] %v1934_v16  ;;  %v17178_v16 = vld [vmem:[#allocation44_spill] sm:$0xff] (!%p6812_p10)  ;;  %v2220_v5 = vmax.f32 (!%p6812_p10), %v2216_v56, %v2186_v42  ;;  %vm2046_vm0 = vcmp.lt.s32.totalorder (!%p6812_p10), %v17191_v52, %v8855_v24  ;;  %vm17192_vm3 = vcmp.ge.s32.totalorder (!%p6812_p10), %v17143_v48, %v8853_v22  ;;  %v2194_v0 = vsel (!%p6812_p10), %vm2080_vm11, %v17193_v36, -inf  ;;  %v17206_v42 = vld [vmem:[#allocation30_spill] sm:$0xff] (!%p6812_p10)  ;;  %v17208_v54 = vld [vmem:[#allocation31_spill] sm:$0xff] (!%p6812_p10) }
 0x1ec   : > { %v2189_v43 = vsel %vm9031_vm10, %v17178_v16, -inf  ;;  %vm2045_vm10 = vcmp.lt.s32.totalorder %v17186_v38, %v8855_v24  ;;  %v2226_v32 = vmax.f32 %v2222_v4, %v2192_v39  ;;  %vm2081_vm6 = vmand %vm17192_vm3, %vm2043_vm4  ;;  %vm2007_vm14 = vcmp.ge.s32.totalorder %v17194_v20, %v8853_v22  ;;  %v17209_v16 = vld [vmem:[#allocation87_spill] sm:$0xff]  ;;  %v17215_v4 = vld [vmem:[#allocation90_spill] sm:$0xff] }
 0x1ed   : > { %v2223_v6 = vmax.f32 %v2219_v1, %v2189_v43  ;;  %v2224_v19 = vmax.f32 %v2220_v5, %v2190_v44  ;;  %vm2047_vm8 = vcmp.lt.s32.totalorder %v17194_v20, %v8855_v24  ;;  %vm17195_vm12 = vcmp.ge.s32.totalorder %v17144_v28, %v8853_v22  ;;  %vm2083_vm9 = vmand %vm2005_vm15, %vm2045_vm10  ;;  %v17210_v43 = vld [vmem:[#allocation34_spill] sm:$0xff]  ;;  %v17211_v1 = vld [vmem:[#allocation88_spill] sm:$0xff] }
 0x1ee   : > { %vm2082_vm1 = vmand %vm17195_vm12, %vm2044_vm2  ;;  %v2195_v17 = vsel %vm2081_vm6, %v17196_v45, -inf  ;;  %vm2008_vm4 = vcmp.ge.s32.totalorder %v17197_v23, %v8853_v22  ;;  %vm2048_vm5 = vcmp.lt.s32.totalorder %v17197_v23, %v8855_v24  ;;  %vm2009_vm2 = vcmp.ge.s32.totalorder %v17199_v12, %v8853_v22  ;;  %v17213_v5 = vld [vmem:[#allocation89_spill] sm:$0xff]  ;;  %v17217_v39 = vld [vmem:[#allocation91_spill] sm:$0xff] }
 0x1ef   : > { %v2227_v41 = vmax.f32 %v2223_v6, %v2193_v3  ;;  %v2228_v48 = vmax.f32 %v2224_v19, %v2194_v0  ;;  %v2196_v60 = vsel %vm2082_vm1, %v17198_v11, -inf  ;;  %v2229_v28 = vmax.f32 %v2225_v47, %v2195_v17  ;;  %vm2084_vm11 = vmand %vm2006_vm13, %vm2046_vm0  ;;  %v17216_v6 = vld [vmem:[#allocation42_spill] sm:$0xff]  ;;  %v17219_v47 = vld [vmem:[#allocation92_spill] sm:$0xff] }
 0x1f0   : > { %vm2049_vm7 = vcmp.lt.s32.totalorder %v17199_v12, %v8855_v24  ;;  %v2197_v9 = vsel %vm2083_vm9, %v17200_v10, -inf  ;;  %v2230_v31 = vmax.f32 %v2226_v32, %v2196_v60  ;;  %vm2010_vm15 = vcmp.ge.s32.totalorder %v17201_v7, %v8853_v22  ;;  %vm2085_vm3 = vmand %vm2007_vm14, %vm2047_vm8  ;;  %v17218_v19 = vld [vmem:[#allocation46_spill] sm:$0xff]  ;;  %v17220_v32 = vld [vmem:[#allocation48_spill] sm:$0xff] }
 0x1f1   : > { %vm2050_vm10 = vcmp.lt.s32.totalorder %v17201_v7, %v8855_v24  ;;  %v2198_v55 = vsel %vm2084_vm11, %v17202_v21, -inf  ;;  %v2231_v18 = vmax.f32 %v2227_v41, %v2197_v9  ;;  %vm2011_vm13 = vcmp.ge.s32.totalorder %v17203_v57, %v8853_v22  ;;  %vm2086_vm6 = vmand %vm2008_vm4, %vm2048_vm5  ;;  %v17221_v0 = vld [vmem:[#allocation93_spill] sm:$0xff]  ;;  %v17222_v41 = vld [vmem:[#allocation52_spill] sm:$0xff] }
 0x1f2   : > { %vm2051_vm0 = vcmp.lt.s32.totalorder %v17203_v57, %v8855_v24  ;;  %v2199_v33 = vsel %vm2085_vm3, %v17204_v37, -inf  ;;  %v2232_v40 = vmax.f32 %v2228_v48, %v2198_v55  ;;  %vm2012_vm14 = vcmp.ge.s32.totalorder %v17205_v30, %v8853_v22  ;;  %vm2087_vm12 = vmand %vm2009_vm2, %vm2049_vm7  ;;  %v17223_v17 = vld [vmem:[#allocation94_spill] sm:$0xff]  ;;  %v17225_v60 = vld [vmem:[#allocation95_spill] sm:$0xff] }
 0x1f3   : > { %vm2052_vm8 = vcmp.lt.s32.totalorder %v17205_v30, %v8855_v24  ;;  %v2200_v53 = vsel %vm2086_vm6, %v17206_v42, -inf  ;;  %v2233_v26 = vmax.f32 %v2229_v28, %v2199_v33  ;;  %vm2013_vm1 = vcmp.ge.s32.totalorder %v17207_v51, %v8853_v22  ;;  %vm2088_vm5 = vmand %vm2010_vm15, %vm2050_vm10  ;;  %v17224_v48 = vld [vmem:[#allocation54_spill] sm:$0xff]  ;;  %v17226_v10 = vld [vmem:[#allocation96_spill] sm:$0xff] }
 0x1f4   : > { %vm2053_vm4 = vcmp.lt.s32.totalorder %v17207_v51, %v8855_v24  ;;  %v2201_v56 = vsel %vm2087_vm12, %v17208_v54, -inf  ;;  %v2234_v13 = vmax.f32 %v2230_v31, %v2200_v53  ;;  %vm2014_vm9 = vcmp.ge.s32.totalorder %v17209_v16, %v8853_v22  ;;  %vm2089_vm7 = vmand %vm2011_vm13, %vm2051_vm0 }
 0x1f5   : > { %vm2054_vm2 = vcmp.lt.s32.totalorder %v17209_v16, %v8855_v24  ;;  %v2202_v49 = vsel %vm2088_vm5, %v17210_v43, -inf  ;;  %v2235_v62 = vmax.f32 %v2231_v18, %v2201_v56  ;;  %vm2015_vm11 = vcmp.ge.s32.totalorder %v17211_v1, %v8853_v22  ;;  %vm2090_vm10 = vmand %vm2012_vm14, %vm2052_vm8 }
 0x1f6   : > { %vm2055_vm15 = vcmp.lt.s32.totalorder %v17211_v1, %v8855_v24  ;;  %v2203_v61 = vsel %vm2089_vm7, %v17212_v35, -inf  ;;  %v2236_v44 = vmax.f32 %v2232_v40, %v2202_v49  ;;  %vm2016_vm3 = vcmp.ge.s32.totalorder %v17213_v5, %v8853_v22  ;;  %vm2091_vm0 = vmand %vm2013_vm1, %vm2053_vm4 }
 0x1f7   : > { %vm2056_vm13 = vcmp.lt.s32.totalorder %v17213_v5, %v8855_v24  ;;  %v2204_v63 = vsel %vm2090_vm10, %v17214_v14, -inf  ;;  %v2237_v50 = vmax.f32 %v2233_v26, %v2203_v61  ;;  %vm2017_vm6 = vcmp.ge.s32.totalorder %v17215_v4, %v8853_v22  ;;  %vm2092_vm8 = vmand %vm2014_vm9, %vm2054_vm2 }
 0x1f8   : > { %vm2057_vm14 = vcmp.lt.s32.totalorder %v17215_v4, %v8855_v24  ;;  %v2205_v38 = vsel %vm2091_vm0, %v17216_v6, -inf  ;;  %v2238_v34 = vmax.f32 %v2234_v13, %v2204_v63  ;;  %vm2018_vm12 = vcmp.ge.s32.totalorder %v17217_v39, %v8853_v22  ;;  %vm2093_vm4 = vmand %vm2015_vm11, %vm2055_vm15  ;;  %v2259_v13 = vld [vmem:[%s8003_s15] sm:$0x1] }
 0x1f9   : > { %vm2058_vm1 = vcmp.lt.s32.totalorder %v17217_v39, %v8855_v24  ;;  %v2206_v2 = vsel %vm2092_vm8, %v17218_v19, -inf  ;;  %v2239_v3 = vmax.f32 %v2235_v62, %v2205_v38  ;;  %vm2019_vm5 = vcmp.ge.s32.totalorder %v17219_v47, %v8853_v22  ;;  %vm2094_vm2 = vmand %vm2016_vm3, %vm2056_vm13 }
 0x1fa   : > { %vm2059_vm9 = vcmp.lt.s32.totalorder %v17219_v47, %v8855_v24  ;;  %v2207_v52 = vsel %vm2093_vm4, %v17220_v32, -inf  ;;  %v2240_v36 = vmax.f32 %v2236_v44, %v2206_v2  ;;  %vm2020_vm7 = vcmp.ge.s32.totalorder %v17221_v0, %v8853_v22  ;;  %vm2095_vm15 = vmand %vm2017_vm6, %vm2057_vm14 }
 0x1fb   : > { %vm2060_vm11 = vcmp.lt.s32.totalorder %v17221_v0, %v8855_v24  ;;  %v2208_v20 = vsel %vm2094_vm2, %v17222_v41, -inf  ;;  %v2241_v45 = vmax.f32 %v2237_v50, %v2207_v52  ;;  %vm2021_vm10 = vcmp.ge.s32.totalorder %v17223_v17, %v8853_v22  ;;  %vm2096_vm13 = vmand %vm2018_vm12, %vm2058_vm1 }
 0x1fc   : > { %vm2061_vm3 = vcmp.lt.s32.totalorder %v17223_v17, %v8855_v24  ;;  %v2209_v23 = vsel %vm2095_vm15, %v17224_v48, -inf  ;;  %v2242_v11 = vmax.f32 %v2238_v34, %v2208_v20  ;;  %vm2022_vm0 = vcmp.ge.s32.totalorder %v17225_v60, %v8853_v22  ;;  %vm2097_vm14 = vmand %vm2019_vm5, %vm2059_vm9 }
 0x1fd   : > { %vm2062_vm6 = vcmp.lt.s32.totalorder %v17225_v60, %v8855_v24  ;;  %v2210_v28 = vsel %vm2096_vm13, %v8583_v46, -inf  ;;  %v2243_v12 = vmax.f32 %v2239_v3, %v2209_v23  ;;  %vm2023_vm8 = vcmp.ge.s32.totalorder %v17226_v10, %v8853_v22  ;;  %vm2098_vm1 = vmand %vm2020_vm7, %vm2060_vm11 }
 0x1fe   : > { %vm2063_vm12 = vcmp.lt.s32.totalorder %v17226_v10, %v8855_v24  ;;  %v2211_v9 = vsel %vm2097_vm14, %v8586_v59, -inf  ;;  %v2244_v31 = vmax.f32 %v2240_v36, %v2210_v28  ;;  %vm2099_vm4 = vmand %vm2021_vm10, %vm2061_vm3  ;;  %v2212_v7 = vsel %vm2098_vm1, %v8591_v25, -inf }
 0x1ff   : > { %v2245_v21 = vmax.f32 %v2241_v45, %v2211_v9  ;;  %vm2100_vm5 = vmand %vm2022_vm0, %vm2062_vm6  ;;  %v2213_v55 = vsel %vm2099_vm4, %v8594_v29, -inf  ;;  %v2246_v18 = vmax.f32 %v2242_v11, %v2212_v7 }
 0x200   : > { %vm2101_vm9 = vmand %vm2023_vm8, %vm2063_vm12  ;;  %v2214_v24 = vsel %vm2100_vm5, %v8604_v15, -inf  ;;  %v2247_v57 = vmax.f32 %v2243_v12, %v2213_v55 }
 0x201   : > { %v2215_v37 = vsel %vm2101_vm9, %v8609_v58, -inf  ;;  %v2248_v33 = vmax.f32 %v2244_v31, %v2214_v24 }
 0x202   : > { %v2249_v40 = vmax.f32 %v2245_v21, %v2215_v37  ;;  %v2251_v30 = vmax.f32 %v2246_v18, %v2247_v57 }
 0x204   : > { %v2250_v22 = vmax.f32 %v2248_v33, %v2249_v40 }
 0x206   : > { %v2252_v42 = vmax.f32 %v2250_v22, %v2251_v30 }
 0x208   : > { %v2253_v53 = vrot.slane %v2252_v42, 4 }
 0x20a   : > { %v2254_v26 = vmax.f32 %v2252_v42, %v2253_v53 }
 0x20c   : > { %v2255_v51 = vrot.slane %v2254_v26, 2 }
 0x20e   : > { %v2256_v54 = vmax.f32 %v2254_v26, %v2255_v51 }
 0x210   : > { %v2257_v56 = vrot.slane %v2256_v54, 1 }
 0x212   : > { %v2258_v16 = vmax.f32 %v2256_v54, %v2257_v56 }
 0x214   : > { %v2260_v43 = vmax.f32 %v2259_v13, %v2258_v16 }
 0x216   : > { %2261 = vst [vmem:[%s8003_s15] sm:$0x1] %v2260_v43 }
 0x217 PF: > { %s6813_s17 = sld [smem:[#allocation5 + $0x1]]  ;;  %s6814_s14 = sld [smem:[#allocation5 + $0x2]] }
 0x21d   : > { %p2265_p12 = scmp.gt.s32.totalorder %s6813_s17, %s8822_s23  ;;  %p2267_p1 = scmp.lt.s32.totalorder %s6814_s14, %s8829_s21 }
 0x21f   : > { %s2266_s20 = scalar_select %p2265_p12, %s6813_s17, %s8822_s23 }
 0x220   : > { %s2268_s29 = scalar_select %p2267_p1, %s6814_s14, %s8829_s21 }
 0x222   : > { %p6815_p2 = scmp.ge.s32.totalorder %s2266_s20, %s2268_s29 }
 0x223   : > { %s2273_s30 = ssub.s32 (!%p6815_p2), %s6813_s17, %s8822_s23  ;;  %s2313_s12 = ssub.s32 (!%p6815_p2), %s6814_s14, %s8822_s23  ;;  %v17227_v1 = vld [vmem:[#allocation61_spill] sm:$0xff] (!%p6815_p2)  ;;  %v17228_v35 = vld [vmem:[#allocation62_spill] sm:$0xff] (!%p6815_p2)  ;;  %v17231_v44 = vld [vmem:[#allocation63_spill] sm:$0xff] (!%p6815_p2)  ;;  %v17255_v41 = vmov (!%p6815_p2), 0 }
 0x224   : > { %2272 = sbr.rel (%p6815_p2) target bundleno = 611 (0x263), region = 48  ;;  %v9316_v49 = vstv (!%p6815_p2), %s2273_s30  ;;  %v9318_v62 = vstv (!%p6815_p2), %s2313_s12  ;;  %v17234_v14 = vld [vmem:[#allocation64_spill] sm:$0xff] (!%p6815_p2)  ;;  %v17237_v50 = vld [vmem:[#allocation65_spill] sm:$0xff] (!%p6815_p2)  ;;  %v17238_v4 = vld [vmem:[#allocation66_spill] sm:$0xff] (!%p6815_p2) }
 0x225   : > { %vm2275_vm2 = vcmp.ge.s32.totalorder (!%p6815_p2), %v8307_v27, %v9316_v49  ;;  %vm2276_vm7 = vcmp.ge.s32.totalorder (!%p6815_p2), %v8329_v8, %v9316_v49  ;;  %vm2277_vm11 = vcmp.ge.s32.totalorder (!%p6815_p2), %v17227_v1, %v9316_v49  ;;  %vm2315_vm15 = vcmp.lt.s32.totalorder (!%p6815_p2), %v8307_v27, %v9318_v62  ;;  %v17241_v38 = vld [vmem:[#allocation67_spill] sm:$0xff] (!%p6815_p2)  ;;  %v17242_v34 = vld [vmem:[#allocation68_spill] sm:$0xff] (!%p6815_p2)  ;;  %v17243_v39 = vld [vmem:[#allocation69_spill] sm:$0xff] (!%p6815_p2) }
 0x226   : > { %vm2316_vm10 = vcmp.lt.s32.totalorder (!%p6815_p2), %v8329_v8, %v9318_v62  ;;  %vm2278_vm3 = vcmp.ge.s32.totalorder (!%p6815_p2), %v17228_v35, %v9316_v49  ;;  %vm2317_vm13 = vcmp.lt.s32.totalorder (!%p6815_p2), %v17227_v1, %v9318_v62  ;;  %vm2318_vm0 = vcmp.lt.s32.totalorder (!%p6815_p2), %v17228_v35, %v9318_v62  ;;  %vm9336_vm6 = vmand (!%p6815_p2), %vm2275_vm2, %vm2315_vm15  ;;  %v17246_v2 = vld [vmem:[#allocation70_spill] sm:$0xff] (!%p6815_p2)  ;;  %v17247_v3 = vld [vmem:[#allocation71_spill] sm:$0xff] (!%p6815_p2) }
 0x227   : > { %vm2279_vm14 = vcmp.ge.s32.totalorder (!%p6815_p2), %v17231_v44, %v9316_v49  ;;  %vm2319_vm8 = vcmp.lt.s32.totalorder (!%p6815_p2), %v17231_v44, %v9318_v62  ;;  %vm9344_vm12 = vmand (!%p6815_p2), %vm2276_vm7, %vm2316_vm10  ;;  %vm2280_vm1 = vcmp.ge.s32.totalorder (!%p6815_p2), %v17234_v14, %v9316_v49  ;;  %vm2320_vm4 = vcmp.lt.s32.totalorder (!%p6815_p2), %v17234_v14, %v9318_v62  ;;  %v17248_v47 = vld [vmem:[#allocation72_spill] sm:$0xff] (!%p6815_p2)  ;;  %v17251_v52 = vld [vmem:[#allocation73_spill] sm:$0xff] (!%p6815_p2) }
 0x228   : > { %vm9352_vm5 = vmand (!%p6815_p2), %vm2277_vm11, %vm2317_vm13  ;;  %vm2321_vm7 = vcmp.lt.s32.totalorder (!%p6815_p2), %v17237_v50, %v9318_v62  ;;  %vm2322_vm9 = vcmp.lt.s32.totalorder (!%p6815_p2), %v17238_v4, %v9318_v62  ;;  %v17252_v36 = vld [vmem:[#allocation74_spill] sm:$0xff] (!%p6815_p2)  ;;  %v17253_v0 = vld [vmem:[#allocation75_spill] sm:$0xff] (!%p6815_p2)  ;;  %vm2325_vm10 = vcmp.lt.s32.totalorder (!%p6815_p2), %v17243_v39, %v9318_v62  ;;  %vm2329_vm11 = vcmp.lt.s32.totalorder (!%p6815_p2), %v17251_v52, %v9318_v62 }
 0x229   : > { %vm9362_vm15 = vmand (!%p6815_p2), %vm2278_vm3, %vm2318_vm0  ;;  %vm2324_vm3 = vcmp.lt.s32.totalorder (!%p6815_p2), %v17242_v34, %v9318_v62  ;;  %v17257_v20 = vld [vmem:[#allocation76_spill] sm:$0xff] (!%p6815_p2)  ;;  %v17258_v45 = vld [vmem:[#allocation77_spill] sm:$0xff] (!%p6815_p2)  ;;  %vm2330_vm13 = vcmp.lt.s32.totalorder (!%p6815_p2), %v17252_v36, %v9318_v62 }
 0x22a   : > { %vm9374_vm2 = vmand (!%p6815_p2), %vm2279_vm14, %vm2319_vm8  ;;  %vm17266_vm8 = vcmp.ge.s32.totalorder (!%p6815_p2), %v17242_v34, %v9316_v49  ;;  %v17269_v11 = vld [vmem:[#allocation20_spill] sm:$0xff] (!%p6815_p2)  ;;  %v17270_v28 = vld [vmem:[#allocation21_spill] sm:$0xff] (!%p6815_p2) }
 0x22b   : > { %vm9392_vm14 = vmand %vm2280_vm1, %vm2320_vm4  ;;  %vm17254_vm1 = vcmp.ge.s32.totalorder %v17237_v50, %v9316_v49  ;;  %v2467_v60 = vsel %vm9336_vm6, %v17269_v11, -inf  ;;  %v2468_v12 = vsel %vm9344_vm12, %v17270_v28, -inf  ;;  %v17271_v10 = vld [vmem:[#allocation24_spill] sm:$0xff]  ;;  %v17272_v31 = vld [vmem:[#allocation25_spill] sm:$0xff]  ;;  %vm17281_vm12 = vcmp.lt.s32.totalorder %v17246_v2, %v9318_v62 }
 0x22c   : > { %vm9410_vm4 = vmand %vm17254_vm1, %vm2321_vm7  ;;  %vm17259_vm7 = vcmp.ge.s32.totalorder %v17238_v4, %v9316_v49  ;;  %v2469_v9 = vsel %vm9352_vm5, %v17271_v10, -inf  ;;  %v2470_v7 = vsel %vm9362_vm15, %v17272_v31, -inf  ;;  %v17276_v55 = vld [vmem:[#allocation28_spill] sm:$0xff]  ;;  %v17277_v24 = vld [vmem:[#allocation29_spill] sm:$0xff]  ;;  %vm17282_vm5 = vcmp.ge.s32.totalorder %v17246_v2, %v9316_v49 }
 0x22d   : > { %v17256_v41 = vsel %vm9410_vm4, 4294967295, %v17255_v41  ;;  %vm9428_vm1 = vmand %vm17259_vm7, %vm2322_vm9  ;;  %vm17262_vm4 = vcmp.lt.s32.totalorder %v17241_v38, %v9318_v62  ;;  %vm17263_vm9 = vcmp.ge.s32.totalorder %v17241_v38, %v9316_v49  ;;  %v2471_v18 = vsel %vm9374_vm2, %v17276_v55, -inf  ;;  %v17278_v37 = vld [vmem:[#allocation32_spill] sm:$0xff]  ;;  %v17280_v40 = vld [vmem:[#allocation33_spill] sm:$0xff] }
 0x22e   : > { %vm9446_vm7 = vmand %vm17263_vm9, %vm17262_vm4  ;;  %v2472_v57 = vsel %vm9392_vm14, %v17277_v24, -inf  ;;  %vm17279_vm6 = vnez %v17256_v41  ;;  %v2474_v30 = vsel %vm9428_vm1, %v17280_v40, -inf  ;;  %v17285_v42 = vld [vmem:[#allocation37_spill] sm:$0xff]  ;;  %v17286_v26 = vld [vmem:[#allocation38_spill] sm:$0xff]  ;;  %v2505_v13 = vmax.f32 %v2467_v60, %v2471_v18 }
 0x22f   : > { %vm9453_vm0 = vmand %vm17266_vm8, %vm2324_vm3  ;;  %vm17273_vm3 = vcmp.ge.s32.totalorder %v17243_v39, %v9316_v49  ;;  %v2473_v33 = vsel %vm17279_vm6, %v17278_v37, -inf  ;;  %v2475_v53 = vsel %vm9446_vm7, %v17285_v42, -inf  ;;  %v17287_v54 = vld [vmem:[#allocation43_spill] sm:$0xff]  ;;  %vm17288_vm2 = vcmp.lt.s32.totalorder %v17247_v3, %v9318_v62  ;;  %v17292_v43 = vld [vmem:[#allocation44_spill] sm:$0xff] }
 0x230   : > { %vm9472_vm8 = vmand %vm17273_vm3, %vm2325_vm10  ;;  %v2476_v51 = vsel %vm9453_vm0, %v17286_v26, -inf  ;;  %vm17289_vm10 = vcmp.ge.s32.totalorder %v17247_v3, %v9316_v49  ;;  %v2506_v35 = vmax.f32 %v2468_v12, %v2472_v57  ;;  %v2507_v61 = vmax.f32 %v2469_v9, %v2473_v33  ;;  %v17297_v14 = vld [vmem:[#allocation49_spill] sm:$0xff]  ;;  %v17299_v4 = vld [vmem:[#allocation50_spill] sm:$0xff] }
 0x231   : > { %vm9494_vm15 = vmand %vm17282_vm5, %vm17281_vm12  ;;  %v2477_v56 = vsel %vm9472_vm8, %v17287_v54, -inf  ;;  %v2508_v44 = vmax.f32 %v2470_v7, %v2474_v30  ;;  %vm2331_vm0 = vcmp.lt.s32.totalorder %v17253_v0, %v9318_v62  ;;  %vm2332_vm4 = vcmp.lt.s32.totalorder %v17257_v20, %v9318_v62  ;;  %v17300_v19 = vld [vmem:[#allocation78_spill] sm:$0xff]  ;;  %v17302_v2 = vld [vmem:[#allocation55_spill] sm:$0xff] }
 0x232   : > { %vm9513_vm14 = vmand %vm17289_vm10, %vm17288_vm2  ;;  %v2478_v1 = vsel %vm9494_vm15, %v17292_v43, -inf  ;;  %vm17293_vm1 = vcmp.lt.s32.totalorder %v17248_v47, %v9318_v62  ;;  %vm17294_vm9 = vcmp.ge.s32.totalorder %v17248_v47, %v9316_v49  ;;  %v2509_v50 = vmax.f32 %v2505_v13, %v2475_v53  ;;  %v17304_v32 = vld [vmem:[#allocation56_spill] sm:$0xff]  ;;  %v17307_v48 = vld [vmem:[#allocation18_spill] sm:$0xff] }
 0x233   : > { %vm9530_vm7 = vmand %vm17294_vm9, %vm17293_vm1  ;;  %v2479_v63 = vsel %vm9513_vm14, %v17297_v14, -inf  ;;  %vm17298_vm3 = vcmp.ge.s32.totalorder %v17251_v52, %v9316_v49  ;;  %v2510_v38 = vmax.f32 %v2506_v35, %v2476_v51  ;;  %v2511_v34 = vmax.f32 %v2507_v61, %v2477_v56  ;;  %v17308_v11 = vld [vmem:[#allocation80_spill] sm:$0xff]  ;;  %v17310_v60 = vld [vmem:[#allocation19_spill] sm:$0xff] }
 0x234   : > { %vm2367_vm8 = vmand %vm17298_vm3, %vm2329_vm11  ;;  %v2480_v6 = vsel %vm9530_vm7, %v17299_v4, -inf  ;;  %v2512_v39 = vmax.f32 %v2508_v44, %v2478_v1  ;;  %vm2294_vm6 = vcmp.ge.s32.totalorder %v17300_v19, %v9316_v49  ;;  %vm2333_vm12 = vcmp.lt.s32.totalorder %v17258_v45, %v9318_v62  ;;  %v17311_v12 = vld [vmem:[#allocation81_spill] sm:$0xff]  ;;  %v17312_v10 = vld [vmem:[#allocation22_spill] sm:$0xff] }
 0x235   : > { %vm17301_vm5 = vcmp.ge.s32.totalorder %v17252_v36, %v9316_v49  ;;  %v2481_v3 = vsel %vm2367_vm8, %v17302_v2, -inf  ;;  %v2513_v47 = vmax.f32 %v2509_v50, %v2479_v63  ;;  %vm2334_vm15 = vcmp.lt.s32.totalorder %v17300_v19, %v9318_v62  ;;  %v17305_v36 = vld [vmem:[#allocation79_spill] sm:$0xff]  ;;  %v17313_v31 = vld [vmem:[#allocation82_spill] sm:$0xff]  ;;  %v17317_v33 = vld [vmem:[#allocation84_spill] sm:$0xff] }
 0x236   : > { %vm2368_vm11 = vmand %vm17301_vm5, %vm2330_vm13  ;;  %vm17303_vm2 = vcmp.ge.s32.totalorder %v17253_v0, %v9316_v49  ;;  %v2514_v41 = vmax.f32 %v2510_v38, %v2480_v6  ;;  %v2515_v17 = vmax.f32 %v2511_v34, %v2481_v3  ;;  %vm2295_vm13 = vcmp.ge.s32.totalorder %v17305_v36, %v9316_v49  ;;  %v17314_v7 = vld [vmem:[#allocation23_spill] sm:$0xff]  ;;  %v17316_v24 = vld [vmem:[#allocation26_spill] sm:$0xff] }
 0x237   : > { %vm2369_vm10 = vmand %vm17303_vm2, %vm2331_vm0  ;;  %v2482_v52 = vsel %vm2368_vm11, %v17304_v32, -inf  ;;  %vm2335_vm14 = vcmp.lt.s32.totalorder %v17305_v36, %v9318_v62  ;;  %vm17306_vm1 = vcmp.ge.s32.totalorder %v17257_v20, %v9316_v49  ;;  %vm2296_vm0 = vcmp.ge.s32.totalorder %v17308_v11, %v9316_v49  ;;  %v17315_v18 = vld [vmem:[#allocation83_spill] sm:$0xff]  ;;  %v17319_v42 = vld [vmem:[#allocation85_spill] sm:$0xff] }
 0x238   : > { %vm2370_vm9 = vmand %vm17306_vm1, %vm2332_vm4  ;;  %v2483_v0 = vsel %vm2369_vm10, %v17307_v48, -inf  ;;  %v2516_v23 = vmax.f32 %v2512_v39, %v2482_v52  ;;  %vm2336_vm7 = vcmp.lt.s32.totalorder %v17308_v11, %v9318_v62  ;;  %vm17309_vm3 = vcmp.ge.s32.totalorder %v17258_v45, %v9316_v49  ;;  %v17318_v40 = vld [vmem:[#allocation27_spill] sm:$0xff]  ;;  %v17320_v53 = vld [vmem:[#allocation30_spill] sm:$0xff] }
 0x239   : > { %vm2371_vm8 = vmand %vm17309_vm3, %vm2333_vm12  ;;  %v2484_v28 = vsel %vm2370_vm9, %v17310_v60, -inf  ;;  %v2517_v20 = vmax.f32 %v2513_v47, %v2483_v0  ;;  %vm2297_vm4 = vcmp.ge.s32.totalorder %v17311_v12, %v9316_v49  ;;  %vm2337_vm5 = vcmp.lt.s32.totalorder %v17311_v12, %v9318_v62  ;;  %v17321_v54 = vld [vmem:[#allocation86_spill] sm:$0xff]  ;;  %v17322_v56 = vld [vmem:[#allocation31_spill] sm:$0xff] }
 0x23a   : > { %vm2372_vm11 = vmand %vm2294_vm6, %vm2334_vm15  ;;  %v2485_v9 = vsel %vm2371_vm8, %v17312_v10, -inf  ;;  %v2518_v45 = vmax.f32 %v2514_v41, %v2484_v28  ;;  %vm2298_vm12 = vcmp.ge.s32.totalorder %v17313_v31, %v9316_v49  ;;  %vm2338_vm2 = vcmp.lt.s32.totalorder %v17313_v31, %v9318_v62  ;;  %v17323_v43 = vld [vmem:[#allocation87_spill] sm:$0xff]  ;;  %v17324_v1 = vld [vmem:[#allocation34_spill] sm:$0xff] }
 0x23b   : > { %vm2373_vm10 = vmand %vm2295_vm13, %vm2335_vm14  ;;  %v2486_v21 = vsel %vm2372_vm11, %v17314_v7, -inf  ;;  %v2519_v55 = vmax.f32 %v2515_v17, %v2485_v9  ;;  %vm2299_vm6 = vcmp.ge.s32.totalorder %v17315_v18, %v9316_v49  ;;  %vm2339_vm15 = vcmp.lt.s32.totalorder %v17315_v18, %v9318_v62  ;;  %v17325_v44 = vld [vmem:[#allocation88_spill] sm:$0xff]  ;;  %v17327_v50 = vld [vmem:[#allocation89_spill] sm:$0xff] }
 0x23c   : > { %vm2374_vm1 = vmand %vm2296_vm0, %vm2336_vm7  ;;  %v2487_v57 = vsel %vm2373_vm10, %v17316_v24, -inf  ;;  %v2520_v37 = vmax.f32 %v2516_v23, %v2486_v21  ;;  %vm2300_vm13 = vcmp.ge.s32.totalorder %v17317_v33, %v9316_v49  ;;  %vm2340_vm14 = vcmp.lt.s32.totalorder %v17317_v33, %v9318_v62  ;;  %v17326_v5 = vld [vmem:[#allocation36_spill] sm:$0xff]  ;;  %v17329_v34 = vld [vmem:[#allocation90_spill] sm:$0xff] }
 0x23d   : > { %vm2375_vm9 = vmand %vm2297_vm4, %vm2337_vm5  ;;  %v2488_v30 = vsel %vm2374_vm1, %v17318_v40, -inf  ;;  %v2521_v22 = vmax.f32 %v2517_v20, %v2487_v57  ;;  %vm2301_vm0 = vcmp.ge.s32.totalorder %v17319_v42, %v9316_v49  ;;  %vm2341_vm7 = vcmp.lt.s32.totalorder %v17319_v42, %v9318_v62  ;;  %v17328_v4 = vld [vmem:[#allocation40_spill] sm:$0xff]  ;;  %v17330_v39 = vld [vmem:[#allocation42_spill] sm:$0xff] }
 0x23e   : > { %vm2376_vm3 = vmand %vm2298_vm12, %vm2338_vm2  ;;  %v2489_v26 = vsel %vm2375_vm9, %v17320_v53, -inf  ;;  %v2522_v51 = vmax.f32 %v2518_v45, %v2488_v30  ;;  %vm2302_vm8 = vcmp.ge.s32.totalorder %v17321_v54, %v9316_v49  ;;  %vm2342_vm4 = vcmp.lt.s32.totalorder %v17321_v54, %v9318_v62  ;;  %v17331_v3 = vld [vmem:[#allocation91_spill] sm:$0xff]  ;;  %v17332_v47 = vld [vmem:[#allocation46_spill] sm:$0xff] }
 0x23f   : > { %vm2377_vm5 = vmand %vm2299_vm6, %vm2339_vm15  ;;  %v2490_v13 = vsel %vm2376_vm3, %v17322_v56, -inf  ;;  %v2523_v16 = vmax.f32 %v2519_v55, %v2489_v26  ;;  %vm2303_vm11 = vcmp.ge.s32.totalorder %v17323_v43, %v9316_v49  ;;  %vm2343_vm12 = vcmp.lt.s32.totalorder %v17323_v43, %v9318_v62  ;;  %v17333_v41 = vld [vmem:[#allocation92_spill] sm:$0xff]  ;;  %v17335_v0 = vld [vmem:[#allocation93_spill] sm:$0xff] }
 0x240   : > { %vm2378_vm2 = vmand %vm2300_vm13, %vm2340_vm14  ;;  %v2491_v35 = vsel %vm2377_vm5, %v17324_v1, -inf  ;;  %v2524_v61 = vmax.f32 %v2520_v37, %v2490_v13  ;;  %vm2304_vm10 = vcmp.ge.s32.totalorder %v17325_v44, %v9316_v49  ;;  %vm2344_vm6 = vcmp.lt.s32.totalorder %v17325_v44, %v9318_v62  ;;  %v17334_v17 = vld [vmem:[#allocation48_spill] sm:$0xff]  ;;  %v17337_v28 = vld [vmem:[#allocation94_spill] sm:$0xff] }
 0x241   : > { %vm2379_vm15 = vmand %vm2301_vm0, %vm2341_vm7  ;;  %v2492_v14 = vsel %vm2378_vm2, %v17326_v5, -inf  ;;  %v2525_v63 = vmax.f32 %v2521_v22, %v2491_v35  ;;  %vm2305_vm1 = vcmp.ge.s32.totalorder %v17327_v50, %v9316_v49  ;;  %vm2345_vm13 = vcmp.lt.s32.totalorder %v17327_v50, %v9318_v62  ;;  %v17336_v23 = vld [vmem:[#allocation52_spill] sm:$0xff]  ;;  %v17338_v20 = vld [vmem:[#allocation54_spill] sm:$0xff] }
 0x242   : > { %vm2380_vm14 = vmand %vm2302_vm8, %vm2342_vm4  ;;  %v2493_v6 = vsel %vm2379_vm15, %v17328_v4, -inf  ;;  %v2526_v38 = vmax.f32 %v2522_v51, %v2492_v14  ;;  %vm2306_vm9 = vcmp.ge.s32.totalorder %v17329_v34, %v9316_v49  ;;  %vm2346_vm0 = vcmp.lt.s32.totalorder %v17329_v34, %v9318_v62  ;;  %v17339_v9 = vld [vmem:[#allocation95_spill] sm:$0xff]  ;;  %v17340_v7 = vld [vmem:[#allocation96_spill] sm:$0xff] }
 0x243   : > { %vm2381_vm7 = vmand %vm2303_vm11, %vm2343_vm12  ;;  %v2494_v19 = vsel %vm2380_vm14, %v17330_v39, -inf  ;;  %v2527_v2 = vmax.f32 %v2523_v16, %v2493_v6  ;;  %vm2307_vm3 = vcmp.ge.s32.totalorder %v17331_v3, %v9316_v49  ;;  %vm2347_vm8 = vcmp.lt.s32.totalorder %v17331_v3, %v9318_v62  ;;  %v2548_v16 = vld [vmem:[%s8003_s15 + $0x1] sm:$0x1] }
 0x244   : > { %vm2382_vm4 = vmand %vm2304_vm10, %vm2344_vm6  ;;  %v2495_v32 = vsel %vm2381_vm7, %v17332_v47, -inf  ;;  %v2528_v52 = vmax.f32 %v2524_v61, %v2494_v19  ;;  %vm2308_vm5 = vcmp.ge.s32.totalorder %v17333_v41, %v9316_v49  ;;  %vm2348_vm11 = vcmp.lt.s32.totalorder %v17333_v41, %v9318_v62 }
 0x245   : > { %vm2383_vm12 = vmand %vm2305_vm1, %vm2345_vm13  ;;  %v2496_v36 = vsel %vm2382_vm4, %v17334_v17, -inf  ;;  %v2529_v48 = vmax.f32 %v2525_v63, %v2495_v32  ;;  %vm2309_vm2 = vcmp.ge.s32.totalorder %v17335_v0, %v9316_v49  ;;  %vm2349_vm10 = vcmp.lt.s32.totalorder %v17335_v0, %v9318_v62 }
 0x246   : > { %vm2384_vm6 = vmand %vm2306_vm9, %vm2346_vm0  ;;  %v2497_v11 = vsel %vm2383_vm12, %v17336_v23, -inf  ;;  %v2530_v60 = vmax.f32 %v2526_v38, %v2496_v36  ;;  %vm2310_vm15 = vcmp.ge.s32.totalorder %v17337_v28, %v9316_v49  ;;  %vm2350_vm1 = vcmp.lt.s32.totalorder %v17337_v28, %v9318_v62 }
 0x247   : > { %vm2385_vm13 = vmand %vm2307_vm3, %vm2347_vm8  ;;  %v2498_v12 = vsel %vm2384_vm6, %v17338_v20, -inf  ;;  %v2531_v10 = vmax.f32 %v2527_v2, %v2497_v11  ;;  %vm2311_vm14 = vcmp.ge.s32.totalorder %v17339_v9, %v9316_v49  ;;  %vm2351_vm9 = vcmp.lt.s32.totalorder %v17339_v9, %v9318_v62 }
 0x248   : > { %vm2386_vm0 = vmand %vm2308_vm5, %vm2348_vm11  ;;  %v2499_v45 = vsel %vm2385_vm13, %v8583_v46, -inf  ;;  %v2532_v31 = vmax.f32 %v2528_v52, %v2498_v12  ;;  %vm2312_vm7 = vcmp.ge.s32.totalorder %v17340_v7, %v9316_v49  ;;  %vm2352_vm3 = vcmp.lt.s32.totalorder %v17340_v7, %v9318_v62 }
 0x249   : > { %vm2387_vm8 = vmand %vm2309_vm2, %vm2349_vm10  ;;  %v2500_v21 = vsel %vm2386_vm0, %v8586_v59, -inf  ;;  %v2533_v55 = vmax.f32 %v2529_v48, %v2499_v45 }
 0x24a   : > { %vm2388_vm4 = vmand %vm2310_vm15, %vm2350_vm1  ;;  %v2501_v18 = vsel %vm2387_vm8, %v8591_v25, -inf  ;;  %v2534_v24 = vmax.f32 %v2530_v60, %v2500_v21 }
 0x24b   : > { %vm2389_vm5 = vmand %vm2311_vm14, %vm2351_vm9  ;;  %v2502_v57 = vsel %vm2388_vm4, %v8594_v29, -inf  ;;  %v2535_v37 = vmax.f32 %v2531_v10, %v2501_v18 }
 0x24c   : > { %vm2390_vm11 = vmand %vm2312_vm7, %vm2352_vm3  ;;  %v2503_v62 = vsel %vm2389_vm5, %v8604_v15, -inf  ;;  %v2536_v33 = vmax.f32 %v2532_v31, %v2502_v57 }
 0x24d   : > { %v2504_v40 = vsel %vm2390_vm11, %v8609_v58, -inf  ;;  %v2537_v30 = vmax.f32 %v2533_v55, %v2503_v62 }
 0x24e   : > { %v2538_v22 = vmax.f32 %v2534_v24, %v2504_v40  ;;  %v2540_v42 = vmax.f32 %v2535_v37, %v2536_v33 }
 0x250   : > { %v2539_v49 = vmax.f32 %v2537_v30, %v2538_v22 }
 0x252   : > { %v2541_v53 = vmax.f32 %v2539_v49, %v2540_v42 }
 0x254   : > { %v2542_v26 = vrot.slane %v2541_v53, 4 }
 0x256   : > { %v2543_v51 = vmax.f32 %v2541_v53, %v2542_v26 }
 0x258   : > { %v2544_v54 = vrot.slane %v2543_v51, 2 }
 0x25a   : > { %v2545_v56 = vmax.f32 %v2543_v51, %v2544_v54 }
 0x25c   : > { %v2546_v13 = vrot.slane %v2545_v56, 1 }
 0x25e   : > { %v2547_v43 = vmax.f32 %v2545_v56, %v2546_v13 }
 0x260   : > { %v2549_v1 = vmax.f32 %v2548_v16, %v2547_v43 }
 0x262   : > { %2550 = vst [vmem:[%s8003_s15 + $0x1] sm:$0x1] %v2549_v1 }
 0x263 PF: > { %s6816_s24 = sld [smem:[#allocation5 + $0x2]]  ;;  %s6817_s18 = sld [smem:[#allocation5 + $0x3]] }
 0x269   : > { %p2554_p3 = scmp.gt.s32.totalorder %s6816_s24, %s8822_s23  ;;  %p2556_p6 = scmp.lt.s32.totalorder %s6817_s18, %s8829_s21 }
 0x26b   : > { %s2555_s22 = scalar_select %p2554_p3, %s6816_s24, %s8822_s23 }
 0x26c   : > { %s2557_s25 = scalar_select %p2556_p6, %s6817_s18, %s8829_s21 }
 0x26e   : > { %p6818_p11 = scmp.ge.s32.totalorder %s2555_s22, %s2557_s25 }
 0x26f   : > { %s2562_s19 = ssub.s32 (!%p6818_p11), %s6816_s24, %s8822_s23  ;;  %s2602_s17 = ssub.s32 (!%p6818_p11), %s6817_s18, %s8822_s23  ;;  %v17341_v44 = vld [vmem:[#allocation61_spill] sm:$0xff] (!%p6818_p11)  ;;  %v17342_v5 = vld [vmem:[#allocation62_spill] sm:$0xff] (!%p6818_p11)  ;;  %v17345_v63 = vld [vmem:[#allocation63_spill] sm:$0xff] (!%p6818_p11)  ;;  %v17369_v23 = vmov (!%p6818_p11), 0 }
 0x270   : > { %2561 = sbr.rel (%p6818_p11) target bundleno = 687 (0x2af), region = 52  ;;  %v9779_v35 = vstv (!%p6818_p11), %s2562_s19  ;;  %v9781_v61 = vstv (!%p6818_p11), %s2602_s17  ;;  %v17348_v4 = vld [vmem:[#allocation64_spill] sm:$0xff] (!%p6818_p11)  ;;  %v17351_v38 = vld [vmem:[#allocation65_spill] sm:$0xff] (!%p6818_p11)  ;;  %v17352_v34 = vld [vmem:[#allocation66_spill] sm:$0xff] (!%p6818_p11) }
 0x271   : > { %vm2564_vm12 = vcmp.ge.s32.totalorder (!%p6818_p11), %v8307_v27, %v9779_v35  ;;  %vm2565_vm2 = vcmp.ge.s32.totalorder (!%p6818_p11), %v8329_v8, %v9779_v35  ;;  %vm2566_vm10 = vcmp.ge.s32.totalorder (!%p6818_p11), %v17341_v44, %v9779_v35  ;;  %vm2604_vm6 = vcmp.lt.s32.totalorder (!%p6818_p11), %v8307_v27, %v9781_v61  ;;  %v17355_v19 = vld [vmem:[#allocation67_spill] sm:$0xff] (!%p6818_p11)  ;;  %v17356_v2 = vld [vmem:[#allocation68_spill] sm:$0xff] (!%p6818_p11)  ;;  %v17357_v3 = vld [vmem:[#allocation69_spill] sm:$0xff] (!%p6818_p11) }
 0x272   : > { %vm2605_vm15 = vcmp.lt.s32.totalorder (!%p6818_p11), %v8329_v8, %v9781_v61  ;;  %vm2567_vm1 = vcmp.ge.s32.totalorder (!%p6818_p11), %v17342_v5, %v9779_v35  ;;  %vm2606_vm13 = vcmp.lt.s32.totalorder (!%p6818_p11), %v17341_v44, %v9781_v61  ;;  %vm2607_vm14 = vcmp.lt.s32.totalorder (!%p6818_p11), %v17342_v5, %v9781_v61  ;;  %vm9799_vm9 = vmand (!%p6818_p11), %vm2564_vm12, %vm2604_vm6  ;;  %v17360_v32 = vld [vmem:[#allocation70_spill] sm:$0xff] (!%p6818_p11)  ;;  %v17361_v52 = vld [vmem:[#allocation71_spill] sm:$0xff] (!%p6818_p11) }
 0x273   : > { %vm2568_vm0 = vcmp.ge.s32.totalorder (!%p6818_p11), %v17345_v63, %v9779_v35  ;;  %vm2608_vm7 = vcmp.lt.s32.totalorder (!%p6818_p11), %v17345_v63, %v9781_v61  ;;  %vm9807_vm3 = vmand (!%p6818_p11), %vm2565_vm2, %vm2605_vm15  ;;  %vm2569_vm8 = vcmp.ge.s32.totalorder (!%p6818_p11), %v17348_v4, %v9779_v35  ;;  %vm2609_vm4 = vcmp.lt.s32.totalorder (!%p6818_p11), %v17348_v4, %v9781_v61  ;;  %v17362_v41 = vld [vmem:[#allocation72_spill] sm:$0xff] (!%p6818_p11)  ;;  %v17365_v36 = vld [vmem:[#allocation73_spill] sm:$0xff] (!%p6818_p11) }
 0x274   : > { %vm9815_vm5 = vmand (!%p6818_p11), %vm2566_vm10, %vm2606_vm13  ;;  %vm2610_vm2 = vcmp.lt.s32.totalorder (!%p6818_p11), %v17351_v38, %v9781_v61  ;;  %vm2611_vm11 = vcmp.lt.s32.totalorder (!%p6818_p11), %v17352_v34, %v9781_v61  ;;  %v17366_v48 = vld [vmem:[#allocation74_spill] sm:$0xff] (!%p6818_p11)  ;;  %v17367_v0 = vld [vmem:[#allocation75_spill] sm:$0xff] (!%p6818_p11)  ;;  %vm2614_vm15 = vcmp.lt.s32.totalorder (!%p6818_p11), %v17357_v3, %v9781_v61  ;;  %vm2618_vm10 = vcmp.lt.s32.totalorder (!%p6818_p11), %v17365_v36, %v9781_v61 }
 0x275   : > { %vm9825_vm6 = vmand (!%p6818_p11), %vm2567_vm1, %vm2607_vm14  ;;  %vm2613_vm1 = vcmp.lt.s32.totalorder (!%p6818_p11), %v17356_v2, %v9781_v61  ;;  %v17371_v11 = vld [vmem:[#allocation76_spill] sm:$0xff] (!%p6818_p11)  ;;  %v17372_v60 = vld [vmem:[#allocation77_spill] sm:$0xff] (!%p6818_p11)  ;;  %vm2619_vm13 = vcmp.lt.s32.totalorder (!%p6818_p11), %v17366_v48, %v9781_v61 }
 0x276   : > { %vm9837_vm12 = vmand (!%p6818_p11), %vm2568_vm0, %vm2608_vm7  ;;  %vm17380_vm7 = vcmp.ge.s32.totalorder (!%p6818_p11), %v17356_v2, %v9779_v35  ;;  %v17383_v10 = vld [vmem:[#allocation20_spill] sm:$0xff] (!%p6818_p11)  ;;  %v17384_v45 = vld [vmem:[#allocation21_spill] sm:$0xff] (!%p6818_p11) }
 0x277   : > { %vm9855_vm0 = vmand %vm2569_vm8, %vm2609_vm4  ;;  %vm17368_vm8 = vcmp.ge.s32.totalorder %v17351_v38, %v9779_v35  ;;  %v2756_v9 = vsel %vm9799_vm9, %v17383_v10, -inf  ;;  %v2757_v31 = vsel %vm9807_vm3, %v17384_v45, -inf  ;;  %v17385_v7 = vld [vmem:[#allocation24_spill] sm:$0xff]  ;;  %v17386_v55 = vld [vmem:[#allocation25_spill] sm:$0xff]  ;;  %vm17395_vm3 = vcmp.lt.s32.totalorder %v17360_v32, %v9781_v61 }
 0x278   : > { %vm9873_vm4 = vmand %vm17368_vm8, %vm2610_vm2  ;;  %vm17373_vm2 = vcmp.ge.s32.totalorder %v17352_v34, %v9779_v35  ;;  %v2758_v21 = vsel %vm9815_vm5, %v17385_v7, -inf  ;;  %v2759_v18 = vsel %vm9825_vm6, %v17386_v55, -inf  ;;  %v17390_v57 = vld [vmem:[#allocation28_spill] sm:$0xff]  ;;  %v17391_v62 = vld [vmem:[#allocation29_spill] sm:$0xff]  ;;  %vm17396_vm5 = vcmp.ge.s32.totalorder %v17360_v32, %v9779_v35 }
 0x279   : > { %v17370_v23 = vsel %vm9873_vm4, 4294967295, %v17369_v23  ;;  %vm9891_vm8 = vmand %vm17373_vm2, %vm2611_vm11  ;;  %vm17376_vm4 = vcmp.lt.s32.totalorder %v17355_v19, %v9781_v61  ;;  %vm17377_vm11 = vcmp.ge.s32.totalorder %v17355_v19, %v9779_v35  ;;  %v2760_v37 = vsel %vm9837_vm12, %v17390_v57, -inf  ;;  %v17392_v40 = vld [vmem:[#allocation32_spill] sm:$0xff]  ;;  %v17394_v22 = vld [vmem:[#allocation33_spill] sm:$0xff] }
 0x27a   : > { %vm9909_vm2 = vmand %vm17377_vm11, %vm17376_vm4  ;;  %v2761_v33 = vsel %vm9855_vm0, %v17391_v62, -inf  ;;  %vm17393_vm9 = vnez %v17370_v23  ;;  %v2763_v42 = vsel %vm9891_vm8, %v17394_v22, -inf  ;;  %v17399_v53 = vld [vmem:[#allocation37_spill] sm:$0xff]  ;;  %v17400_v51 = vld [vmem:[#allocation38_spill] sm:$0xff]  ;;  %v2794_v16 = vmax.f32 %v2756_v9, %v2760_v37 }
 0x27b   : > { %vm9916_vm14 = vmand %vm17380_vm7, %vm2613_vm1  ;;  %vm17387_vm1 = vcmp.ge.s32.totalorder %v17357_v3, %v9779_v35  ;;  %v2762_v30 = vsel %vm17393_vm9, %v17392_v40, -inf  ;;  %v2764_v26 = vsel %vm9909_vm2, %v17399_v53, -inf  ;;  %v17401_v56 = vld [vmem:[#allocation43_spill] sm:$0xff]  ;;  %vm17402_vm12 = vcmp.lt.s32.totalorder %v17361_v52, %v9781_v61  ;;  %v17406_v1 = vld [vmem:[#allocation44_spill] sm:$0xff] }
 0x27c   : > { %vm9935_vm7 = vmand %vm17387_vm1, %vm2614_vm15  ;;  %v2765_v54 = vsel %vm9916_vm14, %v17400_v51, -inf  ;;  %vm17403_vm15 = vcmp.ge.s32.totalorder %v17361_v52, %v9779_v35  ;;  %v2795_v5 = vmax.f32 %v2757_v31, %v2761_v33  ;;  %v2796_v14 = vmax.f32 %v2758_v21, %v2762_v30  ;;  %v17411_v4 = vld [vmem:[#allocation49_spill] sm:$0xff]  ;;  %v17413_v34 = vld [vmem:[#allocation50_spill] sm:$0xff] }
 0x27d   : > { %vm9957_vm6 = vmand %vm17396_vm5, %vm17395_vm3  ;;  %v2766_v13 = vsel %vm9935_vm7, %v17401_v56, -inf  ;;  %v2797_v63 = vmax.f32 %v2759_v18, %v2763_v42  ;;  %vm2620_vm14 = vcmp.lt.s32.totalorder %v17367_v0, %v9781_v61  ;;  %vm2621_vm4 = vcmp.lt.s32.totalorder %v17371_v11, %v9781_v61  ;;  %v17414_v47 = vld [vmem:[#allocation78_spill] sm:$0xff]  ;;  %v17416_v32 = vld [vmem:[#allocation55_spill] sm:$0xff] }
 0x27e   : > { %vm9976_vm0 = vmand %vm17403_vm15, %vm17402_vm12  ;;  %v2767_v44 = vsel %vm9957_vm6, %v17406_v1, -inf  ;;  %vm17407_vm8 = vcmp.lt.s32.totalorder %v17362_v41, %v9781_v61  ;;  %vm17408_vm11 = vcmp.ge.s32.totalorder %v17362_v41, %v9779_v35  ;;  %v2798_v38 = vmax.f32 %v2794_v16, %v2764_v26  ;;  %v17418_v17 = vld [vmem:[#allocation56_spill] sm:$0xff]  ;;  %v17421_v20 = vld [vmem:[#allocation18_spill] sm:$0xff] }
 0x27f   : > { %vm9993_vm2 = vmand %vm17408_vm11, %vm17407_vm8  ;;  %v2768_v6 = vsel %vm9976_vm0, %v17411_v4, -inf  ;;  %vm17412_vm1 = vcmp.ge.s32.totalorder %v17365_v36, %v9779_v35  ;;  %v2799_v19 = vmax.f32 %v2795_v5, %v2765_v54  ;;  %v2800_v2 = vmax.f32 %v2796_v14, %v2766_v13  ;;  %v17422_v10 = vld [vmem:[#allocation80_spill] sm:$0xff]  ;;  %v17424_v9 = vld [vmem:[#allocation19_spill] sm:$0xff] }
 0x280   : > { %vm2656_vm7 = vmand %vm17412_vm1, %vm2618_vm10  ;;  %v2769_v39 = vsel %vm9993_vm2, %v17413_v34, -inf  ;;  %v2801_v3 = vmax.f32 %v2797_v63, %v2767_v44  ;;  %vm2583_vm9 = vcmp.ge.s32.totalorder %v17414_v47, %v9779_v35  ;;  %vm2622_vm3 = vcmp.lt.s32.totalorder %v17372_v60, %v9781_v61  ;;  %v17425_v31 = vld [vmem:[#allocation81_spill] sm:$0xff]  ;;  %v17426_v7 = vld [vmem:[#allocation22_spill] sm:$0xff] }
 0x281   : > { %vm17415_vm5 = vcmp.ge.s32.totalorder %v17366_v48, %v9779_v35  ;;  %v2770_v52 = vsel %vm2656_vm7, %v17416_v32, -inf  ;;  %v2802_v41 = vmax.f32 %v2798_v38, %v2768_v6  ;;  %vm2623_vm6 = vcmp.lt.s32.totalorder %v17414_v47, %v9781_v61  ;;  %v17419_v48 = vld [vmem:[#allocation79_spill] sm:$0xff]  ;;  %v17427_v55 = vld [vmem:[#allocation82_spill] sm:$0xff]  ;;  %v17431_v30 = vld [vmem:[#allocation84_spill] sm:$0xff] }
 0x282   : > { %vm2657_vm10 = vmand %vm17415_vm5, %vm2619_vm13  ;;  %vm17417_vm12 = vcmp.ge.s32.totalorder %v17367_v0, %v9779_v35  ;;  %v2803_v23 = vmax.f32 %v2799_v19, %v2769_v39  ;;  %v2804_v28 = vmax.f32 %v2800_v2, %v2770_v52  ;;  %vm2584_vm13 = vcmp.ge.s32.totalorder %v17419_v48, %v9779_v35  ;;  %v17428_v18 = vld [vmem:[#allocation23_spill] sm:$0xff]  ;;  %v17430_v62 = vld [vmem:[#allocation26_spill] sm:$0xff] }
 0x283   : > { %vm2658_vm15 = vmand %vm17417_vm12, %vm2620_vm14  ;;  %v2771_v36 = vsel %vm2657_vm10, %v17418_v17, -inf  ;;  %vm2624_vm0 = vcmp.lt.s32.totalorder %v17419_v48, %v9781_v61  ;;  %vm17420_vm8 = vcmp.ge.s32.totalorder %v17371_v11, %v9779_v35  ;;  %vm2585_vm14 = vcmp.ge.s32.totalorder %v17422_v10, %v9779_v35  ;;  %v17429_v37 = vld [vmem:[#allocation83_spill] sm:$0xff]  ;;  %v17433_v53 = vld [vmem:[#allocation85_spill] sm:$0xff] }
 0x284   : > { %vm2659_vm11 = vmand %vm17420_vm8, %vm2621_vm4  ;;  %v2772_v0 = vsel %vm2658_vm15, %v17421_v20, -inf  ;;  %v2805_v12 = vmax.f32 %v2801_v3, %v2771_v36  ;;  %vm2625_vm2 = vcmp.lt.s32.totalorder %v17422_v10, %v9781_v61  ;;  %vm17423_vm1 = vcmp.ge.s32.totalorder %v17372_v60, %v9779_v35  ;;  %v17432_v22 = vld [vmem:[#allocation27_spill] sm:$0xff]  ;;  %v17434_v26 = vld [vmem:[#allocation30_spill] sm:$0xff] }
 0x285   : > { %vm2660_vm7 = vmand %vm17423_vm1, %vm2622_vm3  ;;  %v2773_v45 = vsel %vm2659_vm11, %v17424_v9, -inf  ;;  %v2806_v11 = vmax.f32 %v2802_v41, %v2772_v0  ;;  %vm2586_vm4 = vcmp.ge.s32.totalorder %v17425_v31, %v9779_v35  ;;  %vm2626_vm5 = vcmp.lt.s32.totalorder %v17425_v31, %v9781_v61  ;;  %v17435_v56 = vld [vmem:[#allocation86_spill] sm:$0xff]  ;;  %v17436_v13 = vld [vmem:[#allocation31_spill] sm:$0xff] }
 0x286   : > { %vm2661_vm10 = vmand %vm2583_vm9, %vm2623_vm6  ;;  %v2774_v21 = vsel %vm2660_vm7, %v17426_v7, -inf  ;;  %v2807_v60 = vmax.f32 %v2803_v23, %v2773_v45  ;;  %vm2587_vm3 = vcmp.ge.s32.totalorder %v17427_v55, %v9779_v35  ;;  %vm2627_vm12 = vcmp.lt.s32.totalorder %v17427_v55, %v9781_v61  ;;  %v17437_v1 = vld [vmem:[#allocation87_spill] sm:$0xff]  ;;  %v17438_v44 = vld [vmem:[#allocation34_spill] sm:$0xff] }
 0x287   : > { %vm2662_vm15 = vmand %vm2584_vm13, %vm2624_vm0  ;;  %v2775_v24 = vsel %vm2661_vm10, %v17428_v18, -inf  ;;  %v2808_v57 = vmax.f32 %v2804_v28, %v2774_v21  ;;  %vm2588_vm9 = vcmp.ge.s32.totalorder %v17429_v37, %v9779_v35  ;;  %vm2628_vm6 = vcmp.lt.s32.totalorder %v17429_v37, %v9781_v61  ;;  %v17439_v63 = vld [vmem:[#allocation88_spill] sm:$0xff]  ;;  %v17441_v38 = vld [vmem:[#allocation89_spill] sm:$0xff] }
 0x288   : > { %vm2663_vm8 = vmand %vm2585_vm14, %vm2625_vm2  ;;  %v2776_v33 = vsel %vm2662_vm15, %v17430_v62, -inf  ;;  %v2809_v40 = vmax.f32 %v2805_v12, %v2775_v24  ;;  %vm2589_vm13 = vcmp.ge.s32.totalorder %v17431_v30, %v9779_v35  ;;  %vm2629_vm0 = vcmp.lt.s32.totalorder %v17431_v30, %v9781_v61  ;;  %v17440_v50 = vld [vmem:[#allocation36_spill] sm:$0xff]  ;;  %v17443_v2 = vld [vmem:[#allocation90_spill] sm:$0xff] }
 0x289   : > { %vm2664_vm11 = vmand %vm2586_vm4, %vm2626_vm5  ;;  %v2777_v42 = vsel %vm2663_vm8, %v17432_v22, -inf  ;;  %v2810_v49 = vmax.f32 %v2806_v11, %v2776_v33  ;;  %vm2590_vm14 = vcmp.ge.s32.totalorder %v17433_v53, %v9779_v35  ;;  %vm2630_vm2 = vcmp.lt.s32.totalorder %v17433_v53, %v9781_v61  ;;  %v17442_v34 = vld [vmem:[#allocation40_spill] sm:$0xff]  ;;  %v17444_v3 = vld [vmem:[#allocation42_spill] sm:$0xff] }
 0x28a   : > { %vm2665_vm1 = vmand %vm2587_vm3, %vm2627_vm12  ;;  %v2778_v51 = vsel %vm2664_vm11, %v17434_v26, -inf  ;;  %v2811_v54 = vmax.f32 %v2807_v60, %v2777_v42  ;;  %vm2591_vm7 = vcmp.ge.s32.totalorder %v17435_v56, %v9779_v35  ;;  %vm2631_vm4 = vcmp.lt.s32.totalorder %v17435_v56, %v9781_v61  ;;  %v17445_v52 = vld [vmem:[#allocation91_spill] sm:$0xff]  ;;  %v17446_v41 = vld [vmem:[#allocation46_spill] sm:$0xff] }
 0x28b   : > { %vm2666_vm5 = vmand %vm2588_vm9, %vm2628_vm6  ;;  %v2779_v16 = vsel %vm2665_vm1, %v17436_v13, -inf  ;;  %v2812_v43 = vmax.f32 %v2808_v57, %v2778_v51  ;;  %vm2592_vm10 = vcmp.ge.s32.totalorder %v17437_v1, %v9779_v35  ;;  %vm2632_vm3 = vcmp.lt.s32.totalorder %v17437_v1, %v9781_v61  ;;  %v17447_v23 = vld [vmem:[#allocation92_spill] sm:$0xff]  ;;  %v17449_v0 = vld [vmem:[#allocation93_spill] sm:$0xff] }
 0x28c   : > { %vm2667_vm12 = vmand %vm2589_vm13, %vm2629_vm0  ;;  %v2780_v5 = vsel %vm2666_vm5, %v17438_v44, -inf  ;;  %v2813_v14 = vmax.f32 %v2809_v40, %v2779_v16  ;;  %vm2593_vm15 = vcmp.ge.s32.totalorder %v17439_v63, %v9779_v35  ;;  %vm2633_vm9 = vcmp.lt.s32.totalorder %v17439_v63, %v9781_v61  ;;  %v17448_v28 = vld [vmem:[#allocation48_spill] sm:$0xff]  ;;  %v17451_v45 = vld [vmem:[#allocation94_spill] sm:$0xff] }
 0x28d   : > { %vm2668_vm6 = vmand %vm2590_vm14, %vm2630_vm2  ;;  %v2781_v4 = vsel %vm2667_vm12, %v17440_v50, -inf  ;;  %v2814_v6 = vmax.f32 %v2810_v49, %v2780_v5  ;;  %vm2594_vm8 = vcmp.ge.s32.totalorder %v17441_v38, %v9779_v35  ;;  %vm2634_vm13 = vcmp.lt.s32.totalorder %v17441_v38, %v9781_v61  ;;  %v17450_v12 = vld [vmem:[#allocation52_spill] sm:$0xff]  ;;  %v17452_v11 = vld [vmem:[#allocation54_spill] sm:$0xff] }
 0x28e   : > { %vm2669_vm0 = vmand %vm2591_vm7, %vm2631_vm4  ;;  %v2782_v39 = vsel %vm2668_vm6, %v17442_v34, -inf  ;;  %v2815_v19 = vmax.f32 %v2811_v54, %v2781_v4  ;;  %vm2595_vm11 = vcmp.ge.s32.totalorder %v17443_v2, %v9779_v35  ;;  %vm2635_vm14 = vcmp.lt.s32.totalorder %v17443_v2, %v9781_v61  ;;  %v17453_v21 = vld [vmem:[#allocation95_spill] sm:$0xff]  ;;  %v17454_v18 = vld [vmem:[#allocation96_spill] sm:$0xff] }
 0x28f   : > { %vm2670_vm2 = vmand %vm2592_vm10, %vm2632_vm3  ;;  %v2783_v47 = vsel %vm2669_vm0, %v17444_v3, -inf  ;;  %v2816_v32 = vmax.f32 %v2812_v43, %v2782_v39  ;;  %vm2596_vm1 = vcmp.ge.s32.totalorder %v17445_v52, %v9779_v35  ;;  %vm2636_vm7 = vcmp.lt.s32.totalorder %v17445_v52, %v9781_v61  ;;  %v2837_v43 = vld [vmem:[%s8003_s15 + $0x2] sm:$0x1] }
 0x290   : > { %vm2671_vm4 = vmand %vm2593_vm15, %vm2633_vm9  ;;  %v2784_v17 = vsel %vm2670_vm2, %v17446_v41, -inf  ;;  %v2817_v36 = vmax.f32 %v2813_v14, %v2783_v47  ;;  %vm2597_vm5 = vcmp.ge.s32.totalorder %v17447_v23, %v9779_v35  ;;  %vm2637_vm10 = vcmp.lt.s32.totalorder %v17447_v23, %v9781_v61 }
 0x291   : > { %vm2672_vm3 = vmand %vm2594_vm8, %vm2634_vm13  ;;  %v2785_v48 = vsel %vm2671_vm4, %v17448_v28, -inf  ;;  %v2818_v20 = vmax.f32 %v2814_v6, %v2784_v17  ;;  %vm2598_vm12 = vcmp.ge.s32.totalorder %v17449_v0, %v9779_v35  ;;  %vm2638_vm15 = vcmp.lt.s32.totalorder %v17449_v0, %v9781_v61 }
 0x292   : > { %vm2673_vm9 = vmand %vm2595_vm11, %vm2635_vm14  ;;  %v2786_v10 = vsel %vm2672_vm3, %v17450_v12, -inf  ;;  %v2819_v9 = vmax.f32 %v2815_v19, %v2785_v48  ;;  %vm2599_vm6 = vcmp.ge.s32.totalorder %v17451_v45, %v9779_v35  ;;  %vm2639_vm8 = vcmp.lt.s32.totalorder %v17451_v45, %v9781_v61 }
 0x293   : > { %vm2674_vm13 = vmand %vm2596_vm1, %vm2636_vm7  ;;  %v2787_v31 = vsel %vm2673_vm9, %v17452_v11, -inf  ;;  %v2820_v7 = vmax.f32 %v2816_v32, %v2786_v10  ;;  %vm2600_vm0 = vcmp.ge.s32.totalorder %v17453_v21, %v9779_v35  ;;  %vm2640_vm11 = vcmp.lt.s32.totalorder %v17453_v21, %v9781_v61 }
 0x294   : > { %vm2675_vm14 = vmand %vm2597_vm5, %vm2637_vm10  ;;  %v2788_v60 = vsel %vm2674_vm13, %v8583_v46, -inf  ;;  %v2821_v55 = vmax.f32 %v2817_v36, %v2787_v31  ;;  %vm2601_vm2 = vcmp.ge.s32.totalorder %v17454_v18, %v9779_v35  ;;  %vm2641_vm1 = vcmp.lt.s32.totalorder %v17454_v18, %v9781_v61 }
 0x295   : > { %vm2676_vm7 = vmand %vm2598_vm12, %vm2638_vm15  ;;  %v2789_v24 = vsel %vm2675_vm14, %v8586_v59, -inf  ;;  %v2822_v57 = vmax.f32 %v2818_v20, %v2788_v60 }
 0x296   : > { %vm2677_vm4 = vmand %vm2599_vm6, %vm2639_vm8  ;;  %v2790_v37 = vsel %vm2676_vm7, %v8591_v25, -inf  ;;  %v2823_v62 = vmax.f32 %v2819_v9, %v2789_v24 }
 0x297   : > { %vm2678_vm5 = vmand %vm2600_vm0, %vm2640_vm11  ;;  %v2791_v33 = vsel %vm2677_vm4, %v8594_v29, -inf  ;;  %v2824_v40 = vmax.f32 %v2820_v7, %v2790_v37 }
 0x298   : > { %vm2679_vm10 = vmand %vm2601_vm2, %vm2641_vm1  ;;  %v2792_v61 = vsel %vm2678_vm5, %v8604_v15, -inf  ;;  %v2825_v30 = vmax.f32 %v2821_v55, %v2791_v33 }
 0x299   : > { %v2793_v22 = vsel %vm2679_vm10, %v8609_v58, -inf  ;;  %v2826_v42 = vmax.f32 %v2822_v57, %v2792_v61 }
 0x29a   : > { %v2827_v49 = vmax.f32 %v2823_v62, %v2793_v22  ;;  %v2829_v53 = vmax.f32 %v2824_v40, %v2825_v30 }
 0x29c   : > { %v2828_v35 = vmax.f32 %v2826_v42, %v2827_v49 }
 0x29e   : > { %v2830_v26 = vmax.f32 %v2828_v35, %v2829_v53 }
 0x2a0   : > { %v2831_v51 = vrot.slane %v2830_v26, 4 }
 0x2a2   : > { %v2832_v54 = vmax.f32 %v2830_v26, %v2831_v51 }
 0x2a4   : > { %v2833_v56 = vrot.slane %v2832_v54, 2 }
 0x2a6   : > { %v2834_v13 = vmax.f32 %v2832_v54, %v2833_v56 }
 0x2a8   : > { %v2835_v16 = vrot.slane %v2834_v13, 1 }
 0x2aa   : > { %v2836_v1 = vmax.f32 %v2834_v13, %v2835_v16 }
 0x2ac   : > { %v2838_v44 = vmax.f32 %v2837_v43, %v2836_v1 }
 0x2ae   : > { %2839 = vst [vmem:[%s8003_s15 + $0x2] sm:$0x1] %v2838_v44 }
 0x2af PF: > { %s6819_s14 = sld [smem:[#allocation5 + $0x3]]  ;;  %s6820_s20 = sld [smem:[#allocation5 + $0x4]] }
 0x2b5   : > { %p2843_p0 = scmp.gt.s32.totalorder %s6819_s14, %s8822_s23  ;;  %p2845_p13 = scmp.lt.s32.totalorder %s6820_s20, %s8829_s21 }
 0x2b7   : > { %s2844_s29 = scalar_select %p2843_p0, %s6819_s14, %s8822_s23 }
 0x2b8   : > { %s2846_s30 = scalar_select %p2845_p13, %s6820_s20, %s8829_s21 }
 0x2ba   : > { %p6821_p4 = scmp.ge.s32.totalorder %s2844_s29, %s2846_s30 }
 0x2bb   : > { %s2851_s12 = ssub.s32 (!%p6821_p4), %s6819_s14, %s8822_s23  ;;  %s2891_s24 = ssub.s32 (!%p6821_p4), %s6820_s20, %s8822_s23  ;;  %v17455_v63 = vld [vmem:[#allocation61_spill] sm:$0xff] (!%p6821_p4)  ;;  %v17456_v50 = vld [vmem:[#allocation62_spill] sm:$0xff] (!%p6821_p4)  ;;  %v17459_v6 = vld [vmem:[#allocation63_spill] sm:$0xff] (!%p6821_p4)  ;;  %v17483_v12 = vmov (!%p6821_p4), 0 }
 0x2bc   : > { %2850 = sbr.rel (%p6821_p4) target bundleno = 763 (0x2fb), region = 56  ;;  %v10242_v5 = vstv (!%p6821_p4), %s2851_s12  ;;  %v10244_v14 = vstv (!%p6821_p4), %s2891_s24  ;;  %v17462_v34 = vld [vmem:[#allocation64_spill] sm:$0xff] (!%p6821_p4)  ;;  %v17465_v19 = vld [vmem:[#allocation65_spill] sm:$0xff] (!%p6821_p4)  ;;  %v17466_v2 = vld [vmem:[#allocation66_spill] sm:$0xff] (!%p6821_p4) }
 0x2bd   : > { %vm2853_vm3 = vcmp.ge.s32.totalorder (!%p6821_p4), %v8307_v27, %v10242_v5  ;;  %vm2854_vm12 = vcmp.ge.s32.totalorder (!%p6821_p4), %v8329_v8, %v10242_v5  ;;  %vm2855_vm15 = vcmp.ge.s32.totalorder (!%p6821_p4), %v17455_v63, %v10242_v5  ;;  %vm2893_vm9 = vcmp.lt.s32.totalorder (!%p6821_p4), %v8307_v27, %v10244_v14  ;;  %v17469_v47 = vld [vmem:[#allocation67_spill] sm:$0xff] (!%p6821_p4)  ;;  %v17470_v32 = vld [vmem:[#allocation68_spill] sm:$0xff] (!%p6821_p4)  ;;  %v17471_v52 = vld [vmem:[#allocation69_spill] sm:$0xff] (!%p6821_p4) }
 0x2be   : > { %vm2894_vm6 = vcmp.lt.s32.totalorder (!%p6821_p4), %v8329_v8, %v10244_v14  ;;  %vm2856_vm8 = vcmp.ge.s32.totalorder (!%p6821_p4), %v17456_v50, %v10242_v5  ;;  %vm2895_vm13 = vcmp.lt.s32.totalorder (!%p6821_p4), %v17455_v63, %v10244_v14  ;;  %vm2896_vm0 = vcmp.lt.s32.totalorder (!%p6821_p4), %v17456_v50, %v10244_v14  ;;  %vm10262_vm11 = vmand (!%p6821_p4), %vm2853_vm3, %vm2893_vm9  ;;  %v17474_v17 = vld [vmem:[#allocation70_spill] sm:$0xff] (!%p6821_p4)  ;;  %v17475_v36 = vld [vmem:[#allocation71_spill] sm:$0xff] (!%p6821_p4) }
 0x2bf   : > { %vm2857_vm14 = vcmp.ge.s32.totalorder (!%p6821_p4), %v17459_v6, %v10242_v5  ;;  %vm2897_vm2 = vcmp.lt.s32.totalorder (!%p6821_p4), %v17459_v6, %v10244_v14  ;;  %vm10270_vm1 = vmand (!%p6821_p4), %vm2854_vm12, %vm2894_vm6  ;;  %vm2858_vm7 = vcmp.ge.s32.totalorder (!%p6821_p4), %v17462_v34, %v10242_v5  ;;  %vm2898_vm4 = vcmp.lt.s32.totalorder (!%p6821_p4), %v17462_v34, %v10244_v14  ;;  %v17476_v23 = vld [vmem:[#allocation72_spill] sm:$0xff] (!%p6821_p4)  ;;  %v17479_v48 = vld [vmem:[#allocation73_spill] sm:$0xff] (!%p6821_p4) }
 0x2c0   : > { %vm10278_vm5 = vmand (!%p6821_p4), %vm2855_vm15, %vm2895_vm13  ;;  %vm2899_vm12 = vcmp.lt.s32.totalorder (!%p6821_p4), %v17465_v19, %v10244_v14  ;;  %vm2900_vm10 = vcmp.lt.s32.totalorder (!%p6821_p4), %v17466_v2, %v10244_v14  ;;  %v17480_v20 = vld [vmem:[#allocation74_spill] sm:$0xff] (!%p6821_p4)  ;;  %v17481_v0 = vld [vmem:[#allocation75_spill] sm:$0xff] (!%p6821_p4)  ;;  %vm2903_vm6 = vcmp.lt.s32.totalorder (!%p6821_p4), %v17471_v52, %v10244_v14  ;;  %vm2907_vm15 = vcmp.lt.s32.totalorder (!%p6821_p4), %v17479_v48, %v10244_v14 }
 0x2c1   : > { %vm10288_vm9 = vmand (!%p6821_p4), %vm2856_vm8, %vm2896_vm0  ;;  %vm2902_vm8 = vcmp.lt.s32.totalorder (!%p6821_p4), %v17470_v32, %v10244_v14  ;;  %v17485_v10 = vld [vmem:[#allocation76_spill] sm:$0xff] (!%p6821_p4)  ;;  %v17486_v9 = vld [vmem:[#allocation77_spill] sm:$0xff] (!%p6821_p4)  ;;  %vm2908_vm13 = vcmp.lt.s32.totalorder (!%p6821_p4), %v17480_v20, %v10244_v14 }
 0x2c2   : > { %vm10300_vm3 = vmand (!%p6821_p4), %vm2857_vm14, %vm2897_vm2  ;;  %vm17494_vm2 = vcmp.ge.s32.totalorder (!%p6821_p4), %v17470_v32, %v10242_v5  ;;  %v17497_v7 = vld [vmem:[#allocation20_spill] sm:$0xff] (!%p6821_p4)  ;;  %v17498_v60 = vld [vmem:[#allocation21_spill] sm:$0xff] (!%p6821_p4) }
 0x2c3   : > { %vm10318_vm14 = vmand %vm2858_vm7, %vm2898_vm4  ;;  %vm17482_vm7 = vcmp.ge.s32.totalorder %v17465_v19, %v10242_v5  ;;  %v3045_v21 = vsel %vm10262_vm11, %v17497_v7, -inf  ;;  %v3046_v55 = vsel %vm10270_vm1, %v17498_v60, -inf  ;;  %v17499_v18 = vld [vmem:[#allocation24_spill] sm:$0xff]  ;;  %v17500_v57 = vld [vmem:[#allocation25_spill] sm:$0xff]  ;;  %vm17509_vm1 = vcmp.lt.s32.totalorder %v17474_v17, %v10244_v14 }
 0x2c4   : > { %vm10336_vm4 = vmand %vm17482_vm7, %vm2899_vm12  ;;  %vm17487_vm12 = vcmp.ge.s32.totalorder %v17466_v2, %v10242_v5  ;;  %v3047_v24 = vsel %vm10278_vm5, %v17499_v18, -inf  ;;  %v3048_v37 = vsel %vm10288_vm9, %v17500_v57, -inf  ;;  %v17504_v33 = vld [vmem:[#allocation28_spill] sm:$0xff]  ;;  %v17505_v61 = vld [vmem:[#allocation29_spill] sm:$0xff]  ;;  %vm17510_vm5 = vcmp.ge.s32.totalorder %v17474_v17, %v10242_v5 }
 0x2c5   : > { %v17484_v12 = vsel %vm10336_vm4, 4294967295, %v17483_v12  ;;  %vm10354_vm7 = vmand %vm17487_vm12, %vm2900_vm10  ;;  %vm17490_vm4 = vcmp.lt.s32.totalorder %v17469_v47, %v10244_v14  ;;  %vm17491_vm10 = vcmp.ge.s32.totalorder %v17469_v47, %v10242_v5  ;;  %v3049_v40 = vsel %vm10300_vm3, %v17504_v33, -inf  ;;  %v17506_v22 = vld [vmem:[#allocation32_spill] sm:$0xff]  ;;  %v17508_v49 = vld [vmem:[#allocation33_spill] sm:$0xff] }
 0x2c6   : > { %vm10372_vm12 = vmand %vm17491_vm10, %vm17490_vm4  ;;  %v3050_v30 = vsel %vm10318_vm14, %v17505_v61, -inf  ;;  %vm17507_vm11 = vnez %v17484_v12  ;;  %v3052_v53 = vsel %vm10354_vm7, %v17508_v49, -inf  ;;  %v17513_v26 = vld [vmem:[#allocation37_spill] sm:$0xff]  ;;  %v17514_v54 = vld [vmem:[#allocation38_spill] sm:$0xff]  ;;  %v3083_v43 = vmax.f32 %v3045_v21, %v3049_v40 }
 0x2c7   : > { %vm10379_vm0 = vmand %vm17494_vm2, %vm2902_vm8  ;;  %vm17501_vm8 = vcmp.ge.s32.totalorder %v17471_v52, %v10242_v5  ;;  %v3051_v42 = vsel %vm17507_vm11, %v17506_v22, -inf  ;;  %v3053_v51 = vsel %vm10372_vm12, %v17513_v26, -inf  ;;  %v17515_v13 = vld [vmem:[#allocation43_spill] sm:$0xff]  ;;  %vm17516_vm3 = vcmp.lt.s32.totalorder %v17475_v36, %v10244_v14  ;;  %v17520_v44 = vld [vmem:[#allocation44_spill] sm:$0xff] }
 0x2c8   : > { %vm10398_vm2 = vmand %vm17501_vm8, %vm2903_vm6  ;;  %v3054_v56 = vsel %vm10379_vm0, %v17514_v54, -inf  ;;  %vm17517_vm6 = vcmp.ge.s32.totalorder %v17475_v36, %v10242_v5  ;;  %v3084_v50 = vmax.f32 %v3046_v55, %v3050_v30  ;;  %v3085_v4 = vmax.f32 %v3047_v24, %v3051_v42  ;;  %v17525_v34 = vld [vmem:[#allocation49_spill] sm:$0xff]  ;;  %v17527_v2 = vld [vmem:[#allocation50_spill] sm:$0xff] }
 0x2c9   : > { %vm10420_vm9 = vmand %vm17510_vm5, %vm17509_vm1  ;;  %v3055_v16 = vsel %vm10398_vm2, %v17515_v13, -inf  ;;  %v3086_v6 = vmax.f32 %v3048_v37, %v3052_v53  ;;  %vm2909_vm0 = vcmp.lt.s32.totalorder %v17481_v0, %v10244_v14  ;;  %vm2910_vm4 = vcmp.lt.s32.totalorder %v17485_v10, %v10244_v14  ;;  %v17528_v41 = vld [vmem:[#allocation78_spill] sm:$0xff]  ;;  %v17530_v17 = vld [vmem:[#allocation55_spill] sm:$0xff] }
 0x2ca   : > { %vm10439_vm14 = vmand %vm17517_vm6, %vm17516_vm3  ;;  %v3056_v63 = vsel %vm10420_vm9, %v17520_v44, -inf  ;;  %vm17521_vm7 = vcmp.lt.s32.totalorder %v17476_v23, %v10244_v14  ;;  %vm17522_vm10 = vcmp.ge.s32.totalorder %v17476_v23, %v10242_v5  ;;  %v3087_v19 = vmax.f32 %v3083_v43, %v3053_v51  ;;  %v17532_v28 = vld [vmem:[#allocation56_spill] sm:$0xff]  ;;  %v17535_v11 = vld [vmem:[#allocation18_spill] sm:$0xff] }
 0x2cb   : > { %vm10456_vm12 = vmand %vm17522_vm10, %vm17521_vm7  ;;  %v3057_v39 = vsel %vm10439_vm14, %v17525_v34, -inf  ;;  %vm17526_vm8 = vcmp.ge.s32.totalorder %v17479_v48, %v10242_v5  ;;  %v3088_v47 = vmax.f32 %v3084_v50, %v3054_v56  ;;  %v3089_v32 = vmax.f32 %v3085_v4, %v3055_v16  ;;  %v17536_v7 = vld [vmem:[#allocation80_spill] sm:$0xff]  ;;  %v17538_v21 = vld [vmem:[#allocation19_spill] sm:$0xff] }
 0x2cc   : > { %vm2945_vm2 = vmand %vm17526_vm8, %vm2907_vm15  ;;  %v3058_v3 = vsel %vm10456_vm12, %v17527_v2, -inf  ;;  %v3090_v52 = vmax.f32 %v3086_v6, %v3056_v63  ;;  %vm2872_vm11 = vcmp.ge.s32.totalorder %v17528_v41, %v10242_v5  ;;  %vm2911_vm1 = vcmp.lt.s32.totalorder %v17486_v9, %v10244_v14  ;;  %v17539_v55 = vld [vmem:[#allocation81_spill] sm:$0xff]  ;;  %v17540_v18 = vld [vmem:[#allocation22_spill] sm:$0xff] }
 0x2cd   : > { %vm17529_vm5 = vcmp.ge.s32.totalorder %v17480_v20, %v10242_v5  ;;  %v3059_v36 = vsel %vm2945_vm2, %v17530_v17, -inf  ;;  %v3091_v23 = vmax.f32 %v3087_v19, %v3057_v39  ;;  %vm2912_vm9 = vcmp.lt.s32.totalorder %v17528_v41, %v10244_v14  ;;  %v17533_v20 = vld [vmem:[#allocation79_spill] sm:$0xff]  ;;  %v17541_v57 = vld [vmem:[#allocation82_spill] sm:$0xff]  ;;  %v17545_v42 = vld [vmem:[#allocation84_spill] sm:$0xff] }
 0x2ce   : > { %vm2946_vm15 = vmand %vm17529_vm5, %vm2908_vm13  ;;  %vm17531_vm3 = vcmp.ge.s32.totalorder %v17481_v0, %v10242_v5  ;;  %v3092_v12 = vmax.f32 %v3088_v47, %v3058_v3  ;;  %v3093_v45 = vmax.f32 %v3089_v32, %v3059_v36  ;;  %vm2873_vm13 = vcmp.ge.s32.totalorder %v17533_v20, %v10242_v5  ;;  %v17542_v37 = vld [vmem:[#allocation23_spill] sm:$0xff]  ;;  %v17544_v61 = vld [vmem:[#allocation26_spill] sm:$0xff] }
 0x2cf   : > { %vm2947_vm6 = vmand %vm17531_vm3, %vm2909_vm0  ;;  %v3060_v48 = vsel %vm2946_vm15, %v17532_v28, -inf  ;;  %vm2913_vm14 = vcmp.lt.s32.totalorder %v17533_v20, %v10244_v14  ;;  %vm17534_vm7 = vcmp.ge.s32.totalorder %v17485_v10, %v10242_v5  ;;  %vm2874_vm0 = vcmp.ge.s32.totalorder %v17536_v7, %v10242_v5  ;;  %v17543_v40 = vld [vmem:[#allocation83_spill] sm:$0xff]  ;;  %v17547_v26 = vld [vmem:[#allocation85_spill] sm:$0xff] }
 0x2d0   : > { %vm2948_vm10 = vmand %vm17534_vm7, %vm2910_vm4  ;;  %v3061_v0 = vsel %vm2947_vm6, %v17535_v11, -inf  ;;  %v3094_v31 = vmax.f32 %v3090_v52, %v3060_v48  ;;  %vm2914_vm12 = vcmp.lt.s32.totalorder %v17536_v7, %v10244_v14  ;;  %vm17537_vm8 = vcmp.ge.s32.totalorder %v17486_v9, %v10242_v5  ;;  %v17546_v49 = vld [vmem:[#allocation27_spill] sm:$0xff]  ;;  %v17548_v51 = vld [vmem:[#allocation30_spill] sm:$0xff] }
 0x2d1   : > { %vm2949_vm2 = vmand %vm17537_vm8, %vm2911_vm1  ;;  %v3062_v60 = vsel %vm2948_vm10, %v17538_v21, -inf  ;;  %v3095_v10 = vmax.f32 %v3091_v23, %v3061_v0  ;;  %vm2875_vm4 = vcmp.ge.s32.totalorder %v17539_v55, %v10242_v5  ;;  %vm2915_vm5 = vcmp.lt.s32.totalorder %v17539_v55, %v10244_v14  ;;  %v17549_v13 = vld [vmem:[#allocation86_spill] sm:$0xff]  ;;  %v17550_v16 = vld [vmem:[#allocation31_spill] sm:$0xff] }
 0x2d2   : > { %vm2950_vm15 = vmand %vm2872_vm11, %vm2912_vm9  ;;  %v3063_v24 = vsel %vm2949_vm2, %v17540_v18, -inf  ;;  %v3096_v9 = vmax.f32 %v3092_v12, %v3062_v60  ;;  %vm2876_vm1 = vcmp.ge.s32.totalorder %v17541_v57, %v10242_v5  ;;  %vm2916_vm3 = vcmp.lt.s32.totalorder %v17541_v57, %v10244_v14  ;;  %v17551_v44 = vld [vmem:[#allocation87_spill] sm:$0xff]  ;;  %v17552_v63 = vld [vmem:[#allocation34_spill] sm:$0xff] }
 0x2d3   : > { %vm2951_vm6 = vmand %vm2873_vm13, %vm2913_vm14  ;;  %v3064_v62 = vsel %vm2950_vm15, %v17542_v37, -inf  ;;  %v3097_v33 = vmax.f32 %v3093_v45, %v3063_v24  ;;  %vm2877_vm11 = vcmp.ge.s32.totalorder %v17543_v40, %v10242_v5  ;;  %vm2917_vm9 = vcmp.lt.s32.totalorder %v17543_v40, %v10244_v14  ;;  %v17553_v6 = vld [vmem:[#allocation88_spill] sm:$0xff]  ;;  %v17555_v19 = vld [vmem:[#allocation89_spill] sm:$0xff] }
 0x2d4   : > { %vm2952_vm7 = vmand %vm2874_vm0, %vm2914_vm12  ;;  %v3065_v30 = vsel %vm2951_vm6, %v17544_v61, -inf  ;;  %v3098_v22 = vmax.f32 %v3094_v31, %v3064_v62  ;;  %vm2878_vm13 = vcmp.ge.s32.totalorder %v17545_v42, %v10242_v5  ;;  %vm2918_vm14 = vcmp.lt.s32.totalorder %v17545_v42, %v10244_v14  ;;  %v17554_v38 = vld [vmem:[#allocation36_spill] sm:$0xff]  ;;  %v17557_v32 = vld [vmem:[#allocation90_spill] sm:$0xff] }
 0x2d5   : > { %vm2953_vm10 = vmand %vm2875_vm4, %vm2915_vm5  ;;  %v3066_v53 = vsel %vm2952_vm7, %v17546_v49, -inf  ;;  %v3099_v35 = vmax.f32 %v3095_v10, %v3065_v30  ;;  %vm2879_vm0 = vcmp.ge.s32.totalorder %v17547_v26, %v10242_v5  ;;  %vm2919_vm12 = vcmp.lt.s32.totalorder %v17547_v26, %v10244_v14  ;;  %v17556_v2 = vld [vmem:[#allocation40_spill] sm:$0xff]  ;;  %v17558_v52 = vld [vmem:[#allocation42_spill] sm:$0xff] }
 0x2d6   : > { %vm2954_vm8 = vmand %vm2876_vm1, %vm2916_vm3  ;;  %v3067_v54 = vsel %vm2953_vm10, %v17548_v51, -inf  ;;  %v3100_v56 = vmax.f32 %v3096_v9, %v3066_v53  ;;  %vm2880_vm2 = vcmp.ge.s32.totalorder %v17549_v13, %v10242_v5  ;;  %vm2920_vm4 = vcmp.lt.s32.totalorder %v17549_v13, %v10244_v14  ;;  %v17559_v36 = vld [vmem:[#allocation91_spill] sm:$0xff]  ;;  %v17560_v23 = vld [vmem:[#allocation46_spill] sm:$0xff] }
 0x2d7   : > { %vm2955_vm5 = vmand %vm2877_vm11, %vm2917_vm9  ;;  %v3068_v43 = vsel %vm2954_vm8, %v17550_v16, -inf  ;;  %v3101_v1 = vmax.f32 %v3097_v33, %v3067_v54  ;;  %vm2881_vm15 = vcmp.ge.s32.totalorder %v17551_v44, %v10242_v5  ;;  %vm2921_vm1 = vcmp.lt.s32.totalorder %v17551_v44, %v10244_v14  ;;  %v17561_v12 = vld [vmem:[#allocation92_spill] sm:$0xff]  ;;  %v17563_v0 = vld [vmem:[#allocation93_spill] sm:$0xff] }
 0x2d8   : > { %vm2956_vm3 = vmand %vm2878_vm13, %vm2918_vm14  ;;  %v3069_v50 = vsel %vm2955_vm5, %v17552_v63, -inf  ;;  %v3102_v4 = vmax.f32 %v3098_v22, %v3068_v43  ;;  %vm2882_vm6 = vcmp.ge.s32.totalorder %v17553_v6, %v10242_v5  ;;  %vm2922_vm11 = vcmp.lt.s32.totalorder %v17553_v6, %v10244_v14  ;;  %v17562_v45 = vld [vmem:[#allocation48_spill] sm:$0xff]  ;;  %v17565_v60 = vld [vmem:[#allocation94_spill] sm:$0xff] }
 0x2d9   : > { %vm2957_vm9 = vmand %vm2879_vm0, %vm2919_vm12  ;;  %v3070_v34 = vsel %vm2956_vm3, %v17554_v38, -inf  ;;  %v3103_v39 = vmax.f32 %v3099_v35, %v3069_v50  ;;  %vm2883_vm7 = vcmp.ge.s32.totalorder %v17555_v19, %v10242_v5  ;;  %vm2923_vm13 = vcmp.lt.s32.totalorder %v17555_v19, %v10244_v14  ;;  %v17564_v31 = vld [vmem:[#allocation52_spill] sm:$0xff]  ;;  %v17566_v10 = vld [vmem:[#allocation54_spill] sm:$0xff] }
 0x2da   : > { %vm2958_vm14 = vmand %vm2880_vm2, %vm2920_vm4  ;;  %v3071_v3 = vsel %vm2957_vm9, %v17556_v2, -inf  ;;  %v3104_v47 = vmax.f32 %v3100_v56, %v3070_v34  ;;  %vm2884_vm10 = vcmp.ge.s32.totalorder %v17557_v32, %v10242_v5  ;;  %vm2924_vm0 = vcmp.lt.s32.totalorder %v17557_v32, %v10244_v14  ;;  %v17567_v24 = vld [vmem:[#allocation95_spill] sm:$0xff]  ;;  %v17568_v37 = vld [vmem:[#allocation96_spill] sm:$0xff] }
 0x2db   : > { %vm2959_vm12 = vmand %vm2881_vm15, %vm2921_vm1  ;;  %v3072_v41 = vsel %vm2958_vm14, %v17558_v52, -inf  ;;  %v3105_v17 = vmax.f32 %v3101_v1, %v3071_v3  ;;  %vm2885_vm8 = vcmp.ge.s32.totalorder %v17559_v36, %v10242_v5  ;;  %vm2925_vm2 = vcmp.lt.s32.totalorder %v17559_v36, %v10244_v14  ;;  %v3126_v1 = vld [vmem:[%s8003_s15 + $0x3] sm:$0x1] }
 0x2dc   : > { %vm2960_vm4 = vmand %vm2882_vm6, %vm2922_vm11  ;;  %v3073_v28 = vsel %vm2959_vm12, %v17560_v23, -inf  ;;  %v3106_v48 = vmax.f32 %v3102_v4, %v3072_v41  ;;  %vm2886_vm5 = vcmp.ge.s32.totalorder %v17561_v12, %v10242_v5  ;;  %vm2926_vm15 = vcmp.lt.s32.totalorder %v17561_v12, %v10244_v14 }
 0x2dd   : > { %vm2961_vm1 = vmand %vm2883_vm7, %vm2923_vm13  ;;  %v3074_v20 = vsel %vm2960_vm4, %v17562_v45, -inf  ;;  %v3107_v11 = vmax.f32 %v3103_v39, %v3073_v28  ;;  %vm2887_vm3 = vcmp.ge.s32.totalorder %v17563_v0, %v10242_v5  ;;  %vm2927_vm6 = vcmp.lt.s32.totalorder %v17563_v0, %v10244_v14 }
 0x2de   : > { %vm2962_vm11 = vmand %vm2884_vm10, %vm2924_vm0  ;;  %v3075_v7 = vsel %vm2961_vm1, %v17564_v31, -inf  ;;  %v3108_v21 = vmax.f32 %v3104_v47, %v3074_v20  ;;  %vm2888_vm9 = vcmp.ge.s32.totalorder %v17565_v60, %v10242_v5  ;;  %vm2928_vm7 = vcmp.lt.s32.totalorder %v17565_v60, %v10244_v14 }
 0x2df   : > { %vm2963_vm13 = vmand %vm2885_vm8, %vm2925_vm2  ;;  %v3076_v55 = vsel %vm2962_vm11, %v17566_v10, -inf  ;;  %v3109_v18 = vmax.f32 %v3105_v17, %v3075_v7  ;;  %vm2889_vm14 = vcmp.ge.s32.totalorder %v17567_v24, %v10242_v5  ;;  %vm2929_vm10 = vcmp.lt.s32.totalorder %v17567_v24, %v10244_v14 }
 0x2e0   : > { %vm2964_vm0 = vmand %vm2886_vm5, %vm2926_vm15  ;;  %v3077_v9 = vsel %vm2963_vm13, %v8583_v46, -inf  ;;  %v3110_v57 = vmax.f32 %v3106_v48, %v3076_v55  ;;  %vm2890_vm12 = vcmp.ge.s32.totalorder %v17568_v37, %v10242_v5  ;;  %vm2930_vm8 = vcmp.lt.s32.totalorder %v17568_v37, %v10244_v14 }
 0x2e1   : > { %vm2965_vm2 = vmand %vm2887_vm3, %vm2927_vm6  ;;  %v3078_v62 = vsel %vm2964_vm0, %v8586_v59, -inf  ;;  %v3111_v33 = vmax.f32 %v3107_v11, %v3077_v9 }
 0x2e2   : > { %vm2966_vm4 = vmand %vm2888_vm9, %vm2928_vm7  ;;  %v3079_v40 = vsel %vm2965_vm2, %v8591_v25, -inf  ;;  %v3112_v61 = vmax.f32 %v3108_v21, %v3078_v62 }
 0x2e3   : > { %vm2967_vm5 = vmand %vm2889_vm14, %vm2929_vm10  ;;  %v3080_v30 = vsel %vm2966_vm4, %v8594_v29, -inf  ;;  %v3113_v22 = vmax.f32 %v3109_v18, %v3079_v40 }
 0x2e4   : > { %vm2968_vm15 = vmand %vm2890_vm12, %vm2930_vm8  ;;  %v3081_v14 = vsel %vm2967_vm5, %v8604_v15, -inf  ;;  %v3114_v42 = vmax.f32 %v3110_v57, %v3080_v30 }
 0x2e5   : > { %v3082_v49 = vsel %vm2968_vm15, %v8609_v58, -inf  ;;  %v3115_v53 = vmax.f32 %v3111_v33, %v3081_v14 }
 0x2e6   : > { %v3116_v35 = vmax.f32 %v3112_v61, %v3082_v49  ;;  %v3118_v26 = vmax.f32 %v3113_v22, %v3114_v42 }
 0x2e8   : > { %v3117_v5 = vmax.f32 %v3115_v53, %v3116_v35 }
 0x2ea   : > { %v3119_v51 = vmax.f32 %v3117_v5, %v3118_v26 }
 0x2ec   : > { %v3120_v54 = vrot.slane %v3119_v51, 4 }
 0x2ee   : > { %v3121_v56 = vmax.f32 %v3119_v51, %v3120_v54 }
 0x2f0   : > { %v3122_v13 = vrot.slane %v3121_v56, 2 }
 0x2f2   : > { %v3123_v16 = vmax.f32 %v3121_v56, %v3122_v13 }
 0x2f4   : > { %v3124_v43 = vrot.slane %v3123_v16, 1 }
 0x2f6   : > { %v3125_v44 = vmax.f32 %v3123_v16, %v3124_v43 }
 0x2f8   : > { %v3127_v63 = vmax.f32 %v3126_v1, %v3125_v44 }
 0x2fa   : > { %3128 = vst [vmem:[%s8003_s15 + $0x3] sm:$0x1] %v3127_v63 }
 0x2fb PF: > { %s6822_s18 = sld [smem:[#allocation5 + $0x4]]  ;;  %s6823_s22 = sld [smem:[#allocation5 + $0x5]] }
 0x301   : > { %p3132_p7 = scmp.gt.s32.totalorder %s6822_s18, %s8822_s23  ;;  %p3134_p9 = scmp.lt.s32.totalorder %s6823_s22, %s8829_s21 }
 0x303   : > { %s3133_s25 = scalar_select %p3132_p7, %s6822_s18, %s8822_s23 }
 0x304   : > { %s3135_s19 = scalar_select %p3134_p9, %s6823_s22, %s8829_s21 }
 0x306   : > { %p6824_p5 = scmp.ge.s32.totalorder %s3133_s25, %s3135_s19 }
 0x307   : > { %s3140_s17 = ssub.s32 (!%p6824_p5), %s6822_s18, %s8822_s23  ;;  %s3180_s14 = ssub.s32 (!%p6824_p5), %s6823_s22, %s8822_s23  ;;  %v17569_v6 = vld [vmem:[#allocation61_spill] sm:$0xff] (!%p6824_p5)  ;;  %v17570_v38 = vld [vmem:[#allocation62_spill] sm:$0xff] (!%p6824_p5)  ;;  %v17573_v39 = vld [vmem:[#allocation63_spill] sm:$0xff] (!%p6824_p5)  ;;  %v17597_v31 = vmov (!%p6824_p5), 0 }
 0x308   : > { %3139 = sbr.rel (%p6824_p5) target bundleno = 839 (0x347), region = 60  ;;  %v10705_v50 = vstv (!%p6824_p5), %s3140_s17  ;;  %v10707_v4 = vstv (!%p6824_p5), %s3180_s14  ;;  %v17576_v2 = vld [vmem:[#allocation64_spill] sm:$0xff] (!%p6824_p5)  ;;  %v17579_v47 = vld [vmem:[#allocation65_spill] sm:$0xff] (!%p6824_p5)  ;;  %v17580_v32 = vld [vmem:[#allocation66_spill] sm:$0xff] (!%p6824_p5) }
 0x309   : > { %vm3142_vm1 = vcmp.ge.s32.totalorder (!%p6824_p5), %v8307_v27, %v10705_v50  ;;  %vm3143_vm3 = vcmp.ge.s32.totalorder (!%p6824_p5), %v8329_v8, %v10705_v50  ;;  %vm3144_vm6 = vcmp.ge.s32.totalorder (!%p6824_p5), %v17569_v6, %v10705_v50  ;;  %vm3182_vm11 = vcmp.lt.s32.totalorder (!%p6824_p5), %v8307_v27, %v10707_v4  ;;  %v17583_v41 = vld [vmem:[#allocation67_spill] sm:$0xff] (!%p6824_p5)  ;;  %v17584_v17 = vld [vmem:[#allocation68_spill] sm:$0xff] (!%p6824_p5)  ;;  %v17585_v36 = vld [vmem:[#allocation69_spill] sm:$0xff] (!%p6824_p5) }
 0x30a   : > { %vm3183_vm9 = vcmp.lt.s32.totalorder (!%p6824_p5), %v8329_v8, %v10707_v4  ;;  %vm3145_vm7 = vcmp.ge.s32.totalorder (!%p6824_p5), %v17570_v38, %v10705_v50  ;;  %vm3184_vm13 = vcmp.lt.s32.totalorder (!%p6824_p5), %v17569_v6, %v10707_v4  ;;  %vm3185_vm14 = vcmp.lt.s32.totalorder (!%p6824_p5), %v17570_v38, %v10707_v4  ;;  %vm10725_vm10 = vmand (!%p6824_p5), %vm3142_vm1, %vm3182_vm11  ;;  %v17588_v28 = vld [vmem:[#allocation70_spill] sm:$0xff] (!%p6824_p5)  ;;  %v17589_v48 = vld [vmem:[#allocation71_spill] sm:$0xff] (!%p6824_p5) }
 0x30b   : > { %vm3146_vm0 = vcmp.ge.s32.totalorder (!%p6824_p5), %v17573_v39, %v10705_v50  ;;  %vm3186_vm12 = vcmp.lt.s32.totalorder (!%p6824_p5), %v17573_v39, %v10707_v4  ;;  %vm10733_vm8 = vmand (!%p6824_p5), %vm3143_vm3, %vm3183_vm9  ;;  %vm3147_vm2 = vcmp.ge.s32.totalorder (!%p6824_p5), %v17576_v2, %v10705_v50  ;;  %vm3187_vm4 = vcmp.lt.s32.totalorder (!%p6824_p5), %v17576_v2, %v10707_v4  ;;  %v17590_v12 = vld [vmem:[#allocation72_spill] sm:$0xff] (!%p6824_p5)  ;;  %v17593_v20 = vld [vmem:[#allocation73_spill] sm:$0xff] (!%p6824_p5) }
 0x30c   : > { %vm10741_vm5 = vmand (!%p6824_p5), %vm3144_vm6, %vm3184_vm13  ;;  %vm3188_vm3 = vcmp.lt.s32.totalorder (!%p6824_p5), %v17579_v47, %v10707_v4  ;;  %vm3189_vm15 = vcmp.lt.s32.totalorder (!%p6824_p5), %v17580_v32, %v10707_v4  ;;  %v17594_v11 = vld [vmem:[#allocation74_spill] sm:$0xff] (!%p6824_p5)  ;;  %v17595_v0 = vld [vmem:[#allocation75_spill] sm:$0xff] (!%p6824_p5)  ;;  %vm3192_vm9 = vcmp.lt.s32.totalorder (!%p6824_p5), %v17585_v36, %v10707_v4  ;;  %vm3196_vm6 = vcmp.lt.s32.totalorder (!%p6824_p5), %v17593_v20, %v10707_v4 }
 0x30d   : > { %vm10751_vm11 = vmand (!%p6824_p5), %vm3145_vm7, %vm3185_vm14  ;;  %vm3191_vm7 = vcmp.lt.s32.totalorder (!%p6824_p5), %v17584_v17, %v10707_v4  ;;  %v17599_v7 = vld [vmem:[#allocation76_spill] sm:$0xff] (!%p6824_p5)  ;;  %v17600_v21 = vld [vmem:[#allocation77_spill] sm:$0xff] (!%p6824_p5)  ;;  %vm3197_vm13 = vcmp.lt.s32.totalorder (!%p6824_p5), %v17594_v11, %v10707_v4 }
 0x30e   : > { %vm10763_vm1 = vmand (!%p6824_p5), %vm3146_vm0, %vm3186_vm12  ;;  %vm17608_vm12 = vcmp.ge.s32.totalorder (!%p6824_p5), %v17584_v17, %v10705_v50  ;;  %v17611_v18 = vld [vmem:[#allocation20_spill] sm:$0xff] (!%p6824_p5)  ;;  %v17612_v9 = vld [vmem:[#allocation21_spill] sm:$0xff] (!%p6824_p5) }
 0x30f   : > { %vm10781_vm0 = vmand %vm3147_vm2, %vm3187_vm4  ;;  %vm17596_vm2 = vcmp.ge.s32.totalorder %v17579_v47, %v10705_v50  ;;  %v3334_v24 = vsel %vm10725_vm10, %v17611_v18, -inf  ;;  %v3335_v57 = vsel %vm10733_vm8, %v17612_v9, -inf  ;;  %v17613_v37 = vld [vmem:[#allocation24_spill] sm:$0xff]  ;;  %v17614_v33 = vld [vmem:[#allocation25_spill] sm:$0xff]  ;;  %vm17623_vm8 = vcmp.lt.s32.totalorder %v17588_v28, %v10707_v4 }
 0x310   : > { %vm10799_vm4 = vmand %vm17596_vm2, %vm3188_vm3  ;;  %vm17601_vm3 = vcmp.ge.s32.totalorder %v17580_v32, %v10705_v50  ;;  %v3336_v62 = vsel %vm10741_vm5, %v17613_v37, -inf  ;;  %v3337_v40 = vsel %vm10751_vm11, %v17614_v33, -inf  ;;  %v17618_v30 = vld [vmem:[#allocation28_spill] sm:$0xff]  ;;  %v17619_v14 = vld [vmem:[#allocation29_spill] sm:$0xff]  ;;  %vm17624_vm5 = vcmp.ge.s32.totalorder %v17588_v28, %v10705_v50 }
 0x311   : > { %v17598_v31 = vsel %vm10799_vm4, 4294967295, %v17597_v31  ;;  %vm10817_vm2 = vmand %vm17601_vm3, %vm3189_vm15  ;;  %vm17604_vm4 = vcmp.lt.s32.totalorder %v17583_v41, %v10707_v4  ;;  %vm17605_vm15 = vcmp.ge.s32.totalorder %v17583_v41, %v10705_v50  ;;  %v3338_v22 = vsel %vm10763_vm1, %v17618_v30, -inf  ;;  %v17620_v49 = vld [vmem:[#allocation32_spill] sm:$0xff]  ;;  %v17622_v35 = vld [vmem:[#allocation33_spill] sm:$0xff] }
 0x312   : > { %vm10835_vm3 = vmand %vm17605_vm15, %vm17604_vm4  ;;  %v3339_v42 = vsel %vm10781_vm0, %v17619_v14, -inf  ;;  %vm17621_vm10 = vnez %v17598_v31  ;;  %v3341_v26 = vsel %vm10817_vm2, %v17622_v35, -inf  ;;  %v17627_v51 = vld [vmem:[#allocation37_spill] sm:$0xff]  ;;  %v17628_v56 = vld [vmem:[#allocation38_spill] sm:$0xff]  ;;  %v3372_v1 = vmax.f32 %v3334_v24, %v3338_v22 }
 0x313   : > { %vm10842_vm14 = vmand %vm17608_vm12, %vm3191_vm7  ;;  %vm17615_vm7 = vcmp.ge.s32.totalorder %v17585_v36, %v10705_v50  ;;  %v3340_v53 = vsel %vm17621_vm10, %v17620_v49, -inf  ;;  %v3342_v54 = vsel %vm10835_vm3, %v17627_v51, -inf  ;;  %v17629_v16 = vld [vmem:[#allocation43_spill] sm:$0xff]  ;;  %vm17630_vm1 = vcmp.lt.s32.totalorder %v17589_v48, %v10707_v4  ;;  %v17634_v63 = vld [vmem:[#allocation44_spill] sm:$0xff] }
 0x314   : > { %vm10861_vm12 = vmand %vm17615_vm7, %vm3192_vm9  ;;  %v3343_v13 = vsel %vm10842_vm14, %v17628_v56, -inf  ;;  %vm17631_vm9 = vcmp.ge.s32.totalorder %v17589_v48, %v10705_v50  ;;  %v3373_v38 = vmax.f32 %v3335_v57, %v3339_v42  ;;  %v3374_v34 = vmax.f32 %v3336_v62, %v3340_v53  ;;  %v17639_v2 = vld [vmem:[#allocation49_spill] sm:$0xff]  ;;  %v17641_v32 = vld [vmem:[#allocation50_spill] sm:$0xff] }
 0x315   : > { %vm10883_vm11 = vmand %vm17624_vm5, %vm17623_vm8  ;;  %v3344_v43 = vsel %vm10861_vm12, %v17629_v16, -inf  ;;  %v3375_v39 = vmax.f32 %v3337_v40, %v3341_v26  ;;  %vm3198_vm14 = vcmp.lt.s32.totalorder %v17595_v0, %v10707_v4  ;;  %vm3199_vm4 = vcmp.lt.s32.totalorder %v17599_v7, %v10707_v4  ;;  %v17642_v23 = vld [vmem:[#allocation78_spill] sm:$0xff]  ;;  %v17644_v28 = vld [vmem:[#allocation55_spill] sm:$0xff] }
 0x316   : > { %vm10902_vm0 = vmand %vm17631_vm9, %vm17630_vm1  ;;  %v3345_v6 = vsel %vm10883_vm11, %v17634_v63, -inf  ;;  %vm17635_vm2 = vcmp.lt.s32.totalorder %v17590_v12, %v10707_v4  ;;  %vm17636_vm15 = vcmp.ge.s32.totalorder %v17590_v12, %v10705_v50  ;;  %v3376_v47 = vmax.f32 %v3372_v1, %v3342_v54  ;;  %v17646_v45 = vld [vmem:[#allocation56_spill] sm:$0xff]  ;;  %v17649_v10 = vld [vmem:[#allocation18_spill] sm:$0xff] }
 0x317   : > { %vm10919_vm3 = vmand %vm17636_vm15, %vm17635_vm2  ;;  %v3346_v3 = vsel %vm10902_vm0, %v17639_v2, -inf  ;;  %vm17640_vm7 = vcmp.ge.s32.totalorder %v17593_v20, %v10705_v50  ;;  %v3377_v41 = vmax.f32 %v3373_v38, %v3343_v13  ;;  %v3378_v17 = vmax.f32 %v3374_v34, %v3344_v43  ;;  %v17650_v18 = vld [vmem:[#allocation80_spill] sm:$0xff]  ;;  %v17652_v24 = vld [vmem:[#allocation19_spill] sm:$0xff] }
 0x318   : > { %vm3234_vm12 = vmand %vm17640_vm7, %vm3196_vm6  ;;  %v3347_v52 = vsel %vm10919_vm3, %v17641_v32, -inf  ;;  %v3379_v36 = vmax.f32 %v3375_v39, %v3345_v6  ;;  %vm3161_vm10 = vcmp.ge.s32.totalorder %v17642_v23, %v10705_v50  ;;  %vm3200_vm8 = vcmp.lt.s32.totalorder %v17600_v21, %v10707_v4  ;;  %v17653_v57 = vld [vmem:[#allocation81_spill] sm:$0xff]  ;;  %v17654_v37 = vld [vmem:[#allocation22_spill] sm:$0xff] }
 0x319   : > { %vm17643_vm5 = vcmp.ge.s32.totalorder %v17594_v11, %v10705_v50  ;;  %v3348_v48 = vsel %vm3234_vm12, %v17644_v28, -inf  ;;  %v3380_v12 = vmax.f32 %v3376_v47, %v3346_v3  ;;  %vm3201_vm11 = vcmp.lt.s32.totalorder %v17642_v23, %v10707_v4  ;;  %v17647_v11 = vld [vmem:[#allocation79_spill] sm:$0xff]  ;;  %v17655_v33 = vld [vmem:[#allocation82_spill] sm:$0xff]  ;;  %v17659_v53 = vld [vmem:[#allocation84_spill] sm:$0xff] }
 0x31a   : > { %vm3235_vm6 = vmand %vm17643_vm5, %vm3197_vm13  ;;  %vm17645_vm1 = vcmp.ge.s32.totalorder %v17595_v0, %v10705_v50  ;;  %v3381_v31 = vmax.f32 %v3377_v41, %v3347_v52  ;;  %v3382_v60 = vmax.f32 %v3378_v17, %v3348_v48  ;;  %vm3162_vm13 = vcmp.ge.s32.totalorder %v17647_v11, %v10705_v50  ;;  %v17656_v40 = vld [vmem:[#allocation23_spill] sm:$0xff]  ;;  %v17658_v14 = vld [vmem:[#allocation26_spill] sm:$0xff] }
 0x31b   : > { %vm3236_vm9 = vmand %vm17645_vm1, %vm3198_vm14  ;;  %v3349_v20 = vsel %vm3235_vm6, %v17646_v45, -inf  ;;  %vm3202_vm0 = vcmp.lt.s32.totalorder %v17647_v11, %v10707_v4  ;;  %vm17648_vm2 = vcmp.ge.s32.totalorder %v17599_v7, %v10705_v50  ;;  %vm3163_vm14 = vcmp.ge.s32.totalorder %v17650_v18, %v10705_v50  ;;  %v17657_v22 = vld [vmem:[#allocation83_spill] sm:$0xff]  ;;  %v17661_v51 = vld [vmem:[#allocation85_spill] sm:$0xff] }
 0x31c   : > { %vm3237_vm15 = vmand %vm17648_vm2, %vm3199_vm4  ;;  %v3350_v0 = vsel %vm3236_vm9, %v17649_v10, -inf  ;;  %v3383_v55 = vmax.f32 %v3379_v36, %v3349_v20  ;;  %vm3203_vm3 = vcmp.lt.s32.totalorder %v17650_v18, %v10707_v4  ;;  %vm17651_vm7 = vcmp.ge.s32.totalorder %v17600_v21, %v10705_v50  ;;  %v17660_v35 = vld [vmem:[#allocation27_spill] sm:$0xff]  ;;  %v17662_v54 = vld [vmem:[#allocation30_spill] sm:$0xff] }
 0x31d   : > { %vm3238_vm12 = vmand %vm17651_vm7, %vm3200_vm8  ;;  %v3351_v9 = vsel %vm3237_vm15, %v17652_v24, -inf  ;;  %v3384_v7 = vmax.f32 %v3380_v12, %v3350_v0  ;;  %vm3164_vm4 = vcmp.ge.s32.totalorder %v17653_v57, %v10705_v50  ;;  %vm3204_vm5 = vcmp.lt.s32.totalorder %v17653_v57, %v10707_v4  ;;  %v17663_v16 = vld [vmem:[#allocation86_spill] sm:$0xff]  ;;  %v17664_v43 = vld [vmem:[#allocation31_spill] sm:$0xff] }
 0x31e   : > { %vm3239_vm6 = vmand %vm3161_vm10, %vm3201_vm11  ;;  %v3352_v62 = vsel %vm3238_vm12, %v17654_v37, -inf  ;;  %v3385_v21 = vmax.f32 %v3381_v31, %v3351_v9  ;;  %vm3165_vm8 = vcmp.ge.s32.totalorder %v17655_v33, %v10705_v50  ;;  %vm3205_vm1 = vcmp.lt.s32.totalorder %v17655_v33, %v10707_v4  ;;  %v17665_v63 = vld [vmem:[#allocation87_spill] sm:$0xff]  ;;  %v17666_v6 = vld [vmem:[#allocation34_spill] sm:$0xff] }
 0x31f   : > { %vm3240_vm9 = vmand %vm3162_vm13, %vm3202_vm0  ;;  %v3353_v61 = vsel %vm3239_vm6, %v17656_v40, -inf  ;;  %v3386_v30 = vmax.f32 %v3382_v60, %v3352_v62  ;;  %vm3166_vm10 = vcmp.ge.s32.totalorder %v17657_v22, %v10705_v50  ;;  %vm3206_vm11 = vcmp.lt.s32.totalorder %v17657_v22, %v10707_v4  ;;  %v17667_v39 = vld [vmem:[#allocation88_spill] sm:$0xff]  ;;  %v17669_v47 = vld [vmem:[#allocation89_spill] sm:$0xff] }
 0x320   : > { %vm3241_vm2 = vmand %vm3163_vm14, %vm3203_vm3  ;;  %v3354_v42 = vsel %vm3240_vm9, %v17658_v14, -inf  ;;  %v3387_v49 = vmax.f32 %v3383_v55, %v3353_v61  ;;  %vm3167_vm13 = vcmp.ge.s32.totalorder %v17659_v53, %v10705_v50  ;;  %vm3207_vm0 = vcmp.lt.s32.totalorder %v17659_v53, %v10707_v4  ;;  %v17668_v19 = vld [vmem:[#allocation36_spill] sm:$0xff]  ;;  %v17671_v17 = vld [vmem:[#allocation90_spill] sm:$0xff] }
 0x321   : > { %vm3242_vm15 = vmand %vm3164_vm4, %vm3204_vm5  ;;  %v3355_v26 = vsel %vm3241_vm2, %v17660_v35, -inf  ;;  %v3388_v5 = vmax.f32 %v3384_v7, %v3354_v42  ;;  %vm3168_vm14 = vcmp.ge.s32.totalorder %v17661_v51, %v10705_v50  ;;  %vm3208_vm3 = vcmp.lt.s32.totalorder %v17661_v51, %v10707_v4  ;;  %v17670_v32 = vld [vmem:[#allocation40_spill] sm:$0xff]  ;;  %v17672_v36 = vld [vmem:[#allocation42_spill] sm:$0xff] }
 0x322   : > { %vm3243_vm7 = vmand %vm3165_vm8, %vm3205_vm1  ;;  %v3356_v56 = vsel %vm3242_vm15, %v17662_v54, -inf  ;;  %v3389_v13 = vmax.f32 %v3385_v21, %v3355_v26  ;;  %vm3169_vm12 = vcmp.ge.s32.totalorder %v17663_v16, %v10705_v50  ;;  %vm3209_vm4 = vcmp.lt.s32.totalorder %v17663_v16, %v10707_v4  ;;  %v17673_v48 = vld [vmem:[#allocation91_spill] sm:$0xff]  ;;  %v17674_v12 = vld [vmem:[#allocation46_spill] sm:$0xff] }
 0x323   : > { %vm3244_vm5 = vmand %vm3166_vm10, %vm3206_vm11  ;;  %v3357_v1 = vsel %vm3243_vm7, %v17664_v43, -inf  ;;  %v3390_v44 = vmax.f32 %v3386_v30, %v3356_v56  ;;  %vm3170_vm6 = vcmp.ge.s32.totalorder %v17665_v63, %v10705_v50  ;;  %vm3210_vm8 = vcmp.lt.s32.totalorder %v17665_v63, %v10707_v4  ;;  %v17675_v31 = vld [vmem:[#allocation92_spill] sm:$0xff]  ;;  %v17677_v0 = vld [vmem:[#allocation93_spill] sm:$0xff] }
 0x324   : > { %vm3245_vm1 = vmand %vm3167_vm13, %vm3207_vm0  ;;  %v3358_v38 = vsel %vm3244_vm5, %v17666_v6, -inf  ;;  %v3391_v34 = vmax.f32 %v3387_v49, %v3357_v1  ;;  %vm3171_vm9 = vcmp.ge.s32.totalorder %v17667_v39, %v10705_v50  ;;  %vm3211_vm10 = vcmp.lt.s32.totalorder %v17667_v39, %v10707_v4  ;;  %v17676_v60 = vld [vmem:[#allocation48_spill] sm:$0xff]  ;;  %v17679_v9 = vld [vmem:[#allocation94_spill] sm:$0xff] }
 0x325   : > { %vm3246_vm11 = vmand %vm3168_vm14, %vm3208_vm3  ;;  %v3359_v2 = vsel %vm3245_vm1, %v17668_v19, -inf  ;;  %v3392_v3 = vmax.f32 %v3388_v5, %v3358_v38  ;;  %vm3172_vm2 = vcmp.ge.s32.totalorder %v17669_v47, %v10705_v50  ;;  %vm3212_vm13 = vcmp.lt.s32.totalorder %v17669_v47, %v10707_v4  ;;  %v17678_v55 = vld [vmem:[#allocation52_spill] sm:$0xff]  ;;  %v17680_v7 = vld [vmem:[#allocation54_spill] sm:$0xff] }
 0x326   : > { %vm3247_vm0 = vmand %vm3169_vm12, %vm3209_vm4  ;;  %v3360_v52 = vsel %vm3246_vm11, %v17670_v32, -inf  ;;  %v3393_v41 = vmax.f32 %v3389_v13, %v3359_v2  ;;  %vm3173_vm15 = vcmp.ge.s32.totalorder %v17671_v17, %v10705_v50  ;;  %vm3213_vm14 = vcmp.lt.s32.totalorder %v17671_v17, %v10707_v4  ;;  %v17681_v62 = vld [vmem:[#allocation95_spill] sm:$0xff]  ;;  %v17682_v40 = vld [vmem:[#allocation96_spill] sm:$0xff] }
 0x327   : > { %vm3248_vm3 = vmand %vm3170_vm6, %vm3210_vm8  ;;  %v3361_v23 = vsel %vm3247_vm0, %v17672_v36, -inf  ;;  %v3394_v28 = vmax.f32 %v3390_v44, %v3360_v52  ;;  %vm3174_vm7 = vcmp.ge.s32.totalorder %v17673_v48, %v10705_v50  ;;  %vm3214_vm12 = vcmp.lt.s32.totalorder %v17673_v48, %v10707_v4  ;;  %v3415_v44 = vld [vmem:[%s8003_s15 + $0x4] sm:$0x1] }
 0x328   : > { %vm3249_vm4 = vmand %vm3171_vm9, %vm3211_vm10  ;;  %v3362_v45 = vsel %vm3248_vm3, %v17674_v12, -inf  ;;  %v3395_v20 = vmax.f32 %v3391_v34, %v3361_v23  ;;  %vm3175_vm5 = vcmp.ge.s32.totalorder %v17675_v31, %v10705_v50  ;;  %vm3215_vm6 = vcmp.lt.s32.totalorder %v17675_v31, %v10707_v4 }
 0x329   : > { %vm3250_vm8 = vmand %vm3172_vm2, %vm3212_vm13  ;;  %v3363_v11 = vsel %vm3249_vm4, %v17676_v60, -inf  ;;  %v3396_v10 = vmax.f32 %v3392_v3, %v3362_v45  ;;  %vm3176_vm1 = vcmp.ge.s32.totalorder %v17677_v0, %v10705_v50  ;;  %vm3216_vm9 = vcmp.lt.s32.totalorder %v17677_v0, %v10707_v4 }
 0x32a   : > { %vm3251_vm10 = vmand %vm3173_vm15, %vm3213_vm14  ;;  %v3364_v18 = vsel %vm3250_vm8, %v17678_v55, -inf  ;;  %v3397_v24 = vmax.f32 %v3393_v41, %v3363_v11  ;;  %vm3177_vm11 = vcmp.ge.s32.totalorder %v17679_v9, %v10705_v50  ;;  %vm3217_vm2 = vcmp.lt.s32.totalorder %v17679_v9, %v10707_v4 }
 0x32b   : > { %vm3252_vm13 = vmand %vm3174_vm7, %vm3214_vm12  ;;  %v3365_v57 = vsel %vm3251_vm10, %v17680_v7, -inf  ;;  %v3398_v37 = vmax.f32 %v3394_v28, %v3364_v18  ;;  %vm3178_vm0 = vcmp.ge.s32.totalorder %v17681_v62, %v10705_v50  ;;  %vm3218_vm15 = vcmp.lt.s32.totalorder %v17681_v62, %v10707_v4 }
 0x32c   : > { %vm3253_vm14 = vmand %vm3175_vm5, %vm3215_vm6  ;;  %v3366_v21 = vsel %vm3252_vm13, %v8583_v46, -inf  ;;  %v3399_v33 = vmax.f32 %v3395_v20, %v3365_v57  ;;  %vm3179_vm3 = vcmp.ge.s32.totalorder %v17682_v40, %v10705_v50  ;;  %vm3219_vm7 = vcmp.lt.s32.totalorder %v17682_v40, %v10707_v4 }
 0x32d   : > { %vm3254_vm12 = vmand %vm3176_vm1, %vm3216_vm9  ;;  %v3367_v61 = vsel %vm3253_vm14, %v8586_v59, -inf  ;;  %v3400_v30 = vmax.f32 %v3396_v10, %v3366_v21 }
 0x32e   : > { %vm3255_vm4 = vmand %vm3177_vm11, %vm3217_vm2  ;;  %v3368_v22 = vsel %vm3254_vm12, %v8591_v25, -inf  ;;  %v3401_v14 = vmax.f32 %v3397_v24, %v3367_v61 }
 0x32f   : > { %vm3256_vm5 = vmand %vm3178_vm0, %vm3218_vm15  ;;  %v3369_v42 = vsel %vm3255_vm4, %v8594_v29, -inf  ;;  %v3402_v49 = vmax.f32 %v3398_v37, %v3368_v22 }
 0x330   : > { %vm3257_vm6 = vmand %vm3179_vm3, %vm3219_vm7  ;;  %v3370_v4 = vsel %vm3256_vm5, %v8604_v15, -inf  ;;  %v3403_v53 = vmax.f32 %v3399_v33, %v3369_v42 }
 0x331   : > { %v3371_v35 = vsel %vm3257_vm6, %v8609_v58, -inf  ;;  %v3404_v26 = vmax.f32 %v3400_v30, %v3370_v4 }
 0x332   : > { %v3405_v5 = vmax.f32 %v3401_v14, %v3371_v35  ;;  %v3407_v51 = vmax.f32 %v3402_v49, %v3403_v53 }
 0x334   : > { %v3406_v50 = vmax.f32 %v3404_v26, %v3405_v5 }
 0x336   : > { %v3408_v54 = vmax.f32 %v3406_v50, %v3407_v51 }
 0x338   : > { %v3409_v56 = vrot.slane %v3408_v54, 4 }
 0x33a   : > { %v3410_v13 = vmax.f32 %v3408_v54, %v3409_v56 }
 0x33c   : > { %v3411_v16 = vrot.slane %v3410_v13, 2 }
 0x33e   : > { %v3412_v43 = vmax.f32 %v3410_v13, %v3411_v16 }
 0x340   : > { %v3413_v1 = vrot.slane %v3412_v43, 1 }
 0x342   : > { %v3414_v63 = vmax.f32 %v3412_v43, %v3413_v1 }
 0x344   : > { %v3416_v6 = vmax.f32 %v3415_v44, %v3414_v63 }
 0x346   : > { %3417 = vst [vmem:[%s8003_s15 + $0x4] sm:$0x1] %v3416_v6 }
 0x347 PF: > { %s6825_s20 = sld [smem:[#allocation5 + $0x5]]  ;;  %s6826_s29 = sld [smem:[#allocation5 + $0x6]] }
 0x34d   : > { %p3421_p8 = scmp.gt.s32.totalorder %s6825_s20, %s8822_s23  ;;  %p3423_p10 = scmp.lt.s32.totalorder %s6826_s29, %s8829_s21 }
 0x34f   : > { %s3422_s30 = scalar_select %p3421_p8, %s6825_s20, %s8822_s23 }
 0x350   : > { %s3424_s12 = scalar_select %p3423_p10, %s6826_s29, %s8829_s21 }
 0x352   : > { %p6827_p12 = scmp.ge.s32.totalorder %s3422_s30, %s3424_s12 }
 0x353   : > { %s3429_s24 = ssub.s32 (!%p6827_p12), %s6825_s20, %s8822_s23  ;;  %s3469_s18 = ssub.s32 (!%p6827_p12), %s6826_s29, %s8822_s23  ;;  %v17683_v39 = vld [vmem:[#allocation61_spill] sm:$0xff] (!%p6827_p12)  ;;  %v17684_v19 = vld [vmem:[#allocation62_spill] sm:$0xff] (!%p6827_p12)  ;;  %v17687_v3 = vld [vmem:[#allocation63_spill] sm:$0xff] (!%p6827_p12)  ;;  %v17711_v55 = vmov (!%p6827_p12), 0 }
 0x354   : > { %3428 = sbr.rel (%p6827_p12) target bundleno = 915 (0x393), region = 64  ;;  %v11168_v38 = vstv (!%p6827_p12), %s3429_s24  ;;  %v11170_v34 = vstv (!%p6827_p12), %s3469_s18  ;;  %v17690_v32 = vld [vmem:[#allocation64_spill] sm:$0xff] (!%p6827_p12)  ;;  %v17693_v41 = vld [vmem:[#allocation65_spill] sm:$0xff] (!%p6827_p12)  ;;  %v17694_v17 = vld [vmem:[#allocation66_spill] sm:$0xff] (!%p6827_p12) }
 0x355   : > { %vm3431_vm8 = vcmp.ge.s32.totalorder (!%p6827_p12), %v8307_v27, %v11168_v38  ;;  %vm3432_vm1 = vcmp.ge.s32.totalorder (!%p6827_p12), %v8329_v8, %v11168_v38  ;;  %vm3433_vm9 = vcmp.ge.s32.totalorder (!%p6827_p12), %v17683_v39, %v11168_v38  ;;  %vm3471_vm10 = vcmp.lt.s32.totalorder (!%p6827_p12), %v8307_v27, %v11170_v34  ;;  %v17697_v23 = vld [vmem:[#allocation67_spill] sm:$0xff] (!%p6827_p12)  ;;  %v17698_v28 = vld [vmem:[#allocation68_spill] sm:$0xff] (!%p6827_p12)  ;;  %v17699_v48 = vld [vmem:[#allocation69_spill] sm:$0xff] (!%p6827_p12) }
 0x356   : > { %vm3472_vm11 = vcmp.lt.s32.totalorder (!%p6827_p12), %v8329_v8, %v11170_v34  ;;  %vm3434_vm2 = vcmp.ge.s32.totalorder (!%p6827_p12), %v17684_v19, %v11168_v38  ;;  %vm3473_vm13 = vcmp.lt.s32.totalorder (!%p6827_p12), %v17683_v39, %v11170_v34  ;;  %vm3474_vm0 = vcmp.lt.s32.totalorder (!%p6827_p12), %v17684_v19, %v11170_v34  ;;  %vm11188_vm15 = vmand (!%p6827_p12), %vm3431_vm8, %vm3471_vm10  ;;  %v17702_v45 = vld [vmem:[#allocation70_spill] sm:$0xff] (!%p6827_p12)  ;;  %v17703_v20 = vld [vmem:[#allocation71_spill] sm:$0xff] (!%p6827_p12) }
 0x357   : > { %vm3435_vm14 = vcmp.ge.s32.totalorder (!%p6827_p12), %v17687_v3, %v11168_v38  ;;  %vm3475_vm3 = vcmp.lt.s32.totalorder (!%p6827_p12), %v17687_v3, %v11170_v34  ;;  %vm11196_vm7 = vmand (!%p6827_p12), %vm3432_vm1, %vm3472_vm11  ;;  %vm3436_vm12 = vcmp.ge.s32.totalorder (!%p6827_p12), %v17690_v32, %v11168_v38  ;;  %vm3476_vm4 = vcmp.lt.s32.totalorder (!%p6827_p12), %v17690_v32, %v11170_v34  ;;  %v17704_v31 = vld [vmem:[#allocation72_spill] sm:$0xff] (!%p6827_p12)  ;;  %v17707_v11 = vld [vmem:[#allocation73_spill] sm:$0xff] (!%p6827_p12) }
 0x358   : > { %vm11204_vm5 = vmand (!%p6827_p12), %vm3433_vm9, %vm3473_vm13  ;;  %vm3477_vm1 = vcmp.lt.s32.totalorder (!%p6827_p12), %v17693_v41, %v11170_v34  ;;  %vm3478_vm6 = vcmp.lt.s32.totalorder (!%p6827_p12), %v17694_v17, %v11170_v34  ;;  %v17708_v10 = vld [vmem:[#allocation74_spill] sm:$0xff] (!%p6827_p12)  ;;  %v17709_v0 = vld [vmem:[#allocation75_spill] sm:$0xff] (!%p6827_p12)  ;;  %vm3481_vm11 = vcmp.lt.s32.totalorder (!%p6827_p12), %v17699_v48, %v11170_v34  ;;  %vm3485_vm9 = vcmp.lt.s32.totalorder (!%p6827_p12), %v17707_v11, %v11170_v34 }
 0x359   : > { %vm11214_vm10 = vmand (!%p6827_p12), %vm3434_vm2, %vm3474_vm0  ;;  %vm3480_vm2 = vcmp.lt.s32.totalorder (!%p6827_p12), %v17698_v28, %v11170_v34  ;;  %v17713_v18 = vld [vmem:[#allocation76_spill] sm:$0xff] (!%p6827_p12)  ;;  %v17714_v24 = vld [vmem:[#allocation77_spill] sm:$0xff] (!%p6827_p12)  ;;  %vm3486_vm13 = vcmp.lt.s32.totalorder (!%p6827_p12), %v17708_v10, %v11170_v34 }
 0x35a   : > { %vm11226_vm8 = vmand (!%p6827_p12), %vm3435_vm14, %vm3475_vm3  ;;  %vm17722_vm3 = vcmp.ge.s32.totalorder (!%p6827_p12), %v17698_v28, %v11168_v38  ;;  %v17725_v37 = vld [vmem:[#allocation20_spill] sm:$0xff] (!%p6827_p12)  ;;  %v17726_v21 = vld [vmem:[#allocation21_spill] sm:$0xff] (!%p6827_p12) }
 0x35b   : > { %vm11244_vm14 = vmand %vm3436_vm12, %vm3476_vm4  ;;  %vm17710_vm12 = vcmp.ge.s32.totalorder %v17693_v41, %v11168_v38  ;;  %v3623_v62 = vsel %vm11188_vm15, %v17725_v37, -inf  ;;  %v3624_v33 = vsel %vm11196_vm7, %v17726_v21, -inf  ;;  %v17727_v40 = vld [vmem:[#allocation24_spill] sm:$0xff]  ;;  %v17728_v30 = vld [vmem:[#allocation25_spill] sm:$0xff]  ;;  %vm17737_vm7 = vcmp.lt.s32.totalorder %v17702_v45, %v11170_v34 }
 0x35c   : > { %vm11262_vm4 = vmand %vm17710_vm12, %vm3477_vm1  ;;  %vm17715_vm1 = vcmp.ge.s32.totalorder %v17694_v17, %v11168_v38  ;;  %v3625_v61 = vsel %vm11204_vm5, %v17727_v40, -inf  ;;  %v3626_v22 = vsel %vm11214_vm10, %v17728_v30, -inf  ;;  %v17732_v42 = vld [vmem:[#allocation28_spill] sm:$0xff]  ;;  %v17733_v4 = vld [vmem:[#allocation29_spill] sm:$0xff]  ;;  %vm17738_vm5 = vcmp.ge.s32.totalorder %v17702_v45, %v11168_v38 }
 0x35d   : > { %v17712_v55 = vsel %vm11262_vm4, 4294967295, %v17711_v55  ;;  %vm11280_vm12 = vmand %vm17715_vm1, %vm3478_vm6  ;;  %vm17718_vm4 = vcmp.lt.s32.totalorder %v17697_v23, %v11170_v34  ;;  %vm17719_vm6 = vcmp.ge.s32.totalorder %v17697_v23, %v11168_v38  ;;  %v3627_v49 = vsel %vm11226_vm8, %v17732_v42, -inf  ;;  %v17734_v35 = vld [vmem:[#allocation32_spill] sm:$0xff]  ;;  %v17736_v5 = vld [vmem:[#allocation33_spill] sm:$0xff] }
 0x35e   : > { %vm11298_vm1 = vmand %vm17719_vm6, %vm17718_vm4  ;;  %v3628_v53 = vsel %vm11244_vm14, %v17733_v4, -inf  ;;  %vm17735_vm15 = vnez %v17712_v55  ;;  %v3630_v51 = vsel %vm11280_vm12, %v17736_v5, -inf  ;;  %v17741_v54 = vld [vmem:[#allocation37_spill] sm:$0xff]  ;;  %v17742_v13 = vld [vmem:[#allocation38_spill] sm:$0xff]  ;;  %v3661_v44 = vmax.f32 %v3623_v62, %v3627_v49 }
 0x35f   : > { %vm11305_vm0 = vmand %vm17722_vm3, %vm3480_vm2  ;;  %vm17729_vm2 = vcmp.ge.s32.totalorder %v17699_v48, %v11168_v38  ;;  %v3629_v26 = vsel %vm17735_vm15, %v17734_v35, -inf  ;;  %v3631_v56 = vsel %vm11298_vm1, %v17741_v54, -inf  ;;  %v17743_v43 = vld [vmem:[#allocation43_spill] sm:$0xff]  ;;  %vm17744_vm8 = vcmp.lt.s32.totalorder %v17703_v20, %v11170_v34  ;;  %v17748_v6 = vld [vmem:[#allocation44_spill] sm:$0xff] }
 0x360   : > { %vm11324_vm3 = vmand %vm17729_vm2, %vm3481_vm11  ;;  %v3632_v16 = vsel %vm11305_vm0, %v17742_v13, -inf  ;;  %vm17745_vm11 = vcmp.ge.s32.totalorder %v17703_v20, %v11168_v38  ;;  %v3662_v19 = vmax.f32 %v3624_v33, %v3628_v53  ;;  %v3663_v2 = vmax.f32 %v3625_v61, %v3629_v26  ;;  %v17753_v32 = vld [vmem:[#allocation49_spill] sm:$0xff]  ;;  %v17755_v17 = vld [vmem:[#allocation50_spill] sm:$0xff] }
 0x361   : > { %vm11346_vm10 = vmand %vm17738_vm5, %vm17737_vm7  ;;  %v3633_v1 = vsel %vm11324_vm3, %v17743_v43, -inf  ;;  %v3664_v3 = vmax.f32 %v3626_v22, %v3630_v51  ;;  %vm3487_vm0 = vcmp.lt.s32.totalorder %v17709_v0, %v11170_v34  ;;  %vm3488_vm4 = vcmp.lt.s32.totalorder %v17713_v18, %v11170_v34  ;;  %v17756_v12 = vld [vmem:[#allocation78_spill] sm:$0xff]  ;;  %v17758_v45 = vld [vmem:[#allocation55_spill] sm:$0xff] }
 0x362   : > { %vm11365_vm14 = vmand %vm17745_vm11, %vm17744_vm8  ;;  %v3634_v39 = vsel %vm11346_vm10, %v17748_v6, -inf  ;;  %vm17749_vm12 = vcmp.lt.s32.totalorder %v17704_v31, %v11170_v34  ;;  %vm17750_vm6 = vcmp.ge.s32.totalorder %v17704_v31, %v11168_v38  ;;  %v3665_v41 = vmax.f32 %v3661_v44, %v3631_v56  ;;  %v17760_v60 = vld [vmem:[#allocation56_spill] sm:$0xff]  ;;  %v17763_v7 = vld [vmem:[#allocation18_spill] sm:$0xff] }
 0x363   : > { %vm11382_vm1 = vmand %vm17750_vm6, %vm17749_vm12  ;;  %v3635_v52 = vsel %vm11365_vm14, %v17753_v32, -inf  ;;  %vm17754_vm2 = vcmp.ge.s32.totalorder %v17707_v11, %v11168_v38  ;;  %v3666_v23 = vmax.f32 %v3662_v19, %v3632_v16  ;;  %v3667_v28 = vmax.f32 %v3663_v2, %v3633_v1  ;;  %v17764_v37 = vld [vmem:[#allocation80_spill] sm:$0xff]  ;;  %v17766_v62 = vld [vmem:[#allocation19_spill] sm:$0xff] }
 0x364   : > { %vm3523_vm3 = vmand %vm17754_vm2, %vm3485_vm9  ;;  %v3636_v36 = vsel %vm11382_vm1, %v17755_v17, -inf  ;;  %v3668_v48 = vmax.f32 %v3664_v3, %v3634_v39  ;;  %vm3450_vm15 = vcmp.ge.s32.totalorder %v17756_v12, %v11168_v38  ;;  %vm3489_vm7 = vcmp.lt.s32.totalorder %v17714_v24, %v11170_v34  ;;  %v17767_v33 = vld [vmem:[#allocation81_spill] sm:$0xff]  ;;  %v17768_v40 = vld [vmem:[#allocation22_spill] sm:$0xff] }
 0x365   : > { %vm17757_vm5 = vcmp.ge.s32.totalorder %v17708_v10, %v11168_v38  ;;  %v3637_v20 = vsel %vm3523_vm3, %v17758_v45, -inf  ;;  %v3669_v31 = vmax.f32 %v3665_v41, %v3635_v52  ;;  %vm3490_vm10 = vcmp.lt.s32.totalorder %v17756_v12, %v11170_v34  ;;  %v17761_v10 = vld [vmem:[#allocation79_spill] sm:$0xff]  ;;  %v17769_v30 = vld [vmem:[#allocation82_spill] sm:$0xff]  ;;  %v17773_v26 = vld [vmem:[#allocation84_spill] sm:$0xff] }
 0x366   : > { %vm3524_vm9 = vmand %vm17757_vm5, %vm3486_vm13  ;;  %vm17759_vm8 = vcmp.ge.s32.totalorder %v17709_v0, %v11168_v38  ;;  %v3670_v55 = vmax.f32 %v3666_v23, %v3636_v36  ;;  %v3671_v9 = vmax.f32 %v3667_v28, %v3637_v20  ;;  %vm3451_vm13 = vcmp.ge.s32.totalorder %v17761_v10, %v11168_v38  ;;  %v17770_v22 = vld [vmem:[#allocation23_spill] sm:$0xff]  ;;  %v17772_v4 = vld [vmem:[#allocation26_spill] sm:$0xff] }
 0x367   : > { %vm3525_vm11 = vmand %vm17759_vm8, %vm3487_vm0  ;;  %v3638_v11 = vsel %vm3524_vm9, %v17760_v60, -inf  ;;  %vm3491_vm14 = vcmp.lt.s32.totalorder %v17761_v10, %v11170_v34  ;;  %vm17762_vm12 = vcmp.ge.s32.totalorder %v17713_v18, %v11168_v38  ;;  %vm3452_vm0 = vcmp.ge.s32.totalorder %v17764_v37, %v11168_v38  ;;  %v17771_v49 = vld [vmem:[#allocation83_spill] sm:$0xff]  ;;  %v17775_v54 = vld [vmem:[#allocation85_spill] sm:$0xff] }
 0x368   : > { %vm3526_vm6 = vmand %vm17762_vm12, %vm3488_vm4  ;;  %v3639_v0 = vsel %vm3525_vm11, %v17763_v7, -inf  ;;  %v3672_v57 = vmax.f32 %v3668_v48, %v3638_v11  ;;  %vm3492_vm1 = vcmp.lt.s32.totalorder %v17764_v37, %v11170_v34  ;;  %vm17765_vm2 = vcmp.ge.s32.totalorder %v17714_v24, %v11168_v38  ;;  %v17774_v5 = vld [vmem:[#allocation27_spill] sm:$0xff]  ;;  %v17776_v56 = vld [vmem:[#allocation30_spill] sm:$0xff] }
 0x369   : > { %vm3527_vm3 = vmand %vm17765_vm2, %vm3489_vm7  ;;  %v3640_v21 = vsel %vm3526_vm6, %v17766_v62, -inf  ;;  %v3673_v18 = vmax.f32 %v3669_v31, %v3639_v0  ;;  %vm3453_vm4 = vcmp.ge.s32.totalorder %v17767_v33, %v11168_v38  ;;  %vm3493_vm5 = vcmp.lt.s32.totalorder %v17767_v33, %v11170_v34  ;;  %v17777_v43 = vld [vmem:[#allocation86_spill] sm:$0xff]  ;;  %v17778_v1 = vld [vmem:[#allocation31_spill] sm:$0xff] }
 0x36a   : > { %vm3528_vm9 = vmand %vm3450_vm15, %vm3490_vm10  ;;  %v3641_v61 = vsel %vm3527_vm3, %v17768_v40, -inf  ;;  %v3674_v24 = vmax.f32 %v3670_v55, %v3640_v21  ;;  %vm3454_vm7 = vcmp.ge.s32.totalorder %v17769_v30, %v11168_v38  ;;  %vm3494_vm8 = vcmp.lt.s32.totalorder %v17769_v30, %v11170_v34  ;;  %v17779_v6 = vld [vmem:[#allocation87_spill] sm:$0xff]  ;;  %v17780_v39 = vld [vmem:[#allocation34_spill] sm:$0xff] }
 0x36b   : > { %vm3529_vm11 = vmand %vm3451_vm13, %vm3491_vm14  ;;  %v3642_v14 = vsel %vm3528_vm9, %v17770_v22, -inf  ;;  %v3675_v42 = vmax.f32 %v3671_v9, %v3641_v61  ;;  %vm3455_vm15 = vcmp.ge.s32.totalorder %v17771_v49, %v11168_v38  ;;  %vm3495_vm10 = vcmp.lt.s32.totalorder %v17771_v49, %v11170_v34  ;;  %v17781_v3 = vld [vmem:[#allocation88_spill] sm:$0xff]  ;;  %v17783_v41 = vld [vmem:[#allocation89_spill] sm:$0xff] }
 0x36c   : > { %vm3530_vm12 = vmand %vm3452_vm0, %vm3492_vm1  ;;  %v3643_v53 = vsel %vm3529_vm11, %v17772_v4, -inf  ;;  %v3676_v35 = vmax.f32 %v3672_v57, %v3642_v14  ;;  %vm3456_vm13 = vcmp.ge.s32.totalorder %v17773_v26, %v11168_v38  ;;  %vm3496_vm14 = vcmp.lt.s32.totalorder %v17773_v26, %v11170_v34  ;;  %v17782_v47 = vld [vmem:[#allocation36_spill] sm:$0xff]  ;;  %v17785_v28 = vld [vmem:[#allocation90_spill] sm:$0xff] }
 0x36d   : > { %vm3531_vm6 = vmand %vm3453_vm4, %vm3493_vm5  ;;  %v3644_v51 = vsel %vm3530_vm12, %v17774_v5, -inf  ;;  %v3677_v50 = vmax.f32 %v3673_v18, %v3643_v53  ;;  %vm3457_vm0 = vcmp.ge.s32.totalorder %v17775_v54, %v11168_v38  ;;  %vm3497_vm1 = vcmp.lt.s32.totalorder %v17775_v54, %v11170_v34  ;;  %v17784_v17 = vld [vmem:[#allocation40_spill] sm:$0xff]  ;;  %v17786_v48 = vld [vmem:[#allocation42_spill] sm:$0xff] }
 0x36e   : > { %vm3532_vm2 = vmand %vm3454_vm7, %vm3494_vm8  ;;  %v3645_v13 = vsel %vm3531_vm6, %v17776_v56, -inf  ;;  %v3678_v16 = vmax.f32 %v3674_v24, %v3644_v51  ;;  %vm3458_vm3 = vcmp.ge.s32.totalorder %v17777_v43, %v11168_v38  ;;  %vm3498_vm4 = vcmp.lt.s32.totalorder %v17777_v43, %v11170_v34  ;;  %v17787_v20 = vld [vmem:[#allocation91_spill] sm:$0xff]  ;;  %v17788_v31 = vld [vmem:[#allocation46_spill] sm:$0xff] }
 0x36f   : > { %vm3533_vm5 = vmand %vm3455_vm15, %vm3495_vm10  ;;  %v3646_v44 = vsel %vm3532_vm2, %v17778_v1, -inf  ;;  %v3679_v63 = vmax.f32 %v3675_v42, %v3645_v13  ;;  %vm3459_vm9 = vcmp.ge.s32.totalorder %v17779_v6, %v11168_v38  ;;  %vm3499_vm7 = vcmp.lt.s32.totalorder %v17779_v6, %v11170_v34  ;;  %v17789_v55 = vld [vmem:[#allocation92_spill] sm:$0xff]  ;;  %v17791_v0 = vld [vmem:[#allocation93_spill] sm:$0xff] }
 0x370   : > { %vm3534_vm8 = vmand %vm3456_vm13, %vm3496_vm14  ;;  %v3647_v19 = vsel %vm3533_vm5, %v17780_v39, -inf  ;;  %v3680_v2 = vmax.f32 %v3676_v35, %v3646_v44  ;;  %vm3460_vm11 = vcmp.ge.s32.totalorder %v17781_v3, %v11168_v38  ;;  %vm3500_vm15 = vcmp.lt.s32.totalorder %v17781_v3, %v11170_v34  ;;  %v17790_v9 = vld [vmem:[#allocation48_spill] sm:$0xff]  ;;  %v17793_v21 = vld [vmem:[#allocation94_spill] sm:$0xff] }
 0x371   : > { %vm3535_vm10 = vmand %vm3457_vm0, %vm3497_vm1  ;;  %v3648_v32 = vsel %vm3534_vm8, %v17782_v47, -inf  ;;  %v3681_v52 = vmax.f32 %v3677_v50, %v3647_v19  ;;  %vm3461_vm12 = vcmp.ge.s32.totalorder %v17783_v41, %v11168_v38  ;;  %vm3501_vm13 = vcmp.lt.s32.totalorder %v17783_v41, %v11170_v34  ;;  %v17792_v57 = vld [vmem:[#allocation52_spill] sm:$0xff]  ;;  %v17794_v18 = vld [vmem:[#allocation54_spill] sm:$0xff] }
 0x372   : > { %vm3536_vm14 = vmand %vm3458_vm3, %vm3498_vm4  ;;  %v3649_v36 = vsel %vm3535_vm10, %v17784_v17, -inf  ;;  %v3682_v23 = vmax.f32 %v3678_v16, %v3648_v32  ;;  %vm3462_vm6 = vcmp.ge.s32.totalorder %v17785_v28, %v11168_v38  ;;  %vm3502_vm0 = vcmp.lt.s32.totalorder %v17785_v28, %v11170_v34  ;;  %v17795_v61 = vld [vmem:[#allocation95_spill] sm:$0xff]  ;;  %v17796_v22 = vld [vmem:[#allocation96_spill] sm:$0xff] }
 0x373   : > { %vm3537_vm1 = vmand %vm3459_vm9, %vm3499_vm7  ;;  %v3650_v12 = vsel %vm3536_vm14, %v17786_v48, -inf  ;;  %v3683_v45 = vmax.f32 %v3679_v63, %v3649_v36  ;;  %vm3463_vm2 = vcmp.ge.s32.totalorder %v17787_v20, %v11168_v38  ;;  %vm3503_vm3 = vcmp.lt.s32.totalorder %v17787_v20, %v11170_v34  ;;  %v3704_v63 = vld [vmem:[%s8003_s15 + $0x5] sm:$0x1] }
 0x374   : > { %vm3538_vm4 = vmand %vm3460_vm11, %vm3500_vm15  ;;  %v3651_v60 = vsel %vm3537_vm1, %v17788_v31, -inf  ;;  %v3684_v11 = vmax.f32 %v3680_v2, %v3650_v12  ;;  %vm3464_vm5 = vcmp.ge.s32.totalorder %v17789_v55, %v11168_v38  ;;  %vm3504_vm9 = vcmp.lt.s32.totalorder %v17789_v55, %v11170_v34 }
 0x375   : > { %vm3539_vm7 = vmand %vm3461_vm12, %vm3501_vm13  ;;  %v3652_v10 = vsel %vm3538_vm4, %v17790_v9, -inf  ;;  %v3685_v7 = vmax.f32 %v3681_v52, %v3651_v60  ;;  %vm3465_vm8 = vcmp.ge.s32.totalorder %v17791_v0, %v11168_v38  ;;  %vm3505_vm11 = vcmp.lt.s32.totalorder %v17791_v0, %v11170_v34 }
 0x376   : > { %vm3540_vm15 = vmand %vm3462_vm6, %vm3502_vm0  ;;  %v3653_v37 = vsel %vm3539_vm7, %v17792_v57, -inf  ;;  %v3686_v62 = vmax.f32 %v3682_v23, %v3652_v10  ;;  %vm3466_vm10 = vcmp.ge.s32.totalorder %v17793_v21, %v11168_v38  ;;  %vm3506_vm12 = vcmp.lt.s32.totalorder %v17793_v21, %v11170_v34 }
 0x377   : > { %vm3541_vm13 = vmand %vm3463_vm2, %vm3503_vm3  ;;  %v3654_v33 = vsel %vm3540_vm15, %v17794_v18, -inf  ;;  %v3687_v40 = vmax.f32 %v3683_v45, %v3653_v37  ;;  %vm3467_vm14 = vcmp.ge.s32.totalorder %v17795_v61, %v11168_v38  ;;  %vm3507_vm6 = vcmp.lt.s32.totalorder %v17795_v61, %v11170_v34 }
 0x378   : > { %vm3542_vm0 = vmand %vm3464_vm5, %vm3504_vm9  ;;  %v3655_v24 = vsel %vm3541_vm13, %v8583_v46, -inf  ;;  %v3688_v30 = vmax.f32 %v3684_v11, %v3654_v33  ;;  %vm3468_vm1 = vcmp.ge.s32.totalorder %v17796_v22, %v11168_v38  ;;  %vm3508_vm2 = vcmp.lt.s32.totalorder %v17796_v22, %v11170_v34 }
 0x379   : > { %vm3543_vm3 = vmand %vm3465_vm8, %vm3505_vm11  ;;  %v3656_v14 = vsel %vm3542_vm0, %v8586_v59, -inf  ;;  %v3689_v42 = vmax.f32 %v3685_v7, %v3655_v24 }
 0x37a   : > { %vm3544_vm4 = vmand %vm3466_vm10, %vm3506_vm12  ;;  %v3657_v49 = vsel %vm3543_vm3, %v8591_v25, -inf  ;;  %v3690_v4 = vmax.f32 %v3686_v62, %v3656_v14 }
 0x37b   : > { %vm3545_vm5 = vmand %vm3467_vm14, %vm3507_vm6  ;;  %v3658_v53 = vsel %vm3544_vm4, %v8594_v29, -inf  ;;  %v3691_v35 = vmax.f32 %v3687_v40, %v3657_v49 }
 0x37c   : > { %vm3546_vm9 = vmand %vm3468_vm1, %vm3508_vm2  ;;  %v3659_v34 = vsel %vm3545_vm5, %v8604_v15, -inf  ;;  %v3692_v26 = vmax.f32 %v3688_v30, %v3658_v53 }
 0x37d   : > { %v3660_v5 = vsel %vm3546_vm9, %v8609_v58, -inf  ;;  %v3693_v51 = vmax.f32 %v3689_v42, %v3659_v34 }
 0x37e   : > { %v3694_v50 = vmax.f32 %v3690_v4, %v3660_v5  ;;  %v3696_v54 = vmax.f32 %v3691_v35, %v3692_v26 }
 0x380   : > { %v3695_v38 = vmax.f32 %v3693_v51, %v3694_v50 }
 0x382   : > { %v3697_v56 = vmax.f32 %v3695_v38, %v3696_v54 }
 0x384   : > { %v3698_v13 = vrot.slane %v3697_v56, 4 }
 0x386   : > { %v3699_v16 = vmax.f32 %v3697_v56, %v3698_v13 }
 0x388   : > { %v3700_v43 = vrot.slane %v3699_v16, 2 }
 0x38a   : > { %v3701_v1 = vmax.f32 %v3699_v16, %v3700_v43 }
 0x38c   : > { %v3702_v44 = vrot.slane %v3701_v1, 1 }
 0x38e   : > { %v3703_v6 = vmax.f32 %v3701_v1, %v3702_v44 }
 0x390   : > { %v3705_v39 = vmax.f32 %v3704_v63, %v3703_v6 }
 0x392   : > { %3706 = vst [vmem:[%s8003_s15 + $0x5] sm:$0x1] %v3705_v39 }
 0x393 PF: > { %s6828_s22 = sld [smem:[#allocation5 + $0x6]]  ;;  %s6829_s25 = sld [smem:[#allocation5 + $0x7]] }
 0x399   : > { %p3710_p1 = scmp.gt.s32.totalorder %s6828_s22, %s8822_s23  ;;  %p3712_p2 = scmp.lt.s32.totalorder %s6829_s25, %s8829_s21 }
 0x39b   : > { %s3711_s19 = scalar_select %p3710_p1, %s6828_s22, %s8822_s23 }
 0x39c   : > { %s3713_s17 = scalar_select %p3712_p2, %s6829_s25, %s8829_s21 }
 0x39e   : > { %p6830_p3 = scmp.ge.s32.totalorder %s3711_s19, %s3713_s17 }
 0x39f   : > { %s3718_s14 = ssub.s32 (!%p6830_p3), %s6828_s22, %s8822_s23  ;;  %s3758_s20 = ssub.s32 (!%p6830_p3), %s6829_s25, %s8822_s23  ;;  %v17797_v3 = vld [vmem:[#allocation61_spill] sm:$0xff] (!%p6830_p3)  ;;  %v17798_v47 = vld [vmem:[#allocation62_spill] sm:$0xff] (!%p6830_p3)  ;;  %v17801_v52 = vld [vmem:[#allocation63_spill] sm:$0xff] (!%p6830_p3)  ;;  %v17825_v57 = vmov (!%p6830_p3), 0 }
 0x3a0   : > { %3717 = sbr.rel (%p6830_p3) target bundleno = 991 (0x3df), region = 68  ;;  %v11631_v19 = vstv (!%p6830_p3), %s3718_s14  ;;  %v11633_v2 = vstv (!%p6830_p3), %s3758_s20  ;;  %v17804_v17 = vld [vmem:[#allocation64_spill] sm:$0xff] (!%p6830_p3)  ;;  %v17807_v23 = vld [vmem:[#allocation65_spill] sm:$0xff] (!%p6830_p3)  ;;  %v17808_v28 = vld [vmem:[#allocation66_spill] sm:$0xff] (!%p6830_p3) }
 0x3a1   : > { %vm3720_vm7 = vcmp.ge.s32.totalorder (!%p6830_p3), %v8307_v27, %v11631_v19  ;;  %vm3721_vm8 = vcmp.ge.s32.totalorder (!%p6830_p3), %v8329_v8, %v11631_v19  ;;  %vm3722_vm11 = vcmp.ge.s32.totalorder (!%p6830_p3), %v17797_v3, %v11631_v19  ;;  %vm3760_vm15 = vcmp.lt.s32.totalorder (!%p6830_p3), %v8307_v27, %v11633_v2  ;;  %v17811_v12 = vld [vmem:[#allocation67_spill] sm:$0xff] (!%p6830_p3)  ;;  %v17812_v45 = vld [vmem:[#allocation68_spill] sm:$0xff] (!%p6830_p3)  ;;  %v17813_v20 = vld [vmem:[#allocation69_spill] sm:$0xff] (!%p6830_p3) }
 0x3a2   : > { %vm3761_vm10 = vcmp.lt.s32.totalorder (!%p6830_p3), %v8329_v8, %v11633_v2  ;;  %vm3723_vm12 = vcmp.ge.s32.totalorder (!%p6830_p3), %v17798_v47, %v11631_v19  ;;  %vm3762_vm13 = vcmp.lt.s32.totalorder (!%p6830_p3), %v17797_v3, %v11633_v2  ;;  %vm3763_vm14 = vcmp.lt.s32.totalorder (!%p6830_p3), %v17798_v47, %v11633_v2  ;;  %vm11651_vm6 = vmand (!%p6830_p3), %vm3720_vm7, %vm3760_vm15  ;;  %v17816_v60 = vld [vmem:[#allocation70_spill] sm:$0xff] (!%p6830_p3)  ;;  %v17817_v11 = vld [vmem:[#allocation71_spill] sm:$0xff] (!%p6830_p3) }
 0x3a3   : > { %vm3724_vm0 = vcmp.ge.s32.totalorder (!%p6830_p3), %v17801_v52, %v11631_v19  ;;  %vm3764_vm1 = vcmp.lt.s32.totalorder (!%p6830_p3), %v17801_v52, %v11633_v2  ;;  %vm11659_vm2 = vmand (!%p6830_p3), %vm3721_vm8, %vm3761_vm10  ;;  %vm3725_vm3 = vcmp.ge.s32.totalorder (!%p6830_p3), %v17804_v17, %v11631_v19  ;;  %vm3765_vm4 = vcmp.lt.s32.totalorder (!%p6830_p3), %v17804_v17, %v11633_v2  ;;  %v17818_v55 = vld [vmem:[#allocation72_spill] sm:$0xff] (!%p6830_p3)  ;;  %v17821_v10 = vld [vmem:[#allocation73_spill] sm:$0xff] (!%p6830_p3) }
 0x3a4   : > { %vm11667_vm5 = vmand (!%p6830_p3), %vm3722_vm11, %vm3762_vm13  ;;  %vm3766_vm8 = vcmp.lt.s32.totalorder (!%p6830_p3), %v17807_v23, %v11633_v2  ;;  %vm3767_vm9 = vcmp.lt.s32.totalorder (!%p6830_p3), %v17808_v28, %v11633_v2  ;;  %v17822_v7 = vld [vmem:[#allocation74_spill] sm:$0xff] (!%p6830_p3)  ;;  %v17823_v0 = vld [vmem:[#allocation75_spill] sm:$0xff] (!%p6830_p3)  ;;  %vm3770_vm10 = vcmp.lt.s32.totalorder (!%p6830_p3), %v17813_v20, %v11633_v2  ;;  %vm3774_vm11 = vcmp.lt.s32.totalorder (!%p6830_p3), %v17821_v10, %v11633_v2 }
 0x3a5   : > { %vm11677_vm15 = vmand (!%p6830_p3), %vm3723_vm12, %vm3763_vm14  ;;  %vm3769_vm12 = vcmp.lt.s32.totalorder (!%p6830_p3), %v17812_v45, %v11633_v2  ;;  %v17827_v37 = vld [vmem:[#allocation76_spill] sm:$0xff] (!%p6830_p3)  ;;  %v17828_v62 = vld [vmem:[#allocation77_spill] sm:$0xff] (!%p6830_p3)  ;;  %vm3775_vm13 = vcmp.lt.s32.totalorder (!%p6830_p3), %v17822_v7, %v11633_v2 }
 0x3a6   : > { %vm11689_vm7 = vmand (!%p6830_p3), %vm3724_vm0, %vm3764_vm1  ;;  %vm17836_vm1 = vcmp.ge.s32.totalorder (!%p6830_p3), %v17812_v45, %v11631_v19  ;;  %v17839_v40 = vld [vmem:[#allocation20_spill] sm:$0xff] (!%p6830_p3)  ;;  %v17840_v24 = vld [vmem:[#allocation21_spill] sm:$0xff] (!%p6830_p3) }
 0x3a7   : > { %vm11707_vm0 = vmand %vm3725_vm3, %vm3765_vm4  ;;  %vm17824_vm3 = vcmp.ge.s32.totalorder %v17807_v23, %v11631_v19  ;;  %v3912_v61 = vsel %vm11651_vm6, %v17839_v40, -inf  ;;  %v3913_v30 = vsel %vm11659_vm2, %v17840_v24, -inf  ;;  %v17841_v22 = vld [vmem:[#allocation24_spill] sm:$0xff]  ;;  %v17842_v42 = vld [vmem:[#allocation25_spill] sm:$0xff]  ;;  %vm17851_vm2 = vcmp.lt.s32.totalorder %v17816_v60, %v11633_v2 }
 0x3a8   : > { %vm11725_vm4 = vmand %vm17824_vm3, %vm3766_vm8  ;;  %vm17829_vm8 = vcmp.ge.s32.totalorder %v17808_v28, %v11631_v19  ;;  %v3914_v14 = vsel %vm11667_vm5, %v17841_v22, -inf  ;;  %v3915_v49 = vsel %vm11677_vm15, %v17842_v42, -inf  ;;  %v17846_v53 = vld [vmem:[#allocation28_spill] sm:$0xff]  ;;  %v17847_v34 = vld [vmem:[#allocation29_spill] sm:$0xff]  ;;  %vm17852_vm5 = vcmp.ge.s32.totalorder %v17816_v60, %v11631_v19 }
 0x3a9   : > { %v17826_v57 = vsel %vm11725_vm4, 4294967295, %v17825_v57  ;;  %vm11743_vm3 = vmand %vm17829_vm8, %vm3767_vm9  ;;  %vm17832_vm4 = vcmp.lt.s32.totalorder %v17811_v12, %v11633_v2  ;;  %vm17833_vm9 = vcmp.ge.s32.totalorder %v17811_v12, %v11631_v19  ;;  %v3916_v35 = vsel %vm11689_vm7, %v17846_v53, -inf  ;;  %v17848_v5 = vld [vmem:[#allocation32_spill] sm:$0xff]  ;;  %v17850_v50 = vld [vmem:[#allocation33_spill] sm:$0xff] }
 0x3aa   : > { %vm11761_vm8 = vmand %vm17833_vm9, %vm17832_vm4  ;;  %v3917_v26 = vsel %vm11707_vm0, %v17847_v34, -inf  ;;  %vm17849_vm6 = vnez %v17826_v57  ;;  %v3919_v54 = vsel %vm11743_vm3, %v17850_v50, -inf  ;;  %v17855_v56 = vld [vmem:[#allocation37_spill] sm:$0xff]  ;;  %v17856_v16 = vld [vmem:[#allocation38_spill] sm:$0xff]  ;;  %v3950_v63 = vmax.f32 %v3912_v61, %v3916_v35 }
 0x3ab   : > { %vm11768_vm14 = vmand %vm17836_vm1, %vm3769_vm12  ;;  %vm17843_vm12 = vcmp.ge.s32.totalorder %v17813_v20, %v11631_v19  ;;  %v3918_v51 = vsel %vm17849_vm6, %v17848_v5, -inf  ;;  %v3920_v13 = vsel %vm11761_vm8, %v17855_v56, -inf  ;;  %v17857_v1 = vld [vmem:[#allocation43_spill] sm:$0xff]  ;;  %vm17858_vm7 = vcmp.lt.s32.totalorder %v17817_v11, %v11633_v2  ;;  %v17862_v39 = vld [vmem:[#allocation44_spill] sm:$0xff] }
 0x3ac   : > { %vm11787_vm1 = vmand %vm17843_vm12, %vm3770_vm10  ;;  %v3921_v43 = vsel %vm11768_vm14, %v17856_v16, -inf  ;;  %vm17859_vm10 = vcmp.ge.s32.totalorder %v17817_v11, %v11631_v19  ;;  %v3951_v47 = vmax.f32 %v3913_v30, %v3917_v26  ;;  %v3952_v32 = vmax.f32 %v3914_v14, %v3918_v51  ;;  %v17867_v17 = vld [vmem:[#allocation49_spill] sm:$0xff]  ;;  %v17869_v28 = vld [vmem:[#allocation50_spill] sm:$0xff] }
 0x3ad   : > { %vm11809_vm15 = vmand %vm17852_vm5, %vm17851_vm2  ;;  %v3922_v44 = vsel %vm11787_vm1, %v17857_v1, -inf  ;;  %v3953_v52 = vmax.f32 %v3915_v49, %v3919_v54  ;;  %vm3776_vm14 = vcmp.lt.s32.totalorder %v17823_v0, %v11633_v2  ;;  %vm3777_vm4 = vcmp.lt.s32.totalorder %v17827_v37, %v11633_v2  ;;  %v17870_v31 = vld [vmem:[#allocation78_spill] sm:$0xff]  ;;  %v17872_v60 = vld [vmem:[#allocation55_spill] sm:$0xff] }
 0x3ae   : > { %vm11828_vm0 = vmand %vm17859_vm10, %vm17858_vm7  ;;  %v3923_v3 = vsel %vm11809_vm15, %v17862_v39, -inf  ;;  %vm17863_vm3 = vcmp.lt.s32.totalorder %v17818_v55, %v11633_v2  ;;  %vm17864_vm9 = vcmp.ge.s32.totalorder %v17818_v55, %v11631_v19  ;;  %v3954_v23 = vmax.f32 %v3950_v63, %v3920_v13  ;;  %v17874_v9 = vld [vmem:[#allocation56_spill] sm:$0xff]  ;;  %v17877_v18 = vld [vmem:[#allocation18_spill] sm:$0xff] }
 0x3af   : > { %vm11845_vm8 = vmand %vm17864_vm9, %vm17863_vm3  ;;  %v3924_v36 = vsel %vm11828_vm0, %v17867_v17, -inf  ;;  %vm17868_vm12 = vcmp.ge.s32.totalorder %v17821_v10, %v11631_v19  ;;  %v3955_v12 = vmax.f32 %v3951_v47, %v3921_v43  ;;  %v3956_v45 = vmax.f32 %v3952_v32, %v3922_v44  ;;  %v17878_v40 = vld [vmem:[#allocation80_spill] sm:$0xff]  ;;  %v17880_v61 = vld [vmem:[#allocation19_spill] sm:$0xff] }
 0x3b0   : > { %vm3812_vm1 = vmand %vm17868_vm12, %vm3774_vm11  ;;  %v3925_v48 = vsel %vm11845_vm8, %v17869_v28, -inf  ;;  %v3957_v20 = vmax.f32 %v3953_v52, %v3923_v3  ;;  %vm3739_vm6 = vcmp.ge.s32.totalorder %v17870_v31, %v11631_v19  ;;  %vm3778_vm2 = vcmp.lt.s32.totalorder %v17828_v62, %v11633_v2  ;;  %v17881_v30 = vld [vmem:[#allocation81_spill] sm:$0xff]  ;;  %v17882_v22 = vld [vmem:[#allocation22_spill] sm:$0xff] }
 0x3b1   : > { %vm17871_vm5 = vcmp.ge.s32.totalorder %v17822_v7, %v11631_v19  ;;  %v3926_v11 = vsel %vm3812_vm1, %v17872_v60, -inf  ;;  %v3958_v55 = vmax.f32 %v3954_v23, %v3924_v36  ;;  %vm3779_vm15 = vcmp.lt.s32.totalorder %v17870_v31, %v11633_v2  ;;  %v17875_v7 = vld [vmem:[#allocation79_spill] sm:$0xff]  ;;  %v17883_v42 = vld [vmem:[#allocation82_spill] sm:$0xff]  ;;  %v17887_v51 = vld [vmem:[#allocation84_spill] sm:$0xff] }
 0x3b2   : > { %vm3813_vm11 = vmand %vm17871_vm5, %vm3775_vm13  ;;  %vm17873_vm7 = vcmp.ge.s32.totalorder %v17823_v0, %v11631_v19  ;;  %v3959_v57 = vmax.f32 %v3955_v12, %v3925_v48  ;;  %v3960_v21 = vmax.f32 %v3956_v45, %v3926_v11  ;;  %vm3740_vm13 = vcmp.ge.s32.totalorder %v17875_v7, %v11631_v19  ;;  %v17884_v49 = vld [vmem:[#allocation23_spill] sm:$0xff]  ;;  %v17886_v34 = vld [vmem:[#allocation26_spill] sm:$0xff] }
 0x3b3   : > { %vm3814_vm10 = vmand %vm17873_vm7, %vm3776_vm14  ;;  %v3927_v10 = vsel %vm3813_vm11, %v17874_v9, -inf  ;;  %vm3780_vm0 = vcmp.lt.s32.totalorder %v17875_v7, %v11633_v2  ;;  %vm17876_vm3 = vcmp.ge.s32.totalorder %v17827_v37, %v11631_v19  ;;  %vm3741_vm14 = vcmp.ge.s32.totalorder %v17878_v40, %v11631_v19  ;;  %v17885_v35 = vld [vmem:[#allocation83_spill] sm:$0xff]  ;;  %v17889_v56 = vld [vmem:[#allocation85_spill] sm:$0xff] }
 0x3b4   : > { %vm3815_vm9 = vmand %vm17876_vm3, %vm3777_vm4  ;;  %v3928_v0 = vsel %vm3814_vm10, %v17877_v18, -inf  ;;  %v3961_v33 = vmax.f32 %v3957_v20, %v3927_v10  ;;  %vm3781_vm8 = vcmp.lt.s32.totalorder %v17878_v40, %v11633_v2  ;;  %vm17879_vm12 = vcmp.ge.s32.totalorder %v17828_v62, %v11631_v19  ;;  %v17888_v50 = vld [vmem:[#allocation27_spill] sm:$0xff]  ;;  %v17890_v13 = vld [vmem:[#allocation30_spill] sm:$0xff] }
 0x3b5   : > { %vm3816_vm1 = vmand %vm17879_vm12, %vm3778_vm2  ;;  %v3929_v24 = vsel %vm3815_vm9, %v17880_v61, -inf  ;;  %v3962_v37 = vmax.f32 %v3958_v55, %v3928_v0  ;;  %vm3742_vm4 = vcmp.ge.s32.totalorder %v17881_v30, %v11631_v19  ;;  %vm3782_vm5 = vcmp.lt.s32.totalorder %v17881_v30, %v11633_v2  ;;  %v17891_v1 = vld [vmem:[#allocation86_spill] sm:$0xff]  ;;  %v17892_v44 = vld [vmem:[#allocation31_spill] sm:$0xff] }
 0x3b6   : > { %vm3817_vm11 = vmand %vm3739_vm6, %vm3779_vm15  ;;  %v3930_v14 = vsel %vm3816_vm1, %v17882_v22, -inf  ;;  %v3963_v62 = vmax.f32 %v3959_v57, %v3929_v24  ;;  %vm3743_vm2 = vcmp.ge.s32.totalorder %v17883_v42, %v11631_v19  ;;  %vm3783_vm7 = vcmp.lt.s32.totalorder %v17883_v42, %v11633_v2  ;;  %v17893_v39 = vld [vmem:[#allocation87_spill] sm:$0xff]  ;;  %v17894_v3 = vld [vmem:[#allocation34_spill] sm:$0xff] }
 0x3b7   : > { %vm3818_vm10 = vmand %vm3740_vm13, %vm3780_vm0  ;;  %v3931_v4 = vsel %vm3817_vm11, %v17884_v49, -inf  ;;  %v3964_v53 = vmax.f32 %v3960_v21, %v3930_v14  ;;  %vm3744_vm6 = vcmp.ge.s32.totalorder %v17885_v35, %v11631_v19  ;;  %vm3784_vm15 = vcmp.lt.s32.totalorder %v17885_v35, %v11633_v2  ;;  %v17895_v52 = vld [vmem:[#allocation88_spill] sm:$0xff]  ;;  %v17897_v23 = vld [vmem:[#allocation89_spill] sm:$0xff] }
 0x3b8   : > { %vm3819_vm3 = vmand %vm3741_vm14, %vm3781_vm8  ;;  %v3932_v26 = vsel %vm3818_vm10, %v17886_v34, -inf  ;;  %v3965_v5 = vmax.f32 %v3961_v33, %v3931_v4  ;;  %vm3745_vm13 = vcmp.ge.s32.totalorder %v17887_v51, %v11631_v19  ;;  %vm3785_vm0 = vcmp.lt.s32.totalorder %v17887_v51, %v11633_v2  ;;  %v17896_v41 = vld [vmem:[#allocation36_spill] sm:$0xff]  ;;  %v17899_v45 = vld [vmem:[#allocation90_spill] sm:$0xff] }
 0x3b9   : > { %vm3820_vm9 = vmand %vm3742_vm4, %vm3782_vm5  ;;  %v3933_v54 = vsel %vm3819_vm3, %v17888_v50, -inf  ;;  %v3966_v38 = vmax.f32 %v3962_v37, %v3932_v26  ;;  %vm3746_vm14 = vcmp.ge.s32.totalorder %v17889_v56, %v11631_v19  ;;  %vm3786_vm8 = vcmp.lt.s32.totalorder %v17889_v56, %v11633_v2  ;;  %v17898_v28 = vld [vmem:[#allocation40_spill] sm:$0xff]  ;;  %v17900_v20 = vld [vmem:[#allocation42_spill] sm:$0xff] }
 0x3ba   : > { %vm3821_vm12 = vmand %vm3743_vm2, %vm3783_vm7  ;;  %v3934_v16 = vsel %vm3820_vm9, %v17890_v13, -inf  ;;  %v3967_v43 = vmax.f32 %v3963_v62, %v3933_v54  ;;  %vm3747_vm1 = vcmp.ge.s32.totalorder %v17891_v1, %v11631_v19  ;;  %vm3787_vm4 = vcmp.lt.s32.totalorder %v17891_v1, %v11633_v2  ;;  %v17901_v11 = vld [vmem:[#allocation91_spill] sm:$0xff]  ;;  %v17902_v55 = vld [vmem:[#allocation46_spill] sm:$0xff] }
 0x3bb   : > { %vm3822_vm5 = vmand %vm3744_vm6, %vm3784_vm15  ;;  %v3935_v63 = vsel %vm3821_vm12, %v17892_v44, -inf  ;;  %v3968_v6 = vmax.f32 %v3964_v53, %v3934_v16  ;;  %vm3748_vm11 = vcmp.ge.s32.totalorder %v17893_v39, %v11631_v19  ;;  %vm3788_vm2 = vcmp.lt.s32.totalorder %v17893_v39, %v11633_v2  ;;  %v17903_v57 = vld [vmem:[#allocation92_spill] sm:$0xff]  ;;  %v17905_v0 = vld [vmem:[#allocation93_spill] sm:$0xff] }
 0x3bc   : > { %vm3823_vm7 = vmand %vm3745_vm13, %vm3785_vm0  ;;  %v3936_v47 = vsel %vm3822_vm5, %v17894_v3, -inf  ;;  %v3969_v32 = vmax.f32 %v3965_v5, %v3935_v63  ;;  %vm3749_vm10 = vcmp.ge.s32.totalorder %v17895_v52, %v11631_v19  ;;  %vm3789_vm6 = vcmp.lt.s32.totalorder %v17895_v52, %v11633_v2  ;;  %v17904_v21 = vld [vmem:[#allocation48_spill] sm:$0xff]  ;;  %v17907_v24 = vld [vmem:[#allocation94_spill] sm:$0xff] }
 0x3bd   : > { %vm3824_vm15 = vmand %vm3746_vm14, %vm3786_vm8  ;;  %v3937_v17 = vsel %vm3823_vm7, %v17896_v41, -inf  ;;  %v3970_v36 = vmax.f32 %v3966_v38, %v3936_v47  ;;  %vm3750_vm3 = vcmp.ge.s32.totalorder %v17897_v23, %v11631_v19  ;;  %vm3790_vm13 = vcmp.lt.s32.totalorder %v17897_v23, %v11633_v2  ;;  %v17906_v33 = vld [vmem:[#allocation52_spill] sm:$0xff]  ;;  %v17908_v37 = vld [vmem:[#allocation54_spill] sm:$0xff] }
 0x3be   : > { %vm3825_vm0 = vmand %vm3747_vm1, %vm3787_vm4  ;;  %v3938_v48 = vsel %vm3824_vm15, %v17898_v28, -inf  ;;  %v3971_v12 = vmax.f32 %v3967_v43, %v3937_v17  ;;  %vm3751_vm9 = vcmp.ge.s32.totalorder %v17899_v45, %v11631_v19  ;;  %vm3791_vm14 = vcmp.lt.s32.totalorder %v17899_v45, %v11633_v2  ;;  %v17909_v14 = vld [vmem:[#allocation95_spill] sm:$0xff]  ;;  %v17910_v49 = vld [vmem:[#allocation96_spill] sm:$0xff] }
 0x3bf   : > { %vm3826_vm8 = vmand %vm3748_vm11, %vm3788_vm2  ;;  %v3939_v31 = vsel %vm3825_vm0, %v17900_v20, -inf  ;;  %v3972_v60 = vmax.f32 %v3968_v6, %v3938_v48  ;;  %vm3752_vm12 = vcmp.ge.s32.totalorder %v17901_v11, %v11631_v19  ;;  %vm3792_vm1 = vcmp.lt.s32.totalorder %v17901_v11, %v11633_v2  ;;  %v3993_v6 = vld [vmem:[%s8003_s15 + $0x6] sm:$0x1] }
 0x3c0   : > { %vm3827_vm4 = vmand %vm3749_vm10, %vm3789_vm6  ;;  %v3940_v9 = vsel %vm3826_vm8, %v17902_v55, -inf  ;;  %v3973_v10 = vmax.f32 %v3969_v32, %v3939_v31  ;;  %vm3753_vm5 = vcmp.ge.s32.totalorder %v17903_v57, %v11631_v19  ;;  %vm3793_vm11 = vcmp.lt.s32.totalorder %v17903_v57, %v11633_v2 }
 0x3c1   : > { %vm3828_vm2 = vmand %vm3750_vm3, %vm3790_vm13  ;;  %v3941_v7 = vsel %vm3827_vm4, %v17904_v21, -inf  ;;  %v3974_v18 = vmax.f32 %v3970_v36, %v3940_v9  ;;  %vm3754_vm7 = vcmp.ge.s32.totalorder %v17905_v0, %v11631_v19  ;;  %vm3794_vm10 = vcmp.lt.s32.totalorder %v17905_v0, %v11633_v2 }
 0x3c2   : > { %vm3829_vm6 = vmand %vm3751_vm9, %vm3791_vm14  ;;  %v3942_v40 = vsel %vm3828_vm2, %v17906_v33, -inf  ;;  %v3975_v61 = vmax.f32 %v3971_v12, %v3941_v7  ;;  %vm3755_vm15 = vcmp.ge.s32.totalorder %v17907_v24, %v11631_v19  ;;  %vm3795_vm3 = vcmp.lt.s32.totalorder %v17907_v24, %v11633_v2 }
 0x3c3   : > { %vm3830_vm13 = vmand %vm3752_vm12, %vm3792_vm1  ;;  %v3943_v30 = vsel %vm3829_vm6, %v17908_v37, -inf  ;;  %v3976_v22 = vmax.f32 %v3972_v60, %v3942_v40  ;;  %vm3756_vm0 = vcmp.ge.s32.totalorder %v17909_v14, %v11631_v19  ;;  %vm3796_vm9 = vcmp.lt.s32.totalorder %v17909_v14, %v11633_v2 }
 0x3c4   : > { %vm3831_vm14 = vmand %vm3753_vm5, %vm3793_vm11  ;;  %v3944_v62 = vsel %vm3830_vm13, %v8583_v46, -inf  ;;  %v3977_v42 = vmax.f32 %v3973_v10, %v3943_v30  ;;  %vm3757_vm8 = vcmp.ge.s32.totalorder %v17910_v49, %v11631_v19  ;;  %vm3797_vm12 = vcmp.lt.s32.totalorder %v17910_v49, %v11633_v2 }
 0x3c5   : > { %vm3832_vm1 = vmand %vm3754_vm7, %vm3794_vm10  ;;  %v3945_v4 = vsel %vm3831_vm14, %v8586_v59, -inf  ;;  %v3978_v53 = vmax.f32 %v3974_v18, %v3944_v62 }
 0x3c6   : > { %vm3833_vm4 = vmand %vm3755_vm15, %vm3795_vm3  ;;  %v3946_v35 = vsel %vm3832_vm1, %v8591_v25, -inf  ;;  %v3979_v34 = vmax.f32 %v3975_v61, %v3945_v4 }
 0x3c7   : > { %vm3834_vm5 = vmand %vm3756_vm0, %vm3796_vm9  ;;  %v3947_v26 = vsel %vm3833_vm4, %v8594_v29, -inf  ;;  %v3980_v5 = vmax.f32 %v3976_v22, %v3946_v35 }
 0x3c8   : > { %vm3835_vm11 = vmand %vm3757_vm8, %vm3797_vm12  ;;  %v3948_v2 = vsel %vm3834_vm5, %v8604_v15, -inf  ;;  %v3981_v51 = vmax.f32 %v3977_v42, %v3947_v26 }
 0x3c9   : > { %v3949_v50 = vsel %vm3835_vm11, %v8609_v58, -inf  ;;  %v3982_v54 = vmax.f32 %v3978_v53, %v3948_v2 }
 0x3ca   : > { %v3983_v38 = vmax.f32 %v3979_v34, %v3949_v50  ;;  %v3985_v56 = vmax.f32 %v3980_v5, %v3981_v51 }
 0x3cc   : > { %v3984_v19 = vmax.f32 %v3982_v54, %v3983_v38 }
 0x3ce   : > { %v3986_v13 = vmax.f32 %v3984_v19, %v3985_v56 }
 0x3d0   : > { %v3987_v16 = vrot.slane %v3986_v13, 4 }
 0x3d2   : > { %v3988_v43 = vmax.f32 %v3986_v13, %v3987_v16 }
 0x3d4   : > { %v3989_v1 = vrot.slane %v3988_v43, 2 }
 0x3d6   : > { %v3990_v44 = vmax.f32 %v3988_v43, %v3989_v1 }
 0x3d8   : > { %v3991_v63 = vrot.slane %v3990_v44, 1 }
 0x3da   : > { %v3992_v39 = vmax.f32 %v3990_v44, %v3991_v63 }
 0x3dc   : > { %v3994_v3 = vmax.f32 %v3993_v6, %v3992_v39 }
 0x3de   : > { %3995 = vst [vmem:[%s8003_s15 + $0x6] sm:$0x1] %v3994_v3 }
 0x3df PF: > { %s6831_s29 = sld [smem:[#allocation5 + $0x7]]  ;;  %s6832_s30 = sld [smem:[#allocation5 + $0x8]] }
 0x3e5   : > { %p3999_p6 = scmp.gt.s32.totalorder %s6831_s29, %s8822_s23  ;;  %p4001_p11 = scmp.lt.s32.totalorder %s6832_s30, %s8829_s21 }
 0x3e7   : > { %s4000_s12 = scalar_select %p3999_p6, %s6831_s29, %s8822_s23 }
 0x3e8   : > { %s4002_s24 = scalar_select %p4001_p11, %s6832_s30, %s8829_s21 }
 0x3ea   : > { %p6833_p0 = scmp.ge.s32.totalorder %s4000_s12, %s4002_s24 }
 0x3eb   : > { %s4007_s18 = ssub.s32 (!%p6833_p0), %s6831_s29, %s8822_s23  ;;  %s4047_s22 = ssub.s32 (!%p6833_p0), %s6832_s30, %s8822_s23  ;;  %v17911_v52 = vld [vmem:[#allocation61_spill] sm:$0xff] (!%p6833_p0)  ;;  %v17912_v41 = vld [vmem:[#allocation62_spill] sm:$0xff] (!%p6833_p0)  ;;  %v17915_v36 = vld [vmem:[#allocation63_spill] sm:$0xff] (!%p6833_p0)  ;;  %v17939_v33 = vmov (!%p6833_p0), 0 }
 0x3ec   : > { %4006 = sbr.rel (%p6833_p0) target bundleno = 1067 (0x42b), region = 72  ;;  %v12094_v47 = vstv (!%p6833_p0), %s4007_s18  ;;  %v12096_v32 = vstv (!%p6833_p0), %s4047_s22  ;;  %v17918_v28 = vld [vmem:[#allocation64_spill] sm:$0xff] (!%p6833_p0)  ;;  %v17921_v12 = vld [vmem:[#allocation65_spill] sm:$0xff] (!%p6833_p0)  ;;  %v17922_v45 = vld [vmem:[#allocation66_spill] sm:$0xff] (!%p6833_p0) }
 0x3ed   : > { %vm4009_vm2 = vcmp.ge.s32.totalorder (!%p6833_p0), %v8307_v27, %v12094_v47  ;;  %vm4010_vm7 = vcmp.ge.s32.totalorder (!%p6833_p0), %v8329_v8, %v12094_v47  ;;  %vm4011_vm10 = vcmp.ge.s32.totalorder (!%p6833_p0), %v17911_v52, %v12094_v47  ;;  %vm4049_vm6 = vcmp.lt.s32.totalorder (!%p6833_p0), %v8307_v27, %v12096_v32  ;;  %v17925_v31 = vld [vmem:[#allocation67_spill] sm:$0xff] (!%p6833_p0)  ;;  %v17926_v60 = vld [vmem:[#allocation68_spill] sm:$0xff] (!%p6833_p0)  ;;  %v17927_v11 = vld [vmem:[#allocation69_spill] sm:$0xff] (!%p6833_p0) }
 0x3ee   : > { %vm4050_vm15 = vcmp.lt.s32.totalorder (!%p6833_p0), %v8329_v8, %v12096_v32  ;;  %vm4012_vm3 = vcmp.ge.s32.totalorder (!%p6833_p0), %v17912_v41, %v12094_v47  ;;  %vm4051_vm13 = vcmp.lt.s32.totalorder (!%p6833_p0), %v17911_v52, %v12096_v32  ;;  %vm4052_vm0 = vcmp.lt.s32.totalorder (!%p6833_p0), %v17912_v41, %v12096_v32  ;;  %vm12114_vm9 = vmand (!%p6833_p0), %vm4009_vm2, %vm4049_vm6  ;;  %v17930_v9 = vld [vmem:[#allocation70_spill] sm:$0xff] (!%p6833_p0)  ;;  %v17931_v10 = vld [vmem:[#allocation71_spill] sm:$0xff] (!%p6833_p0) }
 0x3ef   : > { %vm4013_vm14 = vcmp.ge.s32.totalorder (!%p6833_p0), %v17915_v36, %v12094_v47  ;;  %vm4053_vm8 = vcmp.lt.s32.totalorder (!%p6833_p0), %v17915_v36, %v12096_v32  ;;  %vm12122_vm12 = vmand (!%p6833_p0), %vm4010_vm7, %vm4050_vm15  ;;  %vm4014_vm1 = vcmp.ge.s32.totalorder (!%p6833_p0), %v17918_v28, %v12094_v47  ;;  %vm4054_vm4 = vcmp.lt.s32.totalorder (!%p6833_p0), %v17918_v28, %v12096_v32  ;;  %v17932_v57 = vld [vmem:[#allocation72_spill] sm:$0xff] (!%p6833_p0)  ;;  %v17935_v7 = vld [vmem:[#allocation73_spill] sm:$0xff] (!%p6833_p0) }
 0x3f0   : > { %vm12130_vm5 = vmand (!%p6833_p0), %vm4011_vm10, %vm4051_vm13  ;;  %vm4055_vm7 = vcmp.lt.s32.totalorder (!%p6833_p0), %v17921_v12, %v12096_v32  ;;  %vm4056_vm11 = vcmp.lt.s32.totalorder (!%p6833_p0), %v17922_v45, %v12096_v32  ;;  %v17936_v18 = vld [vmem:[#allocation74_spill] sm:$0xff] (!%p6833_p0)  ;;  %v17937_v0 = vld [vmem:[#allocation75_spill] sm:$0xff] (!%p6833_p0)  ;;  %vm4059_vm15 = vcmp.lt.s32.totalorder (!%p6833_p0), %v17927_v11, %v12096_v32  ;;  %vm4063_vm10 = vcmp.lt.s32.totalorder (!%p6833_p0), %v17935_v7, %v12096_v32 }
 0x3f1   : > { %vm12140_vm6 = vmand (!%p6833_p0), %vm4012_vm3, %vm4052_vm0  ;;  %vm4058_vm3 = vcmp.lt.s32.totalorder (!%p6833_p0), %v17926_v60, %v12096_v32  ;;  %v17941_v40 = vld [vmem:[#allocation76_spill] sm:$0xff] (!%p6833_p0)  ;;  %v17942_v61 = vld [vmem:[#allocation77_spill] sm:$0xff] (!%p6833_p0)  ;;  %vm4064_vm13 = vcmp.lt.s32.totalorder (!%p6833_p0), %v17936_v18, %v12096_v32 }
 0x3f2   : > { %vm12152_vm2 = vmand (!%p6833_p0), %vm4013_vm14, %vm4053_vm8  ;;  %vm17950_vm8 = vcmp.ge.s32.totalorder (!%p6833_p0), %v17926_v60, %v12094_v47  ;;  %v17953_v22 = vld [vmem:[#allocation20_spill] sm:$0xff] (!%p6833_p0)  ;;  %v17954_v62 = vld [vmem:[#allocation21_spill] sm:$0xff] (!%p6833_p0) }
 0x3f3   : > { %vm12170_vm14 = vmand %vm4014_vm1, %vm4054_vm4  ;;  %vm17938_vm1 = vcmp.ge.s32.totalorder %v17921_v12, %v12094_v47  ;;  %v4201_v14 = vsel %vm12114_vm9, %v17953_v22, -inf  ;;  %v4202_v42 = vsel %vm12122_vm12, %v17954_v62, -inf  ;;  %v17955_v49 = vld [vmem:[#allocation24_spill] sm:$0xff]  ;;  %v17956_v53 = vld [vmem:[#allocation25_spill] sm:$0xff]  ;;  %vm17965_vm12 = vcmp.lt.s32.totalorder %v17930_v9, %v12096_v32 }
 0x3f4   : > { %vm12188_vm4 = vmand %vm17938_vm1, %vm4055_vm7  ;;  %vm17943_vm7 = vcmp.ge.s32.totalorder %v17922_v45, %v12094_v47  ;;  %v4203_v4 = vsel %vm12130_vm5, %v17955_v49, -inf  ;;  %v4204_v35 = vsel %vm12140_vm6, %v17956_v53, -inf  ;;  %v17960_v26 = vld [vmem:[#allocation28_spill] sm:$0xff]  ;;  %v17961_v2 = vld [vmem:[#allocation29_spill] sm:$0xff]  ;;  %vm17966_vm5 = vcmp.ge.s32.totalorder %v17930_v9, %v12094_v47 }
 0x3f5   : > { %v17940_v33 = vsel %vm12188_vm4, 4294967295, %v17939_v33  ;;  %vm12206_vm1 = vmand %vm17943_vm7, %vm4056_vm11  ;;  %vm17946_vm4 = vcmp.lt.s32.totalorder %v17925_v31, %v12096_v32  ;;  %vm17947_vm11 = vcmp.ge.s32.totalorder %v17925_v31, %v12094_v47  ;;  %v4205_v5 = vsel %vm12152_vm2, %v17960_v26, -inf  ;;  %v17962_v50 = vld [vmem:[#allocation32_spill] sm:$0xff]  ;;  %v17964_v38 = vld [vmem:[#allocation33_spill] sm:$0xff] }
 0x3f6   : > { %vm12224_vm7 = vmand %vm17947_vm11, %vm17946_vm4  ;;  %v4206_v51 = vsel %vm12170_vm14, %v17961_v2, -inf  ;;  %vm17963_vm9 = vnez %v17940_v33  ;;  %v4208_v56 = vsel %vm12206_vm1, %v17964_v38, -inf  ;;  %v17969_v13 = vld [vmem:[#allocation37_spill] sm:$0xff]  ;;  %v17970_v43 = vld [vmem:[#allocation38_spill] sm:$0xff]  ;;  %v4239_v6 = vmax.f32 %v4201_v14, %v4205_v5 }
 0x3f7   : > { %vm12231_vm0 = vmand %vm17950_vm8, %vm4058_vm3  ;;  %vm17957_vm3 = vcmp.ge.s32.totalorder %v17927_v11, %v12094_v47  ;;  %v4207_v54 = vsel %vm17963_vm9, %v17962_v50, -inf  ;;  %v4209_v16 = vsel %vm12224_vm7, %v17969_v13, -inf  ;;  %v17971_v44 = vld [vmem:[#allocation43_spill] sm:$0xff]  ;;  %vm17972_vm2 = vcmp.lt.s32.totalorder %v17931_v10, %v12096_v32  ;;  %v17976_v3 = vld [vmem:[#allocation44_spill] sm:$0xff] }
 0x3f8   : > { %vm12250_vm8 = vmand %vm17957_vm3, %vm4059_vm15  ;;  %v4210_v1 = vsel %vm12231_vm0, %v17970_v43, -inf  ;;  %vm17973_vm15 = vcmp.ge.s32.totalorder %v17931_v10, %v12094_v47  ;;  %v4240_v41 = vmax.f32 %v4202_v42, %v4206_v51  ;;  %v4241_v17 = vmax.f32 %v4203_v4, %v4207_v54  ;;  %v17981_v28 = vld [vmem:[#allocation49_spill] sm:$0xff]  ;;  %v17983_v45 = vld [vmem:[#allocation50_spill] sm:$0xff] }
 0x3f9   : > { %vm12272_vm6 = vmand %vm17966_vm5, %vm17965_vm12  ;;  %v4211_v63 = vsel %vm12250_vm8, %v17971_v44, -inf  ;;  %v4242_v36 = vmax.f32 %v4204_v35, %v4208_v56  ;;  %vm4065_vm0 = vcmp.lt.s32.totalorder %v17937_v0, %v12096_v32  ;;  %vm4066_vm4 = vcmp.lt.s32.totalorder %v17941_v40, %v12096_v32  ;;  %v17984_v55 = vld [vmem:[#allocation78_spill] sm:$0xff]  ;;  %v17986_v9 = vld [vmem:[#allocation55_spill] sm:$0xff] }
 0x3fa   : > { %vm12291_vm14 = vmand %vm17973_vm15, %vm17972_vm2  ;;  %v4212_v52 = vsel %vm12272_vm6, %v17976_v3, -inf  ;;  %vm17977_vm1 = vcmp.lt.s32.totalorder %v17932_v57, %v12096_v32  ;;  %vm17978_vm11 = vcmp.ge.s32.totalorder %v17932_v57, %v12094_v47  ;;  %v4243_v12 = vmax.f32 %v4239_v6, %v4209_v16  ;;  %v17988_v21 = vld [vmem:[#allocation56_spill] sm:$0xff]  ;;  %v17991_v37 = vld [vmem:[#allocation18_spill] sm:$0xff] }
 0x3fb   : > { %vm12308_vm7 = vmand %vm17978_vm11, %vm17977_vm1  ;;  %v4213_v48 = vsel %vm12291_vm14, %v17981_v28, -inf  ;;  %vm17982_vm3 = vcmp.ge.s32.totalorder %v17935_v7, %v12094_v47  ;;  %v4244_v31 = vmax.f32 %v4240_v41, %v4210_v1  ;;  %v4245_v60 = vmax.f32 %v4241_v17, %v4211_v63  ;;  %v17992_v22 = vld [vmem:[#allocation80_spill] sm:$0xff]  ;;  %v17994_v14 = vld [vmem:[#allocation19_spill] sm:$0xff] }
 0x3fc   : > { %vm4101_vm8 = vmand %vm17982_vm3, %vm4063_vm10  ;;  %v4214_v20 = vsel %vm12308_vm7, %v17983_v45, -inf  ;;  %v4246_v11 = vmax.f32 %v4242_v36, %v4212_v52  ;;  %vm4028_vm9 = vcmp.ge.s32.totalorder %v17984_v55, %v12094_v47  ;;  %vm4067_vm12 = vcmp.lt.s32.totalorder %v17942_v61, %v12096_v32  ;;  %v17995_v42 = vld [vmem:[#allocation81_spill] sm:$0xff]  ;;  %v17996_v49 = vld [vmem:[#allocation22_spill] sm:$0xff] }
 0x3fd   : > { %vm17985_vm5 = vcmp.ge.s32.totalorder %v17936_v18, %v12094_v47  ;;  %v4215_v10 = vsel %vm4101_vm8, %v17986_v9, -inf  ;;  %v4247_v57 = vmax.f32 %v4243_v12, %v4213_v48  ;;  %vm4068_vm6 = vcmp.lt.s32.totalorder %v17984_v55, %v12096_v32  ;;  %v17989_v18 = vld [vmem:[#allocation79_spill] sm:$0xff]  ;;  %v17997_v53 = vld [vmem:[#allocation82_spill] sm:$0xff]  ;;  %v18001_v54 = vld [vmem:[#allocation84_spill] sm:$0xff] }
 0x3fe   : > { %vm4102_vm10 = vmand %vm17985_vm5, %vm4064_vm13  ;;  %vm17987_vm2 = vcmp.ge.s32.totalorder %v17937_v0, %v12094_v47  ;;  %v4248_v33 = vmax.f32 %v4244_v31, %v4214_v20  ;;  %v4249_v24 = vmax.f32 %v4245_v60, %v4215_v10  ;;  %vm4029_vm13 = vcmp.ge.s32.totalorder %v17989_v18, %v12094_v47  ;;  %v17998_v35 = vld [vmem:[#allocation23_spill] sm:$0xff]  ;;  %v18000_v2 = vld [vmem:[#allocation26_spill] sm:$0xff] }
 0x3ff   : > { %vm4103_vm15 = vmand %vm17987_vm2, %vm4065_vm0  ;;  %v4216_v7 = vsel %vm4102_vm10, %v17988_v21, -inf  ;;  %vm4069_vm14 = vcmp.lt.s32.totalorder %v17989_v18, %v12096_v32  ;;  %vm17990_vm1 = vcmp.ge.s32.totalorder %v17941_v40, %v12094_v47  ;;  %vm4030_vm0 = vcmp.ge.s32.totalorder %v17992_v22, %v12094_v47  ;;  %v17999_v5 = vld [vmem:[#allocation83_spill] sm:$0xff]  ;;  %v18003_v13 = vld [vmem:[#allocation85_spill] sm:$0xff] }
 0x400   : > { %vm4104_vm11 = vmand %vm17990_vm1, %vm4066_vm4  ;;  %v4217_v0 = vsel %vm4103_vm15, %v17991_v37, -inf  ;;  %v4250_v30 = vmax.f32 %v4246_v11, %v4216_v7  ;;  %vm4070_vm7 = vcmp.lt.s32.totalorder %v17992_v22, %v12096_v32  ;;  %vm17993_vm3 = vcmp.ge.s32.totalorder %v17942_v61, %v12094_v47  ;;  %v18002_v38 = vld [vmem:[#allocation27_spill] sm:$0xff]  ;;  %v18004_v16 = vld [vmem:[#allocation30_spill] sm:$0xff] }
 0x401   : > { %vm4105_vm8 = vmand %vm17993_vm3, %vm4067_vm12  ;;  %v4218_v62 = vsel %vm4104_vm11, %v17994_v14, -inf  ;;  %v4251_v40 = vmax.f32 %v4247_v57, %v4217_v0  ;;  %vm4031_vm4 = vcmp.ge.s32.totalorder %v17995_v42, %v12094_v47  ;;  %vm4071_vm5 = vcmp.lt.s32.totalorder %v17995_v42, %v12096_v32  ;;  %v18005_v44 = vld [vmem:[#allocation86_spill] sm:$0xff]  ;;  %v18006_v63 = vld [vmem:[#allocation31_spill] sm:$0xff] }
 0x402   : > { %vm4106_vm10 = vmand %vm4028_vm9, %vm4068_vm6  ;;  %v4219_v4 = vsel %vm4105_vm8, %v17996_v49, -inf  ;;  %v4252_v61 = vmax.f32 %v4248_v33, %v4218_v62  ;;  %vm4032_vm12 = vcmp.ge.s32.totalorder %v17997_v53, %v12094_v47  ;;  %vm4072_vm2 = vcmp.lt.s32.totalorder %v17997_v53, %v12096_v32  ;;  %v18007_v3 = vld [vmem:[#allocation87_spill] sm:$0xff]  ;;  %v18008_v52 = vld [vmem:[#allocation34_spill] sm:$0xff] }
 0x403   : > { %vm4107_vm15 = vmand %vm4029_vm13, %vm4069_vm14  ;;  %v4220_v34 = vsel %vm4106_vm10, %v17998_v35, -inf  ;;  %v4253_v26 = vmax.f32 %v4249_v24, %v4219_v4  ;;  %vm4033_vm9 = vcmp.ge.s32.totalorder %v17999_v5, %v12094_v47  ;;  %vm4073_vm6 = vcmp.lt.s32.totalorder %v17999_v5, %v12096_v32  ;;  %v18009_v36 = vld [vmem:[#allocation88_spill] sm:$0xff]  ;;  %v18011_v12 = vld [vmem:[#allocation89_spill] sm:$0xff] }
 0x404   : > { %vm4108_vm1 = vmand %vm4030_vm0, %vm4070_vm7  ;;  %v4221_v51 = vsel %vm4107_vm15, %v18000_v2, -inf  ;;  %v4254_v50 = vmax.f32 %v4250_v30, %v4220_v34  ;;  %vm4034_vm13 = vcmp.ge.s32.totalorder %v18001_v54, %v12094_v47  ;;  %vm4074_vm14 = vcmp.lt.s32.totalorder %v18001_v54, %v12096_v32  ;;  %v18010_v23 = vld [vmem:[#allocation36_spill] sm:$0xff]  ;;  %v18013_v60 = vld [vmem:[#allocation90_spill] sm:$0xff] }
 0x405   : > { %vm4109_vm11 = vmand %vm4031_vm4, %vm4071_vm5  ;;  %v4222_v56 = vsel %vm4108_vm1, %v18002_v38, -inf  ;;  %v4255_v19 = vmax.f32 %v4251_v40, %v4221_v51  ;;  %vm4035_vm0 = vcmp.ge.s32.totalorder %v18003_v13, %v12094_v47  ;;  %vm4075_vm7 = vcmp.lt.s32.totalorder %v18003_v13, %v12096_v32  ;;  %v18012_v45 = vld [vmem:[#allocation40_spill] sm:$0xff]  ;;  %v18014_v11 = vld [vmem:[#allocation42_spill] sm:$0xff] }
 0x406   : > { %vm4110_vm3 = vmand %vm4032_vm12, %vm4072_vm2  ;;  %v4223_v43 = vsel %vm4109_vm11, %v18004_v16, -inf  ;;  %v4256_v1 = vmax.f32 %v4252_v61, %v4222_v56  ;;  %vm4036_vm8 = vcmp.ge.s32.totalorder %v18005_v44, %v12094_v47  ;;  %vm4076_vm4 = vcmp.lt.s32.totalorder %v18005_v44, %v12096_v32  ;;  %v18015_v10 = vld [vmem:[#allocation91_spill] sm:$0xff]  ;;  %v18016_v57 = vld [vmem:[#allocation46_spill] sm:$0xff] }
 0x407   : > { %vm4111_vm5 = vmand %vm4033_vm9, %vm4073_vm6  ;;  %v4224_v6 = vsel %vm4110_vm3, %v18006_v63, -inf  ;;  %v4257_v39 = vmax.f32 %v4253_v26, %v4223_v43  ;;  %vm4037_vm10 = vcmp.ge.s32.totalorder %v18007_v3, %v12094_v47  ;;  %vm4077_vm12 = vcmp.lt.s32.totalorder %v18007_v3, %v12096_v32  ;;  %v18017_v33 = vld [vmem:[#allocation92_spill] sm:$0xff]  ;;  %v18019_v0 = vld [vmem:[#allocation93_spill] sm:$0xff] }
 0x408   : > { %vm4112_vm2 = vmand %vm4034_vm13, %vm4074_vm14  ;;  %v4225_v41 = vsel %vm4111_vm5, %v18008_v52, -inf  ;;  %v4258_v17 = vmax.f32 %v4254_v50, %v4224_v6  ;;  %vm4038_vm15 = vcmp.ge.s32.totalorder %v18009_v36, %v12094_v47  ;;  %vm4078_vm9 = vcmp.lt.s32.totalorder %v18009_v36, %v12096_v32  ;;  %v18018_v24 = vld [vmem:[#allocation48_spill] sm:$0xff]  ;;  %v18021_v62 = vld [vmem:[#allocation94_spill] sm:$0xff] }
 0x409   : > { %vm4113_vm6 = vmand %vm4035_vm0, %vm4075_vm7  ;;  %v4226_v28 = vsel %vm4112_vm2, %v18010_v23, -inf  ;;  %v4259_v48 = vmax.f32 %v4255_v19, %v4225_v41  ;;  %vm4039_vm1 = vcmp.ge.s32.totalorder %v18011_v12, %v12094_v47  ;;  %vm4079_vm13 = vcmp.lt.s32.totalorder %v18011_v12, %v12096_v32  ;;  %v18020_v30 = vld [vmem:[#allocation52_spill] sm:$0xff]  ;;  %v18022_v40 = vld [vmem:[#allocation54_spill] sm:$0xff] }
 0x40a   : > { %vm4114_vm14 = vmand %vm4036_vm8, %vm4076_vm4  ;;  %v4227_v20 = vsel %vm4113_vm6, %v18012_v45, -inf  ;;  %v4260_v31 = vmax.f32 %v4256_v1, %v4226_v28  ;;  %vm4040_vm11 = vcmp.ge.s32.totalorder %v18013_v60, %v12094_v47  ;;  %vm4080_vm0 = vcmp.lt.s32.totalorder %v18013_v60, %v12096_v32  ;;  %v18023_v4 = vld [vmem:[#allocation95_spill] sm:$0xff]  ;;  %v18024_v35 = vld [vmem:[#allocation96_spill] sm:$0xff] }
 0x40b   : > { %vm4115_vm7 = vmand %vm4037_vm10, %vm4077_vm12  ;;  %v4228_v55 = vsel %vm4114_vm14, %v18014_v11, -inf  ;;  %v4261_v9 = vmax.f32 %v4257_v39, %v4227_v20  ;;  %vm4041_vm3 = vcmp.ge.s32.totalorder %v18015_v10, %v12094_v47  ;;  %vm4081_vm8 = vcmp.lt.s32.totalorder %v18015_v10, %v12096_v32  ;;  %v4282_v39 = vld [vmem:[%s8003_s15 + $0x7] sm:$0x1] }
 0x40c   : > { %vm4116_vm4 = vmand %vm4038_vm15, %vm4078_vm9  ;;  %v4229_v21 = vsel %vm4115_vm7, %v18016_v57, -inf  ;;  %v4262_v7 = vmax.f32 %v4258_v17, %v4228_v55  ;;  %vm4042_vm5 = vcmp.ge.s32.totalorder %v18017_v33, %v12094_v47  ;;  %vm4082_vm10 = vcmp.lt.s32.totalorder %v18017_v33, %v12096_v32 }
 0x40d   : > { %vm4117_vm12 = vmand %vm4039_vm1, %vm4079_vm13  ;;  %v4230_v18 = vsel %vm4116_vm4, %v18018_v24, -inf  ;;  %v4263_v37 = vmax.f32 %v4259_v48, %v4229_v21  ;;  %vm4043_vm2 = vcmp.ge.s32.totalorder %v18019_v0, %v12094_v47  ;;  %vm4083_vm15 = vcmp.lt.s32.totalorder %v18019_v0, %v12096_v32 }
 0x40e   : > { %vm4118_vm9 = vmand %vm4040_vm11, %vm4080_vm0  ;;  %v4231_v22 = vsel %vm4117_vm12, %v18020_v30, -inf  ;;  %v4264_v14 = vmax.f32 %v4260_v31, %v4230_v18  ;;  %vm4044_vm6 = vcmp.ge.s32.totalorder %v18021_v62, %v12094_v47  ;;  %vm4084_vm1 = vcmp.lt.s32.totalorder %v18021_v62, %v12096_v32 }
 0x40f   : > { %vm4119_vm13 = vmand %vm4041_vm3, %vm4081_vm8  ;;  %v4232_v42 = vsel %vm4118_vm9, %v18022_v40, -inf  ;;  %v4265_v49 = vmax.f32 %v4261_v9, %v4231_v22  ;;  %vm4045_vm14 = vcmp.ge.s32.totalorder %v18023_v4, %v12094_v47  ;;  %vm4085_vm11 = vcmp.lt.s32.totalorder %v18023_v4, %v12096_v32 }
 0x410   : > { %vm4120_vm0 = vmand %vm4042_vm5, %vm4082_vm10  ;;  %v4233_v61 = vsel %vm4119_vm13, %v8583_v46, -inf  ;;  %v4266_v53 = vmax.f32 %v4262_v7, %v4232_v42  ;;  %vm4046_vm7 = vcmp.ge.s32.totalorder %v18024_v35, %v12094_v47  ;;  %vm4086_vm3 = vcmp.lt.s32.totalorder %v18024_v35, %v12096_v32 }
 0x411   : > { %vm4121_vm8 = vmand %vm4043_vm2, %vm4083_vm15  ;;  %v4234_v34 = vsel %vm4120_vm0, %v8586_v59, -inf  ;;  %v4267_v26 = vmax.f32 %v4263_v37, %v4233_v61 }
 0x412   : > { %vm4122_vm4 = vmand %vm4044_vm6, %vm4084_vm1  ;;  %v4235_v5 = vsel %vm4121_vm8, %v8591_v25, -inf  ;;  %v4268_v2 = vmax.f32 %v4264_v14, %v4234_v34 }
 0x413   : > { %vm4123_vm5 = vmand %vm4045_vm14, %vm4085_vm11  ;;  %v4236_v51 = vsel %vm4122_vm4, %v8594_v29, -inf  ;;  %v4269_v50 = vmax.f32 %v4265_v49, %v4235_v5 }
 0x414   : > { %vm4124_vm10 = vmand %vm4046_vm7, %vm4086_vm3  ;;  %v4237_v32 = vsel %vm4123_vm5, %v8604_v15, -inf  ;;  %v4270_v54 = vmax.f32 %v4266_v53, %v4236_v51 }
 0x415   : > { %v4238_v38 = vsel %vm4124_vm10, %v8609_v58, -inf  ;;  %v4271_v56 = vmax.f32 %v4267_v26, %v4237_v32 }
 0x416   : > { %v4272_v19 = vmax.f32 %v4268_v2, %v4238_v38  ;;  %v4274_v13 = vmax.f32 %v4269_v50, %v4270_v54 }
 0x418   : > { %v4273_v47 = vmax.f32 %v4271_v56, %v4272_v19 }
 0x41a   : > { %v4275_v16 = vmax.f32 %v4273_v47, %v4274_v13 }
 0x41c   : > { %v4276_v43 = vrot.slane %v4275_v16, 4 }
 0x41e   : > { %v4277_v1 = vmax.f32 %v4275_v16, %v4276_v43 }
 0x420   : > { %v4278_v44 = vrot.slane %v4277_v1, 2 }
 0x422   : > { %v4279_v63 = vmax.f32 %v4277_v1, %v4278_v44 }
 0x424   : > { %v4280_v6 = vrot.slane %v4279_v63, 1 }
 0x426   : > { %v4281_v3 = vmax.f32 %v4279_v63, %v4280_v6 }
 0x428   : > { %v4283_v52 = vmax.f32 %v4282_v39, %v4281_v3 }
 0x42a   : > { %4284 = vst [vmem:[%s8003_s15 + $0x7] sm:$0x1] %v4283_v52 }
 0x42b PF: > { %s6834_s25 = sld [smem:[#allocation5 + $0x8]]  ;;  %s6835_s19 = sld [smem:[#allocation5 + $0x9]] }
 0x431   : > { %p4288_p13 = scmp.gt.s32.totalorder %s6834_s25, %s8822_s23  ;;  %p4290_p4 = scmp.lt.s32.totalorder %s6835_s19, %s8829_s21 }
 0x433   : > { %s4289_s17 = scalar_select %p4288_p13, %s6834_s25, %s8822_s23 }
 0x434   : > { %s4291_s14 = scalar_select %p4290_p4, %s6835_s19, %s8829_s21 }
 0x436   : > { %p6836_p7 = scmp.ge.s32.totalorder %s4289_s17, %s4291_s14 }
 0x437   : > { %s4296_s20 = ssub.s32 (!%p6836_p7), %s6834_s25, %s8822_s23  ;;  %s4336_s29 = ssub.s32 (!%p6836_p7), %s6835_s19, %s8822_s23  ;;  %v18025_v36 = vld [vmem:[#allocation61_spill] sm:$0xff] (!%p6836_p7)  ;;  %v18026_v23 = vld [vmem:[#allocation62_spill] sm:$0xff] (!%p6836_p7)  ;;  %v18029_v48 = vld [vmem:[#allocation63_spill] sm:$0xff] (!%p6836_p7)  ;;  %v18053_v30 = vmov (!%p6836_p7), 0 }
 0x438   : > { %4295 = sbr.rel (%p6836_p7) target bundleno = 1143 (0x477), region = 76  ;;  %v12557_v41 = vstv (!%p6836_p7), %s4296_s20  ;;  %v12559_v17 = vstv (!%p6836_p7), %s4336_s29  ;;  %v18032_v45 = vld [vmem:[#allocation64_spill] sm:$0xff] (!%p6836_p7)  ;;  %v18035_v31 = vld [vmem:[#allocation65_spill] sm:$0xff] (!%p6836_p7)  ;;  %v18036_v60 = vld [vmem:[#allocation66_spill] sm:$0xff] (!%p6836_p7) }
 0x439   : > { %vm4298_vm12 = vcmp.ge.s32.totalorder (!%p6836_p7), %v8307_v27, %v12557_v41  ;;  %vm4299_vm2 = vcmp.ge.s32.totalorder (!%p6836_p7), %v8329_v8, %v12557_v41  ;;  %vm4300_vm15 = vcmp.ge.s32.totalorder (!%p6836_p7), %v18025_v36, %v12557_v41  ;;  %vm4338_vm9 = vcmp.lt.s32.totalorder (!%p6836_p7), %v8307_v27, %v12559_v17  ;;  %v18039_v55 = vld [vmem:[#allocation67_spill] sm:$0xff] (!%p6836_p7)  ;;  %v18040_v9 = vld [vmem:[#allocation68_spill] sm:$0xff] (!%p6836_p7)  ;;  %v18041_v10 = vld [vmem:[#allocation69_spill] sm:$0xff] (!%p6836_p7) }
 0x43a   : > { %vm4339_vm6 = vcmp.lt.s32.totalorder (!%p6836_p7), %v8329_v8, %v12559_v17  ;;  %vm4301_vm1 = vcmp.ge.s32.totalorder (!%p6836_p7), %v18026_v23, %v12557_v41  ;;  %vm4340_vm13 = vcmp.lt.s32.totalorder (!%p6836_p7), %v18025_v36, %v12559_v17  ;;  %vm4341_vm14 = vcmp.lt.s32.totalorder (!%p6836_p7), %v18026_v23, %v12559_v17  ;;  %vm12577_vm11 = vmand (!%p6836_p7), %vm4298_vm12, %vm4338_vm9  ;;  %v18044_v21 = vld [vmem:[#allocation70_spill] sm:$0xff] (!%p6836_p7)  ;;  %v18045_v7 = vld [vmem:[#allocation71_spill] sm:$0xff] (!%p6836_p7) }
 0x43b   : > { %vm4302_vm0 = vcmp.ge.s32.totalorder (!%p6836_p7), %v18029_v48, %v12557_v41  ;;  %vm4342_vm7 = vcmp.lt.s32.totalorder (!%p6836_p7), %v18029_v48, %v12559_v17  ;;  %vm12585_vm3 = vmand (!%p6836_p7), %vm4299_vm2, %vm4339_vm6  ;;  %vm4303_vm8 = vcmp.ge.s32.totalorder (!%p6836_p7), %v18032_v45, %v12557_v41  ;;  %vm4343_vm4 = vcmp.lt.s32.totalorder (!%p6836_p7), %v18032_v45, %v12559_v17  ;;  %v18046_v33 = vld [vmem:[#allocation72_spill] sm:$0xff] (!%p6836_p7)  ;;  %v18049_v18 = vld [vmem:[#allocation73_spill] sm:$0xff] (!%p6836_p7) }
 0x43c   : > { %vm12593_vm5 = vmand (!%p6836_p7), %vm4300_vm15, %vm4340_vm13  ;;  %vm4344_vm2 = vcmp.lt.s32.totalorder (!%p6836_p7), %v18035_v31, %v12559_v17  ;;  %vm4345_vm10 = vcmp.lt.s32.totalorder (!%p6836_p7), %v18036_v60, %v12559_v17  ;;  %v18050_v37 = vld [vmem:[#allocation74_spill] sm:$0xff] (!%p6836_p7)  ;;  %v18051_v0 = vld [vmem:[#allocation75_spill] sm:$0xff] (!%p6836_p7)  ;;  %vm4348_vm6 = vcmp.lt.s32.totalorder (!%p6836_p7), %v18041_v10, %v12559_v17  ;;  %vm4352_vm15 = vcmp.lt.s32.totalorder (!%p6836_p7), %v18049_v18, %v12559_v17 }
 0x43d   : > { %vm12603_vm9 = vmand (!%p6836_p7), %vm4301_vm1, %vm4341_vm14  ;;  %vm4347_vm1 = vcmp.lt.s32.totalorder (!%p6836_p7), %v18040_v9, %v12559_v17  ;;  %v18055_v22 = vld [vmem:[#allocation76_spill] sm:$0xff] (!%p6836_p7)  ;;  %v18056_v14 = vld [vmem:[#allocation77_spill] sm:$0xff] (!%p6836_p7)  ;;  %vm4353_vm13 = vcmp.lt.s32.totalorder (!%p6836_p7), %v18050_v37, %v12559_v17 }
 0x43e   : > { %vm12615_vm12 = vmand (!%p6836_p7), %vm4302_vm0, %vm4342_vm7  ;;  %vm18064_vm7 = vcmp.ge.s32.totalorder (!%p6836_p7), %v18040_v9, %v12557_v41  ;;  %v18067_v49 = vld [vmem:[#allocation20_spill] sm:$0xff] (!%p6836_p7)  ;;  %v18068_v61 = vld [vmem:[#allocation21_spill] sm:$0xff] (!%p6836_p7) }
 0x43f   : > { %vm12633_vm0 = vmand %vm4303_vm8, %vm4343_vm4  ;;  %vm18052_vm8 = vcmp.ge.s32.totalorder %v18035_v31, %v12557_v41  ;;  %v4490_v4 = vsel %vm12577_vm11, %v18067_v49, -inf  ;;  %v4491_v53 = vsel %vm12585_vm3, %v18068_v61, -inf  ;;  %v18069_v35 = vld [vmem:[#allocation24_spill] sm:$0xff]  ;;  %v18070_v26 = vld [vmem:[#allocation25_spill] sm:$0xff]  ;;  %vm18079_vm3 = vcmp.lt.s32.totalorder %v18044_v21, %v12559_v17 }
 0x440   : > { %vm12651_vm4 = vmand %vm18052_vm8, %vm4344_vm2  ;;  %vm18057_vm2 = vcmp.ge.s32.totalorder %v18036_v60, %v12557_v41  ;;  %v4492_v34 = vsel %vm12593_vm5, %v18069_v35, -inf  ;;  %v4493_v5 = vsel %vm12603_vm9, %v18070_v26, -inf  ;;  %v18074_v51 = vld [vmem:[#allocation28_spill] sm:$0xff]  ;;  %v18075_v32 = vld [vmem:[#allocation29_spill] sm:$0xff]  ;;  %vm18080_vm5 = vcmp.ge.s32.totalorder %v18044_v21, %v12557_v41 }
 0x441   : > { %v18054_v30 = vsel %vm12651_vm4, 4294967295, %v18053_v30  ;;  %vm12669_vm8 = vmand %vm18057_vm2, %vm4345_vm10  ;;  %vm18060_vm4 = vcmp.lt.s32.totalorder %v18039_v55, %v12559_v17  ;;  %vm18061_vm10 = vcmp.ge.s32.totalorder %v18039_v55, %v12557_v41  ;;  %v4494_v50 = vsel %vm12615_vm12, %v18074_v51, -inf  ;;  %v18076_v38 = vld [vmem:[#allocation32_spill] sm:$0xff]  ;;  %v18078_v19 = vld [vmem:[#allocation33_spill] sm:$0xff] }
 0x442   : > { %vm12687_vm2 = vmand %vm18061_vm10, %vm18060_vm4  ;;  %v4495_v54 = vsel %vm12633_vm0, %v18075_v32, -inf  ;;  %vm18077_vm11 = vnez %v18054_v30  ;;  %v4497_v13 = vsel %vm12669_vm8, %v18078_v19, -inf  ;;  %v18083_v16 = vld [vmem:[#allocation37_spill] sm:$0xff]  ;;  %v18084_v1 = vld [vmem:[#allocation38_spill] sm:$0xff]  ;;  %v4528_v39 = vmax.f32 %v4490_v4, %v4494_v50 }
 0x443   : > { %vm12694_vm14 = vmand %vm18064_vm7, %vm4347_vm1  ;;  %vm18071_vm1 = vcmp.ge.s32.totalorder %v18041_v10, %v12557_v41  ;;  %v4496_v56 = vsel %vm18077_vm11, %v18076_v38, -inf  ;;  %v4498_v43 = vsel %vm12687_vm2, %v18083_v16, -inf  ;;  %v18085_v63 = vld [vmem:[#allocation43_spill] sm:$0xff]  ;;  %vm18086_vm12 = vcmp.lt.s32.totalorder %v18045_v7, %v12559_v17  ;;  %v18090_v52 = vld [vmem:[#allocation44_spill] sm:$0xff] }
 0x444   : > { %vm12713_vm7 = vmand %vm18071_vm1, %vm4348_vm6  ;;  %v4499_v44 = vsel %vm12694_vm14, %v18084_v1, -inf  ;;  %vm18087_vm6 = vcmp.ge.s32.totalorder %v18045_v7, %v12557_v41  ;;  %v4529_v23 = vmax.f32 %v4491_v53, %v4495_v54  ;;  %v4530_v28 = vmax.f32 %v4492_v34, %v4496_v56  ;;  %v18095_v45 = vld [vmem:[#allocation49_spill] sm:$0xff]  ;;  %v18097_v60 = vld [vmem:[#allocation50_spill] sm:$0xff] }
 0x445   : > { %vm12735_vm9 = vmand %vm18080_vm5, %vm18079_vm3  ;;  %v4500_v6 = vsel %vm12713_vm7, %v18085_v63, -inf  ;;  %v4531_v48 = vmax.f32 %v4493_v5, %v4497_v13  ;;  %vm4354_vm14 = vcmp.lt.s32.totalorder %v18051_v0, %v12559_v17  ;;  %vm4355_vm4 = vcmp.lt.s32.totalorder %v18055_v22, %v12559_v17  ;;  %v18098_v57 = vld [vmem:[#allocation78_spill] sm:$0xff]  ;;  %v18100_v21 = vld [vmem:[#allocation55_spill] sm:$0xff] }
 0x446   : > { %vm12754_vm0 = vmand %vm18087_vm6, %vm18086_vm12  ;;  %v4501_v36 = vsel %vm12735_vm9, %v18090_v52, -inf  ;;  %vm18091_vm8 = vcmp.lt.s32.totalorder %v18046_v33, %v12559_v17  ;;  %vm18092_vm10 = vcmp.ge.s32.totalorder %v18046_v33, %v12557_v41  ;;  %v4532_v31 = vmax.f32 %v4528_v39, %v4498_v43  ;;  %v18102_v24 = vld [vmem:[#allocation56_spill] sm:$0xff]  ;;  %v18105_v40 = vld [vmem:[#allocation18_spill] sm:$0xff] }
 0x447   : > { %vm12771_vm2 = vmand %vm18092_vm10, %vm18091_vm8  ;;  %v4502_v20 = vsel %vm12754_vm0, %v18095_v45, -inf  ;;  %vm18096_vm1 = vcmp.ge.s32.totalorder %v18049_v18, %v12557_v41  ;;  %v4533_v55 = vmax.f32 %v4529_v23, %v4499_v44  ;;  %v4534_v9 = vmax.f32 %v4530_v28, %v4500_v6  ;;  %v18106_v49 = vld [vmem:[#allocation80_spill] sm:$0xff]  ;;  %v18108_v4 = vld [vmem:[#allocation19_spill] sm:$0xff] }
 0x448   : > { %vm4390_vm7 = vmand %vm18096_vm1, %vm4352_vm15  ;;  %v4503_v11 = vsel %vm12771_vm2, %v18097_v60, -inf  ;;  %v4535_v10 = vmax.f32 %v4531_v48, %v4501_v36  ;;  %vm4317_vm11 = vcmp.ge.s32.totalorder %v18098_v57, %v12557_v41  ;;  %vm4356_vm3 = vcmp.lt.s32.totalorder %v18056_v14, %v12559_v17  ;;  %v18109_v53 = vld [vmem:[#allocation81_spill] sm:$0xff]  ;;  %v18110_v35 = vld [vmem:[#allocation22_spill] sm:$0xff] }
 0x449   : > { %vm18099_vm5 = vcmp.ge.s32.totalorder %v18050_v37, %v12557_v41  ;;  %v4504_v7 = vsel %vm4390_vm7, %v18100_v21, -inf  ;;  %v4536_v33 = vmax.f32 %v4532_v31, %v4502_v20  ;;  %vm4357_vm9 = vcmp.lt.s32.totalorder %v18098_v57, %v12559_v17  ;;  %v18103_v37 = vld [vmem:[#allocation79_spill] sm:$0xff]  ;;  %v18111_v26 = vld [vmem:[#allocation82_spill] sm:$0xff]  ;;  %v18115_v56 = vld [vmem:[#allocation84_spill] sm:$0xff] }
 0x44a   : > { %vm4391_vm15 = vmand %vm18099_vm5, %vm4353_vm13  ;;  %vm18101_vm12 = vcmp.ge.s32.totalorder %v18051_v0, %v12557_v41  ;;  %v4537_v30 = vmax.f32 %v4533_v55, %v4503_v11  ;;  %v4538_v62 = vmax.f32 %v4534_v9, %v4504_v7  ;;  %vm4318_vm13 = vcmp.ge.s32.totalorder %v18103_v37, %v12557_v41  ;;  %v18112_v5 = vld [vmem:[#allocation23_spill] sm:$0xff]  ;;  %v18114_v32 = vld [vmem:[#allocation26_spill] sm:$0xff] }
 0x44b   : > { %vm4392_vm6 = vmand %vm18101_vm12, %vm4354_vm14  ;;  %v4505_v18 = vsel %vm4391_vm15, %v18102_v24, -inf  ;;  %vm4358_vm0 = vcmp.lt.s32.totalorder %v18103_v37, %v12559_v17  ;;  %vm18104_vm8 = vcmp.ge.s32.totalorder %v18055_v22, %v12557_v41  ;;  %vm4319_vm14 = vcmp.ge.s32.totalorder %v18106_v49, %v12557_v41  ;;  %v18113_v50 = vld [vmem:[#allocation83_spill] sm:$0xff]  ;;  %v18117_v16 = vld [vmem:[#allocation85_spill] sm:$0xff] }
 0x44c   : > { %vm4393_vm10 = vmand %vm18104_vm8, %vm4355_vm4  ;;  %v4506_v0 = vsel %vm4392_vm6, %v18105_v40, -inf  ;;  %v4539_v42 = vmax.f32 %v4535_v10, %v4505_v18  ;;  %vm4359_vm2 = vcmp.lt.s32.totalorder %v18106_v49, %v12559_v17  ;;  %vm18107_vm1 = vcmp.ge.s32.totalorder %v18056_v14, %v12557_v41  ;;  %v18116_v19 = vld [vmem:[#allocation27_spill] sm:$0xff]  ;;  %v18118_v43 = vld [vmem:[#allocation30_spill] sm:$0xff] }
 0x44d   : > { %vm4394_vm7 = vmand %vm18107_vm1, %vm4356_vm3  ;;  %v4507_v61 = vsel %vm4393_vm10, %v18108_v4, -inf  ;;  %v4540_v22 = vmax.f32 %v4536_v33, %v4506_v0  ;;  %vm4320_vm4 = vcmp.ge.s32.totalorder %v18109_v53, %v12557_v41  ;;  %vm4360_vm5 = vcmp.lt.s32.totalorder %v18109_v53, %v12559_v17  ;;  %v18119_v63 = vld [vmem:[#allocation86_spill] sm:$0xff]  ;;  %v18120_v6 = vld [vmem:[#allocation31_spill] sm:$0xff] }
 0x44e   : > { %vm4395_vm15 = vmand %vm4317_vm11, %vm4357_vm9  ;;  %v4508_v34 = vsel %vm4394_vm7, %v18110_v35, -inf  ;;  %v4541_v14 = vmax.f32 %v4537_v30, %v4507_v61  ;;  %vm4321_vm3 = vcmp.ge.s32.totalorder %v18111_v26, %v12557_v41  ;;  %vm4361_vm12 = vcmp.lt.s32.totalorder %v18111_v26, %v12559_v17  ;;  %v18121_v52 = vld [vmem:[#allocation87_spill] sm:$0xff]  ;;  %v18122_v36 = vld [vmem:[#allocation34_spill] sm:$0xff] }
 0x44f   : > { %vm4396_vm6 = vmand %vm4318_vm13, %vm4358_vm0  ;;  %v4509_v2 = vsel %vm4395_vm15, %v18112_v5, -inf  ;;  %v4542_v51 = vmax.f32 %v4538_v62, %v4508_v34  ;;  %vm4322_vm11 = vcmp.ge.s32.totalorder %v18113_v50, %v12557_v41  ;;  %vm4362_vm9 = vcmp.lt.s32.totalorder %v18113_v50, %v12559_v17  ;;  %v18123_v48 = vld [vmem:[#allocation88_spill] sm:$0xff]  ;;  %v18125_v31 = vld [vmem:[#allocation89_spill] sm:$0xff] }
 0x450   : > { %vm4397_vm8 = vmand %vm4319_vm14, %vm4359_vm2  ;;  %v4510_v54 = vsel %vm4396_vm6, %v18114_v32, -inf  ;;  %v4543_v38 = vmax.f32 %v4539_v42, %v4509_v2  ;;  %vm4323_vm13 = vcmp.ge.s32.totalorder %v18115_v56, %v12557_v41  ;;  %vm4363_vm0 = vcmp.lt.s32.totalorder %v18115_v56, %v12559_v17  ;;  %v18124_v12 = vld [vmem:[#allocation36_spill] sm:$0xff]  ;;  %v18127_v9 = vld [vmem:[#allocation90_spill] sm:$0xff] }
 0x451   : > { %vm4398_vm10 = vmand %vm4320_vm4, %vm4360_vm5  ;;  %v4511_v13 = vsel %vm4397_vm8, %v18116_v19, -inf  ;;  %v4544_v47 = vmax.f32 %v4540_v22, %v4510_v54  ;;  %vm4324_vm14 = vcmp.ge.s32.totalorder %v18117_v16, %v12557_v41  ;;  %vm4364_vm2 = vcmp.lt.s32.totalorder %v18117_v16, %v12559_v17  ;;  %v18126_v60 = vld [vmem:[#allocation40_spill] sm:$0xff]  ;;  %v18128_v10 = vld [vmem:[#allocation42_spill] sm:$0xff] }
 0x452   : > { %vm4399_vm1 = vmand %vm4321_vm3, %vm4361_vm12  ;;  %v4512_v1 = vsel %vm4398_vm10, %v18118_v43, -inf  ;;  %v4545_v44 = vmax.f32 %v4541_v14, %v4511_v13  ;;  %vm4325_vm7 = vcmp.ge.s32.totalorder %v18119_v63, %v12557_v41  ;;  %vm4365_vm4 = vcmp.lt.s32.totalorder %v18119_v63, %v12559_v17  ;;  %v18129_v7 = vld [vmem:[#allocation91_spill] sm:$0xff]  ;;  %v18130_v33 = vld [vmem:[#allocation46_spill] sm:$0xff] }
 0x453   : > { %vm4400_vm5 = vmand %vm4322_vm11, %vm4362_vm9  ;;  %v4513_v39 = vsel %vm4399_vm1, %v18120_v6, -inf  ;;  %v4546_v3 = vmax.f32 %v4542_v51, %v4512_v1  ;;  %vm4326_vm15 = vcmp.ge.s32.totalorder %v18121_v52, %v12557_v41  ;;  %vm4366_vm3 = vcmp.lt.s32.totalorder %v18121_v52, %v12559_v17  ;;  %v18131_v30 = vld [vmem:[#allocation92_spill] sm:$0xff]  ;;  %v18133_v0 = vld [vmem:[#allocation93_spill] sm:$0xff] }
 0x454   : > { %vm4401_vm12 = vmand %vm4323_vm13, %vm4363_vm0  ;;  %v4514_v23 = vsel %vm4400_vm5, %v18122_v36, -inf  ;;  %v4547_v28 = vmax.f32 %v4543_v38, %v4513_v39  ;;  %vm4327_vm6 = vcmp.ge.s32.totalorder %v18123_v48, %v12557_v41  ;;  %vm4367_vm11 = vcmp.lt.s32.totalorder %v18123_v48, %v12559_v17  ;;  %v18132_v62 = vld [vmem:[#allocation48_spill] sm:$0xff]  ;;  %v18135_v61 = vld [vmem:[#allocation94_spill] sm:$0xff] }
 0x455   : > { %vm4402_vm9 = vmand %vm4324_vm14, %vm4364_vm2  ;;  %v4515_v45 = vsel %vm4401_vm12, %v18124_v12, -inf  ;;  %v4548_v20 = vmax.f32 %v4544_v47, %v4514_v23  ;;  %vm4328_vm8 = vcmp.ge.s32.totalorder %v18125_v31, %v12557_v41  ;;  %vm4368_vm13 = vcmp.lt.s32.totalorder %v18125_v31, %v12559_v17  ;;  %v18134_v42 = vld [vmem:[#allocation52_spill] sm:$0xff]  ;;  %v18136_v22 = vld [vmem:[#allocation54_spill] sm:$0xff] }
 0x456   : > { %vm4403_vm0 = vmand %vm4325_vm7, %vm4365_vm4  ;;  %v4516_v11 = vsel %vm4402_vm9, %v18126_v60, -inf  ;;  %v4549_v55 = vmax.f32 %v4545_v44, %v4515_v45  ;;  %vm4329_vm10 = vcmp.ge.s32.totalorder %v18127_v9, %v12557_v41  ;;  %vm4369_vm14 = vcmp.lt.s32.totalorder %v18127_v9, %v12559_v17  ;;  %v18137_v34 = vld [vmem:[#allocation95_spill] sm:$0xff]  ;;  %v18138_v5 = vld [vmem:[#allocation96_spill] sm:$0xff] }
 0x457   : > { %vm4404_vm2 = vmand %vm4326_vm15, %vm4366_vm3  ;;  %v4517_v57 = vsel %vm4403_vm0, %v18128_v10, -inf  ;;  %v4550_v21 = vmax.f32 %v4546_v3, %v4516_v11  ;;  %vm4330_vm1 = vcmp.ge.s32.totalorder %v18129_v7, %v12557_v41  ;;  %vm4370_vm7 = vcmp.lt.s32.totalorder %v18129_v7, %v12559_v17  ;;  %v4571_v3 = vld [vmem:[%s8003_s15 + $0x8] sm:$0x1] }
 0x458   : > { %vm4405_vm4 = vmand %vm4327_vm6, %vm4367_vm11  ;;  %v4518_v24 = vsel %vm4404_vm2, %v18130_v33, -inf  ;;  %v4551_v18 = vmax.f32 %v4547_v28, %v4517_v57  ;;  %vm4331_vm5 = vcmp.ge.s32.totalorder %v18131_v30, %v12557_v41  ;;  %vm4371_vm15 = vcmp.lt.s32.totalorder %v18131_v30, %v12559_v17 }
 0x459   : > { %vm4406_vm3 = vmand %vm4328_vm8, %vm4368_vm13  ;;  %v4519_v37 = vsel %vm4405_vm4, %v18132_v62, -inf  ;;  %v4552_v40 = vmax.f32 %v4548_v20, %v4518_v24  ;;  %vm4332_vm12 = vcmp.ge.s32.totalorder %v18133_v0, %v12557_v41  ;;  %vm4372_vm6 = vcmp.lt.s32.totalorder %v18133_v0, %v12559_v17 }
 0x45a   : > { %vm4407_vm11 = vmand %vm4329_vm10, %vm4369_vm14  ;;  %v4520_v49 = vsel %vm4406_vm3, %v18134_v42, -inf  ;;  %v4553_v4 = vmax.f32 %v4549_v55, %v4519_v37  ;;  %vm4333_vm9 = vcmp.ge.s32.totalorder %v18135_v61, %v12557_v41  ;;  %vm4373_vm8 = vcmp.lt.s32.totalorder %v18135_v61, %v12559_v17 }
 0x45b   : > { %vm4408_vm13 = vmand %vm4330_vm1, %vm4370_vm7  ;;  %v4521_v53 = vsel %vm4407_vm11, %v18136_v22, -inf  ;;  %v4554_v35 = vmax.f32 %v4550_v21, %v4520_v49  ;;  %vm4334_vm0 = vcmp.ge.s32.totalorder %v18137_v34, %v12557_v41  ;;  %vm4374_vm10 = vcmp.lt.s32.totalorder %v18137_v34, %v12559_v17 }
 0x45c   : > { %vm4409_vm14 = vmand %vm4331_vm5, %vm4371_vm15  ;;  %v4522_v14 = vsel %vm4408_vm13, %v8583_v46, -inf  ;;  %v4555_v26 = vmax.f32 %v4551_v18, %v4521_v53  ;;  %vm4335_vm2 = vcmp.ge.s32.totalorder %v18138_v5, %v12557_v41  ;;  %vm4375_vm1 = vcmp.lt.s32.totalorder %v18138_v5, %v12559_v17 }
 0x45d   : > { %vm4410_vm7 = vmand %vm4332_vm12, %vm4372_vm6  ;;  %v4523_v2 = vsel %vm4409_vm14, %v8586_v59, -inf  ;;  %v4556_v51 = vmax.f32 %v4552_v40, %v4522_v14 }
 0x45e   : > { %vm4411_vm4 = vmand %vm4333_vm9, %vm4373_vm8  ;;  %v4524_v50 = vsel %vm4410_vm7, %v8591_v25, -inf  ;;  %v4557_v32 = vmax.f32 %v4553_v4, %v4523_v2 }
 0x45f   : > { %vm4412_vm5 = vmand %vm4334_vm0, %vm4374_vm10  ;;  %v4525_v54 = vsel %vm4411_vm4, %v8594_v29, -inf  ;;  %v4558_v38 = vmax.f32 %v4554_v35, %v4524_v50 }
 0x460   : > { %vm4413_vm15 = vmand %vm4335_vm2, %vm4375_vm1  ;;  %v4526_v17 = vsel %vm4412_vm5, %v8604_v15, -inf  ;;  %v4559_v56 = vmax.f32 %v4555_v26, %v4525_v54 }
 0x461   : > { %v4527_v19 = vsel %vm4413_vm15, %v8609_v58, -inf  ;;  %v4560_v13 = vmax.f32 %v4556_v51, %v4526_v17 }
 0x462   : > { %v4561_v47 = vmax.f32 %v4557_v32, %v4527_v19  ;;  %v4563_v16 = vmax.f32 %v4558_v38, %v4559_v56 }
 0x464   : > { %v4562_v41 = vmax.f32 %v4560_v13, %v4561_v47 }
 0x466   : > { %v4564_v43 = vmax.f32 %v4562_v41, %v4563_v16 }
 0x468   : > { %v4565_v1 = vrot.slane %v4564_v43, 4 }
 0x46a   : > { %v4566_v44 = vmax.f32 %v4564_v43, %v4565_v1 }
 0x46c   : > { %v4567_v63 = vrot.slane %v4566_v44, 2 }
 0x46e   : > { %v4568_v6 = vmax.f32 %v4566_v44, %v4567_v63 }
 0x470   : > { %v4569_v39 = vrot.slane %v4568_v6, 1 }
 0x472   : > { %v4570_v52 = vmax.f32 %v4568_v6, %v4569_v39 }
 0x474   : > { %v4572_v36 = vmax.f32 %v4571_v3, %v4570_v52 }
 0x476   : > { %4573 = vst [vmem:[%s8003_s15 + $0x8] sm:$0x1] %v4572_v36 }
 0x477 PF: > { %s6837_s30 = sld [smem:[#allocation5 + $0x9]]  ;;  %s6838_s12 = sld [smem:[#allocation5 + $0xa]] }
 0x47d   : > { %p4577_p9 = scmp.gt.s32.totalorder %s6837_s30, %s8822_s23  ;;  %p4579_p5 = scmp.lt.s32.totalorder %s6838_s12, %s8829_s21 }
 0x47f   : > { %s4578_s24 = scalar_select %p4577_p9, %s6837_s30, %s8822_s23 }
 0x480   : > { %s4580_s18 = scalar_select %p4579_p5, %s6838_s12, %s8829_s21 }
 0x482   : > { %p6839_p8 = scmp.ge.s32.totalorder %s4578_s24, %s4580_s18 }
 0x483   : > { %s4585_s22 = ssub.s32 (!%p6839_p8), %s6837_s30, %s8822_s23  ;;  %s4625_s25 = ssub.s32 (!%p6839_p8), %s6838_s12, %s8822_s23  ;;  %v18139_v48 = vld [vmem:[#allocation61_spill] sm:$0xff] (!%p6839_p8)  ;;  %v18140_v12 = vld [vmem:[#allocation62_spill] sm:$0xff] (!%p6839_p8)  ;;  %v18143_v20 = vld [vmem:[#allocation63_spill] sm:$0xff] (!%p6839_p8)  ;;  %v18167_v42 = vmov (!%p6839_p8), 0 }
 0x484   : > { %4584 = sbr.rel (%p6839_p8) target bundleno = 1219 (0x4c3), region = 80  ;;  %v13020_v23 = vstv (!%p6839_p8), %s4585_s22  ;;  %v13022_v28 = vstv (!%p6839_p8), %s4625_s25  ;;  %v18146_v60 = vld [vmem:[#allocation64_spill] sm:$0xff] (!%p6839_p8)  ;;  %v18149_v55 = vld [vmem:[#allocation65_spill] sm:$0xff] (!%p6839_p8)  ;;  %v18150_v9 = vld [vmem:[#allocation66_spill] sm:$0xff] (!%p6839_p8) }
 0x485   : > { %vm4587_vm3 = vcmp.ge.s32.totalorder (!%p6839_p8), %v8307_v27, %v13020_v23  ;;  %vm4588_vm12 = vcmp.ge.s32.totalorder (!%p6839_p8), %v8329_v8, %v13020_v23  ;;  %vm4589_vm6 = vcmp.ge.s32.totalorder (!%p6839_p8), %v18139_v48, %v13020_v23  ;;  %vm4627_vm11 = vcmp.lt.s32.totalorder (!%p6839_p8), %v8307_v27, %v13022_v28  ;;  %v18153_v57 = vld [vmem:[#allocation67_spill] sm:$0xff] (!%p6839_p8)  ;;  %v18154_v21 = vld [vmem:[#allocation68_spill] sm:$0xff] (!%p6839_p8)  ;;  %v18155_v7 = vld [vmem:[#allocation69_spill] sm:$0xff] (!%p6839_p8) }
 0x486   : > { %vm4628_vm9 = vcmp.lt.s32.totalorder (!%p6839_p8), %v8329_v8, %v13022_v28  ;;  %vm4590_vm8 = vcmp.ge.s32.totalorder (!%p6839_p8), %v18140_v12, %v13020_v23  ;;  %vm4629_vm13 = vcmp.lt.s32.totalorder (!%p6839_p8), %v18139_v48, %v13022_v28  ;;  %vm4630_vm0 = vcmp.lt.s32.totalorder (!%p6839_p8), %v18140_v12, %v13022_v28  ;;  %vm13040_vm10 = vmand (!%p6839_p8), %vm4587_vm3, %vm4627_vm11  ;;  %v18158_v24 = vld [vmem:[#allocation70_spill] sm:$0xff] (!%p6839_p8)  ;;  %v18159_v18 = vld [vmem:[#allocation71_spill] sm:$0xff] (!%p6839_p8) }
 0x487   : > { %vm4591_vm14 = vcmp.ge.s32.totalorder (!%p6839_p8), %v18143_v20, %v13020_v23  ;;  %vm4631_vm2 = vcmp.lt.s32.totalorder (!%p6839_p8), %v18143_v20, %v13022_v28  ;;  %vm13048_vm1 = vmand (!%p6839_p8), %vm4588_vm12, %vm4628_vm9  ;;  %vm4592_vm7 = vcmp.ge.s32.totalorder (!%p6839_p8), %v18146_v60, %v13020_v23  ;;  %vm4632_vm4 = vcmp.lt.s32.totalorder (!%p6839_p8), %v18146_v60, %v13022_v28  ;;  %v18160_v30 = vld [vmem:[#allocation72_spill] sm:$0xff] (!%p6839_p8)  ;;  %v18163_v37 = vld [vmem:[#allocation73_spill] sm:$0xff] (!%p6839_p8) }
 0x488   : > { %vm13056_vm5 = vmand (!%p6839_p8), %vm4589_vm6, %vm4629_vm13  ;;  %vm4633_vm12 = vcmp.lt.s32.totalorder (!%p6839_p8), %v18149_v55, %v13022_v28  ;;  %vm4634_vm15 = vcmp.lt.s32.totalorder (!%p6839_p8), %v18150_v9, %v13022_v28  ;;  %v18164_v40 = vld [vmem:[#allocation74_spill] sm:$0xff] (!%p6839_p8)  ;;  %v18165_v0 = vld [vmem:[#allocation75_spill] sm:$0xff] (!%p6839_p8)  ;;  %vm4637_vm9 = vcmp.lt.s32.totalorder (!%p6839_p8), %v18155_v7, %v13022_v28  ;;  %vm4641_vm6 = vcmp.lt.s32.totalorder (!%p6839_p8), %v18163_v37, %v13022_v28 }
 0x489   : > { %vm13066_vm11 = vmand (!%p6839_p8), %vm4590_vm8, %vm4630_vm0  ;;  %vm4636_vm8 = vcmp.lt.s32.totalorder (!%p6839_p8), %v18154_v21, %v13022_v28  ;;  %v18169_v49 = vld [vmem:[#allocation76_spill] sm:$0xff] (!%p6839_p8)  ;;  %v18170_v4 = vld [vmem:[#allocation77_spill] sm:$0xff] (!%p6839_p8)  ;;  %vm4642_vm13 = vcmp.lt.s32.totalorder (!%p6839_p8), %v18164_v40, %v13022_v28 }
 0x48a   : > { %vm13078_vm3 = vmand (!%p6839_p8), %vm4591_vm14, %vm4631_vm2  ;;  %vm18178_vm2 = vcmp.ge.s32.totalorder (!%p6839_p8), %v18154_v21, %v13020_v23  ;;  %v18181_v35 = vld [vmem:[#allocation20_spill] sm:$0xff] (!%p6839_p8)  ;;  %v18182_v14 = vld [vmem:[#allocation21_spill] sm:$0xff] (!%p6839_p8) }
 0x48b   : > { %vm13096_vm14 = vmand %vm4592_vm7, %vm4632_vm4  ;;  %vm18166_vm7 = vcmp.ge.s32.totalorder %v18149_v55, %v13020_v23  ;;  %v4779_v34 = vsel %vm13040_vm10, %v18181_v35, -inf  ;;  %v4780_v26 = vsel %vm13048_vm1, %v18182_v14, -inf  ;;  %v18183_v5 = vld [vmem:[#allocation24_spill] sm:$0xff]  ;;  %v18184_v51 = vld [vmem:[#allocation25_spill] sm:$0xff]  ;;  %vm18193_vm1 = vcmp.lt.s32.totalorder %v18158_v24, %v13022_v28 }
 0x48c   : > { %vm13114_vm4 = vmand %vm18166_vm7, %vm4633_vm12  ;;  %vm18171_vm12 = vcmp.ge.s32.totalorder %v18150_v9, %v13020_v23  ;;  %v4781_v2 = vsel %vm13056_vm5, %v18183_v5, -inf  ;;  %v4782_v50 = vsel %vm13066_vm11, %v18184_v51, -inf  ;;  %v18188_v54 = vld [vmem:[#allocation28_spill] sm:$0xff]  ;;  %v18189_v17 = vld [vmem:[#allocation29_spill] sm:$0xff]  ;;  %vm18194_vm5 = vcmp.ge.s32.totalorder %v18158_v24, %v13020_v23 }
 0x48d   : > { %v18168_v42 = vsel %vm13114_vm4, 4294967295, %v18167_v42  ;;  %vm13132_vm7 = vmand %vm18171_vm12, %vm4634_vm15  ;;  %vm18174_vm4 = vcmp.lt.s32.totalorder %v18153_v57, %v13022_v28  ;;  %vm18175_vm15 = vcmp.ge.s32.totalorder %v18153_v57, %v13020_v23  ;;  %v4783_v38 = vsel %vm13078_vm3, %v18188_v54, -inf  ;;  %v18190_v19 = vld [vmem:[#allocation32_spill] sm:$0xff]  ;;  %v18192_v47 = vld [vmem:[#allocation33_spill] sm:$0xff] }
 0x48e   : > { %vm13150_vm12 = vmand %vm18175_vm15, %vm18174_vm4  ;;  %v4784_v56 = vsel %vm13096_vm14, %v18189_v17, -inf  ;;  %vm18191_vm10 = vnez %v18168_v42  ;;  %v4786_v16 = vsel %vm13132_vm7, %v18192_v47, -inf  ;;  %v18197_v43 = vld [vmem:[#allocation37_spill] sm:$0xff]  ;;  %v18198_v44 = vld [vmem:[#allocation38_spill] sm:$0xff]  ;;  %v4817_v3 = vmax.f32 %v4779_v34, %v4783_v38 }
 0x48f   : > { %vm13157_vm0 = vmand %vm18178_vm2, %vm4636_vm8  ;;  %vm18185_vm8 = vcmp.ge.s32.totalorder %v18155_v7, %v13020_v23  ;;  %v4785_v13 = vsel %vm18191_vm10, %v18190_v19, -inf  ;;  %v4787_v1 = vsel %vm13150_vm12, %v18197_v43, -inf  ;;  %v18199_v6 = vld [vmem:[#allocation43_spill] sm:$0xff]  ;;  %vm18200_vm3 = vcmp.lt.s32.totalorder %v18159_v18, %v13022_v28  ;;  %v18204_v36 = vld [vmem:[#allocation44_spill] sm:$0xff] }
 0x490   : > { %vm13176_vm2 = vmand %vm18185_vm8, %vm4637_vm9  ;;  %v4788_v63 = vsel %vm13157_vm0, %v18198_v44, -inf  ;;  %vm18201_vm9 = vcmp.ge.s32.totalorder %v18159_v18, %v13020_v23  ;;  %v4818_v12 = vmax.f32 %v4780_v26, %v4784_v56  ;;  %v4819_v45 = vmax.f32 %v4781_v2, %v4785_v13  ;;  %v18209_v60 = vld [vmem:[#allocation49_spill] sm:$0xff]  ;;  %v18211_v9 = vld [vmem:[#allocation50_spill] sm:$0xff] }
 0x491   : > { %vm13198_vm11 = vmand %vm18194_vm5, %vm18193_vm1  ;;  %v4789_v39 = vsel %vm13176_vm2, %v18199_v6, -inf  ;;  %v4820_v20 = vmax.f32 %v4782_v50, %v4786_v16  ;;  %vm4643_vm0 = vcmp.lt.s32.totalorder %v18165_v0, %v13022_v28  ;;  %vm4644_vm4 = vcmp.lt.s32.totalorder %v18169_v49, %v13022_v28  ;;  %v18212_v33 = vld [vmem:[#allocation78_spill] sm:$0xff]  ;;  %v18214_v24 = vld [vmem:[#allocation55_spill] sm:$0xff] }
 0x492   : > { %vm13217_vm14 = vmand %vm18201_vm9, %vm18200_vm3  ;;  %v4790_v48 = vsel %vm13198_vm11, %v18204_v36, -inf  ;;  %vm18205_vm7 = vcmp.lt.s32.totalorder %v18160_v30, %v13022_v28  ;;  %vm18206_vm15 = vcmp.ge.s32.totalorder %v18160_v30, %v13020_v23  ;;  %v4821_v55 = vmax.f32 %v4817_v3, %v4787_v1  ;;  %v18216_v62 = vld [vmem:[#allocation56_spill] sm:$0xff]  ;;  %v18219_v22 = vld [vmem:[#allocation18_spill] sm:$0xff] }
 0x493   : > { %vm13234_vm12 = vmand %vm18206_vm15, %vm18205_vm7  ;;  %v4791_v11 = vsel %vm13217_vm14, %v18209_v60, -inf  ;;  %vm18210_vm8 = vcmp.ge.s32.totalorder %v18163_v37, %v13020_v23  ;;  %v4822_v57 = vmax.f32 %v4818_v12, %v4788_v63  ;;  %v4823_v21 = vmax.f32 %v4819_v45, %v4789_v39  ;;  %v18220_v35 = vld [vmem:[#allocation80_spill] sm:$0xff]  ;;  %v18222_v34 = vld [vmem:[#allocation19_spill] sm:$0xff] }
 0x494   : > { %vm4679_vm2 = vmand %vm18210_vm8, %vm4641_vm6  ;;  %v4792_v10 = vsel %vm13234_vm12, %v18211_v9, -inf  ;;  %v4824_v7 = vmax.f32 %v4820_v20, %v4790_v48  ;;  %vm4606_vm10 = vcmp.ge.s32.totalorder %v18212_v33, %v13020_v23  ;;  %vm4645_vm1 = vcmp.lt.s32.totalorder %v18170_v4, %v13022_v28  ;;  %v18223_v26 = vld [vmem:[#allocation81_spill] sm:$0xff]  ;;  %v18224_v5 = vld [vmem:[#allocation22_spill] sm:$0xff] }
 0x495   : > { %vm18213_vm5 = vcmp.ge.s32.totalorder %v18164_v40, %v13020_v23  ;;  %v4793_v18 = vsel %vm4679_vm2, %v18214_v24, -inf  ;;  %v4825_v30 = vmax.f32 %v4821_v55, %v4791_v11  ;;  %vm4646_vm11 = vcmp.lt.s32.totalorder %v18212_v33, %v13022_v28  ;;  %v18217_v40 = vld [vmem:[#allocation79_spill] sm:$0xff]  ;;  %v18225_v51 = vld [vmem:[#allocation82_spill] sm:$0xff]  ;;  %v18229_v13 = vld [vmem:[#allocation84_spill] sm:$0xff] }
 0x496   : > { %vm4680_vm6 = vmand %vm18213_vm5, %vm4642_vm13  ;;  %vm18215_vm3 = vcmp.ge.s32.totalorder %v18165_v0, %v13020_v23  ;;  %v4826_v42 = vmax.f32 %v4822_v57, %v4792_v10  ;;  %v4827_v61 = vmax.f32 %v4823_v21, %v4793_v18  ;;  %vm4607_vm13 = vcmp.ge.s32.totalorder %v18217_v40, %v13020_v23  ;;  %v18226_v50 = vld [vmem:[#allocation23_spill] sm:$0xff]  ;;  %v18228_v17 = vld [vmem:[#allocation26_spill] sm:$0xff] }
 0x497   : > { %vm4681_vm9 = vmand %vm18215_vm3, %vm4643_vm0  ;;  %v4794_v37 = vsel %vm4680_vm6, %v18216_v62, -inf  ;;  %vm4647_vm14 = vcmp.lt.s32.totalorder %v18217_v40, %v13022_v28  ;;  %vm18218_vm7 = vcmp.ge.s32.totalorder %v18169_v49, %v13020_v23  ;;  %vm4608_vm0 = vcmp.ge.s32.totalorder %v18220_v35, %v13020_v23  ;;  %v18227_v38 = vld [vmem:[#allocation83_spill] sm:$0xff]  ;;  %v18231_v43 = vld [vmem:[#allocation85_spill] sm:$0xff] }
 0x498   : > { %vm4682_vm15 = vmand %vm18218_vm7, %vm4644_vm4  ;;  %v4795_v0 = vsel %vm4681_vm9, %v18219_v22, -inf  ;;  %v4828_v53 = vmax.f32 %v4824_v7, %v4794_v37  ;;  %vm4648_vm12 = vcmp.lt.s32.totalorder %v18220_v35, %v13022_v28  ;;  %vm18221_vm8 = vcmp.ge.s32.totalorder %v18170_v4, %v13020_v23  ;;  %v18230_v47 = vld [vmem:[#allocation27_spill] sm:$0xff]  ;;  %v18232_v1 = vld [vmem:[#allocation30_spill] sm:$0xff] }
 0x499   : > { %vm4683_vm2 = vmand %vm18221_vm8, %vm4645_vm1  ;;  %v4796_v14 = vsel %vm4682_vm15, %v18222_v34, -inf  ;;  %v4829_v49 = vmax.f32 %v4825_v30, %v4795_v0  ;;  %vm4609_vm4 = vcmp.ge.s32.totalorder %v18223_v26, %v13020_v23  ;;  %vm4649_vm5 = vcmp.lt.s32.totalorder %v18223_v26, %v13022_v28  ;;  %v18233_v6 = vld [vmem:[#allocation86_spill] sm:$0xff]  ;;  %v18234_v39 = vld [vmem:[#allocation31_spill] sm:$0xff] }
 0x49a   : > { %vm4684_vm6 = vmand %vm4606_vm10, %vm4646_vm11  ;;  %v4797_v2 = vsel %vm4683_vm2, %v18224_v5, -inf  ;;  %v4830_v4 = vmax.f32 %v4826_v42, %v4796_v14  ;;  %vm4610_vm1 = vcmp.ge.s32.totalorder %v18225_v51, %v13020_v23  ;;  %vm4650_vm3 = vcmp.lt.s32.totalorder %v18225_v51, %v13022_v28  ;;  %v18235_v36 = vld [vmem:[#allocation87_spill] sm:$0xff]  ;;  %v18236_v48 = vld [vmem:[#allocation34_spill] sm:$0xff] }
 0x49b   : > { %vm4685_vm9 = vmand %vm4607_vm13, %vm4647_vm14  ;;  %v4798_v32 = vsel %vm4684_vm6, %v18226_v50, -inf  ;;  %v4831_v54 = vmax.f32 %v4827_v61, %v4797_v2  ;;  %vm4611_vm10 = vcmp.ge.s32.totalorder %v18227_v38, %v13020_v23  ;;  %vm4651_vm11 = vcmp.lt.s32.totalorder %v18227_v38, %v13022_v28  ;;  %v18237_v20 = vld [vmem:[#allocation88_spill] sm:$0xff]  ;;  %v18239_v55 = vld [vmem:[#allocation89_spill] sm:$0xff] }
 0x49c   : > { %vm4686_vm7 = vmand %vm4608_vm0, %vm4648_vm12  ;;  %v4799_v56 = vsel %vm4685_vm9, %v18228_v17, -inf  ;;  %v4832_v19 = vmax.f32 %v4828_v53, %v4798_v32  ;;  %vm4612_vm13 = vcmp.ge.s32.totalorder %v18229_v13, %v13020_v23  ;;  %vm4652_vm14 = vcmp.lt.s32.totalorder %v18229_v13, %v13022_v28  ;;  %v18238_v31 = vld [vmem:[#allocation36_spill] sm:$0xff]  ;;  %v18241_v21 = vld [vmem:[#allocation90_spill] sm:$0xff] }
 0x49d   : > { %vm4687_vm15 = vmand %vm4609_vm4, %vm4649_vm5  ;;  %v4800_v16 = vsel %vm4686_vm7, %v18230_v47, -inf  ;;  %v4833_v41 = vmax.f32 %v4829_v49, %v4799_v56  ;;  %vm4613_vm0 = vcmp.ge.s32.totalorder %v18231_v43, %v13020_v23  ;;  %vm4653_vm12 = vcmp.lt.s32.totalorder %v18231_v43, %v13022_v28  ;;  %v18240_v9 = vld [vmem:[#allocation40_spill] sm:$0xff]  ;;  %v18242_v7 = vld [vmem:[#allocation42_spill] sm:$0xff] }
 0x49e   : > { %vm4688_vm8 = vmand %vm4610_vm1, %vm4650_vm3  ;;  %v4801_v44 = vsel %vm4687_vm15, %v18232_v1, -inf  ;;  %v4834_v63 = vmax.f32 %v4830_v4, %v4800_v16  ;;  %vm4614_vm2 = vcmp.ge.s32.totalorder %v18233_v6, %v13020_v23  ;;  %vm4654_vm4 = vcmp.lt.s32.totalorder %v18233_v6, %v13022_v28  ;;  %v18243_v18 = vld [vmem:[#allocation91_spill] sm:$0xff]  ;;  %v18244_v30 = vld [vmem:[#allocation46_spill] sm:$0xff] }
 0x49f   : > { %vm4689_vm5 = vmand %vm4611_vm10, %vm4651_vm11  ;;  %v4802_v3 = vsel %vm4688_vm8, %v18234_v39, -inf  ;;  %v4835_v52 = vmax.f32 %v4831_v54, %v4801_v44  ;;  %vm4615_vm6 = vcmp.ge.s32.totalorder %v18235_v36, %v13020_v23  ;;  %vm4655_vm1 = vcmp.lt.s32.totalorder %v18235_v36, %v13022_v28  ;;  %v18245_v42 = vld [vmem:[#allocation92_spill] sm:$0xff]  ;;  %v18247_v0 = vld [vmem:[#allocation93_spill] sm:$0xff] }
 0x4a0   : > { %vm4690_vm3 = vmand %vm4612_vm13, %vm4652_vm14  ;;  %v4803_v12 = vsel %vm4689_vm5, %v18236_v48, -inf  ;;  %v4836_v45 = vmax.f32 %v4832_v19, %v4802_v3  ;;  %vm4616_vm9 = vcmp.ge.s32.totalorder %v18237_v20, %v13020_v23  ;;  %vm4656_vm10 = vcmp.lt.s32.totalorder %v18237_v20, %v13022_v28  ;;  %v18246_v61 = vld [vmem:[#allocation48_spill] sm:$0xff]  ;;  %v18249_v14 = vld [vmem:[#allocation94_spill] sm:$0xff] }
 0x4a1   : > { %vm4691_vm11 = vmand %vm4613_vm0, %vm4653_vm12  ;;  %v4804_v60 = vsel %vm4690_vm3, %v18238_v31, -inf  ;;  %v4837_v11 = vmax.f32 %v4833_v41, %v4803_v12  ;;  %vm4617_vm7 = vcmp.ge.s32.totalorder %v18239_v55, %v13020_v23  ;;  %vm4657_vm13 = vcmp.lt.s32.totalorder %v18239_v55, %v13022_v28  ;;  %v18248_v53 = vld [vmem:[#allocation52_spill] sm:$0xff]  ;;  %v18250_v49 = vld [vmem:[#allocation54_spill] sm:$0xff] }
 0x4a2   : > { %vm4692_vm14 = vmand %vm4614_vm2, %vm4654_vm4  ;;  %v4805_v10 = vsel %vm4691_vm11, %v18240_v9, -inf  ;;  %v4838_v57 = vmax.f32 %v4834_v63, %v4804_v60  ;;  %vm4618_vm15 = vcmp.ge.s32.totalorder %v18241_v21, %v13020_v23  ;;  %vm4658_vm0 = vcmp.lt.s32.totalorder %v18241_v21, %v13022_v28  ;;  %v18251_v2 = vld [vmem:[#allocation95_spill] sm:$0xff]  ;;  %v18252_v50 = vld [vmem:[#allocation96_spill] sm:$0xff] }
 0x4a3   : > { %vm4693_vm12 = vmand %vm4615_vm6, %vm4655_vm1  ;;  %v4806_v33 = vsel %vm4692_vm14, %v18242_v7, -inf  ;;  %v4839_v24 = vmax.f32 %v4835_v52, %v4805_v10  ;;  %vm4619_vm8 = vcmp.ge.s32.totalorder %v18243_v18, %v13020_v23  ;;  %vm4659_vm2 = vcmp.lt.s32.totalorder %v18243_v18, %v13022_v28  ;;  %v4860_v52 = vld [vmem:[%s8003_s15 + $0x9] sm:$0x1] }
 0x4a4   : > { %vm4694_vm4 = vmand %vm4616_vm9, %vm4656_vm10  ;;  %v4807_v62 = vsel %vm4693_vm12, %v18244_v30, -inf  ;;  %v4840_v37 = vmax.f32 %v4836_v45, %v4806_v33  ;;  %vm4620_vm5 = vcmp.ge.s32.totalorder %v18245_v42, %v13020_v23  ;;  %vm4660_vm6 = vcmp.lt.s32.totalorder %v18245_v42, %v13022_v28 }
 0x4a5   : > { %vm4695_vm1 = vmand %vm4617_vm7, %vm4657_vm13  ;;  %v4808_v40 = vsel %vm4694_vm4, %v18246_v61, -inf  ;;  %v4841_v22 = vmax.f32 %v4837_v11, %v4807_v62  ;;  %vm4621_vm3 = vcmp.ge.s32.totalorder %v18247_v0, %v13020_v23  ;;  %vm4661_vm9 = vcmp.lt.s32.totalorder %v18247_v0, %v13022_v28 }
 0x4a6   : > { %vm4696_vm10 = vmand %vm4618_vm15, %vm4658_vm0  ;;  %v4809_v35 = vsel %vm4695_vm1, %v18248_v53, -inf  ;;  %v4842_v34 = vmax.f32 %v4838_v57, %v4808_v40  ;;  %vm4622_vm11 = vcmp.ge.s32.totalorder %v18249_v14, %v13020_v23  ;;  %vm4662_vm7 = vcmp.lt.s32.totalorder %v18249_v14, %v13022_v28 }
 0x4a7   : > { %vm4697_vm13 = vmand %vm4619_vm8, %vm4659_vm2  ;;  %v4810_v26 = vsel %vm4696_vm10, %v18250_v49, -inf  ;;  %v4843_v5 = vmax.f32 %v4839_v24, %v4809_v35  ;;  %vm4623_vm14 = vcmp.ge.s32.totalorder %v18251_v2, %v13020_v23  ;;  %vm4663_vm15 = vcmp.lt.s32.totalorder %v18251_v2, %v13022_v28 }
 0x4a8   : > { %vm4698_vm0 = vmand %vm4620_vm5, %vm4660_vm6  ;;  %v4811_v4 = vsel %vm4697_vm13, %v8583_v46, -inf  ;;  %v4844_v51 = vmax.f32 %v4840_v37, %v4810_v26  ;;  %vm4624_vm12 = vcmp.ge.s32.totalorder %v18252_v50, %v13020_v23  ;;  %vm4664_vm8 = vcmp.lt.s32.totalorder %v18252_v50, %v13022_v28 }
 0x4a9   : > { %vm4699_vm2 = vmand %vm4621_vm3, %vm4661_vm9  ;;  %v4812_v32 = vsel %vm4698_vm0, %v8586_v59, -inf  ;;  %v4845_v54 = vmax.f32 %v4841_v22, %v4811_v4 }
 0x4aa   : > { %vm4700_vm4 = vmand %vm4622_vm11, %vm4662_vm7  ;;  %v4813_v38 = vsel %vm4699_vm2, %v8591_v25, -inf  ;;  %v4846_v17 = vmax.f32 %v4842_v34, %v4812_v32 }
 0x4ab   : > { %vm4701_vm5 = vmand %vm4623_vm14, %vm4663_vm15  ;;  %v4814_v56 = vsel %vm4700_vm4, %v8594_v29, -inf  ;;  %v4847_v19 = vmax.f32 %v4843_v5, %v4813_v38 }
 0x4ac   : > { %vm4702_vm6 = vmand %vm4624_vm12, %vm4664_vm8  ;;  %v4815_v28 = vsel %vm4701_vm5, %v8604_v15, -inf  ;;  %v4848_v13 = vmax.f32 %v4844_v51, %v4814_v56 }
 0x4ad   : > { %v4816_v47 = vsel %vm4702_vm6, %v8609_v58, -inf  ;;  %v4849_v16 = vmax.f32 %v4845_v54, %v4815_v28 }
 0x4ae   : > { %v4850_v41 = vmax.f32 %v4846_v17, %v4816_v47  ;;  %v4852_v43 = vmax.f32 %v4847_v19, %v4848_v13 }
 0x4b0   : > { %v4851_v23 = vmax.f32 %v4849_v16, %v4850_v41 }
 0x4b2   : > { %v4853_v1 = vmax.f32 %v4851_v23, %v4852_v43 }
 0x4b4   : > { %v4854_v44 = vrot.slane %v4853_v1, 4 }
 0x4b6   : > { %v4855_v63 = vmax.f32 %v4853_v1, %v4854_v44 }
 0x4b8   : > { %v4856_v6 = vrot.slane %v4855_v63, 2 }
 0x4ba   : > { %v4857_v39 = vmax.f32 %v4855_v63, %v4856_v6 }
 0x4bc   : > { %v4858_v3 = vrot.slane %v4857_v39, 1 }
 0x4be   : > { %v4859_v36 = vmax.f32 %v4857_v39, %v4858_v3 }
 0x4c0   : > { %v4861_v48 = vmax.f32 %v4860_v52, %v4859_v36 }
 0x4c2   : > { %4862 = vst [vmem:[%s8003_s15 + $0x9] sm:$0x1] %v4861_v48 }
 0x4c3 PF: > { %s6840_s19 = sld [smem:[#allocation5 + $0xa]]  ;;  %s6841_s17 = sld [smem:[#allocation5 + $0xb]] }
 0x4c9   : > { %p4866_p10 = scmp.gt.s32.totalorder %s6840_s19, %s8822_s23  ;;  %p4868_p12 = scmp.lt.s32.totalorder %s6841_s17, %s8829_s21 }
 0x4cb   : > { %s4867_s14 = scalar_select %p4866_p10, %s6840_s19, %s8822_s23 }
 0x4cc   : > { %s4869_s20 = scalar_select %p4868_p12, %s6841_s17, %s8829_s21 }
 0x4ce   : > { %p6842_p1 = scmp.ge.s32.totalorder %s4867_s14, %s4869_s20 }
 0x4cf   : > { %s4874_s29 = ssub.s32 (!%p6842_p1), %s6840_s19, %s8822_s23  ;;  %s4914_s30 = ssub.s32 (!%p6842_p1), %s6841_s17, %s8822_s23  ;;  %v18253_v20 = vld [vmem:[#allocation61_spill] sm:$0xff] (!%p6842_p1)  ;;  %v18254_v31 = vld [vmem:[#allocation62_spill] sm:$0xff] (!%p6842_p1)  ;;  %v18257_v11 = vld [vmem:[#allocation63_spill] sm:$0xff] (!%p6842_p1)  ;;  %v18281_v53 = vmov (!%p6842_p1), 0 }
 0x4d0   : > { %4873 = sbr.rel (%p6842_p1) target bundleno = 1295 (0x50f), region = 84  ;;  %v13483_v12 = vstv (!%p6842_p1), %s4874_s29  ;;  %v13485_v45 = vstv (!%p6842_p1), %s4914_s30  ;;  %v18260_v9 = vld [vmem:[#allocation64_spill] sm:$0xff] (!%p6842_p1)  ;;  %v18263_v57 = vld [vmem:[#allocation65_spill] sm:$0xff] (!%p6842_p1)  ;;  %v18264_v21 = vld [vmem:[#allocation66_spill] sm:$0xff] (!%p6842_p1) }
 0x4d1   : > { %vm4876_vm1 = vcmp.ge.s32.totalorder (!%p6842_p1), %v8307_v27, %v13483_v12  ;;  %vm4877_vm3 = vcmp.ge.s32.totalorder (!%p6842_p1), %v8329_v8, %v13483_v12  ;;  %vm4878_vm9 = vcmp.ge.s32.totalorder (!%p6842_p1), %v18253_v20, %v13483_v12  ;;  %vm4916_vm10 = vcmp.lt.s32.totalorder (!%p6842_p1), %v8307_v27, %v13485_v45  ;;  %v18267_v33 = vld [vmem:[#allocation67_spill] sm:$0xff] (!%p6842_p1)  ;;  %v18268_v24 = vld [vmem:[#allocation68_spill] sm:$0xff] (!%p6842_p1)  ;;  %v18269_v18 = vld [vmem:[#allocation69_spill] sm:$0xff] (!%p6842_p1) }
 0x4d2   : > { %vm4917_vm11 = vcmp.lt.s32.totalorder (!%p6842_p1), %v8329_v8, %v13485_v45  ;;  %vm4879_vm7 = vcmp.ge.s32.totalorder (!%p6842_p1), %v18254_v31, %v13483_v12  ;;  %vm4918_vm13 = vcmp.lt.s32.totalorder (!%p6842_p1), %v18253_v20, %v13485_v45  ;;  %vm4919_vm14 = vcmp.lt.s32.totalorder (!%p6842_p1), %v18254_v31, %v13485_v45  ;;  %vm13503_vm15 = vmand (!%p6842_p1), %vm4876_vm1, %vm4916_vm10  ;;  %v18272_v62 = vld [vmem:[#allocation70_spill] sm:$0xff] (!%p6842_p1)  ;;  %v18273_v37 = vld [vmem:[#allocation71_spill] sm:$0xff] (!%p6842_p1) }
 0x4d3   : > { %vm4880_vm0 = vcmp.ge.s32.totalorder (!%p6842_p1), %v18257_v11, %v13483_v12  ;;  %vm4920_vm12 = vcmp.lt.s32.totalorder (!%p6842_p1), %v18257_v11, %v13485_v45  ;;  %vm13511_vm8 = vmand (!%p6842_p1), %vm4877_vm3, %vm4917_vm11  ;;  %vm4881_vm2 = vcmp.ge.s32.totalorder (!%p6842_p1), %v18260_v9, %v13483_v12  ;;  %vm4921_vm4 = vcmp.lt.s32.totalorder (!%p6842_p1), %v18260_v9, %v13485_v45  ;;  %v18274_v42 = vld [vmem:[#allocation72_spill] sm:$0xff] (!%p6842_p1)  ;;  %v18277_v40 = vld [vmem:[#allocation73_spill] sm:$0xff] (!%p6842_p1) }
 0x4d4   : > { %vm13519_vm5 = vmand (!%p6842_p1), %vm4878_vm9, %vm4918_vm13  ;;  %vm4922_vm3 = vcmp.lt.s32.totalorder (!%p6842_p1), %v18263_v57, %v13485_v45  ;;  %vm4923_vm6 = vcmp.lt.s32.totalorder (!%p6842_p1), %v18264_v21, %v13485_v45  ;;  %v18278_v22 = vld [vmem:[#allocation74_spill] sm:$0xff] (!%p6842_p1)  ;;  %v18279_v0 = vld [vmem:[#allocation75_spill] sm:$0xff] (!%p6842_p1)  ;;  %vm4926_vm11 = vcmp.lt.s32.totalorder (!%p6842_p1), %v18269_v18, %v13485_v45  ;;  %vm4930_vm9 = vcmp.lt.s32.totalorder (!%p6842_p1), %v18277_v40, %v13485_v45 }
 0x4d5   : > { %vm13529_vm10 = vmand (!%p6842_p1), %vm4879_vm7, %vm4919_vm14  ;;  %vm4925_vm7 = vcmp.lt.s32.totalorder (!%p6842_p1), %v18268_v24, %v13485_v45  ;;  %v18283_v35 = vld [vmem:[#allocation76_spill] sm:$0xff] (!%p6842_p1)  ;;  %v18284_v34 = vld [vmem:[#allocation77_spill] sm:$0xff] (!%p6842_p1)  ;;  %vm4931_vm13 = vcmp.lt.s32.totalorder (!%p6842_p1), %v18278_v22, %v13485_v45 }
 0x4d6   : > { %vm13541_vm1 = vmand (!%p6842_p1), %vm4880_vm0, %vm4920_vm12  ;;  %vm18292_vm12 = vcmp.ge.s32.totalorder (!%p6842_p1), %v18268_v24, %v13483_v12  ;;  %v18295_v5 = vld [vmem:[#allocation20_spill] sm:$0xff] (!%p6842_p1)  ;;  %v18296_v4 = vld [vmem:[#allocation21_spill] sm:$0xff] (!%p6842_p1) }
 0x4d7   : > { %vm13559_vm0 = vmand %vm4881_vm2, %vm4921_vm4  ;;  %vm18280_vm2 = vcmp.ge.s32.totalorder %v18263_v57, %v13483_v12  ;;  %v5068_v2 = vsel %vm13503_vm15, %v18295_v5, -inf  ;;  %v5069_v51 = vsel %vm13511_vm8, %v18296_v4, -inf  ;;  %v18297_v50 = vld [vmem:[#allocation24_spill] sm:$0xff]  ;;  %v18298_v54 = vld [vmem:[#allocation25_spill] sm:$0xff]  ;;  %vm18307_vm8 = vcmp.lt.s32.totalorder %v18272_v62, %v13485_v45 }
 0x4d8   : > { %vm13577_vm4 = vmand %vm18280_vm2, %vm4922_vm3  ;;  %vm18285_vm3 = vcmp.ge.s32.totalorder %v18264_v21, %v13483_v12  ;;  %v5070_v32 = vsel %vm13519_vm5, %v18297_v50, -inf  ;;  %v5071_v38 = vsel %vm13529_vm10, %v18298_v54, -inf  ;;  %v18302_v56 = vld [vmem:[#allocation28_spill] sm:$0xff]  ;;  %v18303_v28 = vld [vmem:[#allocation29_spill] sm:$0xff]  ;;  %vm18308_vm5 = vcmp.ge.s32.totalorder %v18272_v62, %v13483_v12 }
 0x4d9   : > { %v18282_v53 = vsel %vm13577_vm4, 4294967295, %v18281_v53  ;;  %vm13595_vm2 = vmand %vm18285_vm3, %vm4923_vm6  ;;  %vm18288_vm4 = vcmp.lt.s32.totalorder %v18267_v33, %v13485_v45  ;;  %vm18289_vm6 = vcmp.ge.s32.totalorder %v18267_v33, %v13483_v12  ;;  %v5072_v19 = vsel %vm13541_vm1, %v18302_v56, -inf  ;;  %v18304_v47 = vld [vmem:[#allocation32_spill] sm:$0xff]  ;;  %v18306_v41 = vld [vmem:[#allocation33_spill] sm:$0xff] }
 0x4da   : > { %vm13613_vm3 = vmand %vm18289_vm6, %vm18288_vm4  ;;  %v5073_v13 = vsel %vm13559_vm0, %v18303_v28, -inf  ;;  %vm18305_vm15 = vnez %v18282_v53  ;;  %v5075_v43 = vsel %vm13595_vm2, %v18306_v41, -inf  ;;  %v18311_v1 = vld [vmem:[#allocation37_spill] sm:$0xff]  ;;  %v18312_v63 = vld [vmem:[#allocation38_spill] sm:$0xff]  ;;  %v5106_v52 = vmax.f32 %v5068_v2, %v5072_v19 }
 0x4db   : > { %vm13620_vm14 = vmand %vm18292_vm12, %vm4925_vm7  ;;  %vm18299_vm7 = vcmp.ge.s32.totalorder %v18269_v18, %v13483_v12  ;;  %v5074_v16 = vsel %vm18305_vm15, %v18304_v47, -inf  ;;  %v5076_v44 = vsel %vm13613_vm3, %v18311_v1, -inf  ;;  %v18313_v39 = vld [vmem:[#allocation43_spill] sm:$0xff]  ;;  %vm18314_vm1 = vcmp.lt.s32.totalorder %v18273_v37, %v13485_v45  ;;  %v18318_v48 = vld [vmem:[#allocation44_spill] sm:$0xff] }
 0x4dc   : > { %vm13639_vm12 = vmand %vm18299_vm7, %vm4926_vm11  ;;  %v5077_v6 = vsel %vm13620_vm14, %v18312_v63, -inf  ;;  %vm18315_vm11 = vcmp.ge.s32.totalorder %v18273_v37, %v13483_v12  ;;  %v5107_v31 = vmax.f32 %v5069_v51, %v5073_v13  ;;  %v5108_v60 = vmax.f32 %v5070_v32, %v5074_v16  ;;  %v18323_v9 = vld [vmem:[#allocation49_spill] sm:$0xff]  ;;  %v18325_v21 = vld [vmem:[#allocation50_spill] sm:$0xff] }
 0x4dd   : > { %vm13661_vm10 = vmand %vm18308_vm5, %vm18307_vm8  ;;  %v5078_v3 = vsel %vm13639_vm12, %v18313_v39, -inf  ;;  %v5109_v11 = vmax.f32 %v5071_v38, %v5075_v43  ;;  %vm4932_vm14 = vcmp.lt.s32.totalorder %v18279_v0, %v13485_v45  ;;  %vm4933_vm4 = vcmp.lt.s32.totalorder %v18283_v35, %v13485_v45  ;;  %v18326_v30 = vld [vmem:[#allocation78_spill] sm:$0xff]  ;;  %v18328_v62 = vld [vmem:[#allocation55_spill] sm:$0xff] }
 0x4de   : > { %vm13680_vm0 = vmand %vm18315_vm11, %vm18314_vm1  ;;  %v5079_v20 = vsel %vm13661_vm10, %v18318_v48, -inf  ;;  %vm18319_vm2 = vcmp.lt.s32.totalorder %v18274_v42, %v13485_v45  ;;  %vm18320_vm6 = vcmp.ge.s32.totalorder %v18274_v42, %v13483_v12  ;;  %v5110_v57 = vmax.f32 %v5106_v52, %v5076_v44  ;;  %v18330_v61 = vld [vmem:[#allocation56_spill] sm:$0xff]  ;;  %v18333_v49 = vld [vmem:[#allocation18_spill] sm:$0xff] }
 0x4df   : > { %vm13697_vm3 = vmand %vm18320_vm6, %vm18319_vm2  ;;  %v5080_v10 = vsel %vm13680_vm0, %v18323_v9, -inf  ;;  %vm18324_vm7 = vcmp.ge.s32.totalorder %v18277_v40, %v13483_v12  ;;  %v5111_v33 = vmax.f32 %v5107_v31, %v5077_v6  ;;  %v5112_v24 = vmax.f32 %v5108_v60, %v5078_v3  ;;  %v18334_v5 = vld [vmem:[#allocation80_spill] sm:$0xff]  ;;  %v18336_v2 = vld [vmem:[#allocation19_spill] sm:$0xff] }
 0x4e0   : > { %vm4968_vm12 = vmand %vm18324_vm7, %vm4930_vm9  ;;  %v5081_v7 = vsel %vm13697_vm3, %v18325_v21, -inf  ;;  %v5113_v18 = vmax.f32 %v5109_v11, %v5079_v20  ;;  %vm4895_vm15 = vcmp.ge.s32.totalorder %v18326_v30, %v13483_v12  ;;  %vm4934_vm8 = vcmp.lt.s32.totalorder %v18284_v34, %v13485_v45  ;;  %v18337_v51 = vld [vmem:[#allocation81_spill] sm:$0xff]  ;;  %v18338_v50 = vld [vmem:[#allocation22_spill] sm:$0xff] }
 0x4e1   : > { %vm18327_vm5 = vcmp.ge.s32.totalorder %v18278_v22, %v13483_v12  ;;  %v5082_v37 = vsel %vm4968_vm12, %v18328_v62, -inf  ;;  %v5114_v42 = vmax.f32 %v5110_v57, %v5080_v10  ;;  %vm4935_vm10 = vcmp.lt.s32.totalorder %v18326_v30, %v13485_v45  ;;  %v18331_v22 = vld [vmem:[#allocation79_spill] sm:$0xff]  ;;  %v18339_v54 = vld [vmem:[#allocation82_spill] sm:$0xff]  ;;  %v18343_v16 = vld [vmem:[#allocation84_spill] sm:$0xff] }
 0x4e2   : > { %vm4969_vm9 = vmand %vm18327_vm5, %vm4931_vm13  ;;  %vm18329_vm1 = vcmp.ge.s32.totalorder %v18279_v0, %v13483_v12  ;;  %v5115_v53 = vmax.f32 %v5111_v33, %v5081_v7  ;;  %v5116_v14 = vmax.f32 %v5112_v24, %v5082_v37  ;;  %vm4896_vm13 = vcmp.ge.s32.totalorder %v18331_v22, %v13483_v12  ;;  %v18340_v38 = vld [vmem:[#allocation23_spill] sm:$0xff]  ;;  %v18342_v28 = vld [vmem:[#allocation26_spill] sm:$0xff] }
 0x4e3   : > { %vm4970_vm11 = vmand %vm18329_vm1, %vm4932_vm14  ;;  %v5083_v40 = vsel %vm4969_vm9, %v18330_v61, -inf  ;;  %vm4936_vm0 = vcmp.lt.s32.totalorder %v18331_v22, %v13485_v45  ;;  %vm18332_vm2 = vcmp.ge.s32.totalorder %v18283_v35, %v13483_v12  ;;  %vm4897_vm14 = vcmp.ge.s32.totalorder %v18334_v5, %v13483_v12  ;;  %v18341_v19 = vld [vmem:[#allocation83_spill] sm:$0xff]  ;;  %v18345_v1 = vld [vmem:[#allocation85_spill] sm:$0xff] }
 0x4e4   : > { %vm4971_vm6 = vmand %vm18332_vm2, %vm4933_vm4  ;;  %v5084_v0 = vsel %vm4970_vm11, %v18333_v49, -inf  ;;  %v5117_v26 = vmax.f32 %v5113_v18, %v5083_v40  ;;  %vm4937_vm3 = vcmp.lt.s32.totalorder %v18334_v5, %v13485_v45  ;;  %vm18335_vm7 = vcmp.ge.s32.totalorder %v18284_v34, %v13483_v12  ;;  %v18344_v41 = vld [vmem:[#allocation27_spill] sm:$0xff]  ;;  %v18346_v44 = vld [vmem:[#allocation30_spill] sm:$0xff] }
 0x4e5   : > { %vm4972_vm12 = vmand %vm18335_vm7, %vm4934_vm8  ;;  %v5085_v4 = vsel %vm4971_vm6, %v18336_v2, -inf  ;;  %v5118_v35 = vmax.f32 %v5114_v42, %v5084_v0  ;;  %vm4898_vm4 = vcmp.ge.s32.totalorder %v18337_v51, %v13483_v12  ;;  %vm4938_vm5 = vcmp.lt.s32.totalorder %v18337_v51, %v13485_v45  ;;  %v18347_v39 = vld [vmem:[#allocation86_spill] sm:$0xff]  ;;  %v18348_v3 = vld [vmem:[#allocation31_spill] sm:$0xff] }
 0x4e6   : > { %vm4973_vm9 = vmand %vm4895_vm15, %vm4935_vm10  ;;  %v5086_v32 = vsel %vm4972_vm12, %v18338_v50, -inf  ;;  %v5119_v34 = vmax.f32 %v5115_v53, %v5085_v4  ;;  %vm4899_vm8 = vcmp.ge.s32.totalorder %v18339_v54, %v13483_v12  ;;  %vm4939_vm1 = vcmp.lt.s32.totalorder %v18339_v54, %v13485_v45  ;;  %v18349_v48 = vld [vmem:[#allocation87_spill] sm:$0xff]  ;;  %v18350_v20 = vld [vmem:[#allocation34_spill] sm:$0xff] }
 0x4e7   : > { %vm4974_vm11 = vmand %vm4896_vm13, %vm4936_vm0  ;;  %v5087_v17 = vsel %vm4973_vm9, %v18340_v38, -inf  ;;  %v5120_v56 = vmax.f32 %v5116_v14, %v5086_v32  ;;  %vm4900_vm15 = vcmp.ge.s32.totalorder %v18341_v19, %v13483_v12  ;;  %vm4940_vm10 = vcmp.lt.s32.totalorder %v18341_v19, %v13485_v45  ;;  %v18351_v11 = vld [vmem:[#allocation88_spill] sm:$0xff]  ;;  %v18353_v57 = vld [vmem:[#allocation89_spill] sm:$0xff] }
 0x4e8   : > { %vm4975_vm2 = vmand %vm4897_vm14, %vm4937_vm3  ;;  %v5088_v13 = vsel %vm4974_vm11, %v18342_v28, -inf  ;;  %v5121_v47 = vmax.f32 %v5117_v26, %v5087_v17  ;;  %vm4901_vm13 = vcmp.ge.s32.totalorder %v18343_v16, %v13483_v12  ;;  %vm4941_vm0 = vcmp.lt.s32.totalorder %v18343_v16, %v13485_v45  ;;  %v18352_v55 = vld [vmem:[#allocation36_spill] sm:$0xff]  ;;  %v18355_v24 = vld [vmem:[#allocation90_spill] sm:$0xff] }
 0x4e9   : > { %vm4976_vm6 = vmand %vm4898_vm4, %vm4938_vm5  ;;  %v5089_v43 = vsel %vm4975_vm2, %v18344_v41, -inf  ;;  %v5122_v23 = vmax.f32 %v5118_v35, %v5088_v13  ;;  %vm4902_vm14 = vcmp.ge.s32.totalorder %v18345_v1, %v13483_v12  ;;  %vm4942_vm3 = vcmp.lt.s32.totalorder %v18345_v1, %v13485_v45  ;;  %v18354_v21 = vld [vmem:[#allocation40_spill] sm:$0xff]  ;;  %v18356_v18 = vld [vmem:[#allocation42_spill] sm:$0xff] }
 0x4ea   : > { %vm4977_vm7 = vmand %vm4899_vm8, %vm4939_vm1  ;;  %v5090_v63 = vsel %vm4976_vm6, %v18346_v44, -inf  ;;  %v5123_v6 = vmax.f32 %v5119_v34, %v5089_v43  ;;  %vm4903_vm12 = vcmp.ge.s32.totalorder %v18347_v39, %v13483_v12  ;;  %vm4943_vm4 = vcmp.lt.s32.totalorder %v18347_v39, %v13485_v45  ;;  %v18357_v37 = vld [vmem:[#allocation91_spill] sm:$0xff]  ;;  %v18358_v42 = vld [vmem:[#allocation46_spill] sm:$0xff] }
 0x4eb   : > { %vm4978_vm5 = vmand %vm4900_vm15, %vm4940_vm10  ;;  %v5091_v52 = vsel %vm4977_vm7, %v18348_v3, -inf  ;;  %v5124_v36 = vmax.f32 %v5120_v56, %v5090_v63  ;;  %vm4904_vm9 = vcmp.ge.s32.totalorder %v18349_v48, %v13483_v12  ;;  %vm4944_vm8 = vcmp.lt.s32.totalorder %v18349_v48, %v13485_v45  ;;  %v18359_v53 = vld [vmem:[#allocation92_spill] sm:$0xff]  ;;  %v18361_v0 = vld [vmem:[#allocation93_spill] sm:$0xff] }
 0x4ec   : > { %vm4979_vm1 = vmand %vm4901_vm13, %vm4941_vm0  ;;  %v5092_v31 = vsel %vm4978_vm5, %v18350_v20, -inf  ;;  %v5125_v60 = vmax.f32 %v5121_v47, %v5091_v52  ;;  %vm4905_vm11 = vcmp.ge.s32.totalorder %v18351_v11, %v13483_v12  ;;  %vm4945_vm15 = vcmp.lt.s32.totalorder %v18351_v11, %v13485_v45  ;;  %v18360_v14 = vld [vmem:[#allocation48_spill] sm:$0xff]  ;;  %v18363_v4 = vld [vmem:[#allocation94_spill] sm:$0xff] }
 0x4ed   : > { %vm4980_vm10 = vmand %vm4902_vm14, %vm4942_vm3  ;;  %v5093_v9 = vsel %vm4979_vm1, %v18352_v55, -inf  ;;  %v5126_v10 = vmax.f32 %v5122_v23, %v5092_v31  ;;  %vm4906_vm2 = vcmp.ge.s32.totalorder %v18353_v57, %v13483_v12  ;;  %vm4946_vm13 = vcmp.lt.s32.totalorder %v18353_v57, %v13485_v45  ;;  %v18362_v26 = vld [vmem:[#allocation52_spill] sm:$0xff]  ;;  %v18364_v35 = vld [vmem:[#allocation54_spill] sm:$0xff] }
 0x4ee   : > { %vm4981_vm0 = vmand %vm4903_vm12, %vm4943_vm4  ;;  %v5094_v7 = vsel %vm4980_vm10, %v18354_v21, -inf  ;;  %v5127_v33 = vmax.f32 %v5123_v6, %v5093_v9  ;;  %vm4907_vm6 = vcmp.ge.s32.totalorder %v18355_v24, %v13483_v12  ;;  %vm4947_vm14 = vcmp.lt.s32.totalorder %v18355_v24, %v13485_v45  ;;  %v18365_v32 = vld [vmem:[#allocation95_spill] sm:$0xff]  ;;  %v18366_v38 = vld [vmem:[#allocation96_spill] sm:$0xff] }
 0x4ef   : > { %vm4982_vm3 = vmand %vm4904_vm9, %vm4944_vm8  ;;  %v5095_v30 = vsel %vm4981_vm0, %v18356_v18, -inf  ;;  %v5128_v62 = vmax.f32 %v5124_v36, %v5094_v7  ;;  %vm4908_vm7 = vcmp.ge.s32.totalorder %v18357_v37, %v13483_v12  ;;  %vm4948_vm12 = vcmp.lt.s32.totalorder %v18357_v37, %v13485_v45  ;;  %v5149_v36 = vld [vmem:[%s8003_s15 + $0xa] sm:$0x1] }
 0x4f0   : > { %vm4983_vm4 = vmand %vm4905_vm11, %vm4945_vm15  ;;  %v5096_v61 = vsel %vm4982_vm3, %v18358_v42, -inf  ;;  %v5129_v40 = vmax.f32 %v5125_v60, %v5095_v30  ;;  %vm4909_vm5 = vcmp.ge.s32.totalorder %v18359_v53, %v13483_v12  ;;  %vm4949_vm9 = vcmp.lt.s32.totalorder %v18359_v53, %v13485_v45 }
 0x4f1   : > { %vm4984_vm8 = vmand %vm4906_vm2, %vm4946_vm13  ;;  %v5097_v22 = vsel %vm4983_vm4, %v18360_v14, -inf  ;;  %v5130_v49 = vmax.f32 %v5126_v10, %v5096_v61  ;;  %vm4910_vm1 = vcmp.ge.s32.totalorder %v18361_v0, %v13483_v12  ;;  %vm4950_vm11 = vcmp.lt.s32.totalorder %v18361_v0, %v13485_v45 }
 0x4f2   : > { %vm4985_vm15 = vmand %vm4907_vm6, %vm4947_vm14  ;;  %v5098_v5 = vsel %vm4984_vm8, %v18362_v26, -inf  ;;  %v5131_v2 = vmax.f32 %v5127_v33, %v5097_v22  ;;  %vm4911_vm10 = vcmp.ge.s32.totalorder %v18363_v4, %v13483_v12  ;;  %vm4951_vm2 = vcmp.lt.s32.totalorder %v18363_v4, %v13485_v45 }
 0x4f3   : > { %vm4986_vm13 = vmand %vm4908_vm7, %vm4948_vm12  ;;  %v5099_v51 = vsel %vm4985_vm15, %v18364_v35, -inf  ;;  %v5132_v50 = vmax.f32 %v5128_v62, %v5098_v5  ;;  %vm4912_vm0 = vcmp.ge.s32.totalorder %v18365_v32, %v13483_v12  ;;  %vm4952_vm6 = vcmp.lt.s32.totalorder %v18365_v32, %v13485_v45 }
 0x4f4   : > { %vm4987_vm14 = vmand %vm4909_vm5, %vm4949_vm9  ;;  %v5100_v34 = vsel %vm4986_vm13, %v8583_v46, -inf  ;;  %v5133_v54 = vmax.f32 %v5129_v40, %v5099_v51  ;;  %vm4913_vm3 = vcmp.ge.s32.totalorder %v18366_v38, %v13483_v12  ;;  %vm4953_vm7 = vcmp.lt.s32.totalorder %v18366_v38, %v13485_v45 }
 0x4f5   : > { %vm4988_vm12 = vmand %vm4910_vm1, %vm4950_vm11  ;;  %v5101_v17 = vsel %vm4987_vm14, %v8586_v59, -inf  ;;  %v5134_v56 = vmax.f32 %v5130_v49, %v5100_v34 }
 0x4f6   : > { %vm4989_vm4 = vmand %vm4911_vm10, %vm4951_vm2  ;;  %v5102_v19 = vsel %vm4988_vm12, %v8591_v25, -inf  ;;  %v5135_v28 = vmax.f32 %v5131_v2, %v5101_v17 }
 0x4f7   : > { %vm4990_vm5 = vmand %vm4912_vm0, %vm4952_vm6  ;;  %v5103_v13 = vsel %vm4989_vm4, %v8594_v29, -inf  ;;  %v5136_v47 = vmax.f32 %v5132_v50, %v5102_v19 }
 0x4f8   : > { %vm4991_vm9 = vmand %vm4913_vm3, %vm4953_vm7  ;;  %v5104_v45 = vsel %vm4990_vm5, %v8604_v15, -inf  ;;  %v5137_v16 = vmax.f32 %v5133_v54, %v5103_v13 }
 0x4f9   : > { %v5105_v41 = vsel %vm4991_vm9, %v8609_v58, -inf  ;;  %v5138_v43 = vmax.f32 %v5134_v56, %v5104_v45 }
 0x4fa   : > { %v5139_v23 = vmax.f32 %v5135_v28, %v5105_v41  ;;  %v5141_v1 = vmax.f32 %v5136_v47, %v5137_v16 }
 0x4fc   : > { %v5140_v12 = vmax.f32 %v5138_v43, %v5139_v23 }
 0x4fe   : > { %v5142_v44 = vmax.f32 %v5140_v12, %v5141_v1 }
 0x500   : > { %v5143_v63 = vrot.slane %v5142_v44, 4 }
 0x502   : > { %v5144_v6 = vmax.f32 %v5142_v44, %v5143_v63 }
 0x504   : > { %v5145_v39 = vrot.slane %v5144_v6, 2 }
 0x506   : > { %v5146_v3 = vmax.f32 %v5144_v6, %v5145_v39 }
 0x508   : > { %v5147_v52 = vrot.slane %v5146_v3, 1 }
 0x50a   : > { %v5148_v48 = vmax.f32 %v5146_v3, %v5147_v52 }
 0x50c   : > { %v5150_v20 = vmax.f32 %v5149_v36, %v5148_v48 }
 0x50e   : > { %5151 = vst [vmem:[%s8003_s15 + $0xa] sm:$0x1] %v5150_v20 }
 0x50f PF: > { %s6843_s12 = sld [smem:[#allocation5 + $0xb]]  ;;  %s6844_s24 = sld [smem:[#allocation5 + $0xc]] }
 0x515   : > { %p5155_p2 = scmp.gt.s32.totalorder %s6843_s12, %s8822_s23  ;;  %p5157_p3 = scmp.lt.s32.totalorder %s6844_s24, %s8829_s21 }
 0x517   : > { %s5156_s18 = scalar_select %p5155_p2, %s6843_s12, %s8822_s23 }
 0x518   : > { %s5158_s22 = scalar_select %p5157_p3, %s6844_s24, %s8829_s21 }
 0x51a   : > { %p6845_p6 = scmp.ge.s32.totalorder %s5156_s18, %s5158_s22 }
 0x51b   : > { %s5163_s25 = ssub.s32 (!%p6845_p6), %s6843_s12, %s8822_s23  ;;  %s5203_s19 = ssub.s32 (!%p6845_p6), %s6844_s24, %s8822_s23  ;;  %v18367_v11 = vld [vmem:[#allocation61_spill] sm:$0xff] (!%p6845_p6)  ;;  %v18368_v55 = vld [vmem:[#allocation62_spill] sm:$0xff] (!%p6845_p6)  ;;  %v18371_v10 = vld [vmem:[#allocation63_spill] sm:$0xff] (!%p6845_p6)  ;;  %v18395_v26 = vmov (!%p6845_p6), 0 }
 0x51c   : > { %5162 = sbr.rel (%p6845_p6) target bundleno = 1371 (0x55b), region = 88  ;;  %v13946_v31 = vstv (!%p6845_p6), %s5163_s25  ;;  %v13948_v60 = vstv (!%p6845_p6), %s5203_s19  ;;  %v18374_v21 = vld [vmem:[#allocation64_spill] sm:$0xff] (!%p6845_p6)  ;;  %v18377_v33 = vld [vmem:[#allocation65_spill] sm:$0xff] (!%p6845_p6)  ;;  %v18378_v24 = vld [vmem:[#allocation66_spill] sm:$0xff] (!%p6845_p6) }
 0x51d   : > { %vm5165_vm8 = vcmp.ge.s32.totalorder (!%p6845_p6), %v8307_v27, %v13946_v31  ;;  %vm5166_vm1 = vcmp.ge.s32.totalorder (!%p6845_p6), %v8329_v8, %v13946_v31  ;;  %vm5167_vm11 = vcmp.ge.s32.totalorder (!%p6845_p6), %v18367_v11, %v13946_v31  ;;  %vm5205_vm15 = vcmp.lt.s32.totalorder (!%p6845_p6), %v8307_v27, %v13948_v60  ;;  %v18381_v30 = vld [vmem:[#allocation67_spill] sm:$0xff] (!%p6845_p6)  ;;  %v18382_v62 = vld [vmem:[#allocation68_spill] sm:$0xff] (!%p6845_p6)  ;;  %v18383_v37 = vld [vmem:[#allocation69_spill] sm:$0xff] (!%p6845_p6) }
 0x51e   : > { %vm5206_vm10 = vcmp.lt.s32.totalorder (!%p6845_p6), %v8329_v8, %v13948_v60  ;;  %vm5168_vm2 = vcmp.ge.s32.totalorder (!%p6845_p6), %v18368_v55, %v13946_v31  ;;  %vm5207_vm13 = vcmp.lt.s32.totalorder (!%p6845_p6), %v18367_v11, %v13948_v60  ;;  %vm5208_vm0 = vcmp.lt.s32.totalorder (!%p6845_p6), %v18368_v55, %v13948_v60  ;;  %vm13966_vm6 = vmand (!%p6845_p6), %vm5165_vm8, %vm5205_vm15  ;;  %v18386_v61 = vld [vmem:[#allocation70_spill] sm:$0xff] (!%p6845_p6)  ;;  %v18387_v40 = vld [vmem:[#allocation71_spill] sm:$0xff] (!%p6845_p6) }
 0x51f   : > { %vm5169_vm14 = vcmp.ge.s32.totalorder (!%p6845_p6), %v18371_v10, %v13946_v31  ;;  %vm5209_vm3 = vcmp.lt.s32.totalorder (!%p6845_p6), %v18371_v10, %v13948_v60  ;;  %vm13974_vm7 = vmand (!%p6845_p6), %vm5166_vm1, %vm5206_vm10  ;;  %vm5170_vm12 = vcmp.ge.s32.totalorder (!%p6845_p6), %v18374_v21, %v13946_v31  ;;  %vm5210_vm4 = vcmp.lt.s32.totalorder (!%p6845_p6), %v18374_v21, %v13948_v60  ;;  %v18388_v53 = vld [vmem:[#allocation72_spill] sm:$0xff] (!%p6845_p6)  ;;  %v18391_v22 = vld [vmem:[#allocation73_spill] sm:$0xff] (!%p6845_p6) }
 0x520   : > { %vm13982_vm5 = vmand (!%p6845_p6), %vm5167_vm11, %vm5207_vm13  ;;  %vm5211_vm1 = vcmp.lt.s32.totalorder (!%p6845_p6), %v18377_v33, %v13948_v60  ;;  %vm5212_vm9 = vcmp.lt.s32.totalorder (!%p6845_p6), %v18378_v24, %v13948_v60  ;;  %v18392_v49 = vld [vmem:[#allocation74_spill] sm:$0xff] (!%p6845_p6)  ;;  %v18393_v0 = vld [vmem:[#allocation75_spill] sm:$0xff] (!%p6845_p6)  ;;  %vm5215_vm10 = vcmp.lt.s32.totalorder (!%p6845_p6), %v18383_v37, %v13948_v60  ;;  %vm5219_vm11 = vcmp.lt.s32.totalorder (!%p6845_p6), %v18391_v22, %v13948_v60 }
 0x521   : > { %vm13992_vm15 = vmand (!%p6845_p6), %vm5168_vm2, %vm5208_vm0  ;;  %vm5214_vm2 = vcmp.lt.s32.totalorder (!%p6845_p6), %v18382_v62, %v13948_v60  ;;  %v18397_v5 = vld [vmem:[#allocation76_spill] sm:$0xff] (!%p6845_p6)  ;;  %v18398_v2 = vld [vmem:[#allocation77_spill] sm:$0xff] (!%p6845_p6)  ;;  %vm5220_vm13 = vcmp.lt.s32.totalorder (!%p6845_p6), %v18392_v49, %v13948_v60 }
 0x522   : > { %vm14004_vm8 = vmand (!%p6845_p6), %vm5169_vm14, %vm5209_vm3  ;;  %vm18406_vm3 = vcmp.ge.s32.totalorder (!%p6845_p6), %v18382_v62, %v13946_v31  ;;  %v18409_v50 = vld [vmem:[#allocation20_spill] sm:$0xff] (!%p6845_p6)  ;;  %v18410_v34 = vld [vmem:[#allocation21_spill] sm:$0xff] (!%p6845_p6) }
 0x523   : > { %vm14022_vm14 = vmand %vm5170_vm12, %vm5210_vm4  ;;  %vm18394_vm12 = vcmp.ge.s32.totalorder %v18377_v33, %v13946_v31  ;;  %v5357_v32 = vsel %vm13966_vm6, %v18409_v50, -inf  ;;  %v5358_v54 = vsel %vm13974_vm7, %v18410_v34, -inf  ;;  %v18411_v38 = vld [vmem:[#allocation24_spill] sm:$0xff]  ;;  %v18412_v56 = vld [vmem:[#allocation25_spill] sm:$0xff]  ;;  %vm18421_vm7 = vcmp.lt.s32.totalorder %v18386_v61, %v13948_v60 }
 0x524   : > { %vm14040_vm4 = vmand %vm18394_vm12, %vm5211_vm1  ;;  %vm18399_vm1 = vcmp.ge.s32.totalorder %v18378_v24, %v13946_v31  ;;  %v5359_v17 = vsel %vm13982_vm5, %v18411_v38, -inf  ;;  %v5360_v19 = vsel %vm13992_vm15, %v18412_v56, -inf  ;;  %v18416_v13 = vld [vmem:[#allocation28_spill] sm:$0xff]  ;;  %v18417_v45 = vld [vmem:[#allocation29_spill] sm:$0xff]  ;;  %vm18422_vm5 = vcmp.ge.s32.totalorder %v18386_v61, %v13946_v31 }
 0x525   : > { %v18396_v26 = vsel %vm14040_vm4, 4294967295, %v18395_v26  ;;  %vm14058_vm12 = vmand %vm18399_vm1, %vm5212_vm9  ;;  %vm18402_vm4 = vcmp.lt.s32.totalorder %v18381_v30, %v13948_v60  ;;  %vm18403_vm9 = vcmp.ge.s32.totalorder %v18381_v30, %v13946_v31  ;;  %v5361_v47 = vsel %vm14004_vm8, %v18416_v13, -inf  ;;  %v18418_v41 = vld [vmem:[#allocation32_spill] sm:$0xff]  ;;  %v18420_v23 = vld [vmem:[#allocation33_spill] sm:$0xff] }
 0x526   : > { %vm14076_vm1 = vmand %vm18403_vm9, %vm18402_vm4  ;;  %v5362_v16 = vsel %vm14022_vm14, %v18417_v45, -inf  ;;  %vm18419_vm6 = vnez %v18396_v26  ;;  %v5364_v1 = vsel %vm14058_vm12, %v18420_v23, -inf  ;;  %v18425_v44 = vld [vmem:[#allocation37_spill] sm:$0xff]  ;;  %v18426_v6 = vld [vmem:[#allocation38_spill] sm:$0xff]  ;;  %v5395_v36 = vmax.f32 %v5357_v32, %v5361_v47 }
 0x527   : > { %vm14083_vm0 = vmand %vm18406_vm3, %vm5214_vm2  ;;  %vm18413_vm2 = vcmp.ge.s32.totalorder %v18383_v37, %v13946_v31  ;;  %v5363_v43 = vsel %vm18419_vm6, %v18418_v41, -inf  ;;  %v5365_v63 = vsel %vm14076_vm1, %v18425_v44, -inf  ;;  %v18427_v3 = vld [vmem:[#allocation43_spill] sm:$0xff]  ;;  %vm18428_vm8 = vcmp.lt.s32.totalorder %v18387_v40, %v13948_v60  ;;  %v18432_v20 = vld [vmem:[#allocation44_spill] sm:$0xff] }
 0x528   : > { %vm14102_vm3 = vmand %vm18413_vm2, %vm5215_vm10  ;;  %v5366_v39 = vsel %vm14083_vm0, %v18426_v6, -inf  ;;  %vm18429_vm10 = vcmp.ge.s32.totalorder %v18387_v40, %v13946_v31  ;;  %v5396_v55 = vmax.f32 %v5358_v54, %v5362_v16  ;;  %v5397_v9 = vmax.f32 %v5359_v17, %v5363_v43  ;;  %v18437_v21 = vld [vmem:[#allocation49_spill] sm:$0xff]  ;;  %v18439_v24 = vld [vmem:[#allocation50_spill] sm:$0xff] }
 0x529   : > { %vm14124_vm15 = vmand %vm18422_vm5, %vm18421_vm7  ;;  %v5367_v52 = vsel %vm14102_vm3, %v18427_v3, -inf  ;;  %v5398_v10 = vmax.f32 %v5360_v19, %v5364_v1  ;;  %vm5221_vm0 = vcmp.lt.s32.totalorder %v18393_v0, %v13948_v60  ;;  %vm5222_vm4 = vcmp.lt.s32.totalorder %v18397_v5, %v13948_v60  ;;  %v18440_v42 = vld [vmem:[#allocation78_spill] sm:$0xff]  ;;  %v18442_v61 = vld [vmem:[#allocation55_spill] sm:$0xff] }
 0x52a   : > { %vm14143_vm14 = vmand %vm18429_vm10, %vm18428_vm8  ;;  %v5368_v11 = vsel %vm14124_vm15, %v18432_v20, -inf  ;;  %vm18433_vm12 = vcmp.lt.s32.totalorder %v18388_v53, %v13948_v60  ;;  %vm18434_vm9 = vcmp.ge.s32.totalorder %v18388_v53, %v13946_v31  ;;  %v5399_v33 = vmax.f32 %v5395_v36, %v5365_v63  ;;  %v18444_v14 = vld [vmem:[#allocation56_spill] sm:$0xff]  ;;  %v18447_v35 = vld [vmem:[#allocation18_spill] sm:$0xff] }
 0x52b   : > { %vm14160_vm1 = vmand %vm18434_vm9, %vm18433_vm12  ;;  %v5369_v7 = vsel %vm14143_vm14, %v18437_v21, -inf  ;;  %vm18438_vm2 = vcmp.ge.s32.totalorder %v18391_v22, %v13946_v31  ;;  %v5400_v30 = vmax.f32 %v5396_v55, %v5366_v39  ;;  %v5401_v62 = vmax.f32 %v5397_v9, %v5367_v52  ;;  %v18448_v50 = vld [vmem:[#allocation80_spill] sm:$0xff]  ;;  %v18450_v32 = vld [vmem:[#allocation19_spill] sm:$0xff] }
 0x52c   : > { %vm5257_vm3 = vmand %vm18438_vm2, %vm5219_vm11  ;;  %v5370_v18 = vsel %vm14160_vm1, %v18439_v24, -inf  ;;  %v5402_v37 = vmax.f32 %v5398_v10, %v5368_v11  ;;  %vm5184_vm6 = vcmp.ge.s32.totalorder %v18440_v42, %v13946_v31  ;;  %vm5223_vm7 = vcmp.lt.s32.totalorder %v18398_v2, %v13948_v60  ;;  %v18451_v54 = vld [vmem:[#allocation81_spill] sm:$0xff]  ;;  %v18452_v38 = vld [vmem:[#allocation22_spill] sm:$0xff] }
 0x52d   : > { %vm18441_vm5 = vcmp.ge.s32.totalorder %v18392_v49, %v13946_v31  ;;  %v5371_v40 = vsel %vm5257_vm3, %v18442_v61, -inf  ;;  %v5403_v53 = vmax.f32 %v5399_v33, %v5369_v7  ;;  %vm5224_vm15 = vcmp.lt.s32.totalorder %v18440_v42, %v13948_v60  ;;  %v18445_v49 = vld [vmem:[#allocation79_spill] sm:$0xff]  ;;  %v18453_v56 = vld [vmem:[#allocation82_spill] sm:$0xff]  ;;  %v18457_v43 = vld [vmem:[#allocation84_spill] sm:$0xff] }
 0x52e   : > { %vm5258_vm11 = vmand %vm18441_vm5, %vm5220_vm13  ;;  %vm18443_vm8 = vcmp.ge.s32.totalorder %v18393_v0, %v13946_v31  ;;  %v5404_v26 = vmax.f32 %v5400_v30, %v5370_v18  ;;  %v5405_v4 = vmax.f32 %v5401_v62, %v5371_v40  ;;  %vm5185_vm13 = vcmp.ge.s32.totalorder %v18445_v49, %v13946_v31  ;;  %v18454_v19 = vld [vmem:[#allocation23_spill] sm:$0xff]  ;;  %v18456_v45 = vld [vmem:[#allocation26_spill] sm:$0xff] }
 0x52f   : > { %vm5259_vm10 = vmand %vm18443_vm8, %vm5221_vm0  ;;  %v5372_v22 = vsel %vm5258_vm11, %v18444_v14, -inf  ;;  %vm5225_vm14 = vcmp.lt.s32.totalorder %v18445_v49, %v13948_v60  ;;  %vm18446_vm12 = vcmp.ge.s32.totalorder %v18397_v5, %v13946_v31  ;;  %vm5186_vm0 = vcmp.ge.s32.totalorder %v18448_v50, %v13946_v31  ;;  %v18455_v47 = vld [vmem:[#allocation83_spill] sm:$0xff]  ;;  %v18459_v44 = vld [vmem:[#allocation85_spill] sm:$0xff] }
 0x530   : > { %vm5260_vm9 = vmand %vm18446_vm12, %vm5222_vm4  ;;  %v5373_v0 = vsel %vm5259_vm10, %v18447_v35, -inf  ;;  %v5406_v51 = vmax.f32 %v5402_v37, %v5372_v22  ;;  %vm5226_vm1 = vcmp.lt.s32.totalorder %v18448_v50, %v13948_v60  ;;  %vm18449_vm2 = vcmp.ge.s32.totalorder %v18398_v2, %v13946_v31  ;;  %v18458_v23 = vld [vmem:[#allocation27_spill] sm:$0xff]  ;;  %v18460_v63 = vld [vmem:[#allocation30_spill] sm:$0xff] }
 0x531   : > { %vm5261_vm3 = vmand %vm18449_vm2, %vm5223_vm7  ;;  %v5374_v34 = vsel %vm5260_vm9, %v18450_v32, -inf  ;;  %v5407_v5 = vmax.f32 %v5403_v53, %v5373_v0  ;;  %vm5187_vm4 = vcmp.ge.s32.totalorder %v18451_v54, %v13946_v31  ;;  %vm5227_vm5 = vcmp.lt.s32.totalorder %v18451_v54, %v13948_v60  ;;  %v18461_v3 = vld [vmem:[#allocation86_spill] sm:$0xff]  ;;  %v18462_v52 = vld [vmem:[#allocation31_spill] sm:$0xff] }
 0x532   : > { %vm5262_vm11 = vmand %vm5184_vm6, %vm5224_vm15  ;;  %v5375_v17 = vsel %vm5261_vm3, %v18452_v38, -inf  ;;  %v5408_v2 = vmax.f32 %v5404_v26, %v5374_v34  ;;  %vm5188_vm7 = vcmp.ge.s32.totalorder %v18453_v56, %v13946_v31  ;;  %vm5228_vm8 = vcmp.lt.s32.totalorder %v18453_v56, %v13948_v60  ;;  %v18463_v20 = vld [vmem:[#allocation87_spill] sm:$0xff]  ;;  %v18464_v11 = vld [vmem:[#allocation34_spill] sm:$0xff] }
 0x533   : > { %vm5263_vm10 = vmand %vm5185_vm13, %vm5225_vm14  ;;  %v5376_v28 = vsel %vm5262_vm11, %v18454_v19, -inf  ;;  %v5409_v13 = vmax.f32 %v5405_v4, %v5375_v17  ;;  %vm5189_vm6 = vcmp.ge.s32.totalorder %v18455_v47, %v13946_v31  ;;  %vm5229_vm15 = vcmp.lt.s32.totalorder %v18455_v47, %v13948_v60  ;;  %v18465_v10 = vld [vmem:[#allocation88_spill] sm:$0xff]  ;;  %v18467_v33 = vld [vmem:[#allocation89_spill] sm:$0xff] }
 0x534   : > { %vm5264_vm12 = vmand %vm5186_vm0, %vm5226_vm1  ;;  %v5377_v16 = vsel %vm5263_vm10, %v18456_v45, -inf  ;;  %v5410_v41 = vmax.f32 %v5406_v51, %v5376_v28  ;;  %vm5190_vm13 = vcmp.ge.s32.totalorder %v18457_v43, %v13946_v31  ;;  %vm5230_vm14 = vcmp.lt.s32.totalorder %v18457_v43, %v13948_v60  ;;  %v18466_v57 = vld [vmem:[#allocation36_spill] sm:$0xff]  ;;  %v18469_v62 = vld [vmem:[#allocation90_spill] sm:$0xff] }
 0x535   : > { %vm5265_vm9 = vmand %vm5187_vm4, %vm5227_vm5  ;;  %v5378_v1 = vsel %vm5264_vm12, %v18458_v23, -inf  ;;  %v5411_v12 = vmax.f32 %v5407_v5, %v5377_v16  ;;  %vm5191_vm0 = vcmp.ge.s32.totalorder %v18459_v44, %v13946_v31  ;;  %vm5231_vm1 = vcmp.lt.s32.totalorder %v18459_v44, %v13948_v60  ;;  %v18468_v24 = vld [vmem:[#allocation40_spill] sm:$0xff]  ;;  %v18470_v37 = vld [vmem:[#allocation42_spill] sm:$0xff] }
 0x536   : > { %vm5266_vm2 = vmand %vm5188_vm7, %vm5228_vm8  ;;  %v5379_v6 = vsel %vm5265_vm9, %v18460_v63, -inf  ;;  %v5412_v39 = vmax.f32 %v5408_v2, %v5378_v1  ;;  %vm5192_vm3 = vcmp.ge.s32.totalorder %v18461_v3, %v13946_v31  ;;  %vm5232_vm4 = vcmp.lt.s32.totalorder %v18461_v3, %v13948_v60  ;;  %v18471_v40 = vld [vmem:[#allocation91_spill] sm:$0xff]  ;;  %v18472_v53 = vld [vmem:[#allocation46_spill] sm:$0xff] }
 0x537   : > { %vm5267_vm5 = vmand %vm5189_vm6, %vm5229_vm15  ;;  %v5380_v36 = vsel %vm5266_vm2, %v18462_v52, -inf  ;;  %v5413_v48 = vmax.f32 %v5409_v13, %v5379_v6  ;;  %vm5193_vm11 = vcmp.ge.s32.totalorder %v18463_v20, %v13946_v31  ;;  %vm5233_vm7 = vcmp.lt.s32.totalorder %v18463_v20, %v13948_v60  ;;  %v18473_v26 = vld [vmem:[#allocation92_spill] sm:$0xff]  ;;  %v18475_v0 = vld [vmem:[#allocation93_spill] sm:$0xff] }
 0x538   : > { %vm5268_vm8 = vmand %vm5190_vm13, %vm5230_vm14  ;;  %v5381_v55 = vsel %vm5267_vm5, %v18464_v11, -inf  ;;  %v5414_v9 = vmax.f32 %v5410_v41, %v5380_v36  ;;  %vm5194_vm10 = vcmp.ge.s32.totalorder %v18465_v10, %v13946_v31  ;;  %vm5234_vm6 = vcmp.lt.s32.totalorder %v18465_v10, %v13948_v60  ;;  %v18474_v4 = vld [vmem:[#allocation48_spill] sm:$0xff]  ;;  %v18477_v34 = vld [vmem:[#allocation94_spill] sm:$0xff] }
 0x539   : > { %vm5269_vm15 = vmand %vm5191_vm0, %vm5231_vm1  ;;  %v5382_v21 = vsel %vm5268_vm8, %v18466_v57, -inf  ;;  %v5415_v7 = vmax.f32 %v5411_v12, %v5381_v55  ;;  %vm5195_vm12 = vcmp.ge.s32.totalorder %v18467_v33, %v13946_v31  ;;  %vm5235_vm13 = vcmp.lt.s32.totalorder %v18467_v33, %v13948_v60  ;;  %v18476_v51 = vld [vmem:[#allocation52_spill] sm:$0xff]  ;;  %v18478_v5 = vld [vmem:[#allocation54_spill] sm:$0xff] }
 0x53a   : > { %vm5270_vm14 = vmand %vm5192_vm3, %vm5232_vm4  ;;  %v5383_v18 = vsel %vm5269_vm15, %v18468_v24, -inf  ;;  %v5416_v30 = vmax.f32 %v5412_v39, %v5382_v21  ;;  %vm5196_vm9 = vcmp.ge.s32.totalorder %v18469_v62, %v13946_v31  ;;  %vm5236_vm0 = vcmp.lt.s32.totalorder %v18469_v62, %v13948_v60  ;;  %v18479_v17 = vld [vmem:[#allocation95_spill] sm:$0xff]  ;;  %v18480_v19 = vld [vmem:[#allocation96_spill] sm:$0xff] }
 0x53b   : > { %vm5271_vm1 = vmand %vm5193_vm11, %vm5233_vm7  ;;  %v5384_v42 = vsel %vm5270_vm14, %v18470_v37, -inf  ;;  %v5417_v61 = vmax.f32 %v5413_v48, %v5383_v18  ;;  %vm5197_vm2 = vcmp.ge.s32.totalorder %v18471_v40, %v13946_v31  ;;  %vm5237_vm3 = vcmp.lt.s32.totalorder %v18471_v40, %v13948_v60  ;;  %v5438_v48 = vld [vmem:[%s8003_s15 + $0xb] sm:$0x1] }
 0x53c   : > { %vm5272_vm4 = vmand %vm5194_vm10, %vm5234_vm6  ;;  %v5385_v14 = vsel %vm5271_vm1, %v18472_v53, -inf  ;;  %v5418_v22 = vmax.f32 %v5414_v9, %v5384_v42  ;;  %vm5198_vm5 = vcmp.ge.s32.totalorder %v18473_v26, %v13946_v31  ;;  %vm5238_vm11 = vcmp.lt.s32.totalorder %v18473_v26, %v13948_v60 }
 0x53d   : > { %vm5273_vm7 = vmand %vm5195_vm12, %vm5235_vm13  ;;  %v5386_v49 = vsel %vm5272_vm4, %v18474_v4, -inf  ;;  %v5419_v35 = vmax.f32 %v5415_v7, %v5385_v14  ;;  %vm5199_vm8 = vcmp.ge.s32.totalorder %v18475_v0, %v13946_v31  ;;  %vm5239_vm10 = vcmp.lt.s32.totalorder %v18475_v0, %v13948_v60 }
 0x53e   : > { %vm5274_vm6 = vmand %vm5196_vm9, %vm5236_vm0  ;;  %v5387_v50 = vsel %vm5273_vm7, %v18476_v51, -inf  ;;  %v5420_v32 = vmax.f32 %v5416_v30, %v5386_v49  ;;  %vm5200_vm15 = vcmp.ge.s32.totalorder %v18477_v34, %v13946_v31  ;;  %vm5240_vm12 = vcmp.lt.s32.totalorder %v18477_v34, %v13948_v60 }
 0x53f   : > { %vm5275_vm13 = vmand %vm5197_vm2, %vm5237_vm3  ;;  %v5388_v54 = vsel %vm5274_vm6, %v18478_v5, -inf  ;;  %v5421_v38 = vmax.f32 %v5417_v61, %v5387_v50  ;;  %vm5201_vm14 = vcmp.ge.s32.totalorder %v18479_v17, %v13946_v31  ;;  %vm5241_vm9 = vcmp.lt.s32.totalorder %v18479_v17, %v13948_v60 }
 0x540   : > { %vm5276_vm0 = vmand %vm5198_vm5, %vm5238_vm11  ;;  %v5389_v2 = vsel %vm5275_vm13, %v8583_v46, -inf  ;;  %v5422_v56 = vmax.f32 %v5418_v22, %v5388_v54  ;;  %vm5202_vm1 = vcmp.ge.s32.totalorder %v18480_v19, %v13946_v31  ;;  %vm5242_vm2 = vcmp.lt.s32.totalorder %v18480_v19, %v13948_v60 }
 0x541   : > { %vm5277_vm3 = vmand %vm5199_vm8, %vm5239_vm10  ;;  %v5390_v28 = vsel %vm5276_vm0, %v8586_v59, -inf  ;;  %v5423_v13 = vmax.f32 %v5419_v35, %v5389_v2 }
 0x542   : > { %vm5278_vm4 = vmand %vm5200_vm15, %vm5240_vm12  ;;  %v5391_v47 = vsel %vm5277_vm3, %v8591_v25, -inf  ;;  %v5424_v45 = vmax.f32 %v5420_v32, %v5390_v28 }
 0x543   : > { %vm5279_vm5 = vmand %vm5201_vm14, %vm5241_vm9  ;;  %v5392_v16 = vsel %vm5278_vm4, %v8594_v29, -inf  ;;  %v5425_v41 = vmax.f32 %v5421_v38, %v5391_v47 }
 0x544   : > { %vm5280_vm11 = vmand %vm5202_vm1, %vm5242_vm2  ;;  %v5393_v60 = vsel %vm5279_vm5, %v8604_v15, -inf  ;;  %v5426_v43 = vmax.f32 %v5422_v56, %v5392_v16 }
 0x545   : > { %v5394_v23 = vsel %vm5280_vm11, %v8609_v58, -inf  ;;  %v5427_v1 = vmax.f32 %v5423_v13, %v5393_v60 }
 0x546   : > { %v5428_v12 = vmax.f32 %v5424_v45, %v5394_v23  ;;  %v5430_v44 = vmax.f32 %v5425_v41, %v5426_v43 }
 0x548   : > { %v5429_v31 = vmax.f32 %v5427_v1, %v5428_v12 }
 0x54a   : > { %v5431_v63 = vmax.f32 %v5429_v31, %v5430_v44 }
 0x54c   : > { %v5432_v6 = vrot.slane %v5431_v63, 4 }
 0x54e   : > { %v5433_v39 = vmax.f32 %v5431_v63, %v5432_v6 }
 0x550   : > { %v5434_v3 = vrot.slane %v5433_v39, 2 }
 0x552   : > { %v5435_v52 = vmax.f32 %v5433_v39, %v5434_v3 }
 0x554   : > { %v5436_v36 = vrot.slane %v5435_v52, 1 }
 0x556   : > { %v5437_v20 = vmax.f32 %v5435_v52, %v5436_v36 }
 0x558   : > { %v5439_v11 = vmax.f32 %v5438_v48, %v5437_v20 }
 0x55a   : > { %5440 = vst [vmem:[%s8003_s15 + $0xb] sm:$0x1] %v5439_v11 }
 0x55b PF: > { %s6846_s17 = sld [smem:[#allocation5 + $0xc]]  ;;  %s6847_s14 = sld [smem:[#allocation5 + $0xd]] }
 0x561   : > { %p5444_p11 = scmp.gt.s32.totalorder %s6846_s17, %s8822_s23  ;;  %p5446_p0 = scmp.lt.s32.totalorder %s6847_s14, %s8829_s21 }
 0x563   : > { %s5445_s20 = scalar_select %p5444_p11, %s6846_s17, %s8822_s23 }
 0x564   : > { %s5447_s29 = scalar_select %p5446_p0, %s6847_s14, %s8829_s21 }
 0x566   : > { %p6848_p13 = scmp.ge.s32.totalorder %s5445_s20, %s5447_s29 }
 0x567   : > { %s5452_s30 = ssub.s32 (!%p6848_p13), %s6846_s17, %s8822_s23  ;;  %s5492_s12 = ssub.s32 (!%p6848_p13), %s6847_s14, %s8822_s23  ;;  %v18481_v10 = vld [vmem:[#allocation61_spill] sm:$0xff] (!%p6848_p13)  ;;  %v18482_v57 = vld [vmem:[#allocation62_spill] sm:$0xff] (!%p6848_p13)  ;;  %v18485_v7 = vld [vmem:[#allocation63_spill] sm:$0xff] (!%p6848_p13)  ;;  %v18509_v51 = vmov (!%p6848_p13), 0 }
 0x568   : > { %5451 = sbr.rel (%p6848_p13) target bundleno = 1447 (0x5a7), region = 92  ;;  %v14409_v55 = vstv (!%p6848_p13), %s5452_s30  ;;  %v14411_v9 = vstv (!%p6848_p13), %s5492_s12  ;;  %v18488_v24 = vld [vmem:[#allocation64_spill] sm:$0xff] (!%p6848_p13)  ;;  %v18491_v30 = vld [vmem:[#allocation65_spill] sm:$0xff] (!%p6848_p13)  ;;  %v18492_v62 = vld [vmem:[#allocation66_spill] sm:$0xff] (!%p6848_p13) }
 0x569   : > { %vm5454_vm7 = vcmp.ge.s32.totalorder (!%p6848_p13), %v8307_v27, %v14409_v55  ;;  %vm5455_vm8 = vcmp.ge.s32.totalorder (!%p6848_p13), %v8329_v8, %v14409_v55  ;;  %vm5456_vm10 = vcmp.ge.s32.totalorder (!%p6848_p13), %v18481_v10, %v14409_v55  ;;  %vm5494_vm6 = vcmp.lt.s32.totalorder (!%p6848_p13), %v8307_v27, %v14411_v9  ;;  %v18495_v42 = vld [vmem:[#allocation67_spill] sm:$0xff] (!%p6848_p13)  ;;  %v18496_v61 = vld [vmem:[#allocation68_spill] sm:$0xff] (!%p6848_p13)  ;;  %v18497_v40 = vld [vmem:[#allocation69_spill] sm:$0xff] (!%p6848_p13) }
 0x56a   : > { %vm5495_vm15 = vcmp.lt.s32.totalorder (!%p6848_p13), %v8329_v8, %v14411_v9  ;;  %vm5457_vm12 = vcmp.ge.s32.totalorder (!%p6848_p13), %v18482_v57, %v14409_v55  ;;  %vm5496_vm13 = vcmp.lt.s32.totalorder (!%p6848_p13), %v18481_v10, %v14411_v9  ;;  %vm5497_vm14 = vcmp.lt.s32.totalorder (!%p6848_p13), %v18482_v57, %v14411_v9  ;;  %vm14429_vm9 = vmand (!%p6848_p13), %vm5454_vm7, %vm5494_vm6  ;;  %v18500_v14 = vld [vmem:[#allocation70_spill] sm:$0xff] (!%p6848_p13)  ;;  %v18501_v22 = vld [vmem:[#allocation71_spill] sm:$0xff] (!%p6848_p13) }
 0x56b   : > { %vm5458_vm0 = vcmp.ge.s32.totalorder (!%p6848_p13), %v18485_v7, %v14409_v55  ;;  %vm5498_vm1 = vcmp.lt.s32.totalorder (!%p6848_p13), %v18485_v7, %v14411_v9  ;;  %vm14437_vm2 = vmand (!%p6848_p13), %vm5455_vm8, %vm5495_vm15  ;;  %vm5459_vm3 = vcmp.ge.s32.totalorder (!%p6848_p13), %v18488_v24, %v14409_v55  ;;  %vm5499_vm4 = vcmp.lt.s32.totalorder (!%p6848_p13), %v18488_v24, %v14411_v9  ;;  %v18502_v26 = vld [vmem:[#allocation72_spill] sm:$0xff] (!%p6848_p13)  ;;  %v18505_v49 = vld [vmem:[#allocation73_spill] sm:$0xff] (!%p6848_p13) }
 0x56c   : > { %vm14445_vm5 = vmand (!%p6848_p13), %vm5456_vm10, %vm5496_vm13  ;;  %vm5500_vm8 = vcmp.lt.s32.totalorder (!%p6848_p13), %v18491_v30, %v14411_v9  ;;  %vm5501_vm11 = vcmp.lt.s32.totalorder (!%p6848_p13), %v18492_v62, %v14411_v9  ;;  %v18506_v35 = vld [vmem:[#allocation74_spill] sm:$0xff] (!%p6848_p13)  ;;  %v18507_v0 = vld [vmem:[#allocation75_spill] sm:$0xff] (!%p6848_p13)  ;;  %vm5504_vm15 = vcmp.lt.s32.totalorder (!%p6848_p13), %v18497_v40, %v14411_v9  ;;  %vm5508_vm10 = vcmp.lt.s32.totalorder (!%p6848_p13), %v18505_v49, %v14411_v9 }
 0x56d   : > { %vm14455_vm6 = vmand (!%p6848_p13), %vm5457_vm12, %vm5497_vm14  ;;  %vm5503_vm12 = vcmp.lt.s32.totalorder (!%p6848_p13), %v18496_v61, %v14411_v9  ;;  %v18511_v50 = vld [vmem:[#allocation76_spill] sm:$0xff] (!%p6848_p13)  ;;  %v18512_v32 = vld [vmem:[#allocation77_spill] sm:$0xff] (!%p6848_p13)  ;;  %vm5509_vm13 = vcmp.lt.s32.totalorder (!%p6848_p13), %v18506_v35, %v14411_v9 }
 0x56e   : > { %vm14467_vm7 = vmand (!%p6848_p13), %vm5458_vm0, %vm5498_vm1  ;;  %vm18520_vm1 = vcmp.ge.s32.totalorder (!%p6848_p13), %v18496_v61, %v14409_v55  ;;  %v18523_v38 = vld [vmem:[#allocation20_spill] sm:$0xff] (!%p6848_p13)  ;;  %v18524_v2 = vld [vmem:[#allocation21_spill] sm:$0xff] (!%p6848_p13) }
 0x56f   : > { %vm14485_vm0 = vmand %vm5459_vm3, %vm5499_vm4  ;;  %vm18508_vm3 = vcmp.ge.s32.totalorder %v18491_v30, %v14409_v55  ;;  %v5646_v17 = vsel %vm14429_vm9, %v18523_v38, -inf  ;;  %v5647_v56 = vsel %vm14437_vm2, %v18524_v2, -inf  ;;  %v18525_v19 = vld [vmem:[#allocation24_spill] sm:$0xff]  ;;  %v18526_v13 = vld [vmem:[#allocation25_spill] sm:$0xff]  ;;  %vm18535_vm2 = vcmp.lt.s32.totalorder %v18500_v14, %v14411_v9 }
 0x570   : > { %vm14503_vm4 = vmand %vm18508_vm3, %vm5500_vm8  ;;  %vm18513_vm8 = vcmp.ge.s32.totalorder %v18492_v62, %v14409_v55  ;;  %v5648_v28 = vsel %vm14445_vm5, %v18525_v19, -inf  ;;  %v5649_v47 = vsel %vm14455_vm6, %v18526_v13, -inf  ;;  %v18530_v16 = vld [vmem:[#allocation28_spill] sm:$0xff]  ;;  %v18531_v60 = vld [vmem:[#allocation29_spill] sm:$0xff]  ;;  %vm18536_vm5 = vcmp.ge.s32.totalorder %v18500_v14, %v14409_v55 }
 0x571   : > { %v18510_v51 = vsel %vm14503_vm4, 4294967295, %v18509_v51  ;;  %vm14521_vm3 = vmand %vm18513_vm8, %vm5501_vm11  ;;  %vm18516_vm4 = vcmp.lt.s32.totalorder %v18495_v42, %v14411_v9  ;;  %vm18517_vm11 = vcmp.ge.s32.totalorder %v18495_v42, %v14409_v55  ;;  %v5650_v41 = vsel %vm14467_vm7, %v18530_v16, -inf  ;;  %v18532_v23 = vld [vmem:[#allocation32_spill] sm:$0xff]  ;;  %v18534_v12 = vld [vmem:[#allocation33_spill] sm:$0xff] }
 0x572   : > { %vm14539_vm8 = vmand %vm18517_vm11, %vm18516_vm4  ;;  %v5651_v43 = vsel %vm14485_vm0, %v18531_v60, -inf  ;;  %vm18533_vm9 = vnez %v18510_v51  ;;  %v5653_v44 = vsel %vm14521_vm3, %v18534_v12, -inf  ;;  %v18539_v63 = vld [vmem:[#allocation37_spill] sm:$0xff]  ;;  %v18540_v39 = vld [vmem:[#allocation38_spill] sm:$0xff]  ;;  %v5684_v48 = vmax.f32 %v5646_v17, %v5650_v41 }
 0x573   : > { %vm14546_vm14 = vmand %vm18520_vm1, %vm5503_vm12  ;;  %vm18527_vm12 = vcmp.ge.s32.totalorder %v18497_v40, %v14409_v55  ;;  %v5652_v1 = vsel %vm18533_vm9, %v18532_v23, -inf  ;;  %v5654_v6 = vsel %vm14539_vm8, %v18539_v63, -inf  ;;  %v18541_v52 = vld [vmem:[#allocation43_spill] sm:$0xff]  ;;  %vm18542_vm7 = vcmp.lt.s32.totalorder %v18501_v22, %v14411_v9  ;;  %v18546_v11 = vld [vmem:[#allocation44_spill] sm:$0xff] }
 0x574   : > { %vm14565_vm1 = vmand %vm18527_vm12, %vm5504_vm15  ;;  %v5655_v3 = vsel %vm14546_vm14, %v18540_v39, -inf  ;;  %vm18543_vm15 = vcmp.ge.s32.totalorder %v18501_v22, %v14409_v55  ;;  %v5685_v57 = vmax.f32 %v5647_v56, %v5651_v43  ;;  %v5686_v21 = vmax.f32 %v5648_v28, %v5652_v1  ;;  %v18551_v24 = vld [vmem:[#allocation49_spill] sm:$0xff]  ;;  %v18553_v62 = vld [vmem:[#allocation50_spill] sm:$0xff] }
 0x575   : > { %vm14587_vm6 = vmand %vm18536_vm5, %vm18535_vm2  ;;  %v5656_v36 = vsel %vm14565_vm1, %v18541_v52, -inf  ;;  %v5687_v7 = vmax.f32 %v5649_v47, %v5653_v44  ;;  %vm5510_vm14 = vcmp.lt.s32.totalorder %v18507_v0, %v14411_v9  ;;  %vm5511_vm4 = vcmp.lt.s32.totalorder %v18511_v50, %v14411_v9  ;;  %v18554_v53 = vld [vmem:[#allocation78_spill] sm:$0xff]  ;;  %v18556_v14 = vld [vmem:[#allocation55_spill] sm:$0xff] }
 0x576   : > { %vm14606_vm0 = vmand %vm18543_vm15, %vm18542_vm7  ;;  %v5657_v10 = vsel %vm14587_vm6, %v18546_v11, -inf  ;;  %vm18547_vm3 = vcmp.lt.s32.totalorder %v18502_v26, %v14411_v9  ;;  %vm18548_vm11 = vcmp.ge.s32.totalorder %v18502_v26, %v14409_v55  ;;  %v5688_v30 = vmax.f32 %v5684_v48, %v5654_v6  ;;  %v18558_v4 = vld [vmem:[#allocation56_spill] sm:$0xff]  ;;  %v18561_v5 = vld [vmem:[#allocation18_spill] sm:$0xff] }
 0x577   : > { %vm14623_vm8 = vmand %vm18548_vm11, %vm18547_vm3  ;;  %v5658_v18 = vsel %vm14606_vm0, %v18551_v24, -inf  ;;  %vm18552_vm12 = vcmp.ge.s32.totalorder %v18505_v49, %v14409_v55  ;;  %v5689_v42 = vmax.f32 %v5685_v57, %v5655_v3  ;;  %v5690_v61 = vmax.f32 %v5686_v21, %v5656_v36  ;;  %v18562_v38 = vld [vmem:[#allocation80_spill] sm:$0xff]  ;;  %v18564_v17 = vld [vmem:[#allocation19_spill] sm:$0xff] }
 0x578   : > { %vm5546_vm1 = vmand %vm18552_vm12, %vm5508_vm10  ;;  %v5659_v37 = vsel %vm14623_vm8, %v18553_v62, -inf  ;;  %v5691_v40 = vmax.f32 %v5687_v7, %v5657_v10  ;;  %vm5473_vm9 = vcmp.ge.s32.totalorder %v18554_v53, %v14409_v55  ;;  %vm5512_vm2 = vcmp.lt.s32.totalorder %v18512_v32, %v14411_v9  ;;  %v18565_v56 = vld [vmem:[#allocation81_spill] sm:$0xff]  ;;  %v18566_v19 = vld [vmem:[#allocation22_spill] sm:$0xff] }
 0x579   : > { %vm18555_vm5 = vcmp.ge.s32.totalorder %v18506_v35, %v14409_v55  ;;  %v5660_v22 = vsel %vm5546_vm1, %v18556_v14, -inf  ;;  %v5692_v26 = vmax.f32 %v5688_v30, %v5658_v18  ;;  %vm5513_vm6 = vcmp.lt.s32.totalorder %v18554_v53, %v14411_v9  ;;  %v18559_v35 = vld [vmem:[#allocation79_spill] sm:$0xff]  ;;  %v18567_v13 = vld [vmem:[#allocation82_spill] sm:$0xff]  ;;  %v18571_v1 = vld [vmem:[#allocation84_spill] sm:$0xff] }
 0x57a   : > { %vm5547_vm10 = vmand %vm18555_vm5, %vm5509_vm13  ;;  %vm18557_vm7 = vcmp.ge.s32.totalorder %v18507_v0, %v14409_v55  ;;  %v5693_v51 = vmax.f32 %v5689_v42, %v5659_v37  ;;  %v5694_v34 = vmax.f32 %v5690_v61, %v5660_v22  ;;  %vm5474_vm13 = vcmp.ge.s32.totalorder %v18559_v35, %v14409_v55  ;;  %v18568_v47 = vld [vmem:[#allocation23_spill] sm:$0xff]  ;;  %v18570_v60 = vld [vmem:[#allocation26_spill] sm:$0xff] }
 0x57b   : > { %vm5548_vm15 = vmand %vm18557_vm7, %vm5510_vm14  ;;  %v5661_v49 = vsel %vm5547_vm10, %v18558_v4, -inf  ;;  %vm5514_vm0 = vcmp.lt.s32.totalorder %v18559_v35, %v14411_v9  ;;  %vm18560_vm3 = vcmp.ge.s32.totalorder %v18511_v50, %v14409_v55  ;;  %vm5475_vm14 = vcmp.ge.s32.totalorder %v18562_v38, %v14409_v55  ;;  %v18569_v41 = vld [vmem:[#allocation83_spill] sm:$0xff]  ;;  %v18573_v63 = vld [vmem:[#allocation85_spill] sm:$0xff] }
 0x57c   : > { %vm5549_vm11 = vmand %vm18560_vm3, %vm5511_vm4  ;;  %v5662_v0 = vsel %vm5548_vm15, %v18561_v5, -inf  ;;  %v5695_v54 = vmax.f32 %v5691_v40, %v5661_v49  ;;  %vm5515_vm8 = vcmp.lt.s32.totalorder %v18562_v38, %v14411_v9  ;;  %vm18563_vm12 = vcmp.ge.s32.totalorder %v18512_v32, %v14409_v55  ;;  %v18572_v12 = vld [vmem:[#allocation27_spill] sm:$0xff]  ;;  %v18574_v6 = vld [vmem:[#allocation30_spill] sm:$0xff] }
 0x57d   : > { %vm5550_vm1 = vmand %vm18563_vm12, %vm5512_vm2  ;;  %v5663_v2 = vsel %vm5549_vm11, %v18564_v17, -inf  ;;  %v5696_v50 = vmax.f32 %v5692_v26, %v5662_v0  ;;  %vm5476_vm4 = vcmp.ge.s32.totalorder %v18565_v56, %v14409_v55  ;;  %vm5516_vm5 = vcmp.lt.s32.totalorder %v18565_v56, %v14411_v9  ;;  %v18575_v52 = vld [vmem:[#allocation86_spill] sm:$0xff]  ;;  %v18576_v36 = vld [vmem:[#allocation31_spill] sm:$0xff] }
 0x57e   : > { %vm5551_vm10 = vmand %vm5473_vm9, %vm5513_vm6  ;;  %v5664_v28 = vsel %vm5550_vm1, %v18566_v19, -inf  ;;  %v5697_v32 = vmax.f32 %v5693_v51, %v5663_v2  ;;  %vm5477_vm2 = vcmp.ge.s32.totalorder %v18567_v13, %v14409_v55  ;;  %vm5517_vm7 = vcmp.lt.s32.totalorder %v18567_v13, %v14411_v9  ;;  %v18577_v11 = vld [vmem:[#allocation87_spill] sm:$0xff]  ;;  %v18578_v10 = vld [vmem:[#allocation34_spill] sm:$0xff] }
 0x57f   : > { %vm5552_vm15 = vmand %vm5474_vm13, %vm5514_vm0  ;;  %v5665_v45 = vsel %vm5551_vm10, %v18568_v47, -inf  ;;  %v5698_v16 = vmax.f32 %v5694_v34, %v5664_v28  ;;  %vm5478_vm9 = vcmp.ge.s32.totalorder %v18569_v41, %v14409_v55  ;;  %vm5518_vm6 = vcmp.lt.s32.totalorder %v18569_v41, %v14411_v9  ;;  %v18579_v7 = vld [vmem:[#allocation88_spill] sm:$0xff]  ;;  %v18581_v30 = vld [vmem:[#allocation89_spill] sm:$0xff] }
 0x580   : > { %vm5553_vm3 = vmand %vm5475_vm14, %vm5515_vm8  ;;  %v5666_v43 = vsel %vm5552_vm15, %v18570_v60, -inf  ;;  %v5699_v23 = vmax.f32 %v5695_v54, %v5665_v45  ;;  %vm5479_vm13 = vcmp.ge.s32.totalorder %v18571_v1, %v14409_v55  ;;  %vm5519_vm0 = vcmp.lt.s32.totalorder %v18571_v1, %v14411_v9  ;;  %v18580_v33 = vld [vmem:[#allocation36_spill] sm:$0xff]  ;;  %v18583_v61 = vld [vmem:[#allocation90_spill] sm:$0xff] }
 0x581   : > { %vm5554_vm11 = vmand %vm5476_vm4, %vm5516_vm5  ;;  %v5667_v44 = vsel %vm5553_vm3, %v18572_v12, -inf  ;;  %v5700_v31 = vmax.f32 %v5696_v50, %v5666_v43  ;;  %vm5480_vm14 = vcmp.ge.s32.totalorder %v18573_v63, %v14409_v55  ;;  %vm5520_vm8 = vcmp.lt.s32.totalorder %v18573_v63, %v14411_v9  ;;  %v18582_v62 = vld [vmem:[#allocation40_spill] sm:$0xff]  ;;  %v18584_v40 = vld [vmem:[#allocation42_spill] sm:$0xff] }
 0x582   : > { %vm5555_vm12 = vmand %vm5477_vm2, %vm5517_vm7  ;;  %v5668_v39 = vsel %vm5554_vm11, %v18574_v6, -inf  ;;  %v5701_v3 = vmax.f32 %v5697_v32, %v5667_v44  ;;  %vm5481_vm1 = vcmp.ge.s32.totalorder %v18575_v52, %v14409_v55  ;;  %vm5521_vm4 = vcmp.lt.s32.totalorder %v18575_v52, %v14411_v9  ;;  %v18585_v22 = vld [vmem:[#allocation91_spill] sm:$0xff]  ;;  %v18586_v26 = vld [vmem:[#allocation46_spill] sm:$0xff] }
 0x583   : > { %vm5556_vm5 = vmand %vm5478_vm9, %vm5518_vm6  ;;  %v5669_v48 = vsel %vm5555_vm12, %v18576_v36, -inf  ;;  %v5702_v20 = vmax.f32 %v5698_v16, %v5668_v39  ;;  %vm5482_vm10 = vcmp.ge.s32.totalorder %v18577_v11, %v14409_v55  ;;  %vm5522_vm2 = vcmp.lt.s32.totalorder %v18577_v11, %v14411_v9  ;;  %v18587_v51 = vld [vmem:[#allocation92_spill] sm:$0xff]  ;;  %v18589_v0 = vld [vmem:[#allocation93_spill] sm:$0xff] }
 0x584   : > { %vm5557_vm7 = vmand %vm5479_vm13, %vm5519_vm0  ;;  %v5670_v57 = vsel %vm5556_vm5, %v18578_v10, -inf  ;;  %v5703_v21 = vmax.f32 %v5699_v23, %v5669_v48  ;;  %vm5483_vm15 = vcmp.ge.s32.totalorder %v18579_v7, %v14409_v55  ;;  %vm5523_vm9 = vcmp.lt.s32.totalorder %v18579_v7, %v14411_v9  ;;  %v18588_v34 = vld [vmem:[#allocation48_spill] sm:$0xff]  ;;  %v18591_v2 = vld [vmem:[#allocation94_spill] sm:$0xff] }
 0x585   : > { %vm5558_vm6 = vmand %vm5480_vm14, %vm5520_vm8  ;;  %v5671_v24 = vsel %vm5557_vm7, %v18580_v33, -inf  ;;  %v5704_v18 = vmax.f32 %v5700_v31, %v5670_v57  ;;  %vm5484_vm3 = vcmp.ge.s32.totalorder %v18581_v30, %v14409_v55  ;;  %vm5524_vm13 = vcmp.lt.s32.totalorder %v18581_v30, %v14411_v9  ;;  %v18590_v54 = vld [vmem:[#allocation52_spill] sm:$0xff]  ;;  %v18592_v50 = vld [vmem:[#allocation54_spill] sm:$0xff] }
 0x586   : > { %vm5559_vm0 = vmand %vm5481_vm1, %vm5521_vm4  ;;  %v5672_v37 = vsel %vm5558_vm6, %v18582_v62, -inf  ;;  %v5705_v42 = vmax.f32 %v5701_v3, %v5671_v24  ;;  %vm5485_vm11 = vcmp.ge.s32.totalorder %v18583_v61, %v14409_v55  ;;  %vm5525_vm14 = vcmp.lt.s32.totalorder %v18583_v61, %v14411_v9  ;;  %v18593_v28 = vld [vmem:[#allocation95_spill] sm:$0xff]  ;;  %v18594_v47 = vld [vmem:[#allocation96_spill] sm:$0xff] }
 0x587   : > { %vm5560_vm8 = vmand %vm5482_vm10, %vm5522_vm2  ;;  %v5673_v53 = vsel %vm5559_vm0, %v18584_v40, -inf  ;;  %v5706_v14 = vmax.f32 %v5702_v20, %v5672_v37  ;;  %vm5486_vm12 = vcmp.ge.s32.totalorder %v18585_v22, %v14409_v55  ;;  %vm5526_vm1 = vcmp.lt.s32.totalorder %v18585_v22, %v14411_v9  ;;  %v5727_v20 = vld [vmem:[%s8003_s15 + $0xc] sm:$0x1] }
 0x588   : > { %vm5561_vm4 = vmand %vm5483_vm15, %vm5523_vm9  ;;  %v5674_v4 = vsel %vm5560_vm8, %v18586_v26, -inf  ;;  %v5707_v49 = vmax.f32 %v5703_v21, %v5673_v53  ;;  %vm5487_vm5 = vcmp.ge.s32.totalorder %v18587_v51, %v14409_v55  ;;  %vm5527_vm10 = vcmp.lt.s32.totalorder %v18587_v51, %v14411_v9 }
 0x589   : > { %vm5562_vm2 = vmand %vm5484_vm3, %vm5524_vm13  ;;  %v5675_v35 = vsel %vm5561_vm4, %v18588_v34, -inf  ;;  %v5708_v5 = vmax.f32 %v5704_v18, %v5674_v4  ;;  %vm5488_vm7 = vcmp.ge.s32.totalorder %v18589_v0, %v14409_v55  ;;  %vm5528_vm15 = vcmp.lt.s32.totalorder %v18589_v0, %v14411_v9 }
 0x58a   : > { %vm5563_vm9 = vmand %vm5485_vm11, %vm5525_vm14  ;;  %v5676_v38 = vsel %vm5562_vm2, %v18590_v54, -inf  ;;  %v5709_v17 = vmax.f32 %v5705_v42, %v5675_v35  ;;  %vm5489_vm6 = vcmp.ge.s32.totalorder %v18591_v2, %v14409_v55  ;;  %vm5529_vm3 = vcmp.lt.s32.totalorder %v18591_v2, %v14411_v9 }
 0x58b   : > { %vm5564_vm13 = vmand %vm5486_vm12, %vm5526_vm1  ;;  %v5677_v56 = vsel %vm5563_vm9, %v18592_v50, -inf  ;;  %v5710_v19 = vmax.f32 %v5706_v14, %v5676_v38  ;;  %vm5490_vm0 = vcmp.ge.s32.totalorder %v18593_v28, %v14409_v55  ;;  %vm5530_vm11 = vcmp.lt.s32.totalorder %v18593_v28, %v14411_v9 }
 0x58c   : > { %vm5565_vm14 = vmand %vm5487_vm5, %vm5527_vm10  ;;  %v5678_v32 = vsel %vm5564_vm13, %v8583_v46, -inf  ;;  %v5711_v13 = vmax.f32 %v5707_v49, %v5677_v56  ;;  %vm5491_vm8 = vcmp.ge.s32.totalorder %v18594_v47, %v14409_v55  ;;  %vm5531_vm12 = vcmp.lt.s32.totalorder %v18594_v47, %v14411_v9 }
 0x58d   : > { %vm5566_vm1 = vmand %vm5488_vm7, %vm5528_vm15  ;;  %v5679_v45 = vsel %vm5565_vm14, %v8586_v59, -inf  ;;  %v5712_v16 = vmax.f32 %v5708_v5, %v5678_v32 }
 0x58e   : > { %vm5567_vm4 = vmand %vm5489_vm6, %vm5529_vm3  ;;  %v5680_v41 = vsel %vm5566_vm1, %v8591_v25, -inf  ;;  %v5713_v60 = vmax.f32 %v5709_v17, %v5679_v45 }
 0x58f   : > { %vm5568_vm5 = vmand %vm5490_vm0, %vm5530_vm11  ;;  %v5681_v43 = vsel %vm5567_vm4, %v8594_v29, -inf  ;;  %v5714_v23 = vmax.f32 %v5710_v19, %v5680_v41 }
 0x590   : > { %vm5569_vm10 = vmand %vm5491_vm8, %vm5531_vm12  ;;  %v5682_v9 = vsel %vm5568_vm5, %v8604_v15, -inf  ;;  %v5715_v1 = vmax.f32 %v5711_v13, %v5681_v43 }
 0x591   : > { %v5683_v12 = vsel %vm5569_vm10, %v8609_v58, -inf  ;;  %v5716_v44 = vmax.f32 %v5712_v16, %v5682_v9 }
 0x592   : > { %v5717_v31 = vmax.f32 %v5713_v60, %v5683_v12  ;;  %v5719_v63 = vmax.f32 %v5714_v23, %v5715_v1 }
 0x594   : > { %v5718_v55 = vmax.f32 %v5716_v44, %v5717_v31 }
 0x596   : > { %v5720_v6 = vmax.f32 %v5718_v55, %v5719_v63 }
 0x598   : > { %v5721_v39 = vrot.slane %v5720_v6, 4 }
 0x59a   : > { %v5722_v3 = vmax.f32 %v5720_v6, %v5721_v39 }
 0x59c   : > { %v5723_v52 = vrot.slane %v5722_v3, 2 }
 0x59e   : > { %v5724_v36 = vmax.f32 %v5722_v3, %v5723_v52 }
 0x5a0   : > { %v5725_v48 = vrot.slane %v5724_v36, 1 }
 0x5a2   : > { %v5726_v11 = vmax.f32 %v5724_v36, %v5725_v48 }
 0x5a4   : > { %v5728_v10 = vmax.f32 %v5727_v20, %v5726_v11 }
 0x5a6   : > { %5729 = vst [vmem:[%s8003_s15 + $0xc] sm:$0x1] %v5728_v10 }
 0x5a7 PF: > { %s6849_s24 = sld [smem:[#allocation5 + $0xd]]  ;;  %s6850_s18 = sld [smem:[#allocation5 + $0xe]] }
 0x5ad   : > { %p5733_p4 = scmp.gt.s32.totalorder %s6849_s24, %s8822_s23  ;;  %p5735_p7 = scmp.lt.s32.totalorder %s6850_s18, %s8829_s21 }
 0x5af   : > { %s5734_s22 = scalar_select %p5733_p4, %s6849_s24, %s8822_s23 }
 0x5b0   : > { %s5736_s25 = scalar_select %p5735_p7, %s6850_s18, %s8829_s21 }
 0x5b2   : > { %p6851_p9 = scmp.ge.s32.totalorder %s5734_s22, %s5736_s25 }
 0x5b3   : > { %s5741_s19 = ssub.s32 (!%p6851_p9), %s6849_s24, %s8822_s23  ;;  %s5781_s17 = ssub.s32 (!%p6851_p9), %s6850_s18, %s8822_s23  ;;  %v18595_v7 = vld [vmem:[#allocation61_spill] sm:$0xff] (!%p6851_p9)  ;;  %v18596_v33 = vld [vmem:[#allocation62_spill] sm:$0xff] (!%p6851_p9)  ;;  %v18599_v18 = vld [vmem:[#allocation63_spill] sm:$0xff] (!%p6851_p9)  ;;  %v18623_v54 = vmov (!%p6851_p9), 0 }
 0x5b4   : > { %5740 = sbr.rel (%p6851_p9) target bundleno = 1523 (0x5f3), region = 96  ;;  %v14872_v57 = vstv (!%p6851_p9), %s5741_s19  ;;  %v14874_v21 = vstv (!%p6851_p9), %s5781_s17  ;;  %v18602_v62 = vld [vmem:[#allocation64_spill] sm:$0xff] (!%p6851_p9)  ;;  %v18605_v42 = vld [vmem:[#allocation65_spill] sm:$0xff] (!%p6851_p9)  ;;  %v18606_v61 = vld [vmem:[#allocation66_spill] sm:$0xff] (!%p6851_p9) }
 0x5b5   : > { %vm5743_vm2 = vcmp.ge.s32.totalorder (!%p6851_p9), %v8307_v27, %v14872_v57  ;;  %vm5744_vm7 = vcmp.ge.s32.totalorder (!%p6851_p9), %v8329_v8, %v14872_v57  ;;  %vm5745_vm15 = vcmp.ge.s32.totalorder (!%p6851_p9), %v18595_v7, %v14872_v57  ;;  %vm5783_vm9 = vcmp.lt.s32.totalorder (!%p6851_p9), %v8307_v27, %v14874_v21  ;;  %v18609_v53 = vld [vmem:[#allocation67_spill] sm:$0xff] (!%p6851_p9)  ;;  %v18610_v14 = vld [vmem:[#allocation68_spill] sm:$0xff] (!%p6851_p9)  ;;  %v18611_v22 = vld [vmem:[#allocation69_spill] sm:$0xff] (!%p6851_p9) }
 0x5b6   : > { %vm5784_vm6 = vcmp.lt.s32.totalorder (!%p6851_p9), %v8329_v8, %v14874_v21  ;;  %vm5746_vm3 = vcmp.ge.s32.totalorder (!%p6851_p9), %v18596_v33, %v14872_v57  ;;  %vm5785_vm13 = vcmp.lt.s32.totalorder (!%p6851_p9), %v18595_v7, %v14874_v21  ;;  %vm5786_vm0 = vcmp.lt.s32.totalorder (!%p6851_p9), %v18596_v33, %v14874_v21  ;;  %vm14892_vm11 = vmand (!%p6851_p9), %vm5743_vm2, %vm5783_vm9  ;;  %v18614_v4 = vld [vmem:[#allocation70_spill] sm:$0xff] (!%p6851_p9)  ;;  %v18615_v49 = vld [vmem:[#allocation71_spill] sm:$0xff] (!%p6851_p9) }
 0x5b7   : > { %vm5747_vm14 = vcmp.ge.s32.totalorder (!%p6851_p9), %v18599_v18, %v14872_v57  ;;  %vm5787_vm8 = vcmp.lt.s32.totalorder (!%p6851_p9), %v18599_v18, %v14874_v21  ;;  %vm14900_vm12 = vmand (!%p6851_p9), %vm5744_vm7, %vm5784_vm6  ;;  %vm5748_vm1 = vcmp.ge.s32.totalorder (!%p6851_p9), %v18602_v62, %v14872_v57  ;;  %vm5788_vm4 = vcmp.lt.s32.totalorder (!%p6851_p9), %v18602_v62, %v14874_v21  ;;  %v18616_v51 = vld [vmem:[#allocation72_spill] sm:$0xff] (!%p6851_p9)  ;;  %v18619_v35 = vld [vmem:[#allocation73_spill] sm:$0xff] (!%p6851_p9) }
 0x5b8   : > { %vm14908_vm5 = vmand (!%p6851_p9), %vm5745_vm15, %vm5785_vm13  ;;  %vm5789_vm7 = vcmp.lt.s32.totalorder (!%p6851_p9), %v18605_v42, %v14874_v21  ;;  %vm5790_vm10 = vcmp.lt.s32.totalorder (!%p6851_p9), %v18606_v61, %v14874_v21  ;;  %v18620_v5 = vld [vmem:[#allocation74_spill] sm:$0xff] (!%p6851_p9)  ;;  %v18621_v0 = vld [vmem:[#allocation75_spill] sm:$0xff] (!%p6851_p9)  ;;  %vm5793_vm6 = vcmp.lt.s32.totalorder (!%p6851_p9), %v18611_v22, %v14874_v21  ;;  %vm5797_vm15 = vcmp.lt.s32.totalorder (!%p6851_p9), %v18619_v35, %v14874_v21 }
 0x5b9   : > { %vm14918_vm9 = vmand (!%p6851_p9), %vm5746_vm3, %vm5786_vm0  ;;  %vm5792_vm3 = vcmp.lt.s32.totalorder (!%p6851_p9), %v18610_v14, %v14874_v21  ;;  %v18625_v38 = vld [vmem:[#allocation76_spill] sm:$0xff] (!%p6851_p9)  ;;  %v18626_v17 = vld [vmem:[#allocation77_spill] sm:$0xff] (!%p6851_p9)  ;;  %vm5798_vm13 = vcmp.lt.s32.totalorder (!%p6851_p9), %v18620_v5, %v14874_v21 }
 0x5ba   : > { %vm14930_vm2 = vmand (!%p6851_p9), %vm5747_vm14, %vm5787_vm8  ;;  %vm18634_vm8 = vcmp.ge.s32.totalorder (!%p6851_p9), %v18610_v14, %v14872_v57  ;;  %v18637_v19 = vld [vmem:[#allocation20_spill] sm:$0xff] (!%p6851_p9)  ;;  %v18638_v32 = vld [vmem:[#allocation21_spill] sm:$0xff] (!%p6851_p9) }
 0x5bb   : > { %vm14948_vm14 = vmand %vm5748_vm1, %vm5788_vm4  ;;  %vm18622_vm1 = vcmp.ge.s32.totalorder %v18605_v42, %v14872_v57  ;;  %v5935_v28 = vsel %vm14892_vm11, %v18637_v19, -inf  ;;  %v5936_v13 = vsel %vm14900_vm12, %v18638_v32, -inf  ;;  %v18639_v47 = vld [vmem:[#allocation24_spill] sm:$0xff]  ;;  %v18640_v16 = vld [vmem:[#allocation25_spill] sm:$0xff]  ;;  %vm18649_vm12 = vcmp.lt.s32.totalorder %v18614_v4, %v14874_v21 }
 0x5bc   : > { %vm14966_vm4 = vmand %vm18622_vm1, %vm5789_vm7  ;;  %vm18627_vm7 = vcmp.ge.s32.totalorder %v18606_v61, %v14872_v57  ;;  %v5937_v45 = vsel %vm14908_vm5, %v18639_v47, -inf  ;;  %v5938_v41 = vsel %vm14918_vm9, %v18640_v16, -inf  ;;  %v18644_v43 = vld [vmem:[#allocation28_spill] sm:$0xff]  ;;  %v18645_v9 = vld [vmem:[#allocation29_spill] sm:$0xff]  ;;  %vm18650_vm5 = vcmp.ge.s32.totalorder %v18614_v4, %v14872_v57 }
 0x5bd   : > { %v18624_v54 = vsel %vm14966_vm4, 4294967295, %v18623_v54  ;;  %vm14984_vm1 = vmand %vm18627_vm7, %vm5790_vm10  ;;  %vm18630_vm4 = vcmp.lt.s32.totalorder %v18609_v53, %v14874_v21  ;;  %vm18631_vm10 = vcmp.ge.s32.totalorder %v18609_v53, %v14872_v57  ;;  %v5939_v23 = vsel %vm14930_vm2, %v18644_v43, -inf  ;;  %v18646_v12 = vld [vmem:[#allocation32_spill] sm:$0xff]  ;;  %v18648_v31 = vld [vmem:[#allocation33_spill] sm:$0xff] }
 0x5be   : > { %vm15002_vm7 = vmand %vm18631_vm10, %vm18630_vm4  ;;  %v5940_v1 = vsel %vm14948_vm14, %v18645_v9, -inf  ;;  %vm18647_vm11 = vnez %v18624_v54  ;;  %v5942_v63 = vsel %vm14984_vm1, %v18648_v31, -inf  ;;  %v18653_v6 = vld [vmem:[#allocation37_spill] sm:$0xff]  ;;  %v18654_v3 = vld [vmem:[#allocation38_spill] sm:$0xff]  ;;  %v5973_v20 = vmax.f32 %v5935_v28, %v5939_v23 }
 0x5bf   : > { %vm15009_vm0 = vmand %vm18634_vm8, %vm5792_vm3  ;;  %vm18641_vm3 = vcmp.ge.s32.totalorder %v18611_v22, %v14872_v57  ;;  %v5941_v44 = vsel %vm18647_vm11, %v18646_v12, -inf  ;;  %v5943_v39 = vsel %vm15002_vm7, %v18653_v6, -inf  ;;  %v18655_v36 = vld [vmem:[#allocation43_spill] sm:$0xff]  ;;  %vm18656_vm2 = vcmp.lt.s32.totalorder %v18615_v49, %v14874_v21  ;;  %v18660_v10 = vld [vmem:[#allocation44_spill] sm:$0xff] }
 0x5c0   : > { %vm15028_vm8 = vmand %vm18641_vm3, %vm5793_vm6  ;;  %v5944_v52 = vsel %vm15009_vm0, %v18654_v3, -inf  ;;  %vm18657_vm6 = vcmp.ge.s32.totalorder %v18615_v49, %v14872_v57  ;;  %v5974_v33 = vmax.f32 %v5936_v13, %v5940_v1  ;;  %v5975_v24 = vmax.f32 %v5937_v45, %v5941_v44  ;;  %v18665_v62 = vld [vmem:[#allocation49_spill] sm:$0xff]  ;;  %v18667_v61 = vld [vmem:[#allocation50_spill] sm:$0xff] }
 0x5c1   : > { %vm15050_vm9 = vmand %vm18650_vm5, %vm18649_vm12  ;;  %v5945_v48 = vsel %vm15028_vm8, %v18655_v36, -inf  ;;  %v5976_v18 = vmax.f32 %v5938_v41, %v5942_v63  ;;  %vm5799_vm0 = vcmp.lt.s32.totalorder %v18621_v0, %v14874_v21  ;;  %vm5800_vm4 = vcmp.lt.s32.totalorder %v18625_v38, %v14874_v21  ;;  %v18668_v26 = vld [vmem:[#allocation78_spill] sm:$0xff]  ;;  %v18670_v4 = vld [vmem:[#allocation55_spill] sm:$0xff] }
 0x5c2   : > { %vm15069_vm14 = vmand %vm18657_vm6, %vm18656_vm2  ;;  %v5946_v7 = vsel %vm15050_vm9, %v18660_v10, -inf  ;;  %vm18661_vm1 = vcmp.lt.s32.totalorder %v18616_v51, %v14874_v21  ;;  %vm18662_vm10 = vcmp.ge.s32.totalorder %v18616_v51, %v14872_v57  ;;  %v5977_v42 = vmax.f32 %v5973_v20, %v5943_v39  ;;  %v18672_v34 = vld [vmem:[#allocation56_spill] sm:$0xff]  ;;  %v18675_v50 = vld [vmem:[#allocation18_spill] sm:$0xff] }
 0x5c3   : > { %vm15086_vm7 = vmand %vm18662_vm10, %vm18661_vm1  ;;  %v5947_v37 = vsel %vm15069_vm14, %v18665_v62, -inf  ;;  %vm18666_vm3 = vcmp.ge.s32.totalorder %v18619_v35, %v14872_v57  ;;  %v5978_v53 = vmax.f32 %v5974_v33, %v5944_v52  ;;  %v5979_v14 = vmax.f32 %v5975_v24, %v5945_v48  ;;  %v18676_v19 = vld [vmem:[#allocation80_spill] sm:$0xff]  ;;  %v18678_v28 = vld [vmem:[#allocation19_spill] sm:$0xff] }
 0x5c4   : > { %vm5835_vm8 = vmand %vm18666_vm3, %vm5797_vm15  ;;  %v5948_v40 = vsel %vm15086_vm7, %v18667_v61, -inf  ;;  %v5980_v22 = vmax.f32 %v5976_v18, %v5946_v7  ;;  %vm5762_vm11 = vcmp.ge.s32.totalorder %v18668_v26, %v14872_v57  ;;  %vm5801_vm12 = vcmp.lt.s32.totalorder %v18626_v17, %v14874_v21  ;;  %v18679_v13 = vld [vmem:[#allocation81_spill] sm:$0xff]  ;;  %v18680_v47 = vld [vmem:[#allocation22_spill] sm:$0xff] }
 0x5c5   : > { %vm18669_vm5 = vcmp.ge.s32.totalorder %v18620_v5, %v14872_v57  ;;  %v5949_v49 = vsel %vm5835_vm8, %v18670_v4, -inf  ;;  %v5981_v51 = vmax.f32 %v5977_v42, %v5947_v37  ;;  %vm5802_vm9 = vcmp.lt.s32.totalorder %v18668_v26, %v14874_v21  ;;  %v18673_v5 = vld [vmem:[#allocation79_spill] sm:$0xff]  ;;  %v18681_v16 = vld [vmem:[#allocation82_spill] sm:$0xff]  ;;  %v18685_v44 = vld [vmem:[#allocation84_spill] sm:$0xff] }
 0x5c6   : > { %vm5836_vm15 = vmand %vm18669_vm5, %vm5798_vm13  ;;  %vm18671_vm2 = vcmp.ge.s32.totalorder %v18621_v0, %v14872_v57  ;;  %v5982_v54 = vmax.f32 %v5978_v53, %v5948_v40  ;;  %v5983_v2 = vmax.f32 %v5979_v14, %v5949_v49  ;;  %vm5763_vm13 = vcmp.ge.s32.totalorder %v18673_v5, %v14872_v57  ;;  %v18682_v41 = vld [vmem:[#allocation23_spill] sm:$0xff]  ;;  %v18684_v9 = vld [vmem:[#allocation26_spill] sm:$0xff] }
 0x5c7   : > { %vm5837_vm6 = vmand %vm18671_vm2, %vm5799_vm0  ;;  %v5950_v35 = vsel %vm5836_vm15, %v18672_v34, -inf  ;;  %vm5803_vm14 = vcmp.lt.s32.totalorder %v18673_v5, %v14874_v21  ;;  %vm18674_vm1 = vcmp.ge.s32.totalorder %v18625_v38, %v14872_v57  ;;  %vm5764_vm0 = vcmp.ge.s32.totalorder %v18676_v19, %v14872_v57  ;;  %v18683_v23 = vld [vmem:[#allocation83_spill] sm:$0xff]  ;;  %v18687_v6 = vld [vmem:[#allocation85_spill] sm:$0xff] }
 0x5c8   : > { %vm5838_vm10 = vmand %vm18674_vm1, %vm5800_vm4  ;;  %v5951_v0 = vsel %vm5837_vm6, %v18675_v50, -inf  ;;  %v5984_v56 = vmax.f32 %v5980_v22, %v5950_v35  ;;  %vm5804_vm7 = vcmp.lt.s32.totalorder %v18676_v19, %v14874_v21  ;;  %vm18677_vm3 = vcmp.ge.s32.totalorder %v18626_v17, %v14872_v57  ;;  %v18686_v31 = vld [vmem:[#allocation27_spill] sm:$0xff]  ;;  %v18688_v39 = vld [vmem:[#allocation30_spill] sm:$0xff] }
 0x5c9   : > { %vm5839_vm8 = vmand %vm18677_vm3, %vm5801_vm12  ;;  %v5952_v32 = vsel %vm5838_vm10, %v18678_v28, -inf  ;;  %v5985_v38 = vmax.f32 %v5981_v51, %v5951_v0  ;;  %vm5765_vm4 = vcmp.ge.s32.totalorder %v18679_v13, %v14872_v57  ;;  %vm5805_vm5 = vcmp.lt.s32.totalorder %v18679_v13, %v14874_v21  ;;  %v18689_v36 = vld [vmem:[#allocation86_spill] sm:$0xff]  ;;  %v18690_v48 = vld [vmem:[#allocation31_spill] sm:$0xff] }
 0x5ca   : > { %vm5840_vm15 = vmand %vm5762_vm11, %vm5802_vm9  ;;  %v5953_v45 = vsel %vm5839_vm8, %v18680_v47, -inf  ;;  %v5986_v17 = vmax.f32 %v5982_v54, %v5952_v32  ;;  %vm5766_vm12 = vcmp.ge.s32.totalorder %v18681_v16, %v14872_v57  ;;  %vm5806_vm2 = vcmp.lt.s32.totalorder %v18681_v16, %v14874_v21  ;;  %v18691_v10 = vld [vmem:[#allocation87_spill] sm:$0xff]  ;;  %v18692_v7 = vld [vmem:[#allocation34_spill] sm:$0xff] }
 0x5cb   : > { %vm5841_vm6 = vmand %vm5763_vm13, %vm5803_vm14  ;;  %v5954_v60 = vsel %vm5840_vm15, %v18682_v41, -inf  ;;  %v5987_v43 = vmax.f32 %v5983_v2, %v5953_v45  ;;  %vm5767_vm11 = vcmp.ge.s32.totalorder %v18683_v23, %v14872_v57  ;;  %vm5807_vm9 = vcmp.lt.s32.totalorder %v18683_v23, %v14874_v21  ;;  %v18693_v18 = vld [vmem:[#allocation88_spill] sm:$0xff]  ;;  %v18695_v42 = vld [vmem:[#allocation89_spill] sm:$0xff] }
 0x5cc   : > { %vm5842_vm1 = vmand %vm5764_vm0, %vm5804_vm7  ;;  %v5955_v1 = vsel %vm5841_vm6, %v18684_v9, -inf  ;;  %v5988_v12 = vmax.f32 %v5984_v56, %v5954_v60  ;;  %vm5768_vm13 = vcmp.ge.s32.totalorder %v18685_v44, %v14872_v57  ;;  %vm5808_vm14 = vcmp.lt.s32.totalorder %v18685_v44, %v14874_v21  ;;  %v18694_v30 = vld [vmem:[#allocation36_spill] sm:$0xff]  ;;  %v18697_v14 = vld [vmem:[#allocation90_spill] sm:$0xff] }
 0x5cd   : > { %vm5843_vm10 = vmand %vm5765_vm4, %vm5805_vm5  ;;  %v5956_v63 = vsel %vm5842_vm1, %v18686_v31, -inf  ;;  %v5989_v55 = vmax.f32 %v5985_v38, %v5955_v1  ;;  %vm5769_vm0 = vcmp.ge.s32.totalorder %v18687_v6, %v14872_v57  ;;  %vm5809_vm7 = vcmp.lt.s32.totalorder %v18687_v6, %v14874_v21  ;;  %v18696_v61 = vld [vmem:[#allocation40_spill] sm:$0xff]  ;;  %v18698_v22 = vld [vmem:[#allocation42_spill] sm:$0xff] }
 0x5ce   : > { %vm5844_vm3 = vmand %vm5766_vm12, %vm5806_vm2  ;;  %v5957_v3 = vsel %vm5843_vm10, %v18688_v39, -inf  ;;  %v5990_v52 = vmax.f32 %v5986_v17, %v5956_v63  ;;  %vm5770_vm8 = vcmp.ge.s32.totalorder %v18689_v36, %v14872_v57  ;;  %vm5810_vm4 = vcmp.lt.s32.totalorder %v18689_v36, %v14874_v21  ;;  %v18699_v49 = vld [vmem:[#allocation91_spill] sm:$0xff]  ;;  %v18700_v51 = vld [vmem:[#allocation46_spill] sm:$0xff] }
 0x5cf   : > { %vm5845_vm5 = vmand %vm5767_vm11, %vm5807_vm9  ;;  %v5958_v20 = vsel %vm5844_vm3, %v18690_v48, -inf  ;;  %v5991_v11 = vmax.f32 %v5987_v43, %v5957_v3  ;;  %vm5771_vm15 = vcmp.ge.s32.totalorder %v18691_v10, %v14872_v57  ;;  %vm5811_vm12 = vcmp.lt.s32.totalorder %v18691_v10, %v14874_v21  ;;  %v18701_v54 = vld [vmem:[#allocation92_spill] sm:$0xff]  ;;  %v18703_v0 = vld [vmem:[#allocation93_spill] sm:$0xff] }
 0x5d0   : > { %vm5846_vm2 = vmand %vm5768_vm13, %vm5808_vm14  ;;  %v5959_v33 = vsel %vm5845_vm5, %v18692_v7, -inf  ;;  %v5992_v24 = vmax.f32 %v5988_v12, %v5958_v20  ;;  %vm5772_vm6 = vcmp.ge.s32.totalorder %v18693_v18, %v14872_v57  ;;  %vm5812_vm11 = vcmp.lt.s32.totalorder %v18693_v18, %v14874_v21  ;;  %v18702_v2 = vld [vmem:[#allocation48_spill] sm:$0xff]  ;;  %v18705_v32 = vld [vmem:[#allocation94_spill] sm:$0xff] }
 0x5d1   : > { %vm5847_vm9 = vmand %vm5769_vm0, %vm5809_vm7  ;;  %v5960_v62 = vsel %vm5846_vm2, %v18694_v30, -inf  ;;  %v5993_v37 = vmax.f32 %v5989_v55, %v5959_v33  ;;  %vm5773_vm1 = vcmp.ge.s32.totalorder %v18695_v42, %v14872_v57  ;;  %vm5813_vm13 = vcmp.lt.s32.totalorder %v18695_v42, %v14874_v21  ;;  %v18704_v56 = vld [vmem:[#allocation52_spill] sm:$0xff]  ;;  %v18706_v38 = vld [vmem:[#allocation54_spill] sm:$0xff] }
 0x5d2   : > { %vm5848_vm14 = vmand %vm5770_vm8, %vm5810_vm4  ;;  %v5961_v40 = vsel %vm5847_vm9, %v18696_v61, -inf  ;;  %v5994_v53 = vmax.f32 %v5990_v52, %v5960_v62  ;;  %vm5774_vm10 = vcmp.ge.s32.totalorder %v18697_v14, %v14872_v57  ;;  %vm5814_vm0 = vcmp.lt.s32.totalorder %v18697_v14, %v14874_v21  ;;  %v18707_v45 = vld [vmem:[#allocation95_spill] sm:$0xff]  ;;  %v18708_v41 = vld [vmem:[#allocation96_spill] sm:$0xff] }
 0x5d3   : > { %vm5849_vm7 = vmand %vm5771_vm15, %vm5811_vm12  ;;  %v5962_v26 = vsel %vm5848_vm14, %v18698_v22, -inf  ;;  %v5995_v4 = vmax.f32 %v5991_v11, %v5961_v40  ;;  %vm5775_vm3 = vcmp.ge.s32.totalorder %v18699_v49, %v14872_v57  ;;  %vm5815_vm8 = vcmp.lt.s32.totalorder %v18699_v49, %v14874_v21  ;;  %v6016_v11 = vld [vmem:[%s8003_s15 + $0xd] sm:$0x1] }
 0x5d4   : > { %vm5850_vm4 = vmand %vm5772_vm6, %vm5812_vm11  ;;  %v5963_v34 = vsel %vm5849_vm7, %v18700_v51, -inf  ;;  %v5996_v35 = vmax.f32 %v5992_v24, %v5962_v26  ;;  %vm5776_vm5 = vcmp.ge.s32.totalorder %v18701_v54, %v14872_v57  ;;  %vm5816_vm15 = vcmp.lt.s32.totalorder %v18701_v54, %v14874_v21 }
 0x5d5   : > { %vm5851_vm12 = vmand %vm5773_vm1, %vm5813_vm13  ;;  %v5964_v5 = vsel %vm5850_vm4, %v18702_v2, -inf  ;;  %v5997_v50 = vmax.f32 %v5993_v37, %v5963_v34  ;;  %vm5777_vm2 = vcmp.ge.s32.totalorder %v18703_v0, %v14872_v57  ;;  %vm5817_vm6 = vcmp.lt.s32.totalorder %v18703_v0, %v14874_v21 }
 0x5d6   : > { %vm5852_vm11 = vmand %vm5774_vm10, %vm5814_vm0  ;;  %v5965_v19 = vsel %vm5851_vm12, %v18704_v56, -inf  ;;  %v5998_v28 = vmax.f32 %v5994_v53, %v5964_v5  ;;  %vm5778_vm9 = vcmp.ge.s32.totalorder %v18705_v32, %v14872_v57  ;;  %vm5818_vm1 = vcmp.lt.s32.totalorder %v18705_v32, %v14874_v21 }
 0x5d7   : > { %vm5853_vm13 = vmand %vm5775_vm3, %vm5815_vm8  ;;  %v5966_v13 = vsel %vm5852_vm11, %v18706_v38, -inf  ;;  %v5999_v47 = vmax.f32 %v5995_v4, %v5965_v19  ;;  %vm5779_vm14 = vcmp.ge.s32.totalorder %v18707_v45, %v14872_v57  ;;  %vm5819_vm10 = vcmp.lt.s32.totalorder %v18707_v45, %v14874_v21 }
 0x5d8   : > { %vm5854_vm0 = vmand %vm5776_vm5, %vm5816_vm15  ;;  %v5967_v17 = vsel %vm5853_vm13, %v8583_v46, -inf  ;;  %v6000_v16 = vmax.f32 %v5996_v35, %v5966_v13  ;;  %vm5780_vm7 = vcmp.ge.s32.totalorder %v18708_v41, %v14872_v57  ;;  %vm5820_vm3 = vcmp.lt.s32.totalorder %v18708_v41, %v14874_v21 }
 0x5d9   : > { %vm5855_vm8 = vmand %vm5777_vm2, %vm5817_vm6  ;;  %v5968_v60 = vsel %vm5854_vm0, %v8586_v59, -inf  ;;  %v6001_v43 = vmax.f32 %v5997_v50, %v5967_v17 }
 0x5da   : > { %vm5856_vm4 = vmand %vm5778_vm9, %vm5818_vm1  ;;  %v5969_v23 = vsel %vm5855_vm8, %v8591_v25, -inf  ;;  %v6002_v9 = vmax.f32 %v5998_v28, %v5968_v60 }
 0x5db   : > { %vm5857_vm5 = vmand %vm5779_vm14, %vm5819_vm10  ;;  %v5970_v1 = vsel %vm5856_vm4, %v8594_v29, -inf  ;;  %v6003_v12 = vmax.f32 %v5999_v47, %v5969_v23 }
 0x5dc   : > { %vm5858_vm15 = vmand %vm5780_vm7, %vm5820_vm3  ;;  %v5971_v21 = vsel %vm5857_vm5, %v8604_v15, -inf  ;;  %v6004_v44 = vmax.f32 %v6000_v16, %v5970_v1 }
 0x5dd   : > { %v5972_v31 = vsel %vm5858_vm15, %v8609_v58, -inf  ;;  %v6005_v63 = vmax.f32 %v6001_v43, %v5971_v21 }
 0x5de   : > { %v6006_v55 = vmax.f32 %v6002_v9, %v5972_v31  ;;  %v6008_v6 = vmax.f32 %v6003_v12, %v6004_v44 }
 0x5e0   : > { %v6007_v57 = vmax.f32 %v6005_v63, %v6006_v55 }
 0x5e2   : > { %v6009_v39 = vmax.f32 %v6007_v57, %v6008_v6 }
 0x5e4   : > { %v6010_v3 = vrot.slane %v6009_v39, 4 }
 0x5e6   : > { %v6011_v52 = vmax.f32 %v6009_v39, %v6010_v3 }
 0x5e8   : > { %v6012_v36 = vrot.slane %v6011_v52, 2 }
 0x5ea   : > { %v6013_v48 = vmax.f32 %v6011_v52, %v6012_v36 }
 0x5ec   : > { %v6014_v20 = vrot.slane %v6013_v48, 1 }
 0x5ee   : > { %v6015_v10 = vmax.f32 %v6013_v48, %v6014_v20 }
 0x5f0   : > { %v6017_v7 = vmax.f32 %v6016_v11, %v6015_v10 }
 0x5f2   : > { %6018 = vst [vmem:[%s8003_s15 + $0xd] sm:$0x1] %v6017_v7 }
 0x5f3 PF: > { %s6852_s14 = sld [smem:[#allocation5 + $0xe]]  ;;  %s6853_s20 = sld [smem:[#allocation5 + $0xf]] }
 0x5f9   : > { %p6022_p5 = scmp.gt.s32.totalorder %s6852_s14, %s8822_s23  ;;  %p6024_p8 = scmp.lt.s32.totalorder %s6853_s20, %s8829_s21 }
 0x5fb   : > { %s6023_s29 = scalar_select %p6022_p5, %s6852_s14, %s8822_s23 }
 0x5fc   : > { %s6025_s30 = scalar_select %p6024_p8, %s6853_s20, %s8829_s21 }
 0x5fe   : > { %p6854_p10 = scmp.ge.s32.totalorder %s6023_s29, %s6025_s30 }
 0x5ff   : > { %s6030_s12 = ssub.s32 (!%p6854_p10), %s6852_s14, %s8822_s23  ;;  %s6070_s24 = ssub.s32 (!%p6854_p10), %s6853_s20, %s8822_s23  ;;  %v18709_v18 = vld [vmem:[#allocation61_spill] sm:$0xff] (!%p6854_p10)  ;;  %v18710_v30 = vld [vmem:[#allocation62_spill] sm:$0xff] (!%p6854_p10)  ;;  %v18713_v37 = vld [vmem:[#allocation63_spill] sm:$0xff] (!%p6854_p10)  ;;  %v18737_v56 = vmov (!%p6854_p10), 0 }
 0x600   : > { %6029 = sbr.rel (%p6854_p10) target bundleno = 1599 (0x63f), region = 100  ;;  %v15335_v33 = vstv (!%p6854_p10), %s6030_s12  ;;  %v15337_v24 = vstv (!%p6854_p10), %s6070_s24  ;;  %v18716_v61 = vld [vmem:[#allocation64_spill] sm:$0xff] (!%p6854_p10)  ;;  %v18719_v53 = vld [vmem:[#allocation65_spill] sm:$0xff] (!%p6854_p10)  ;;  %v18720_v14 = vld [vmem:[#allocation66_spill] sm:$0xff] (!%p6854_p10) }
 0x601   : > { %vm6032_vm12 = vcmp.ge.s32.totalorder (!%p6854_p10), %v8307_v27, %v15335_v33  ;;  %vm6033_vm2 = vcmp.ge.s32.totalorder (!%p6854_p10), %v8329_v8, %v15335_v33  ;;  %vm6034_vm6 = vcmp.ge.s32.totalorder (!%p6854_p10), %v18709_v18, %v15335_v33  ;;  %vm6072_vm11 = vcmp.lt.s32.totalorder (!%p6854_p10), %v8307_v27, %v15337_v24  ;;  %v18723_v26 = vld [vmem:[#allocation67_spill] sm:$0xff] (!%p6854_p10)  ;;  %v18724_v4 = vld [vmem:[#allocation68_spill] sm:$0xff] (!%p6854_p10)  ;;  %v18725_v49 = vld [vmem:[#allocation69_spill] sm:$0xff] (!%p6854_p10) }
 0x602   : > { %vm6073_vm9 = vcmp.lt.s32.totalorder (!%p6854_p10), %v8329_v8, %v15337_v24  ;;  %vm6035_vm1 = vcmp.ge.s32.totalorder (!%p6854_p10), %v18710_v30, %v15335_v33  ;;  %vm6074_vm13 = vcmp.lt.s32.totalorder (!%p6854_p10), %v18709_v18, %v15337_v24  ;;  %vm6075_vm14 = vcmp.lt.s32.totalorder (!%p6854_p10), %v18710_v30, %v15337_v24  ;;  %vm15355_vm10 = vmand (!%p6854_p10), %vm6032_vm12, %vm6072_vm11  ;;  %v18728_v34 = vld [vmem:[#allocation70_spill] sm:$0xff] (!%p6854_p10)  ;;  %v18729_v35 = vld [vmem:[#allocation71_spill] sm:$0xff] (!%p6854_p10) }
 0x603   : > { %vm6036_vm0 = vcmp.ge.s32.totalorder (!%p6854_p10), %v18713_v37, %v15335_v33  ;;  %vm6076_vm7 = vcmp.lt.s32.totalorder (!%p6854_p10), %v18713_v37, %v15337_v24  ;;  %vm15363_vm3 = vmand (!%p6854_p10), %vm6033_vm2, %vm6073_vm9  ;;  %vm6037_vm8 = vcmp.ge.s32.totalorder (!%p6854_p10), %v18716_v61, %v15335_v33  ;;  %vm6077_vm4 = vcmp.lt.s32.totalorder (!%p6854_p10), %v18716_v61, %v15337_v24  ;;  %v18730_v54 = vld [vmem:[#allocation72_spill] sm:$0xff] (!%p6854_p10)  ;;  %v18733_v5 = vld [vmem:[#allocation73_spill] sm:$0xff] (!%p6854_p10) }
 0x604   : > { %vm15371_vm5 = vmand (!%p6854_p10), %vm6034_vm6, %vm6074_vm13  ;;  %vm6078_vm2 = vcmp.lt.s32.totalorder (!%p6854_p10), %v18719_v53, %v15337_v24  ;;  %vm6079_vm15 = vcmp.lt.s32.totalorder (!%p6854_p10), %v18720_v14, %v15337_v24  ;;  %v18734_v50 = vld [vmem:[#allocation74_spill] sm:$0xff] (!%p6854_p10)  ;;  %v18735_v0 = vld [vmem:[#allocation75_spill] sm:$0xff] (!%p6854_p10)  ;;  %vm6082_vm9 = vcmp.lt.s32.totalorder (!%p6854_p10), %v18725_v49, %v15337_v24  ;;  %vm6086_vm6 = vcmp.lt.s32.totalorder (!%p6854_p10), %v18733_v5, %v15337_v24 }
 0x605   : > { %vm15381_vm11 = vmand (!%p6854_p10), %vm6035_vm1, %vm6075_vm14  ;;  %vm6081_vm1 = vcmp.lt.s32.totalorder (!%p6854_p10), %v18724_v4, %v15337_v24  ;;  %v18739_v19 = vld [vmem:[#allocation76_spill] sm:$0xff] (!%p6854_p10)  ;;  %v18740_v28 = vld [vmem:[#allocation77_spill] sm:$0xff] (!%p6854_p10)  ;;  %vm6087_vm13 = vcmp.lt.s32.totalorder (!%p6854_p10), %v18734_v50, %v15337_v24 }
 0x606   : > { %vm15393_vm12 = vmand (!%p6854_p10), %vm6036_vm0, %vm6076_vm7  ;;  %vm18748_vm7 = vcmp.ge.s32.totalorder (!%p6854_p10), %v18724_v4, %v15335_v33  ;;  %v18751_v47 = vld [vmem:[#allocation20_spill] sm:$0xff] (!%p6854_p10)  ;;  %v18752_v17 = vld [vmem:[#allocation21_spill] sm:$0xff] (!%p6854_p10) }
 0x607   : > { %vm15411_vm0 = vmand %vm6037_vm8, %vm6077_vm4  ;;  %vm18736_vm8 = vcmp.ge.s32.totalorder %v18719_v53, %v15335_v33  ;;  %v6224_v45 = vsel %vm15355_vm10, %v18751_v47, -inf  ;;  %v6225_v16 = vsel %vm15363_vm3, %v18752_v17, -inf  ;;  %v18753_v41 = vld [vmem:[#allocation24_spill] sm:$0xff]  ;;  %v18754_v43 = vld [vmem:[#allocation25_spill] sm:$0xff]  ;;  %vm18763_vm3 = vcmp.lt.s32.totalorder %v18728_v34, %v15337_v24 }
 0x608   : > { %vm15429_vm4 = vmand %vm18736_vm8, %vm6078_vm2  ;;  %vm18741_vm2 = vcmp.ge.s32.totalorder %v18720_v14, %v15335_v33  ;;  %v6226_v60 = vsel %vm15371_vm5, %v18753_v41, -inf  ;;  %v6227_v23 = vsel %vm15381_vm11, %v18754_v43, -inf  ;;  %v18758_v1 = vld [vmem:[#allocation28_spill] sm:$0xff]  ;;  %v18759_v21 = vld [vmem:[#allocation29_spill] sm:$0xff]  ;;  %vm18764_vm5 = vcmp.ge.s32.totalorder %v18728_v34, %v15335_v33 }
 0x609   : > { %v18738_v56 = vsel %vm15429_vm4, 4294967295, %v18737_v56  ;;  %vm15447_vm8 = vmand %vm18741_vm2, %vm6079_vm15  ;;  %vm18744_vm4 = vcmp.lt.s32.totalorder %v18723_v26, %v15337_v24  ;;  %vm18745_vm15 = vcmp.ge.s32.totalorder %v18723_v26, %v15335_v33  ;;  %v6228_v12 = vsel %vm15393_vm12, %v18758_v1, -inf  ;;  %v18760_v31 = vld [vmem:[#allocation32_spill] sm:$0xff]  ;;  %v18762_v55 = vld [vmem:[#allocation33_spill] sm:$0xff] }
 0x60a   : > { %vm15465_vm2 = vmand %vm18745_vm15, %vm18744_vm4  ;;  %v6229_v44 = vsel %vm15411_vm0, %v18759_v21, -inf  ;;  %vm18761_vm10 = vnez %v18738_v56  ;;  %v6231_v6 = vsel %vm15447_vm8, %v18762_v55, -inf  ;;  %v18767_v39 = vld [vmem:[#allocation37_spill] sm:$0xff]  ;;  %v18768_v52 = vld [vmem:[#allocation38_spill] sm:$0xff]  ;;  %v6262_v11 = vmax.f32 %v6224_v45, %v6228_v12 }
 0x60b   : > { %vm15472_vm14 = vmand %vm18748_vm7, %vm6081_vm1  ;;  %vm18755_vm1 = vcmp.ge.s32.totalorder %v18725_v49, %v15335_v33  ;;  %v6230_v63 = vsel %vm18761_vm10, %v18760_v31, -inf  ;;  %v6232_v3 = vsel %vm15465_vm2, %v18767_v39, -inf  ;;  %v18769_v48 = vld [vmem:[#allocation43_spill] sm:$0xff]  ;;  %vm18770_vm12 = vcmp.lt.s32.totalorder %v18729_v35, %v15337_v24  ;;  %v18774_v7 = vld [vmem:[#allocation44_spill] sm:$0xff] }
 0x60c   : > { %vm15491_vm7 = vmand %vm18755_vm1, %vm6082_vm9  ;;  %v6233_v36 = vsel %vm15472_vm14, %v18768_v52, -inf  ;;  %vm18771_vm9 = vcmp.ge.s32.totalorder %v18729_v35, %v15335_v33  ;;  %v6263_v30 = vmax.f32 %v6225_v16, %v6229_v44  ;;  %v6264_v62 = vmax.f32 %v6226_v60, %v6230_v63  ;;  %v18779_v61 = vld [vmem:[#allocation49_spill] sm:$0xff]  ;;  %v18781_v14 = vld [vmem:[#allocation50_spill] sm:$0xff] }
 0x60d   : > { %vm15513_vm11 = vmand %vm18764_vm5, %vm18763_vm3  ;;  %v6234_v20 = vsel %vm15491_vm7, %v18769_v48, -inf  ;;  %v6265_v37 = vmax.f32 %v6227_v23, %v6231_v6  ;;  %vm6088_vm14 = vcmp.lt.s32.totalorder %v18735_v0, %v15337_v24  ;;  %vm6089_vm4 = vcmp.lt.s32.totalorder %v18739_v19, %v15337_v24  ;;  %v18782_v51 = vld [vmem:[#allocation78_spill] sm:$0xff]  ;;  %v18784_v34 = vld [vmem:[#allocation55_spill] sm:$0xff] }
 0x60e   : > { %vm15532_vm0 = vmand %vm18771_vm9, %vm18770_vm12  ;;  %v6235_v18 = vsel %vm15513_vm11, %v18774_v7, -inf  ;;  %vm18775_vm8 = vcmp.lt.s32.totalorder %v18730_v54, %v15337_v24  ;;  %vm18776_vm15 = vcmp.ge.s32.totalorder %v18730_v54, %v15335_v33  ;;  %v6266_v53 = vmax.f32 %v6262_v11, %v6232_v3  ;;  %v18786_v2 = vld [vmem:[#allocation56_spill] sm:$0xff]  ;;  %v18789_v38 = vld [vmem:[#allocation18_spill] sm:$0xff] }
 0x60f   : > { %vm15549_vm2 = vmand %vm18776_vm15, %vm18775_vm8  ;;  %v6236_v40 = vsel %vm15532_vm0, %v18779_v61, -inf  ;;  %vm18780_vm1 = vcmp.ge.s32.totalorder %v18733_v5, %v15335_v33  ;;  %v6267_v26 = vmax.f32 %v6263_v30, %v6233_v36  ;;  %v6268_v4 = vmax.f32 %v6264_v62, %v6234_v20  ;;  %v18790_v47 = vld [vmem:[#allocation80_spill] sm:$0xff]  ;;  %v18792_v45 = vld [vmem:[#allocation19_spill] sm:$0xff] }
 0x610   : > { %vm6124_vm7 = vmand %vm18780_vm1, %vm6086_vm6  ;;  %v6237_v22 = vsel %vm15549_vm2, %v18781_v14, -inf  ;;  %v6269_v49 = vmax.f32 %v6265_v37, %v6235_v18  ;;  %vm6051_vm10 = vcmp.ge.s32.totalorder %v18782_v51, %v15335_v33  ;;  %vm6090_vm3 = vcmp.lt.s32.totalorder %v18740_v28, %v15337_v24  ;;  %v18793_v16 = vld [vmem:[#allocation81_spill] sm:$0xff]  ;;  %v18794_v41 = vld [vmem:[#allocation22_spill] sm:$0xff] }
 0x611   : > { %vm18783_vm5 = vcmp.ge.s32.totalorder %v18734_v50, %v15335_v33  ;;  %v6238_v35 = vsel %vm6124_vm7, %v18784_v34, -inf  ;;  %v6270_v54 = vmax.f32 %v6266_v53, %v6236_v40  ;;  %vm6091_vm11 = vcmp.lt.s32.totalorder %v18782_v51, %v15337_v24  ;;  %v18787_v50 = vld [vmem:[#allocation79_spill] sm:$0xff]  ;;  %v18795_v43 = vld [vmem:[#allocation82_spill] sm:$0xff]  ;;  %v18799_v63 = vld [vmem:[#allocation84_spill] sm:$0xff] }
 0x612   : > { %vm6125_vm6 = vmand %vm18783_vm5, %vm6087_vm13  ;;  %vm18785_vm12 = vcmp.ge.s32.totalorder %v18735_v0, %v15335_v33  ;;  %v6271_v56 = vmax.f32 %v6267_v26, %v6237_v22  ;;  %v6272_v32 = vmax.f32 %v6268_v4, %v6238_v35  ;;  %vm6052_vm13 = vcmp.ge.s32.totalorder %v18787_v50, %v15335_v33  ;;  %v18796_v23 = vld [vmem:[#allocation23_spill] sm:$0xff]  ;;  %v18798_v21 = vld [vmem:[#allocation26_spill] sm:$0xff] }
 0x613   : > { %vm6126_vm9 = vmand %vm18785_vm12, %vm6088_vm14  ;;  %v6239_v5 = vsel %vm6125_vm6, %v18786_v2, -inf  ;;  %vm6092_vm0 = vcmp.lt.s32.totalorder %v18787_v50, %v15337_v24  ;;  %vm18788_vm8 = vcmp.ge.s32.totalorder %v18739_v19, %v15335_v33  ;;  %vm6053_vm14 = vcmp.ge.s32.totalorder %v18790_v47, %v15335_v33  ;;  %v18797_v12 = vld [vmem:[#allocation83_spill] sm:$0xff]  ;;  %v18801_v39 = vld [vmem:[#allocation85_spill] sm:$0xff] }
 0x614   : > { %vm6127_vm15 = vmand %vm18788_vm8, %vm6089_vm4  ;;  %v6240_v0 = vsel %vm6126_vm9, %v18789_v38, -inf  ;;  %v6273_v13 = vmax.f32 %v6269_v49, %v6239_v5  ;;  %vm6093_vm2 = vcmp.lt.s32.totalorder %v18790_v47, %v15337_v24  ;;  %vm18791_vm1 = vcmp.ge.s32.totalorder %v18740_v28, %v15335_v33  ;;  %v18800_v55 = vld [vmem:[#allocation27_spill] sm:$0xff]  ;;  %v18802_v3 = vld [vmem:[#allocation30_spill] sm:$0xff] }
 0x615   : > { %vm6128_vm7 = vmand %vm18791_vm1, %vm6090_vm3  ;;  %v6241_v17 = vsel %vm6127_vm15, %v18792_v45, -inf  ;;  %v6274_v19 = vmax.f32 %v6270_v54, %v6240_v0  ;;  %vm6054_vm4 = vcmp.ge.s32.totalorder %v18793_v16, %v15335_v33  ;;  %vm6094_vm5 = vcmp.lt.s32.totalorder %v18793_v16, %v15337_v24  ;;  %v18803_v48 = vld [vmem:[#allocation86_spill] sm:$0xff]  ;;  %v18804_v20 = vld [vmem:[#allocation31_spill] sm:$0xff] }
 0x616   : > { %vm6129_vm6 = vmand %vm6051_vm10, %vm6091_vm11  ;;  %v6242_v60 = vsel %vm6128_vm7, %v18794_v41, -inf  ;;  %v6275_v28 = vmax.f32 %v6271_v56, %v6241_v17  ;;  %vm6055_vm3 = vcmp.ge.s32.totalorder %v18795_v43, %v15335_v33  ;;  %vm6095_vm12 = vcmp.lt.s32.totalorder %v18795_v43, %v15337_v24  ;;  %v18805_v7 = vld [vmem:[#allocation87_spill] sm:$0xff]  ;;  %v18806_v18 = vld [vmem:[#allocation34_spill] sm:$0xff] }
 0x617   : > { %vm6130_vm9 = vmand %vm6052_vm13, %vm6092_vm0  ;;  %v6243_v9 = vsel %vm6129_vm6, %v18796_v23, -inf  ;;  %v6276_v1 = vmax.f32 %v6272_v32, %v6242_v60  ;;  %vm6056_vm10 = vcmp.ge.s32.totalorder %v18797_v12, %v15335_v33  ;;  %vm6096_vm11 = vcmp.lt.s32.totalorder %v18797_v12, %v15337_v24  ;;  %v18807_v37 = vld [vmem:[#allocation88_spill] sm:$0xff]  ;;  %v18809_v53 = vld [vmem:[#allocation89_spill] sm:$0xff] }
 0x618   : > { %vm6131_vm8 = vmand %vm6053_vm14, %vm6093_vm2  ;;  %v6244_v44 = vsel %vm6130_vm9, %v18798_v21, -inf  ;;  %v6277_v31 = vmax.f32 %v6273_v13, %v6243_v9  ;;  %vm6057_vm13 = vcmp.ge.s32.totalorder %v18799_v63, %v15335_v33  ;;  %vm6097_vm0 = vcmp.lt.s32.totalorder %v18799_v63, %v15337_v24  ;;  %v18808_v42 = vld [vmem:[#allocation36_spill] sm:$0xff]  ;;  %v18811_v4 = vld [vmem:[#allocation90_spill] sm:$0xff] }
 0x619   : > { %vm6132_vm15 = vmand %vm6054_vm4, %vm6094_vm5  ;;  %v6245_v6 = vsel %vm6131_vm8, %v18800_v55, -inf  ;;  %v6278_v57 = vmax.f32 %v6274_v19, %v6244_v44  ;;  %vm6058_vm14 = vcmp.ge.s32.totalorder %v18801_v39, %v15335_v33  ;;  %vm6098_vm2 = vcmp.lt.s32.totalorder %v18801_v39, %v15337_v24  ;;  %v18810_v14 = vld [vmem:[#allocation40_spill] sm:$0xff]  ;;  %v18812_v49 = vld [vmem:[#allocation42_spill] sm:$0xff] }
 0x61a   : > { %vm6133_vm1 = vmand %vm6055_vm3, %vm6095_vm12  ;;  %v6246_v52 = vsel %vm6132_vm15, %v18802_v3, -inf  ;;  %v6279_v36 = vmax.f32 %v6275_v28, %v6245_v6  ;;  %vm6059_vm7 = vcmp.ge.s32.totalorder %v18803_v48, %v15335_v33  ;;  %vm6099_vm4 = vcmp.lt.s32.totalorder %v18803_v48, %v15337_v24  ;;  %v18813_v35 = vld [vmem:[#allocation91_spill] sm:$0xff]  ;;  %v18814_v54 = vld [vmem:[#allocation46_spill] sm:$0xff] }
 0x61b   : > { %vm6134_vm5 = vmand %vm6056_vm10, %vm6096_vm11  ;;  %v6247_v11 = vsel %vm6133_vm1, %v18804_v20, -inf  ;;  %v6280_v10 = vmax.f32 %v6276_v1, %v6246_v52  ;;  %vm6060_vm6 = vcmp.ge.s32.totalorder %v18805_v7, %v15335_v33  ;;  %vm6100_vm3 = vcmp.lt.s32.totalorder %v18805_v7, %v15337_v24  ;;  %v18815_v56 = vld [vmem:[#allocation92_spill] sm:$0xff]  ;;  %v18817_v0 = vld [vmem:[#allocation93_spill] sm:$0xff] }
 0x61c   : > { %vm6135_vm12 = vmand %vm6057_vm13, %vm6097_vm0  ;;  %v6248_v30 = vsel %vm6134_vm5, %v18806_v18, -inf  ;;  %v6281_v62 = vmax.f32 %v6277_v31, %v6247_v11  ;;  %vm6061_vm9 = vcmp.ge.s32.totalorder %v18807_v37, %v15335_v33  ;;  %vm6101_vm10 = vcmp.lt.s32.totalorder %v18807_v37, %v15337_v24  ;;  %v18816_v32 = vld [vmem:[#allocation48_spill] sm:$0xff]  ;;  %v18819_v17 = vld [vmem:[#allocation94_spill] sm:$0xff] }
 0x61d   : > { %vm6136_vm11 = vmand %vm6058_vm14, %vm6098_vm2  ;;  %v6249_v61 = vsel %vm6135_vm12, %v18808_v42, -inf  ;;  %v6282_v40 = vmax.f32 %v6278_v57, %v6248_v30  ;;  %vm6062_vm8 = vcmp.ge.s32.totalorder %v18809_v53, %v15335_v33  ;;  %vm6102_vm13 = vcmp.lt.s32.totalorder %v18809_v53, %v15337_v24  ;;  %v18818_v13 = vld [vmem:[#allocation52_spill] sm:$0xff]  ;;  %v18820_v19 = vld [vmem:[#allocation54_spill] sm:$0xff] }
 0x61e   : > { %vm6137_vm0 = vmand %vm6059_vm7, %vm6099_vm4  ;;  %v6250_v22 = vsel %vm6136_vm11, %v18810_v14, -inf  ;;  %v6283_v26 = vmax.f32 %v6279_v36, %v6249_v61  ;;  %vm6063_vm15 = vcmp.ge.s32.totalorder %v18811_v4, %v15335_v33  ;;  %vm6103_vm14 = vcmp.lt.s32.totalorder %v18811_v4, %v15337_v24  ;;  %v18821_v60 = vld [vmem:[#allocation95_spill] sm:$0xff]  ;;  %v18822_v23 = vld [vmem:[#allocation96_spill] sm:$0xff] }
 0x61f   : > { %vm6138_vm2 = vmand %vm6060_vm6, %vm6100_vm3  ;;  %v6251_v51 = vsel %vm6137_vm0, %v18812_v49, -inf  ;;  %v6284_v34 = vmax.f32 %v6280_v10, %v6250_v22  ;;  %vm6064_vm1 = vcmp.ge.s32.totalorder %v18813_v35, %v15335_v33  ;;  %vm6104_vm7 = vcmp.lt.s32.totalorder %v18813_v35, %v15337_v24  ;;  %v6305_v10 = vld [vmem:[%s8003_s15 + $0xe] sm:$0x1] }
 0x620   : > { %vm6139_vm4 = vmand %vm6061_vm9, %vm6101_vm10  ;;  %v6252_v2 = vsel %vm6138_vm2, %v18814_v54, -inf  ;;  %v6285_v5 = vmax.f32 %v6281_v62, %v6251_v51  ;;  %vm6065_vm5 = vcmp.ge.s32.totalorder %v18815_v56, %v15335_v33  ;;  %vm6105_vm6 = vcmp.lt.s32.totalorder %v18815_v56, %v15337_v24 }
 0x621   : > { %vm6140_vm3 = vmand %vm6062_vm8, %vm6102_vm13  ;;  %v6253_v50 = vsel %vm6139_vm4, %v18816_v32, -inf  ;;  %v6286_v38 = vmax.f32 %v6282_v40, %v6252_v2  ;;  %vm6066_vm12 = vcmp.ge.s32.totalorder %v18817_v0, %v15335_v33  ;;  %vm6106_vm9 = vcmp.lt.s32.totalorder %v18817_v0, %v15337_v24 }
 0x622   : > { %vm6141_vm10 = vmand %vm6063_vm15, %vm6103_vm14  ;;  %v6254_v47 = vsel %vm6140_vm3, %v18818_v13, -inf  ;;  %v6287_v45 = vmax.f32 %v6283_v26, %v6253_v50  ;;  %vm6067_vm11 = vcmp.ge.s32.totalorder %v18819_v17, %v15335_v33  ;;  %vm6107_vm8 = vcmp.lt.s32.totalorder %v18819_v17, %v15337_v24 }
 0x623   : > { %vm6142_vm13 = vmand %vm6064_vm1, %vm6104_vm7  ;;  %v6255_v16 = vsel %vm6141_vm10, %v18820_v19, -inf  ;;  %v6288_v41 = vmax.f32 %v6284_v34, %v6254_v47  ;;  %vm6068_vm0 = vcmp.ge.s32.totalorder %v18821_v60, %v15335_v33  ;;  %vm6108_vm15 = vcmp.lt.s32.totalorder %v18821_v60, %v15337_v24 }
 0x624   : > { %vm6143_vm14 = vmand %vm6065_vm5, %vm6105_vm6  ;;  %v6256_v28 = vsel %vm6142_vm13, %v8583_v46, -inf  ;;  %v6289_v43 = vmax.f32 %v6285_v5, %v6255_v16  ;;  %vm6069_vm2 = vcmp.ge.s32.totalorder %v18822_v23, %v15335_v33  ;;  %vm6109_vm1 = vcmp.lt.s32.totalorder %v18822_v23, %v15337_v24 }
 0x625   : > { %vm6144_vm7 = vmand %vm6066_vm12, %vm6106_vm9  ;;  %v6257_v9 = vsel %vm6143_vm14, %v8586_v59, -inf  ;;  %v6290_v1 = vmax.f32 %v6286_v38, %v6256_v28 }
 0x626   : > { %vm6145_vm4 = vmand %vm6067_vm11, %vm6107_vm8  ;;  %v6258_v12 = vsel %vm6144_vm7, %v8591_v25, -inf  ;;  %v6291_v21 = vmax.f32 %v6287_v45, %v6257_v9 }
 0x627   : > { %vm6146_vm5 = vmand %vm6068_vm0, %vm6108_vm15  ;;  %v6259_v44 = vsel %vm6145_vm4, %v8594_v29, -inf  ;;  %v6292_v31 = vmax.f32 %v6288_v41, %v6258_v12 }
 0x628   : > { %vm6147_vm6 = vmand %vm6069_vm2, %vm6109_vm1  ;;  %v6260_v24 = vsel %vm6146_vm5, %v8604_v15, -inf  ;;  %v6293_v63 = vmax.f32 %v6289_v43, %v6259_v44 }
 0x629   : > { %v6261_v55 = vsel %vm6147_vm6, %v8609_v58, -inf  ;;  %v6294_v6 = vmax.f32 %v6290_v1, %v6260_v24 }
 0x62a   : > { %v6295_v57 = vmax.f32 %v6291_v21, %v6261_v55  ;;  %v6297_v39 = vmax.f32 %v6292_v31, %v6293_v63 }
 0x62c   : > { %v6296_v33 = vmax.f32 %v6294_v6, %v6295_v57 }
 0x62e   : > { %v6298_v3 = vmax.f32 %v6296_v33, %v6297_v39 }
 0x630   : > { %v6299_v52 = vrot.slane %v6298_v3, 4 }
 0x632   : > { %v6300_v36 = vmax.f32 %v6298_v3, %v6299_v52 }
 0x634   : > { %v6301_v48 = vrot.slane %v6300_v36, 2 }
 0x636   : > { %v6302_v20 = vmax.f32 %v6300_v36, %v6301_v48 }
 0x638   : > { %v6303_v11 = vrot.slane %v6302_v20, 1 }
 0x63a   : > { %v6304_v7 = vmax.f32 %v6302_v20, %v6303_v11 }
 0x63c   : > { %v6306_v18 = vmax.f32 %v6305_v10, %v6304_v7 }
 0x63e   : > { %6307 = vst [vmem:[%s8003_s15 + $0xe] sm:$0x1] %v6306_v18 }
 0x63f PF: > { %s6855_s18 = sld [smem:[#allocation5 + $0xf]]  ;;  %s6856_s22 = sld [smem:[#allocation5 + $0x10]] }
 0x645   : > { %p6311_p12 = scmp.gt.s32.totalorder %s6855_s18, %s8822_s23  ;;  %p6313_p1 = scmp.lt.s32.totalorder %s6856_s22, %s8829_s21 }
 0x647   : > { %s6312_s25 = scalar_select %p6311_p12, %s6855_s18, %s8822_s23 }
 0x648   : > { %s6314_s19 = scalar_select %p6313_p1, %s6856_s22, %s8829_s21 }
 0x64a   : > { %p6857_p2 = scmp.ge.s32.totalorder %s6312_s25, %s6314_s19 }
 0x64b   : > { %s6319_s17 = ssub.s32 (!%p6857_p2), %s6855_s18, %s8822_s23  ;;  %s6359_s14 = ssub.s32 (!%p6857_p2), %s6856_s22, %s8822_s23  ;;  %v18823_v37 = vld [vmem:[#allocation61_spill] sm:$0xff] (!%p6857_p2)  ;;  %v18824_v42 = vld [vmem:[#allocation62_spill] sm:$0xff] (!%p6857_p2)  ;;  %v18827_v40 = vld [vmem:[#allocation63_spill] sm:$0xff] (!%p6857_p2)  ;;  %v18851_v38 = vmov (!%p6857_p2), 0 }
 0x64c   : > { %6318 = sbr.rel (%p6857_p2) target bundleno = 1675 (0x68b), region = 104  ;;  %v15798_v30 = vstv (!%p6857_p2), %s6319_s17  ;;  %v15800_v62 = vstv (!%p6857_p2), %s6359_s14  ;;  %v18833_v14 = vld [vmem:[#allocation65_spill] sm:$0xff] (!%p6857_p2)  ;;  %v18834_v22 = vld [vmem:[#allocation66_spill] sm:$0xff] (!%p6857_p2)  ;;  %v18837_v4 = vld [vmem:[#allocation67_spill] sm:$0xff] (!%p6857_p2) }
 0x64d   : > { %vm6321_vm3 = vcmp.ge.s32.totalorder (!%p6857_p2), %v8307_v27, %v15798_v30  ;;  %vm6322_vm12 = vcmp.ge.s32.totalorder (!%p6857_p2), %v8329_v8, %v15798_v30  ;;  %vm6323_vm9 = vcmp.ge.s32.totalorder (!%p6857_p2), %v18823_v37, %v15798_v30  ;;  %vm6361_vm10 = vcmp.lt.s32.totalorder (!%p6857_p2), %v8307_v27, %v15800_v62  ;;  %v18838_v49 = vld [vmem:[#allocation68_spill] sm:$0xff] (!%p6857_p2)  ;;  %v18839_v51 = vld [vmem:[#allocation69_spill] sm:$0xff] (!%p6857_p2)  ;;  %v18842_v35 = vld [vmem:[#allocation70_spill] sm:$0xff] (!%p6857_p2) }
 0x64e   : > { %vm6362_vm11 = vcmp.lt.s32.totalorder (!%p6857_p2), %v8329_v8, %v15800_v62  ;;  %vm6324_vm8 = vcmp.ge.s32.totalorder (!%p6857_p2), %v18824_v42, %v15798_v30  ;;  %vm6363_vm13 = vcmp.lt.s32.totalorder (!%p6857_p2), %v18823_v37, %v15800_v62  ;;  %vm6364_vm0 = vcmp.lt.s32.totalorder (!%p6857_p2), %v18824_v42, %v15800_v62  ;;  %vm15818_vm15 = vmand (!%p6857_p2), %vm6321_vm3, %vm6361_vm10  ;;  %v18830_v8 = vld [vmem:[#allocation64_spill] sm:$0xff] (!%p6857_p2)  ;;  %v18843_v54 = vld [vmem:[#allocation71_spill] sm:$0xff] (!%p6857_p2) }
 0x64f   : > { %vm6325_vm14 = vcmp.ge.s32.totalorder (!%p6857_p2), %v18827_v40, %v15798_v30  ;;  %vm6365_vm2 = vcmp.lt.s32.totalorder (!%p6857_p2), %v18827_v40, %v15800_v62  ;;  %vm15826_vm1 = vmand (!%p6857_p2), %vm6322_vm12, %vm6362_vm11  ;;  %vm6326_vm7 = vcmp.ge.s32.totalorder (!%p6857_p2), %v18830_v8, %v15798_v30  ;;  %vm6366_vm4 = vcmp.lt.s32.totalorder (!%p6857_p2), %v18830_v8, %v15800_v62  ;;  %v18844_v2 = vld [vmem:[#allocation72_spill] sm:$0xff] (!%p6857_p2)  ;;  %v18847_v56 = vld [vmem:[#allocation73_spill] sm:$0xff] (!%p6857_p2) }
 0x650   : > { %vm15834_vm5 = vmand (!%p6857_p2), %vm6323_vm9, %vm6363_vm13  ;;  %vm6367_vm12 = vcmp.lt.s32.totalorder (!%p6857_p2), %v18833_v14, %v15800_v62  ;;  %vm6368_vm6 = vcmp.lt.s32.totalorder (!%p6857_p2), %v18834_v22, %v15800_v62  ;;  %v18848_v32 = vld [vmem:[#allocation74_spill] sm:$0xff] (!%p6857_p2)  ;;  %v18849_v50 = vld [vmem:[#allocation75_spill] sm:$0xff] (!%p6857_p2)  ;;  %vm6371_vm11 = vcmp.lt.s32.totalorder (!%p6857_p2), %v18839_v51, %v15800_v62  ;;  %vm6375_vm9 = vcmp.lt.s32.totalorder (!%p6857_p2), %v18847_v56, %v15800_v62 }
 0x651   : > { %vm15844_vm10 = vmand (!%p6857_p2), %vm6324_vm8, %vm6364_vm0  ;;  %vm6370_vm8 = vcmp.lt.s32.totalorder (!%p6857_p2), %v18838_v49, %v15800_v62  ;;  %v18853_v0 = vld [vmem:[#allocation76_spill] sm:$0xff] (!%p6857_p2)  ;;  %v18854_v13 = vld [vmem:[#allocation77_spill] sm:$0xff] (!%p6857_p2)  ;;  %vm6376_vm13 = vcmp.lt.s32.totalorder (!%p6857_p2), %v18848_v32, %v15800_v62 }
 0x652   : > { %vm15856_vm3 = vmand (!%p6857_p2), %vm6325_vm14, %vm6365_vm2  ;;  %vm18862_vm2 = vcmp.ge.s32.totalorder (!%p6857_p2), %v18838_v49, %v15798_v30  ;;  %v18865_v19 = vld [vmem:[#allocation20_spill] sm:$0xff] (!%p6857_p2)  ;;  %v18866_v41 = vld [vmem:[#allocation21_spill] sm:$0xff] (!%p6857_p2) }
 0x653   : > { %vm15874_vm14 = vmand %vm6326_vm7, %vm6366_vm4  ;;  %vm18850_vm7 = vcmp.ge.s32.totalorder %v18833_v14, %v15798_v30  ;;  %v6513_v16 = vsel %vm15818_vm15, %v18865_v19, -inf  ;;  %v6514_v60 = vsel %vm15826_vm1, %v18866_v41, -inf  ;;  %v18867_v28 = vld [vmem:[#allocation24_spill] sm:$0xff]  ;;  %v18868_v23 = vld [vmem:[#allocation25_spill] sm:$0xff]  ;;  %vm18877_vm1 = vcmp.lt.s32.totalorder %v18842_v35, %v15800_v62 }
 0x654   : > { %vm15892_vm4 = vmand %vm18850_vm7, %vm6367_vm12  ;;  %vm18855_vm12 = vcmp.ge.s32.totalorder %v18834_v22, %v15798_v30  ;;  %v6515_v43 = vsel %vm15834_vm5, %v18867_v28, -inf  ;;  %v6516_v9 = vsel %vm15844_vm10, %v18868_v23, -inf  ;;  %v18872_v12 = vld [vmem:[#allocation28_spill] sm:$0xff]  ;;  %v18873_v44 = vld [vmem:[#allocation29_spill] sm:$0xff]  ;;  %vm18878_vm5 = vcmp.ge.s32.totalorder %v18842_v35, %v15798_v30 }
 0x655   : > { %v18852_v38 = vsel %vm15892_vm4, 4294967295, %v18851_v38  ;;  %vm15910_vm7 = vmand %vm18855_vm12, %vm6368_vm6  ;;  %vm18858_vm4 = vcmp.lt.s32.totalorder %v18837_v4, %v15800_v62  ;;  %vm18859_vm6 = vcmp.ge.s32.totalorder %v18837_v4, %v15798_v30  ;;  %v6517_v21 = vsel %vm15856_vm3, %v18872_v12, -inf  ;;  %v18874_v24 = vld [vmem:[#allocation32_spill] sm:$0xff]  ;;  %v18876_v55 = vld [vmem:[#allocation33_spill] sm:$0xff] }
 0x656   : > { %vm15928_vm12 = vmand %vm18859_vm6, %vm18858_vm4  ;;  %v6518_v31 = vsel %vm15874_vm14, %v18873_v44, -inf  ;;  %vm18875_vm15 = vnez %v18852_v38  ;;  %v6520_v6 = vsel %vm15910_vm7, %v18876_v55, -inf  ;;  %v18881_v39 = vld [vmem:[#allocation37_spill] sm:$0xff]  ;;  %v18882_v3 = vld [vmem:[#allocation38_spill] sm:$0xff]  ;;  %v6551_v20 = vmax.f32 %v6513_v16, %v6517_v21 }
 0x657   : > { %vm15935_vm0 = vmand %vm18862_vm2, %vm6370_vm8  ;;  %vm18869_vm8 = vcmp.ge.s32.totalorder %v18839_v51, %v15798_v30  ;;  %v6519_v63 = vsel %vm18875_vm15, %v18874_v24, -inf  ;;  %v6521_v33 = vsel %vm15928_vm12, %v18881_v39, -inf  ;;  %v18883_v36 = vld [vmem:[#allocation43_spill] sm:$0xff]  ;;  %vm18884_vm3 = vcmp.lt.s32.totalorder %v18843_v54, %v15800_v62  ;;  %v18888_v10 = vld [vmem:[#allocation44_spill] sm:$0xff] }
 0x658   : > { %vm15954_vm2 = vmand %vm18869_vm8, %vm6371_vm11  ;;  %v6522_v52 = vsel %vm15935_vm0, %v18882_v3, -inf  ;;  %vm18885_vm11 = vcmp.ge.s32.totalorder %v18843_v54, %v15798_v30  ;;  %v6552_v18 = vmax.f32 %v6514_v60, %v6518_v31  ;;  %v6553_v37 = vmax.f32 %v6515_v43, %v6519_v63  ;;  %v18893_v40 = vld [vmem:[#allocation49_spill] sm:$0xff]  ;;  %v18895_v53 = vld [vmem:[#allocation50_spill] sm:$0xff] }
 0x659   : > { %vm15976_vm10 = vmand %vm18878_vm5, %vm18877_vm1  ;;  %v6523_v48 = vsel %vm15954_vm2, %v18883_v36, -inf  ;;  %v6554_v42 = vmax.f32 %v6516_v9, %v6520_v6  ;;  %vm6377_vm0 = vcmp.lt.s32.totalorder %v18849_v50, %v15800_v62  ;;  %vm6378_vm4 = vcmp.lt.s32.totalorder %v18853_v0, %v15800_v62  ;;  %v18896_v49 = vld [vmem:[#allocation78_spill] sm:$0xff]  ;;  %v18898_v51 = vld [vmem:[#allocation55_spill] sm:$0xff] }
 0x65a   : > { %vm15995_vm14 = vmand %vm18885_vm11, %vm18884_vm3  ;;  %v6524_v7 = vsel %vm15976_vm10, %v18888_v10, -inf  ;;  %vm18889_vm7 = vcmp.lt.s32.totalorder %v18844_v2, %v15800_v62  ;;  %vm18890_vm6 = vcmp.ge.s32.totalorder %v18844_v2, %v15798_v30  ;;  %v6555_v8 = vmax.f32 %v6551_v20, %v6521_v33  ;;  %v18900_v54 = vld [vmem:[#allocation56_spill] sm:$0xff]  ;;  %v18903_v38 = vld [vmem:[#allocation18_spill] sm:$0xff] }
 0x65b   : > { %vm16012_vm12 = vmand %vm18890_vm6, %vm18889_vm7  ;;  %v6525_v27 = vsel %vm15995_vm14, %v18893_v40, -inf  ;;  %vm18894_vm8 = vcmp.ge.s32.totalorder %v18847_v56, %v15798_v30  ;;  %v6556_v22 = vmax.f32 %v6552_v18, %v6522_v52  ;;  %v6557_v26 = vmax.f32 %v6553_v37, %v6523_v48  ;;  %v18904_v45 = vld [vmem:[#allocation80_spill] sm:$0xff]  ;;  %v18906_v17 = vld [vmem:[#allocation19_spill] sm:$0xff] }
 0x65c   : > { %vm6413_vm2 = vmand %vm18894_vm8, %vm6375_vm9  ;;  %v6526_v14 = vsel %vm16012_vm12, %v18895_v53, -inf  ;;  %v6558_v4 = vmax.f32 %v6554_v42, %v6524_v7  ;;  %vm6340_vm15 = vcmp.ge.s32.totalorder %v18896_v49, %v15798_v30  ;;  %vm6379_vm1 = vcmp.lt.s32.totalorder %v18854_v13, %v15800_v62  ;;  %v18907_v16 = vld [vmem:[#allocation81_spill] sm:$0xff]  ;;  %v18908_v41 = vld [vmem:[#allocation22_spill] sm:$0xff] }
 0x65d   : > { %vm18897_vm5 = vcmp.ge.s32.totalorder %v18848_v32, %v15798_v30  ;;  %v6527_v34 = vsel %vm6413_vm2, %v18898_v51, -inf  ;;  %v6559_v35 = vmax.f32 %v6555_v8, %v6525_v27  ;;  %vm6380_vm10 = vcmp.lt.s32.totalorder %v18896_v49, %v15800_v62  ;;  %v18901_v32 = vld [vmem:[#allocation79_spill] sm:$0xff]  ;;  %v18909_v28 = vld [vmem:[#allocation82_spill] sm:$0xff]  ;;  %v18913_v31 = vld [vmem:[#allocation84_spill] sm:$0xff] }
 0x65e   : > { %vm6414_vm9 = vmand %vm18897_vm5, %vm6376_vm13  ;;  %vm18899_vm3 = vcmp.ge.s32.totalorder %v18849_v50, %v15798_v30  ;;  %v6560_v5 = vmax.f32 %v6556_v22, %v6526_v14  ;;  %v6561_v56 = vmax.f32 %v6557_v26, %v6527_v34  ;;  %vm6341_vm13 = vcmp.ge.s32.totalorder %v18901_v32, %v15798_v30  ;;  %v18910_v43 = vld [vmem:[#allocation23_spill] sm:$0xff]  ;;  %v18912_v12 = vld [vmem:[#allocation26_spill] sm:$0xff] }
 0x65f   : > { %vm6415_vm11 = vmand %vm18899_vm3, %vm6377_vm0  ;;  %v6528_v2 = vsel %vm6414_vm9, %v18900_v54, -inf  ;;  %vm6381_vm14 = vcmp.lt.s32.totalorder %v18901_v32, %v15800_v62  ;;  %vm18902_vm7 = vcmp.ge.s32.totalorder %v18853_v0, %v15798_v30  ;;  %vm6342_vm0 = vcmp.ge.s32.totalorder %v18904_v45, %v15798_v30  ;;  %v18911_v1 = vld [vmem:[#allocation83_spill] sm:$0xff]  ;;  %v18915_v6 = vld [vmem:[#allocation85_spill] sm:$0xff] }
 0x660   : > { %vm6416_vm6 = vmand %vm18902_vm7, %vm6378_vm4  ;;  %v6529_v50 = vsel %vm6415_vm11, %v18903_v38, -inf  ;;  %v6562_v47 = vmax.f32 %v6558_v4, %v6528_v2  ;;  %vm6382_vm12 = vcmp.lt.s32.totalorder %v18904_v45, %v15800_v62  ;;  %vm18905_vm8 = vcmp.ge.s32.totalorder %v18854_v13, %v15798_v30  ;;  %v18914_v24 = vld [vmem:[#allocation27_spill] sm:$0xff]  ;;  %v18916_v57 = vld [vmem:[#allocation30_spill] sm:$0xff] }
 0x661   : > { %vm6417_vm2 = vmand %vm18905_vm8, %vm6379_vm1  ;;  %v6530_v19 = vsel %vm6416_vm6, %v18906_v17, -inf  ;;  %v6563_v0 = vmax.f32 %v6559_v35, %v6529_v50  ;;  %vm6343_vm4 = vcmp.ge.s32.totalorder %v18907_v16, %v15798_v30  ;;  %vm6383_vm5 = vcmp.lt.s32.totalorder %v18907_v16, %v15800_v62  ;;  %v18917_v3 = vld [vmem:[#allocation86_spill] sm:$0xff]  ;;  %v18918_v52 = vld [vmem:[#allocation31_spill] sm:$0xff] }
 0x662   : > { %vm6418_vm9 = vmand %vm6340_vm15, %vm6380_vm10  ;;  %v6531_v60 = vsel %vm6417_vm2, %v18908_v41, -inf  ;;  %v6564_v13 = vmax.f32 %v6560_v5, %v6530_v19  ;;  %vm6344_vm1 = vcmp.ge.s32.totalorder %v18909_v28, %v15798_v30  ;;  %vm6384_vm3 = vcmp.lt.s32.totalorder %v18909_v28, %v15800_v62  ;;  %v18919_v20 = vld [vmem:[#allocation87_spill] sm:$0xff]  ;;  %v18920_v11 = vld [vmem:[#allocation34_spill] sm:$0xff] }
 0x663   : > { %vm6419_vm11 = vmand %vm6341_vm13, %vm6381_vm14  ;;  %v6532_v23 = vsel %vm6418_vm9, %v18910_v43, -inf  ;;  %v6565_v9 = vmax.f32 %v6561_v56, %v6531_v60  ;;  %vm6345_vm15 = vcmp.ge.s32.totalorder %v18911_v1, %v15798_v30  ;;  %vm6385_vm10 = vcmp.lt.s32.totalorder %v18911_v1, %v15800_v62  ;;  %v18921_v18 = vld [vmem:[#allocation88_spill] sm:$0xff]  ;;  %v18923_v40 = vld [vmem:[#allocation89_spill] sm:$0xff] }
 0x664   : > { %vm6420_vm7 = vmand %vm6342_vm0, %vm6382_vm12  ;;  %v6533_v21 = vsel %vm6419_vm11, %v18912_v12, -inf  ;;  %v6566_v44 = vmax.f32 %v6562_v47, %v6532_v23  ;;  %vm6346_vm13 = vcmp.ge.s32.totalorder %v18913_v31, %v15798_v30  ;;  %vm6386_vm14 = vcmp.lt.s32.totalorder %v18913_v31, %v15800_v62  ;;  %v18922_v37 = vld [vmem:[#allocation36_spill] sm:$0xff]  ;;  %v18925_v14 = vld [vmem:[#allocation90_spill] sm:$0xff] }
 0x665   : > { %vm6421_vm6 = vmand %vm6343_vm4, %vm6383_vm5  ;;  %v6534_v63 = vsel %vm6420_vm7, %v18914_v24, -inf  ;;  %v6567_v55 = vmax.f32 %v6563_v0, %v6533_v21  ;;  %vm6347_vm0 = vcmp.ge.s32.totalorder %v18915_v6, %v15798_v30  ;;  %vm6387_vm12 = vcmp.lt.s32.totalorder %v18915_v6, %v15800_v62  ;;  %v18924_v27 = vld [vmem:[#allocation40_spill] sm:$0xff]  ;;  %v18926_v22 = vld [vmem:[#allocation42_spill] sm:$0xff] }
 0x666   : > { %vm6422_vm8 = vmand %vm6344_vm1, %vm6384_vm3  ;;  %v6535_v39 = vsel %vm6421_vm6, %v18916_v57, -inf  ;;  %v6568_v33 = vmax.f32 %v6564_v13, %v6534_v63  ;;  %vm6348_vm2 = vcmp.ge.s32.totalorder %v18917_v3, %v15798_v30  ;;  %vm6388_vm4 = vcmp.lt.s32.totalorder %v18917_v3, %v15800_v62  ;;  %v18927_v49 = vld [vmem:[#allocation91_spill] sm:$0xff]  ;;  %v18928_v51 = vld [vmem:[#allocation46_spill] sm:$0xff] }
 0x667   : > { %vm6423_vm5 = vmand %vm6345_vm15, %vm6385_vm10  ;;  %v6536_v36 = vsel %vm6422_vm8, %v18918_v52, -inf  ;;  %v6569_v48 = vmax.f32 %v6565_v9, %v6535_v39  ;;  %vm6349_vm9 = vcmp.ge.s32.totalorder %v18919_v20, %v15798_v30  ;;  %vm6389_vm1 = vcmp.lt.s32.totalorder %v18919_v20, %v15800_v62  ;;  %v18929_v54 = vld [vmem:[#allocation92_spill] sm:$0xff]  ;;  %v18931_v32 = vld [vmem:[#allocation93_spill] sm:$0xff] }
 0x668   : > { %vm6424_vm3 = vmand %vm6346_vm13, %vm6386_vm14  ;;  %v6537_v10 = vsel %vm6423_vm5, %v18920_v11, -inf  ;;  %v6570_v7 = vmax.f32 %v6566_v44, %v6536_v36  ;;  %vm6350_vm11 = vcmp.ge.s32.totalorder %v18921_v18, %v15798_v30  ;;  %vm6390_vm15 = vcmp.lt.s32.totalorder %v18921_v18, %v15800_v62  ;;  %v18930_v2 = vld [vmem:[#allocation48_spill] sm:$0xff]  ;;  %v18933_v45 = vld [vmem:[#allocation94_spill] sm:$0xff] }
 0x669   : > { %vm6425_vm10 = vmand %vm6347_vm0, %vm6387_vm12  ;;  %v6538_v42 = vsel %vm6424_vm3, %v18922_v37, -inf  ;;  %v6571_v61 = vmax.f32 %v6567_v55, %v6537_v10  ;;  %vm6351_vm7 = vcmp.ge.s32.totalorder %v18923_v40, %v15798_v30  ;;  %vm6391_vm13 = vcmp.lt.s32.totalorder %v18923_v40, %v15800_v62  ;;  %v18932_v38 = vld [vmem:[#allocation52_spill] sm:$0xff]  ;;  %v18934_v17 = vld [vmem:[#allocation54_spill] sm:$0xff] }
 0x66a   : > { %vm6426_vm14 = vmand %vm6348_vm2, %vm6388_vm4  ;;  %v6539_v8 = vsel %vm6425_vm10, %v18924_v27, -inf  ;;  %v6572_v53 = vmax.f32 %v6568_v33, %v6538_v42  ;;  %vm6352_vm6 = vcmp.ge.s32.totalorder %v18925_v14, %v15798_v30  ;;  %vm6392_vm0 = vcmp.lt.s32.totalorder %v18925_v14, %v15800_v62  ;;  %v18935_v16 = vld [vmem:[#allocation95_spill] sm:$0xff]  ;;  %v18936_v13 = vld [vmem:[#allocation96_spill] sm:$0xff] }
 0x66b   : > { %vm6427_vm12 = vmand %vm6349_vm9, %vm6389_vm1  ;;  %v6540_v26 = vsel %vm6426_vm14, %v18926_v22, -inf  ;;  %v6573_v4 = vmax.f32 %v6569_v48, %v6539_v8  ;;  %vm6353_vm8 = vcmp.ge.s32.totalorder %v18927_v49, %v15798_v30  ;;  %vm6393_vm2 = vcmp.lt.s32.totalorder %v18927_v49, %v15800_v62 }
 0x66c   : > { %vm6428_vm4 = vmand %vm6350_vm11, %vm6390_vm15  ;;  %v6541_v34 = vsel %vm6427_vm12, %v18928_v51, -inf  ;;  %v6574_v35 = vmax.f32 %v6570_v7, %v6540_v26  ;;  %vm6354_vm5 = vcmp.ge.s32.totalorder %v18929_v54, %v15798_v30  ;;  %vm6394_vm9 = vcmp.lt.s32.totalorder %v18929_v54, %v15800_v62 }
 0x66d   : > { %vm6429_vm1 = vmand %vm6351_vm7, %vm6391_vm13  ;;  %v6542_v5 = vsel %vm6428_vm4, %v18930_v2, -inf  ;;  %v6575_v56 = vmax.f32 %v6571_v61, %v6541_v34  ;;  %vm6355_vm3 = vcmp.ge.s32.totalorder %v18931_v32, %v15798_v30  ;;  %vm6395_vm11 = vcmp.lt.s32.totalorder %v18931_v32, %v15800_v62 }
 0x66e   : > { %vm6430_vm15 = vmand %vm6352_vm6, %vm6392_vm0  ;;  %v6543_v50 = vsel %vm6429_vm1, %v18932_v38, -inf  ;;  %v6576_v47 = vmax.f32 %v6572_v53, %v6542_v5  ;;  %vm6356_vm10 = vcmp.ge.s32.totalorder %v18933_v45, %v15798_v30  ;;  %vm6396_vm7 = vcmp.lt.s32.totalorder %v18933_v45, %v15800_v62 }
 0x66f   : > { %vm6431_vm13 = vmand %vm6353_vm8, %vm6393_vm2  ;;  %v6544_v19 = vsel %vm6430_vm15, %v18934_v17, -inf  ;;  %v6577_v0 = vmax.f32 %v6573_v4, %v6543_v50  ;;  %vm6357_vm14 = vcmp.ge.s32.totalorder %v18935_v16, %v15798_v30  ;;  %vm6397_vm6 = vcmp.lt.s32.totalorder %v18935_v16, %v15800_v62 }
 0x670   : > { %vm6432_vm0 = vmand %vm6354_vm5, %vm6394_vm9  ;;  %v6545_v41 = vsel %vm6431_vm13, %v8583_v46, -inf  ;;  %v6578_v60 = vmax.f32 %v6574_v35, %v6544_v19  ;;  %vm6358_vm12 = vcmp.ge.s32.totalorder %v18936_v13, %v15798_v30  ;;  %vm6398_vm8 = vcmp.lt.s32.totalorder %v18936_v13, %v15800_v62 }
 0x671   : > { %vm6433_vm2 = vmand %vm6355_vm3, %vm6395_vm11  ;;  %v6546_v28 = vsel %vm6432_vm0, %v8586_v59, -inf  ;;  %v6579_v43 = vmax.f32 %v6575_v56, %v6545_v41 }
 0x672   : > { %vm6434_vm4 = vmand %vm6356_vm10, %vm6396_vm7  ;;  %v6547_v46 = vsel %vm6433_vm2, %v8591_v25, -inf  ;;  %v6580_v23 = vmax.f32 %v6576_v47, %v6546_v28 }
 0x673   : > { %vm6435_vm5 = vmand %vm6357_vm14, %vm6397_vm6  ;;  %v6548_v9 = vsel %vm6434_vm4, %v8594_v29, -inf  ;;  %v6581_v1 = vmax.f32 %v6577_v0, %v6547_v46  ;;  %v6594_v29 = vld [vmem:[%s8003_s15 + $0xf] sm:$0x1] }
 0x674   : > { %vm6436_vm9 = vmand %vm6358_vm12, %vm6398_vm8  ;;  %v6549_v62 = vsel %vm6435_vm5, %v8604_v15, -inf  ;;  %v6582_v12 = vmax.f32 %v6578_v60, %v6548_v9 }
 0x675   : > { %v6550_v59 = vsel %vm6436_vm9, %v8609_v58, -inf  ;;  %v6583_v21 = vmax.f32 %v6579_v43, %v6549_v62 }
 0x676   : > { %v6584_v44 = vmax.f32 %v6580_v23, %v6550_v59  ;;  %v6586_v31 = vmax.f32 %v6581_v1, %v6582_v12 }
 0x678   : > { %v6585_v30 = vmax.f32 %v6583_v21, %v6584_v44 }
 0x67a   : > { %v6587_v24 = vmax.f32 %v6585_v30, %v6586_v31 }
 0x67c   : > { %v6588_v63 = vrot.slane %v6587_v24, 4 }
 0x67e   : > { %v6589_v25 = vmax.f32 %v6587_v24, %v6588_v63 }
 0x680   : > { %v6590_v55 = vrot.slane %v6589_v25, 2 }
 0x682   : > { %v6591_v6 = vmax.f32 %v6589_v25, %v6590_v55 }
 0x684   : > { %v6592_v57 = vrot.slane %v6591_v6, 1 }
 0x686   : > { %v6593_v39 = vmax.f32 %v6591_v6, %v6592_v57 }
 0x688   : > { %v6595_v33 = vmax.f32 %v6594_v29, %v6593_v39 }
 0x68a   : > { %6596 = vst [vmem:[%s8003_s15 + $0xf] sm:$0x1] %v6595_v33 }
 0x68b PF: > { %s6860_s23 = sshll.u32 %s7785_s9, 7  ;;  %s6618_s30 = sshll.u32 %s8003_s15, 4  ;;  %s16264_s30 = int_to_ptr.vmem [resolvable:$true] %s6618_s30 }
 0x68c   : > { %s16261_s29 = scalar_lea.hbm %s16367_s5, %s6860_s23  ;;  %s6598_s12 = scalar_lea.sflag [#allocation8], %s8000_s28 }
 0x68d   : > { %s7653_s24 = scalar_lea.vmem %s16264_s30, 256  ;;  %p18937_p6 = scmp.ne.s32.totalorder %s17009_s26, 0 }
 0x68e   : > { %p7654_p3 = scmp.ne.s32.totalorder %s16264_s30, %s7653_s24  ;;  %s7804_s18 = smov [#allocation9]  }
 0x68f   : > { %s7657_s22 = sshll.u32 %s7804_s18, 4  ;;  %s7658_s22 = int_to_ptr.vmem [resolvable:$false] %s7657_s22 }
 0x690   : > { %p7655_p11 = pnand %p7654_p3, %p18937_p6  ;;  %s7659_s25 = scalar_lea.vmem %s7658_s22, 512 }
 0x691   : > { %p7660_p13 = scmp.lt.s32.totalorder %s16264_s30, %s7658_s22  ;;  %p7661_p4 = scmp.lt.s32.totalorder %s7659_s25, %s7653_s24 }
 0x692   : > { %p7656_p0 = pneg %p7655_p11 }
 0x693   : > { %p7662_p7 = por %p7661_p4, %p7660_p13 }
 0x695   : > { %p7663_p9 = pnand %p7662_p7, %p7656_p0 }
 0x697   : > { %7666 = shalt.err (!%p7663_p9)
}
 0x698   : > { %s7667_s15 = scalar_lea.hbm %s16261_s29, 256  ;;  %s7671_s14 = scalar_lea.hbm %s16367_s5, 512 }
 0x699   : > { %p7668_p5 = scmp.ne.s32.totalorder %s16261_s29, %s7667_s15  ;;  %p7672_p12 = scmp.lt.u32.totalorder %s16261_s29, %s16367_s5 }
 0x69a   : > { %p7673_p1 = scmp.lt.u32.totalorder %s7671_s14, %s7667_s15  ;;  %p7675_p3 = scmp.lt.u32.totalorder %s7667_s15, %s16261_s29 }
 0x69b   : > { %p7669_p8 = pnand %p7668_p5, %p18937_p6 }
 0x69c   : > { %p7674_p2 = por %p7673_p1, %p7672_p12 }
 0x69d   : > { %p7670_p10 = pneg %p7669_p8 }
 0x69e   : > { %p7676_p11 = por %p7675_p3, %p7674_p2 }
 0x6a0   : > { %p7677_p0 = pnand %p7676_p11, %p7670_p10 }
 0x6a2   : > { %7680 = shalt.err (!%p7677_p0)
}
 0x6a3   : > { %s7805_s24 = smov 128   ;;  %s7806_s18 = smov 256  }
 0x6a4   : > { %s7807_s22 = smov 8   ;;  %s16298_s19 = scalar_lea.hbm %s16368_s6, %s6860_s23 }
 0x6a5   : > { %7511 = dma.vmem_to_hbm [thread:$0]  (%p18937_p6), %s16264_s30, 256, %s16261_s29, %s6598_s12, %s7805_s24, %s7806_s18, %s7807_s22  }
 0x6a6   : > { %s6636_s17 = sshll.u32 %s8007_s16, 4  ;;  %s6603_s14 = scalar_lea.sflag [#allocation11], %s8000_s28  ;;  %s16301_s17 = int_to_ptr.vmem [resolvable:$true] %s6636_s17 }
 0x6a7   : > { %s7681_s21 = scalar_lea.vmem %s16301_s17, 256  ;;  %s7808_s20 = smov [#allocation10]  }
 0x6a8   : > { %p7682_p13 = scmp.ne.s32.totalorder %s16301_s17, %s7681_s21  ;;  %s7685_s29 = sshll.u32 %s7808_s20, 4  ;;  %s7686_s29 = int_to_ptr.vmem [resolvable:$false] %s7685_s29 }
 0x6a9   : > { %s7687_s9 = scalar_lea.vmem %s7686_s29, 512  ;;  %p7688_p9 = scmp.lt.s32.totalorder %s16301_s17, %s7686_s29 }
 0x6aa   : > { %p7683_p4 = pnand %p7682_p13, %p18937_p6  ;;  %p7689_p5 = scmp.lt.s32.totalorder %s7687_s9, %s7681_s21 }
 0x6ac   : > { %p7684_p7 = pneg %p7683_p4  ;;  %p7690_p8 = por %p7689_p5, %p7688_p9 }
 0x6ae   : > { %p7691_p10 = pnand %p7690_p8, %p7684_p7 }
 0x6b0   : > { %7694 = shalt.err (!%p7691_p10)
}
 0x6b1   : > { %s7695_s16 = scalar_lea.hbm %s16298_s19, 256  ;;  %s7699_s12 = scalar_lea.hbm %s16368_s6, 512 }
 0x6b2   : > { %p7696_p12 = scmp.ne.s32.totalorder %s16298_s19, %s7695_s16  ;;  %p7700_p3 = scmp.lt.u32.totalorder %s16298_s19, %s16368_s6 }
 0x6b3   : > { %p7701_p11 = scmp.lt.u32.totalorder %s7699_s12, %s7695_s16  ;;  %p7703_p13 = scmp.lt.u32.totalorder %s7695_s16, %s16298_s19 }
 0x6b4   : > { %p7697_p1 = pnand %p7696_p12, %p18937_p6 }
 0x6b5   : > { %p7702_p0 = por %p7701_p11, %p7700_p3 }
 0x6b6   : > { %p7698_p2 = pneg %p7697_p1 }
 0x6b7   : > { %p7704_p4 = por %p7703_p13, %p7702_p0 }
 0x6b9   : > { %p7705_p7 = pnand %p7704_p4, %p7698_p2 }
 0x6bb   : > { %7708 = shalt.err (!%p7705_p7)
}
 0x6bc   : > { %7512 = dma.vmem_to_hbm [thread:$0]  (%p18937_p6), %s16301_s17, 256, %s16298_s19, %s6603_s14, %s7805_s24, %s7806_s18, %s7807_s22  }
 0x6bd PF: > { %s6651_s21 = sand.u32 1, %s7761_s0   ;;  %p18938_p9 = scmp.ne.s32.totalorder %s17010_s27, 0 }
 0x6be   : > { %p18939_p5 = scmp.ge.s32.totalorder %s7793_s11, 2  ;;  %s6652_s20 = scalar_lea.sflag [#allocation8], %s6651_s21 }
 0x6c0   : > { %p7520_p8 = pnand %p18939_p5, %p18938_p9 }
 0x6c2   : > { %7752 = dma.done.wait (!%p7520_p8), %s6652_s20, 256  }
 0x6c3   : > { %7754 = vsyncadd (!%p7520_p8), %s6652_s20, 4294967040  ;;  %s6661_s26 = scalar_lea.sflag [#allocation11], %s6651_s21 }
 0x6c4   : > { %7756 = dma.done.wait (!%p7520_p8), %s6661_s26, 256  }
 0x6c5   : > { %7758 = vsyncadd (!%p7520_p8), %s6661_s26, 4294967040  ;;  %s34_s11 = sadd.s32 1, %s7793_s11   ;;  %s18940_s28 = sld [smem:[#allocation17_spill]] }
 0x6c6   : > { %p31_p10 = scmp.ge.s32.totalorder %s34_s11, 4   ;;  %s18941_s24 = sld [smem:[#allocation16_spill]] }
 0x6c7   : > { %s18942_s0 = smov %s7765_s1  ;;  %s18943_s1 = smov %s7769_s2 }
 0x6c8   : > { %s18945_s30 = smov %s7777_s7  ;;  %s18946_s7 = smov %s7781_s8 }
 0x6c9   : > { %s18947_s8 = smov %s7952_s13  ;;  %s18948_s9 = smov %s7789_s10 }
 0x6ca   :  { %33 = sbr.rel (!%p31_p10) target bundleno = 26 (0x1a), region = 165 }
 0x6cb   : > { %s18944_s2 = smov %s18940_s28 }
 0x6cc   : > { %s18949_s10 = smov %s18941_s24 }
 0x6d1   :  { %6666 = vsyncpa [#allocation7], 1 }
 0x6d2   :  { %6668 = vsyncpa [#allocation7 + $0x1], 1 }
 0x6d3   :  { %6669 = vsyncpa [#allocation8], 1 }
 0x6d4   :  { %6671 = vsyncpa [#allocation8 + $0x1], 1 }
 0x6d5   :  { %6672 = vsyncpa [#allocation11], 1 }
 0x6d6   :  { %6674 = vsyncpa [#allocation11 + $0x1], 1 }

</bundles_post_ra>
